<compile_context>
chip_gen: v7x
topology: tpu7x:2x2x1
jax: 0.10.0
libtpu: 0.0.40
codegen_flags: <defaults>
</compile_context>

<pallas_src>
import jax
import jax.numpy as jnp
from jax import lax
from jax.experimental import pallas as pl
from jax.experimental.pallas import tpu as pltpu

EPS = 1e-5
CONV5_CHUNK = 256   # channel-chunk width for the fused conv5 epilogue
                    # (lane-tile aligned; one 2x256^2 MXU tile on v6e/v7x,
                    #  two 128^2 tiles on v5e).


def cloudpose_trans_kernel(
    pc_ref,
    w1, g1, q1, w2, g2, q2, w3, g3, q3, w4, g4, q4, w5, g5, q5,
    wf1, g6, q6, wf2, g7, q7, wf3, bf3,
    pose_ref, idx_ref,
):
    B, _, N = pc_ref.shape
    C5 = w5.shape[1]
    CK = CONV5_CHUNK
    n_chunks = C5 // CK

    def bn_affine(y, gamma, beta):
        """One-pass batch stats over axis 0 -> folded per-channel (scale, shift).

        The pre-BN conv/linear bias is dropped by the caller: a constant
        per-channel shift is exactly removed by mean subtraction.
        """
        inv_n = 1.0 / y.shape[0]
        s = jnp.sum(y, axis=0, keepdims=True)
        ss = jnp.sum(y * y, axis=0, keepdims=True)
        mean = s * inv_n
        var = jnp.maximum(ss * inv_n - mean * mean, 0.0)   # guard cancellation
        scale = gamma * lax.rsqrt(var + EPS)
        shift = beta - mean * scale
        return scale, shift

    # ---- conv1: consume the NCW input directly.  Per-batch transposed-lhs
    # matmul (contraction over C_in on sublanes), concatenated into a single
    # (M, 64) slab so every following layer is one large-M 2-D MXU matmul.
    y1 = jnp.concatenate(
        [lax.dot_general(pc_ref[b], w1[...], (((0,), (0,)), ((), ())),
                         preferred_element_type=jnp.float32)
         for b in range(B)],
        axis=0)                                                  # (M, 64) f32
    s, t = bn_affine(y1, g1[...], q1[...])
    h = jnp.maximum(y1 * s + t, 0.0).astype(jnp.bfloat16)

    # ---- conv2..conv4: (M, C) x (C, C') matmuls, folded BN + ReLU, bf16.
    for w_r, g_r, q_r in ((w2, g2, q2), (w3, g3, q3), (w4, g4, q4)):
        y = jnp.dot(h, w_r[...], preferred_element_type=jnp.float32)
        s, t = bn_affine(y, g_r[...], q_r[...])
        h = jnp.maximum(y * s + t, 0.0).astype(jnp.bfloat16)     # (M, 128) at conv4

    # ---- conv5: fused, chunked epilogue.  For each CK-wide channel chunk one
    # matmul produces the chunk; on the resident chunk we compute BN stats,
    # the normalized+ReLU'd values, the pooled (point-max) slice and the
    # per-point channel max / first-occurrence argmax.  The full (M, 1024)
    # activation is never materialized and is traversed exactly once.
    lane_ids = lax.broadcasted_iota(jnp.int32, (1, 1, CK), 2)
    big = jnp.int32(1 << 30)
    pooled_parts, max_parts, arg_parts = [], [], []
    for c in range(n_chunks):
        c0 = c * CK
        y5c = jnp.dot(h, w5[:, c0:c0 + CK],
                      preferred_element_type=jnp.float32)        # (M, CK) f32
        sc, tc = bn_affine(y5c, g5[:, c0:c0 + CK], q5[:, c0:c0 + CK])
        # Normalize + ReLU on the resident chunk (no scale>0 precondition:
        # the pooled branch pools the already-normalized values).
        zc = jnp.maximum(y5c.reshape(B, N, CK) * sc + tc, 0.0)   # (B, N, CK)
        pooled_parts.append(jnp.max(zc, axis=1))                 # (B, CK)
        cmax = jnp.max(zc, axis=2, keepdims=True)                # (B, N, 1)
        carg = jnp.min(jnp.where(zc == cmax, lane_ids, big),
                       axis=2, keepdims=True) + c0               # (B, N, 1)
        max_parts.append(cmax)
        arg_parts.append(carg)

    # Finalize the channel argmax across chunks.  First-occurrence tie-break:
    # within a chunk the min-index trick picks the first hit; across tied
    # chunks the earliest chunk holds the smallest index, so min wins.
    all_max = jnp.concatenate(max_parts, axis=2)                 # (B, N, n_chunks)
    all_arg = jnp.concatenate(arg_parts, axis=2)                 # (B, N, n_chunks)
    gmax = jnp.max(all_max, axis=2, keepdims=True)
    idx_ref[...] = jnp.min(jnp.where(all_max == gmax, all_arg, big), axis=2)
    # TODO(synk): PyTorch returns int64 indices; JAX default config keeps int32.

    pooled = jnp.concatenate(pooled_parts, axis=1)               # (B, 1024) f32

    # ---- FC head (per-feature BN over the batch axis)
    def fc_bn_relu(x_bf16, w_ref, g_ref, q_ref):
        y = jnp.dot(x_bf16, w_ref[...], preferred_element_type=jnp.float32)
        scale, shift = bn_affine(y, g_ref[...], q_ref[...])
        return jnp.maximum(y * scale + shift, 0.0).astype(jnp.bfloat16)

    f = fc_bn_relu(pooled.astype(jnp.bfloat16), wf1, g6, q6)     # (B, 512)
    f = fc_bn_relu(f, wf2, g7, q7)                               # (B, 256)
    pose_ref[...] = (
        jnp.dot(f, wf3[...], preferred_element_type=jnp.float32) + bf3[...]
    )                                                            # (B, 3)


def _flops_estimate(B, N, c_in):
    M = B * N
    conv = 2 * M * (c_in * 64 + 64 * 64 + 64 * 64 + 64 * 128 + 128 * 1024)
    fc = 2 * B * (1024 * 512 + 512 * 256 + 256 * 3)
    return int(conv + fc)


def _vmem_limit_bytes(B, N, c_in):
    """Budget derived from actual buffers, capped at 3/4 of physical VMEM."""
    M = B * N
    weights = 2 * (c_in * 64 + 64 * 64 + 64 * 64 + 64 * 128 + 128 * 1024
                   + 1024 * 512 + 512 * 256 + 256 * 3)                 # bf16
    bn_params = 4 * 2 * (3 * 64 + 128 + 1024 + 512 + 256) + 4 * 3
    io = 2 * B * c_in * N + 4 * B * N + 4 * B * 3
    # Largest live activation set: conv4 h (M,128) bf16, one f32 conv5 chunk
    # (M,CK) plus its int/float temps, per-chunk argmax carries, pooled f32.
    acts = (M * 128 * 2 + 3 * M * CONV5_CHUNK * 4
            + M * (1024 // CONV5_CHUNK) * 8 + B * 1024 * 4)
    need = 3 * (weights + bn_params + io + acts) + (8 << 20)
    try:
        phys = pltpu.get_tpu_info().vmem_capacity_bytes
    except Exception:
        phys = 64 * 1024 * 1024          # v7x per-core (smallest generation)
    return max(16 << 20, min(int(need), int(phys * 3 // 4)))


def init_params(key, channel=3, num_class=5):
    """Deterministic synthetic parameters with the same shapes as the module."""
    cin = channel + num_class
    conv_dims = [cin, 64, 64, 64, 128, 1024]
    fc_dims = [1024, 512, 256, 3]
    keys = iter(jax.random.split(key, 16))

    conv = []
    for i in range(5):
        w = jax.random.normal(next(keys), (conv_dims[i], conv_dims[i + 1]),
                              jnp.float32) * 0.1
        b = jax.random.normal(next(keys), (1, conv_dims[i + 1]),
                              jnp.float32) * 0.01
        g = jnp.ones((1, conv_dims[i + 1]), jnp.float32)
        q = jnp.zeros((1, conv_dims[i + 1]), jnp.float32)
        conv += [w, b, g, q]

    fc = []
    for i in range(3):
        w = jax.random.normal(next(keys), (fc_dims[i], fc_dims[i + 1]),
                              jnp.float32) * 0.05
        b = jax.random.normal(next(keys), (1, fc_dims[i + 1]),
                              jnp.float32) * 0.01
        fc += [w, b]
        if i < 2:  # bn6, bn7
            fc += [jnp.ones((1, fc_dims[i + 1]), jnp.float32),
                   jnp.zeros((1, fc_dims[i + 1]), jnp.float32)]
    return conv + fc


def cloudpose_trans_forward(point_cloud_ncw, params):
    """point_cloud_ncw: (B, C_in, N) float32, like the PyTorch module input."""
    (w1, b1, g1, q1, w2, b2, g2, q2, w3, b3, g3, q3,
     w4, b4, g4, q4, w5, b5, g5, q5,
     wf1, bf1, g6, q6, wf2, bf2, g7, q7, wf3, bf3) = params
    del b1, b2, b3, b4, b5, bf1, bf2   # exactly cancelled by training-mode BN

    B, c_in, N = point_cloud_ncw.shape
    bfw = lambda w: w.astype(jnp.bfloat16)

    # NCW bf16 input goes straight in: no wrapper transpose, no lane-padded
    # (B, N, 8) buffer (input HBM/VMEM traffic cut by >10x at large N).
    args = [point_cloud_ncw.astype(jnp.bfloat16),
            bfw(w1), g1, q1, bfw(w2), g2, q2, bfw(w3), g3, q3,
            bfw(w4), g4, q4, bfw(w5), g5, q5,
            bfw(wf1), g6, q6, bfw(wf2), g7, q7, bfw(wf3), bf3]

    param_bytes = sum(int(a.size) * a.dtype.itemsize for a in args)
    out_bytes = 4 * B * 3 + 4 * B * N
    ce = pl.CostEstimate(
        flops=_flops_estimate(B, N, c_in),
        transcendentals=3 * 64 + 128 + 1024 + 512 + 256,   # one rsqrt per BN channel
        bytes_accessed=int(param_bytes + out_bytes))

    vmem = pl.BlockSpec(memory_space=pltpu.MemorySpace.VMEM)
    pose, idx = pl.pallas_call(
        cloudpose_trans_kernel,
        out_shape=(jax.ShapeDtypeStruct((B, 3), jnp.float32),
                   jax.ShapeDtypeStruct((B, N), jnp.int32)),
        in_specs=[vmem] * len(args),
        out_specs=(vmem, vmem),
        compiler_params=pltpu.CompilerParams(
            vmem_limit_bytes=_vmem_limit_bytes(B, N, c_in)),
        cost_estimate=ce,
    )(*args)
    return pose, idx


def reference_forward(point_cloud_ncw, params):
    """Plain-JAX reference with the literal PyTorch math (biases, two-pass BN,
    normalize-then-pool), using the same bf16 matmul operand precision as the
    kernel so the comparison isolates the algebraic rewrites."""
    (w1, b1, g1, q1, w2, b2, g2, q2, w3, b3, g3, q3,
     w4, b4, g4, q4, w5, b5, g5, q5,
     wf1, bf1, g6, q6, wf2, bf2, g7, q7, wf3, bf3) = params
    pc = jnp.transpose(point_cloud_ncw, (0, 2, 1))

    def bn(y, g, q, axes):
        mean = jnp.mean(y, axis=axes, keepdims=True)
        var = jnp.mean(jnp.square(y - mean), axis=axes, keepdims=True)
        return (y - mean) * lax.rsqrt(var + EPS) * g + q

    def cbr(x, w, b, g, q):
        y = lax.dot_general(x.astype(jnp.bfloat16), w.astype(jnp.bfloat16),
                            (((2,), (0,)), ((), ())),
                            preferred_element_type=jnp.float32) + b[None]
        return jnp.maximum(bn(y, g[None], q[None], (0, 1)), 0.0)

    h = cbr(pc, w1, b1, g1, q1)
    h = cbr(h, w2, b2, g2, q2)
    h = cbr(h, w3, b3, g3, q3)
    h = cbr(h, w4, b4, g4, q4)
    h = cbr(h, w5, b5, g5, q5)
    idx = jnp.argmax(h, axis=2).astype(jnp.int32)
    pooled = jnp.max(h, axis=1)

    def fbr(x, w, b, g, q):
        y = jnp.dot(x.astype(jnp.bfloat16), w.astype(jnp.bfloat16),
                    preferred_element_type=jnp.float32) + b
        return jnp.maximum(bn(y, g, q, (0,)), 0.0)

    f = fbr(pooled, wf1, bf1, g6, q6)
    f = fbr(f, wf2, bf2, g7, q7)
    pose = jnp.dot(f.astype(jnp.bfloat16), wf3.astype(jnp.bfloat16),
                   preferred_element_type=jnp.float32) + bf3
    return pose, idx


if __name__ == "__main__":
    B, channel, num_class, N = 2, 3, 5, 64
    c_in = channel + num_class

    key = jax.random.PRNGKey(0)
    k_pc, k_par = jax.random.split(key)
    point_cloud = jax.random.normal(k_pc, (B, c_in, N), jnp.float32)  # NCW
    params = init_params(k_par, channel=channel, num_class=num_class)

    pose, max_indices = cloudpose_trans_forward(point_cloud, params)
    pose = jax.block_until_ready(pose)
    max_indices = jax.block_until_ready(max_indices)

    # Sanity check: kernel (bias-free, folded one-pass BN, fused chunked conv5
    # epilogue) vs. literal PyTorch-style math at matched bf16 matmul precision.
    ref_pose, ref_idx = reference_forward(point_cloud, params)
    assert pose.shape == (B, 3) and max_indices.shape == (B, N)
    assert jnp.all(jnp.isfinite(pose))
    assert jnp.allclose(pose, ref_pose, atol=2e-2, rtol=2e-2)
    assert jnp.mean((max_indices == ref_idx).astype(jnp.float32)) > 0.95

    print("KERNEL_OK")
</pallas_src>

<mosaic_0001>
module attributes {stable_mosaic.version = 11 : i64} {
  func.func @cloudpose_trans_kernel(%arg0: memref<2x8x64xbf16, #tpu.memory_space<vmem>>, %arg1: memref<8x64xbf16, #tpu.memory_space<vmem>>, %arg2: memref<1x64xf32, #tpu.memory_space<vmem>>, %arg3: memref<1x64xf32, #tpu.memory_space<vmem>>, %arg4: memref<64x64xbf16, #tpu.memory_space<vmem>>, %arg5: memref<1x64xf32, #tpu.memory_space<vmem>>, %arg6: memref<1x64xf32, #tpu.memory_space<vmem>>, %arg7: memref<64x64xbf16, #tpu.memory_space<vmem>>, %arg8: memref<1x64xf32, #tpu.memory_space<vmem>>, %arg9: memref<1x64xf32, #tpu.memory_space<vmem>>, %arg10: memref<64x128xbf16, #tpu.memory_space<vmem>>, %arg11: memref<1x128xf32, #tpu.memory_space<vmem>>, %arg12: memref<1x128xf32, #tpu.memory_space<vmem>>, %arg13: memref<128x1024xbf16, #tpu.memory_space<vmem>>, %arg14: memref<1x1024xf32, #tpu.memory_space<vmem>>, %arg15: memref<1x1024xf32, #tpu.memory_space<vmem>>, %arg16: memref<1024x512xbf16, #tpu.memory_space<vmem>>, %arg17: memref<1x512xf32, #tpu.memory_space<vmem>>, %arg18: memref<1x512xf32, #tpu.memory_space<vmem>>, %arg19: memref<512x256xbf16, #tpu.memory_space<vmem>>, %arg20: memref<1x256xf32, #tpu.memory_space<vmem>>, %arg21: memref<1x256xf32, #tpu.memory_space<vmem>>, %arg22: memref<256x3xbf16, #tpu.memory_space<vmem>>, %arg23: memref<1x3xf32, #tpu.memory_space<vmem>>, %arg24: memref<2x3xf32, #tpu.memory_space<vmem>>, %arg25: memref<2x64xi32, #tpu.memory_space<vmem>>) attributes {dimension_semantics = [], scalar_prefetch = 0 : i64, scratch_operands = 0 : i64, tpu.core_type = #tpu.core_type<tc>} {
    %c0 = arith.constant 0 : index
    %c0_0 = arith.constant 0 : index
    %c0_1 = arith.constant 0 : index
    %0 = vector.load %arg0[%c0, %c0_0, %c0_1] : memref<2x8x64xbf16, #tpu.memory_space<vmem>>, vector<1x8x64xbf16>
    %1 = vector.shape_cast %0 : vector<1x8x64xbf16> to vector<8x64xbf16>
    %c0_2 = arith.constant 0 : index
    %c0_3 = arith.constant 0 : index
    %2 = vector.load %arg1[%c0_2, %c0_3] : memref<8x64xbf16, #tpu.memory_space<vmem>>, vector<8x64xbf16>
    %cst = arith.constant dense<0.000000e+00> : vector<64x64xf32>
    %3 = tpu.matmul %1, %2, %cst {dimension_numbers = #tpu.dot_dimension_numbers<[0], [0], [1], [1], [0, 1, 1, 1], [], []>} : vector<8x64xbf16>, vector<8x64xbf16>, vector<64x64xf32> -> vector<64x64xf32>
    %c1 = arith.constant 1 : index
    %c0_4 = arith.constant 0 : index
    %c0_5 = arith.constant 0 : index
    %4 = vector.load %arg0[%c1, %c0_4, %c0_5] : memref<2x8x64xbf16, #tpu.memory_space<vmem>>, vector<1x8x64xbf16>
    %5 = vector.shape_cast %4 : vector<1x8x64xbf16> to vector<8x64xbf16>
    %c0_6 = arith.constant 0 : index
    %c0_7 = arith.constant 0 : index
    %6 = vector.load %arg1[%c0_6, %c0_7] : memref<8x64xbf16, #tpu.memory_space<vmem>>, vector<8x64xbf16>
    %cst_8 = arith.constant dense<0.000000e+00> : vector<64x64xf32>
    %7 = tpu.matmul %5, %6, %cst_8 {dimension_numbers = #tpu.dot_dimension_numbers<[0], [0], [1], [1], [0, 1, 1, 1], [], []>} : vector<8x64xbf16>, vector<8x64xbf16>, vector<64x64xf32> -> vector<64x64xf32>
    %8 = tpu.concatenate %3, %7 in 0 : vector<64x64xf32>, vector<64x64xf32> -> vector<128x64xf32>
    %c0_9 = arith.constant 0 : index
    %c0_10 = arith.constant 0 : index
    %9 = vector.load %arg2[%c0_9, %c0_10] : memref<1x64xf32, #tpu.memory_space<vmem>>, vector<1x64xf32>
    %c0_11 = arith.constant 0 : index
    %c0_12 = arith.constant 0 : index
    %10 = vector.load %arg3[%c0_11, %c0_12] : memref<1x64xf32, #tpu.memory_space<vmem>>, vector<1x64xf32>
    %cst_13 = arith.constant dense<0.000000e+00> : vector<64xf32>
    %11 = vector.multi_reduction <add>, %8, %cst_13 [0] : vector<128x64xf32> to vector<64xf32>
    %12 = vector.shape_cast %11 : vector<64xf32> to vector<1x64xf32>
    %13 = arith.mulf %8, %8 : vector<128x64xf32>
    %cst_14 = arith.constant dense<0.000000e+00> : vector<64xf32>
    %14 = vector.multi_reduction <add>, %13, %cst_14 [0] : vector<128x64xf32> to vector<64xf32>
    %15 = vector.shape_cast %14 : vector<64xf32> to vector<1x64xf32>
    %cst_15 = arith.constant 7.812500e-03 : f32
    %16 = vector.broadcast %cst_15 : f32 to vector<1x64xf32>
    %17 = arith.mulf %12, %16 : vector<1x64xf32>
    %cst_16 = arith.constant 7.812500e-03 : f32
    %18 = vector.broadcast %cst_16 : f32 to vector<1x64xf32>
    %19 = arith.mulf %15, %18 : vector<1x64xf32>
    %20 = arith.mulf %17, %17 : vector<1x64xf32>
    %21 = arith.subf %19, %20 : vector<1x64xf32>
    %cst_17 = arith.constant 0.000000e+00 : f32
    %22 = vector.broadcast %cst_17 : f32 to vector<1x64xf32>
    %23 = arith.maximumf %21, %22 : vector<1x64xf32>
    %cst_18 = arith.constant 9.99999974E-6 : f32
    %24 = vector.broadcast %cst_18 : f32 to vector<1x64xf32>
    %25 = arith.addf %23, %24 : vector<1x64xf32>
    %26 = math.rsqrt %25 : vector<1x64xf32>
    %27 = arith.mulf %9, %26 : vector<1x64xf32>
    %28 = arith.mulf %17, %27 : vector<1x64xf32>
    %29 = arith.subf %10, %28 : vector<1x64xf32>
    %30 = vector.broadcast %27 : vector<1x64xf32> to vector<128x64xf32>
    %31 = arith.mulf %8, %30 : vector<128x64xf32>
    %32 = vector.broadcast %29 : vector<1x64xf32> to vector<128x64xf32>
    %33 = arith.addf %31, %32 : vector<128x64xf32>
    %cst_19 = arith.constant 0.000000e+00 : f32
    %34 = vector.broadcast %cst_19 : f32 to vector<128x64xf32>
    %35 = arith.maximumf %33, %34 : vector<128x64xf32>
    %36 = arith.truncf %35 : vector<128x64xf32> to vector<128x64xbf16>
    %c0_20 = arith.constant 0 : index
    %c0_21 = arith.constant 0 : index
    %37 = vector.load %arg4[%c0_20, %c0_21] : memref<64x64xbf16, #tpu.memory_space<vmem>>, vector<64x64xbf16>
    %cst_22 = arith.constant dense<0.000000e+00> : vector<128x64xf32>
    %38 = tpu.matmul %36, %37, %cst_22 {dimension_numbers = #tpu.dot_dimension_numbers<[1], [0], [0], [1], [0, 0, 1, 1], [], []>} : vector<128x64xbf16>, vector<64x64xbf16>, vector<128x64xf32> -> vector<128x64xf32>
    %c0_23 = arith.constant 0 : index
    %c0_24 = arith.constant 0 : index
    %39 = vector.load %arg5[%c0_23, %c0_24] : memref<1x64xf32, #tpu.memory_space<vmem>>, vector<1x64xf32>
    %c0_25 = arith.constant 0 : index
    %c0_26 = arith.constant 0 : index
    %40 = vector.load %arg6[%c0_25, %c0_26] : memref<1x64xf32, #tpu.memory_space<vmem>>, vector<1x64xf32>
    %cst_27 = arith.constant dense<0.000000e+00> : vector<64xf32>
    %41 = vector.multi_reduction <add>, %38, %cst_27 [0] : vector<128x64xf32> to vector<64xf32>
    %42 = vector.shape_cast %41 : vector<64xf32> to vector<1x64xf32>
    %43 = arith.mulf %38, %38 : vector<128x64xf32>
    %cst_28 = arith.constant dense<0.000000e+00> : vector<64xf32>
    %44 = vector.multi_reduction <add>, %43, %cst_28 [0] : vector<128x64xf32> to vector<64xf32>
    %45 = vector.shape_cast %44 : vector<64xf32> to vector<1x64xf32>
    %cst_29 = arith.constant 7.812500e-03 : f32
    %46 = vector.broadcast %cst_29 : f32 to vector<1x64xf32>
    %47 = arith.mulf %42, %46 : vector<1x64xf32>
    %cst_30 = arith.constant 7.812500e-03 : f32
    %48 = vector.broadcast %cst_30 : f32 to vector<1x64xf32>
    %49 = arith.mulf %45, %48 : vector<1x64xf32>
    %50 = arith.mulf %47, %47 : vector<1x64xf32>
    %51 = arith.subf %49, %50 : vector<1x64xf32>
    %cst_31 = arith.constant 0.000000e+00 : f32
    %52 = vector.broadcast %cst_31 : f32 to vector<1x64xf32>
    %53 = arith.maximumf %51, %52 : vector<1x64xf32>
    %cst_32 = arith.constant 9.99999974E-6 : f32
    %54 = vector.broadcast %cst_32 : f32 to vector<1x64xf32>
    %55 = arith.addf %53, %54 : vector<1x64xf32>
    %56 = math.rsqrt %55 : vector<1x64xf32>
    %57 = arith.mulf %39, %56 : vector<1x64xf32>
    %58 = arith.mulf %47, %57 : vector<1x64xf32>
    %59 = arith.subf %40, %58 : vector<1x64xf32>
    %60 = vector.broadcast %57 : vector<1x64xf32> to vector<128x64xf32>
    %61 = arith.mulf %38, %60 : vector<128x64xf32>
    %62 = vector.broadcast %59 : vector<1x64xf32> to vector<128x64xf32>
    %63 = arith.addf %61, %62 : vector<128x64xf32>
    %cst_33 = arith.constant 0.000000e+00 : f32
    %64 = vector.broadcast %cst_33 : f32 to vector<128x64xf32>
    %65 = arith.maximumf %63, %64 : vector<128x64xf32>
    %66 = arith.truncf %65 : vector<128x64xf32> to vector<128x64xbf16>
    %c0_34 = arith.constant 0 : index
    %c0_35 = arith.constant 0 : index
    %67 = vector.load %arg7[%c0_34, %c0_35] : memref<64x64xbf16, #tpu.memory_space<vmem>>, vector<64x64xbf16>
    %cst_36 = arith.constant dense<0.000000e+00> : vector<128x64xf32>
    %68 = tpu.matmul %66, %67, %cst_36 {dimension_numbers = #tpu.dot_dimension_numbers<[1], [0], [0], [1], [0, 0, 1, 1], [], []>} : vector<128x64xbf16>, vector<64x64xbf16>, vector<128x64xf32> -> vector<128x64xf32>
    %c0_37 = arith.constant 0 : index
    %c0_38 = arith.constant 0 : index
    %69 = vector.load %arg8[%c0_37, %c0_38] : memref<1x64xf32, #tpu.memory_space<vmem>>, vector<1x64xf32>
    %c0_39 = arith.constant 0 : index
    %c0_40 = arith.constant 0 : index
    %70 = vector.load %arg9[%c0_39, %c0_40] : memref<1x64xf32, #tpu.memory_space<vmem>>, vector<1x64xf32>
    %cst_41 = arith.constant dense<0.000000e+00> : vector<64xf32>
    %71 = vector.multi_reduction <add>, %68, %cst_41 [0] : vector<128x64xf32> to vector<64xf32>
    %72 = vector.shape_cast %71 : vector<64xf32> to vector<1x64xf32>
    %73 = arith.mulf %68, %68 : vector<128x64xf32>
    %cst_42 = arith.constant dense<0.000000e+00> : vector<64xf32>
    %74 = vector.multi_reduction <add>, %73, %cst_42 [0] : vector<128x64xf32> to vector<64xf32>
    %75 = vector.shape_cast %74 : vector<64xf32> to vector<1x64xf32>
    %cst_43 = arith.constant 7.812500e-03 : f32
    %76 = vector.broadcast %cst_43 : f32 to vector<1x64xf32>
    %77 = arith.mulf %72, %76 : vector<1x64xf32>
    %cst_44 = arith.constant 7.812500e-03 : f32
    %78 = vector.broadcast %cst_44 : f32 to vector<1x64xf32>
    %79 = arith.mulf %75, %78 : vector<1x64xf32>
    %80 = arith.mulf %77, %77 : vector<1x64xf32>
    %81 = arith.subf %79, %80 : vector<1x64xf32>
    %cst_45 = arith.constant 0.000000e+00 : f32
    %82 = vector.broadcast %cst_45 : f32 to vector<1x64xf32>
    %83 = arith.maximumf %81, %82 : vector<1x64xf32>
    %cst_46 = arith.constant 9.99999974E-6 : f32
    %84 = vector.broadcast %cst_46 : f32 to vector<1x64xf32>
    %85 = arith.addf %83, %84 : vector<1x64xf32>
    %86 = math.rsqrt %85 : vector<1x64xf32>
    %87 = arith.mulf %69, %86 : vector<1x64xf32>
    %88 = arith.mulf %77, %87 : vector<1x64xf32>
    %89 = arith.subf %70, %88 : vector<1x64xf32>
    %90 = vector.broadcast %87 : vector<1x64xf32> to vector<128x64xf32>
    %91 = arith.mulf %68, %90 : vector<128x64xf32>
    %92 = vector.broadcast %89 : vector<1x64xf32> to vector<128x64xf32>
    %93 = arith.addf %91, %92 : vector<128x64xf32>
    %cst_47 = arith.constant 0.000000e+00 : f32
    %94 = vector.broadcast %cst_47 : f32 to vector<128x64xf32>
    %95 = arith.maximumf %93, %94 : vector<128x64xf32>
    %96 = arith.truncf %95 : vector<128x64xf32> to vector<128x64xbf16>
    %c0_48 = arith.constant 0 : index
    %c0_49 = arith.constant 0 : index
    %97 = vector.load %arg10[%c0_48, %c0_49] : memref<64x128xbf16, #tpu.memory_space<vmem>>, vector<64x128xbf16>
    %cst_50 = arith.constant dense<0.000000e+00> : vector<128x128xf32>
    %98 = tpu.matmul %96, %97, %cst_50 {dimension_numbers = #tpu.dot_dimension_numbers<[1], [0], [0], [1], [0, 0, 1, 1], [], []>} : vector<128x64xbf16>, vector<64x128xbf16>, vector<128x128xf32> -> vector<128x128xf32>
    %c0_51 = arith.constant 0 : index
    %c0_52 = arith.constant 0 : index
    %99 = vector.load %arg11[%c0_51, %c0_52] : memref<1x128xf32, #tpu.memory_space<vmem>>, vector<1x128xf32>
    %c0_53 = arith.constant 0 : index
    %c0_54 = arith.constant 0 : index
    %100 = vector.load %arg12[%c0_53, %c0_54] : memref<1x128xf32, #tpu.memory_space<vmem>>, vector<1x128xf32>
    %cst_55 = arith.constant dense<0.000000e+00> : vector<128xf32>
    %101 = vector.multi_reduction <add>, %98, %cst_55 [0] : vector<128x128xf32> to vector<128xf32>
    %102 = vector.shape_cast %101 : vector<128xf32> to vector<1x128xf32>
    %103 = arith.mulf %98, %98 : vector<128x128xf32>
    %cst_56 = arith.constant dense<0.000000e+00> : vector<128xf32>
    %104 = vector.multi_reduction <add>, %103, %cst_56 [0] : vector<128x128xf32> to vector<128xf32>
    %105 = vector.shape_cast %104 : vector<128xf32> to vector<1x128xf32>
    %cst_57 = arith.constant 7.812500e-03 : f32
    %106 = vector.broadcast %cst_57 : f32 to vector<1x128xf32>
    %107 = arith.mulf %102, %106 : vector<1x128xf32>
    %cst_58 = arith.constant 7.812500e-03 : f32
    %108 = vector.broadcast %cst_58 : f32 to vector<1x128xf32>
    %109 = arith.mulf %105, %108 : vector<1x128xf32>
    %110 = arith.mulf %107, %107 : vector<1x128xf32>
    %111 = arith.subf %109, %110 : vector<1x128xf32>
    %cst_59 = arith.constant 0.000000e+00 : f32
    %112 = vector.broadcast %cst_59 : f32 to vector<1x128xf32>
    %113 = arith.maximumf %111, %112 : vector<1x128xf32>
    %cst_60 = arith.constant 9.99999974E-6 : f32
    %114 = vector.broadcast %cst_60 : f32 to vector<1x128xf32>
    %115 = arith.addf %113, %114 : vector<1x128xf32>
    %116 = math.rsqrt %115 : vector<1x128xf32>
    %117 = arith.mulf %99, %116 : vector<1x128xf32>
    %118 = arith.mulf %107, %117 : vector<1x128xf32>
    %119 = arith.subf %100, %118 : vector<1x128xf32>
    %120 = vector.broadcast %117 : vector<1x128xf32> to vector<128x128xf32>
    %121 = arith.mulf %98, %120 : vector<128x128xf32>
    %122 = vector.broadcast %119 : vector<1x128xf32> to vector<128x128xf32>
    %123 = arith.addf %121, %122 : vector<128x128xf32>
    %cst_61 = arith.constant 0.000000e+00 : f32
    %124 = vector.broadcast %cst_61 : f32 to vector<128x128xf32>
    %125 = arith.maximumf %123, %124 : vector<128x128xf32>
    %126 = arith.truncf %125 : vector<128x128xf32> to vector<128x128xbf16>
    %127 = tpu.iota {dimensions = array<i32: 2>} : vector<1x1x256xi32>
    %c0_62 = arith.constant 0 : index
    %c0_63 = arith.constant 0 : index
    %128 = vector.load %arg13[%c0_62, %c0_63] : memref<128x1024xbf16, #tpu.memory_space<vmem>>, vector<128x256xbf16>
    %cst_64 = arith.constant dense<0.000000e+00> : vector<128x256xf32>
    %129 = tpu.matmul %126, %128, %cst_64 {dimension_numbers = #tpu.dot_dimension_numbers<[1], [0], [0], [1], [0, 0, 1, 1], [], []>} : vector<128x128xbf16>, vector<128x256xbf16>, vector<128x256xf32> -> vector<128x256xf32>
    %c0_65 = arith.constant 0 : index
    %c0_66 = arith.constant 0 : index
    %130 = vector.load %arg14[%c0_65, %c0_66] : memref<1x1024xf32, #tpu.memory_space<vmem>>, vector<1x256xf32>
    %c0_67 = arith.constant 0 : index
    %c0_68 = arith.constant 0 : index
    %131 = vector.load %arg15[%c0_67, %c0_68] : memref<1x1024xf32, #tpu.memory_space<vmem>>, vector<1x256xf32>
    %cst_69 = arith.constant dense<0.000000e+00> : vector<256xf32>
    %132 = vector.multi_reduction <add>, %129, %cst_69 [0] : vector<128x256xf32> to vector<256xf32>
    %133 = vector.shape_cast %132 : vector<256xf32> to vector<1x256xf32>
    %134 = arith.mulf %129, %129 : vector<128x256xf32>
    %cst_70 = arith.constant dense<0.000000e+00> : vector<256xf32>
    %135 = vector.multi_reduction <add>, %134, %cst_70 [0] : vector<128x256xf32> to vector<256xf32>
    %136 = vector.shape_cast %135 : vector<256xf32> to vector<1x256xf32>
    %cst_71 = arith.constant 7.812500e-03 : f32
    %137 = vector.broadcast %cst_71 : f32 to vector<1x256xf32>
    %138 = arith.mulf %133, %137 : vector<1x256xf32>
    %cst_72 = arith.constant 7.812500e-03 : f32
    %139 = vector.broadcast %cst_72 : f32 to vector<1x256xf32>
    %140 = arith.mulf %136, %139 : vector<1x256xf32>
    %141 = arith.mulf %138, %138 : vector<1x256xf32>
    %142 = arith.subf %140, %141 : vector<1x256xf32>
    %cst_73 = arith.constant 0.000000e+00 : f32
    %143 = vector.broadcast %cst_73 : f32 to vector<1x256xf32>
    %144 = arith.maximumf %142, %143 : vector<1x256xf32>
    %cst_74 = arith.constant 9.99999974E-6 : f32
    %145 = vector.broadcast %cst_74 : f32 to vector<1x256xf32>
    %146 = arith.addf %144, %145 : vector<1x256xf32>
    %147 = math.rsqrt %146 : vector<1x256xf32>
    %148 = arith.mulf %130, %147 : vector<1x256xf32>
    %149 = arith.mulf %138, %148 : vector<1x256xf32>
    %150 = arith.subf %131, %149 : vector<1x256xf32>
    %151 = vector.shape_cast %129 : vector<128x256xf32> to vector<2x64x256xf32>
    %152 = vector.shape_cast %148 : vector<1x256xf32> to vector<1x1x256xf32>
    %153 = vector.broadcast %152 : vector<1x1x256xf32> to vector<2x64x256xf32>
    %154 = arith.mulf %151, %153 : vector<2x64x256xf32>
    %155 = vector.shape_cast %150 : vector<1x256xf32> to vector<1x1x256xf32>
    %156 = vector.broadcast %155 : vector<1x1x256xf32> to vector<2x64x256xf32>
    %157 = arith.addf %154, %156 : vector<2x64x256xf32>
    %cst_75 = arith.constant 0.000000e+00 : f32
    %158 = vector.broadcast %cst_75 : f32 to vector<2x64x256xf32>
    %159 = arith.maximumf %157, %158 : vector<2x64x256xf32>
    %cst_76 = arith.constant dense<0xFF800000> : vector<2x256xf32>
    %160 = vector.multi_reduction <maximumf>, %159, %cst_76 [1] : vector<2x64x256xf32> to vector<2x256xf32>
    %cst_77 = arith.constant dense<0xFF800000> : vector<2x64xf32>
    %161 = vector.multi_reduction <maximumf>, %159, %cst_77 [2] : vector<2x64x256xf32> to vector<2x64xf32>
    %162 = vector.shape_cast %161 : vector<2x64xf32> to vector<2x64x1xf32>
    %163 = vector.broadcast %162 : vector<2x64x1xf32> to vector<2x64x256xf32>
    %164 = arith.cmpf oeq, %159, %163 : vector<2x64x256xf32>
    %c1073741824_i32 = arith.constant 1073741824 : i32
    %165 = vector.shape_cast %127 : vector<1x1x256xi32> to vector<1x1x256xi32>
    %166 = vector.broadcast %165 : vector<1x1x256xi32> to vector<2x64x256xi32>
    %167 = vector.broadcast %c1073741824_i32 : i32 to vector<2x64x256xi32>
    %168 = arith.select %164, %166, %167 : vector<2x64x256xi1>, vector<2x64x256xi32>
    %cst_78 = arith.constant dense<2147483647> : vector<2x64xi32>
    %169 = vector.multi_reduction <minsi>, %168, %cst_78 [2] : vector<2x64x256xi32> to vector<2x64xi32>
    %170 = vector.shape_cast %169 : vector<2x64xi32> to vector<2x64x1xi32>
    %c0_i32 = arith.constant 0 : i32
    %171 = vector.broadcast %c0_i32 : i32 to vector<2x64x1xi32>
    %172 = arith.addi %170, %171 : vector<2x64x1xi32>
    %c0_79 = arith.constant 0 : index
    %c256 = arith.constant 256 : index
    %173 = vector.load %arg13[%c0_79, %c256] : memref<128x1024xbf16, #tpu.memory_space<vmem>>, vector<128x256xbf16>
    %cst_80 = arith.constant dense<0.000000e+00> : vector<128x256xf32>
    %174 = tpu.matmul %126, %173, %cst_80 {dimension_numbers = #tpu.dot_dimension_numbers<[1], [0], [0], [1], [0, 0, 1, 1], [], []>} : vector<128x128xbf16>, vector<128x256xbf16>, vector<128x256xf32> -> vector<128x256xf32>
    %c0_81 = arith.constant 0 : index
    %c256_82 = arith.constant 256 : index
    %175 = vector.load %arg14[%c0_81, %c256_82] : memref<1x1024xf32, #tpu.memory_space<vmem>>, vector<1x256xf32>
    %c0_83 = arith.constant 0 : index
    %c256_84 = arith.constant 256 : index
    %176 = vector.load %arg15[%c0_83, %c256_84] : memref<1x1024xf32, #tpu.memory_space<vmem>>, vector<1x256xf32>
    %cst_85 = arith.constant dense<0.000000e+00> : vector<256xf32>
    %177 = vector.multi_reduction <add>, %174, %cst_85 [0] : vector<128x256xf32> to vector<256xf32>
    %178 = vector.shape_cast %177 : vector<256xf32> to vector<1x256xf32>
    %179 = arith.mulf %174, %174 : vector<128x256xf32>
    %cst_86 = arith.constant dense<0.000000e+00> : vector<256xf32>
    %180 = vector.multi_reduction <add>, %179, %cst_86 [0] : vector<128x256xf32> to vector<256xf32>
    %181 = vector.shape_cast %180 : vector<256xf32> to vector<1x256xf32>
    %cst_87 = arith.constant 7.812500e-03 : f32
    %182 = vector.broadcast %cst_87 : f32 to vector<1x256xf32>
    %183 = arith.mulf %178, %182 : vector<1x256xf32>
    %cst_88 = arith.constant 7.812500e-03 : f32
    %184 = vector.broadcast %cst_88 : f32 to vector<1x256xf32>
    %185 = arith.mulf %181, %184 : vector<1x256xf32>
    %186 = arith.mulf %183, %183 : vector<1x256xf32>
    %187 = arith.subf %185, %186 : vector<1x256xf32>
    %cst_89 = arith.constant 0.000000e+00 : f32
    %188 = vector.broadcast %cst_89 : f32 to vector<1x256xf32>
    %189 = arith.maximumf %187, %188 : vector<1x256xf32>
    %cst_90 = arith.constant 9.99999974E-6 : f32
    %190 = vector.broadcast %cst_90 : f32 to vector<1x256xf32>
    %191 = arith.addf %189, %190 : vector<1x256xf32>
    %192 = math.rsqrt %191 : vector<1x256xf32>
    %193 = arith.mulf %175, %192 : vector<1x256xf32>
    %194 = arith.mulf %183, %193 : vector<1x256xf32>
    %195 = arith.subf %176, %194 : vector<1x256xf32>
    %196 = vector.shape_cast %174 : vector<128x256xf32> to vector<2x64x256xf32>
    %197 = vector.shape_cast %193 : vector<1x256xf32> to vector<1x1x256xf32>
    %198 = vector.broadcast %197 : vector<1x1x256xf32> to vector<2x64x256xf32>
    %199 = arith.mulf %196, %198 : vector<2x64x256xf32>
    %200 = vector.shape_cast %195 : vector<1x256xf32> to vector<1x1x256xf32>
    %201 = vector.broadcast %200 : vector<1x1x256xf32> to vector<2x64x256xf32>
    %202 = arith.addf %199, %201 : vector<2x64x256xf32>
    %cst_91 = arith.constant 0.000000e+00 : f32
    %203 = vector.broadcast %cst_91 : f32 to vector<2x64x256xf32>
    %204 = arith.maximumf %202, %203 : vector<2x64x256xf32>
    %cst_92 = arith.constant dense<0xFF800000> : vector<2x256xf32>
    %205 = vector.multi_reduction <maximumf>, %204, %cst_92 [1] : vector<2x64x256xf32> to vector<2x256xf32>
    %cst_93 = arith.constant dense<0xFF800000> : vector<2x64xf32>
    %206 = vector.multi_reduction <maximumf>, %204, %cst_93 [2] : vector<2x64x256xf32> to vector<2x64xf32>
    %207 = vector.shape_cast %206 : vector<2x64xf32> to vector<2x64x1xf32>
    %208 = vector.broadcast %207 : vector<2x64x1xf32> to vector<2x64x256xf32>
    %209 = arith.cmpf oeq, %204, %208 : vector<2x64x256xf32>
    %c1073741824_i32_94 = arith.constant 1073741824 : i32
    %210 = vector.shape_cast %127 : vector<1x1x256xi32> to vector<1x1x256xi32>
    %211 = vector.broadcast %210 : vector<1x1x256xi32> to vector<2x64x256xi32>
    %212 = vector.broadcast %c1073741824_i32_94 : i32 to vector<2x64x256xi32>
    %213 = arith.select %209, %211, %212 : vector<2x64x256xi1>, vector<2x64x256xi32>
    %cst_95 = arith.constant dense<2147483647> : vector<2x64xi32>
    %214 = vector.multi_reduction <minsi>, %213, %cst_95 [2] : vector<2x64x256xi32> to vector<2x64xi32>
    %215 = vector.shape_cast %214 : vector<2x64xi32> to vector<2x64x1xi32>
    %c256_i32 = arith.constant 256 : i32
    %216 = vector.broadcast %c256_i32 : i32 to vector<2x64x1xi32>
    %217 = arith.addi %215, %216 : vector<2x64x1xi32>
    %c0_96 = arith.constant 0 : index
    %c512 = arith.constant 512 : index
    %218 = vector.load %arg13[%c0_96, %c512] : memref<128x1024xbf16, #tpu.memory_space<vmem>>, vector<128x256xbf16>
    %cst_97 = arith.constant dense<0.000000e+00> : vector<128x256xf32>
    %219 = tpu.matmul %126, %218, %cst_97 {dimension_numbers = #tpu.dot_dimension_numbers<[1], [0], [0], [1], [0, 0, 1, 1], [], []>} : vector<128x128xbf16>, vector<128x256xbf16>, vector<128x256xf32> -> vector<128x256xf32>
    %c0_98 = arith.constant 0 : index
    %c512_99 = arith.constant 512 : index
    %220 = vector.load %arg14[%c0_98, %c512_99] : memref<1x1024xf32, #tpu.memory_space<vmem>>, vector<1x256xf32>
    %c0_100 = arith.constant 0 : index
    %c512_101 = arith.constant 512 : index
    %221 = vector.load %arg15[%c0_100, %c512_101] : memref<1x1024xf32, #tpu.memory_space<vmem>>, vector<1x256xf32>
    %cst_102 = arith.constant dense<0.000000e+00> : vector<256xf32>
    %222 = vector.multi_reduction <add>, %219, %cst_102 [0] : vector<128x256xf32> to vector<256xf32>
    %223 = vector.shape_cast %222 : vector<256xf32> to vector<1x256xf32>
    %224 = arith.mulf %219, %219 : vector<128x256xf32>
    %cst_103 = arith.constant dense<0.000000e+00> : vector<256xf32>
    %225 = vector.multi_reduction <add>, %224, %cst_103 [0] : vector<128x256xf32> to vector<256xf32>
    %226 = vector.shape_cast %225 : vector<256xf32> to vector<1x256xf32>
    %cst_104 = arith.constant 7.812500e-03 : f32
    %227 = vector.broadcast %cst_104 : f32 to vector<1x256xf32>
    %228 = arith.mulf %223, %227 : vector<1x256xf32>
    %cst_105 = arith.constant 7.812500e-03 : f32
    %229 = vector.broadcast %cst_105 : f32 to vector<1x256xf32>
    %230 = arith.mulf %226, %229 : vector<1x256xf32>
    %231 = arith.mulf %228, %228 : vector<1x256xf32>
    %232 = arith.subf %230, %231 : vector<1x256xf32>
    %cst_106 = arith.constant 0.000000e+00 : f32
    %233 = vector.broadcast %cst_106 : f32 to vector<1x256xf32>
    %234 = arith.maximumf %232, %233 : vector<1x256xf32>
    %cst_107 = arith.constant 9.99999974E-6 : f32
    %235 = vector.broadcast %cst_107 : f32 to vector<1x256xf32>
    %236 = arith.addf %234, %235 : vector<1x256xf32>
    %237 = math.rsqrt %236 : vector<1x256xf32>
    %238 = arith.mulf %220, %237 : vector<1x256xf32>
    %239 = arith.mulf %228, %238 : vector<1x256xf32>
    %240 = arith.subf %221, %239 : vector<1x256xf32>
    %241 = vector.shape_cast %219 : vector<128x256xf32> to vector<2x64x256xf32>
    %242 = vector.shape_cast %238 : vector<1x256xf32> to vector<1x1x256xf32>
    %243 = vector.broadcast %242 : vector<1x1x256xf32> to vector<2x64x256xf32>
    %244 = arith.mulf %241, %243 : vector<2x64x256xf32>
    %245 = vector.shape_cast %240 : vector<1x256xf32> to vector<1x1x256xf32>
    %246 = vector.broadcast %245 : vector<1x1x256xf32> to vector<2x64x256xf32>
    %247 = arith.addf %244, %246 : vector<2x64x256xf32>
    %cst_108 = arith.constant 0.000000e+00 : f32
    %248 = vector.broadcast %cst_108 : f32 to vector<2x64x256xf32>
    %249 = arith.maximumf %247, %248 : vector<2x64x256xf32>
    %cst_109 = arith.constant dense<0xFF800000> : vector<2x256xf32>
    %250 = vector.multi_reduction <maximumf>, %249, %cst_109 [1] : vector<2x64x256xf32> to vector<2x256xf32>
    %cst_110 = arith.constant dense<0xFF800000> : vector<2x64xf32>
    %251 = vector.multi_reduction <maximumf>, %249, %cst_110 [2] : vector<2x64x256xf32> to vector<2x64xf32>
    %252 = vector.shape_cast %251 : vector<2x64xf32> to vector<2x64x1xf32>
    %253 = vector.broadcast %252 : vector<2x64x1xf32> to vector<2x64x256xf32>
    %254 = arith.cmpf oeq, %249, %253 : vector<2x64x256xf32>
    %c1073741824_i32_111 = arith.constant 1073741824 : i32
    %255 = vector.shape_cast %127 : vector<1x1x256xi32> to vector<1x1x256xi32>
    %256 = vector.broadcast %255 : vector<1x1x256xi32> to vector<2x64x256xi32>
    %257 = vector.broadcast %c1073741824_i32_111 : i32 to vector<2x64x256xi32>
    %258 = arith.select %254, %256, %257 : vector<2x64x256xi1>, vector<2x64x256xi32>
    %cst_112 = arith.constant dense<2147483647> : vector<2x64xi32>
    %259 = vector.multi_reduction <minsi>, %258, %cst_112 [2] : vector<2x64x256xi32> to vector<2x64xi32>
    %260 = vector.shape_cast %259 : vector<2x64xi32> to vector<2x64x1xi32>
    %c512_i32 = arith.constant 512 : i32
    %261 = vector.broadcast %c512_i32 : i32 to vector<2x64x1xi32>
    %262 = arith.addi %260, %261 : vector<2x64x1xi32>
    %c0_113 = arith.constant 0 : index
    %c768 = arith.constant 768 : index
    %263 = vector.load %arg13[%c0_113, %c768] : memref<128x1024xbf16, #tpu.memory_space<vmem>>, vector<128x256xbf16>
    %cst_114 = arith.constant dense<0.000000e+00> : vector<128x256xf32>
    %264 = tpu.matmul %126, %263, %cst_114 {dimension_numbers = #tpu.dot_dimension_numbers<[1], [0], [0], [1], [0, 0, 1, 1], [], []>} : vector<128x128xbf16>, vector<128x256xbf16>, vector<128x256xf32> -> vector<128x256xf32>
    %c0_115 = arith.constant 0 : index
    %c768_116 = arith.constant 768 : index
    %265 = vector.load %arg14[%c0_115, %c768_116] : memref<1x1024xf32, #tpu.memory_space<vmem>>, vector<1x256xf32>
    %c0_117 = arith.constant 0 : index
    %c768_118 = arith.constant 768 : index
    %266 = vector.load %arg15[%c0_117, %c768_118] : memref<1x1024xf32, #tpu.memory_space<vmem>>, vector<1x256xf32>
    %cst_119 = arith.constant dense<0.000000e+00> : vector<256xf32>
    %267 = vector.multi_reduction <add>, %264, %cst_119 [0] : vector<128x256xf32> to vector<256xf32>
    %268 = vector.shape_cast %267 : vector<256xf32> to vector<1x256xf32>
    %269 = arith.mulf %264, %264 : vector<128x256xf32>
    %cst_120 = arith.constant dense<0.000000e+00> : vector<256xf32>
    %270 = vector.multi_reduction <add>, %269, %cst_120 [0] : vector<128x256xf32> to vector<256xf32>
    %271 = vector.shape_cast %270 : vector<256xf32> to vector<1x256xf32>
    %cst_121 = arith.constant 7.812500e-03 : f32
    %272 = vector.broadcast %cst_121 : f32 to vector<1x256xf32>
    %273 = arith.mulf %268, %272 : vector<1x256xf32>
    %cst_122 = arith.constant 7.812500e-03 : f32
    %274 = vector.broadcast %cst_122 : f32 to vector<1x256xf32>
    %275 = arith.mulf %271, %274 : vector<1x256xf32>
    %276 = arith.mulf %273, %273 : vector<1x256xf32>
    %277 = arith.subf %275, %276 : vector<1x256xf32>
    %cst_123 = arith.constant 0.000000e+00 : f32
    %278 = vector.broadcast %cst_123 : f32 to vector<1x256xf32>
    %279 = arith.maximumf %277, %278 : vector<1x256xf32>
    %cst_124 = arith.constant 9.99999974E-6 : f32
    %280 = vector.broadcast %cst_124 : f32 to vector<1x256xf32>
    %281 = arith.addf %279, %280 : vector<1x256xf32>
    %282 = math.rsqrt %281 : vector<1x256xf32>
    %283 = arith.mulf %265, %282 : vector<1x256xf32>
    %284 = arith.mulf %273, %283 : vector<1x256xf32>
    %285 = arith.subf %266, %284 : vector<1x256xf32>
    %286 = vector.shape_cast %264 : vector<128x256xf32> to vector<2x64x256xf32>
    %287 = vector.shape_cast %283 : vector<1x256xf32> to vector<1x1x256xf32>
    %288 = vector.broadcast %287 : vector<1x1x256xf32> to vector<2x64x256xf32>
    %289 = arith.mulf %286, %288 : vector<2x64x256xf32>
    %290 = vector.shape_cast %285 : vector<1x256xf32> to vector<1x1x256xf32>
    %291 = vector.broadcast %290 : vector<1x1x256xf32> to vector<2x64x256xf32>
    %292 = arith.addf %289, %291 : vector<2x64x256xf32>
    %cst_125 = arith.constant 0.000000e+00 : f32
    %293 = vector.broadcast %cst_125 : f32 to vector<2x64x256xf32>
    %294 = arith.maximumf %292, %293 : vector<2x64x256xf32>
    %cst_126 = arith.constant dense<0xFF800000> : vector<2x256xf32>
    %295 = vector.multi_reduction <maximumf>, %294, %cst_126 [1] : vector<2x64x256xf32> to vector<2x256xf32>
    %cst_127 = arith.constant dense<0xFF800000> : vector<2x64xf32>
    %296 = vector.multi_reduction <maximumf>, %294, %cst_127 [2] : vector<2x64x256xf32> to vector<2x64xf32>
    %297 = vector.shape_cast %296 : vector<2x64xf32> to vector<2x64x1xf32>
    %298 = vector.broadcast %297 : vector<2x64x1xf32> to vector<2x64x256xf32>
    %299 = arith.cmpf oeq, %294, %298 : vector<2x64x256xf32>
    %c1073741824_i32_128 = arith.constant 1073741824 : i32
    %300 = vector.shape_cast %127 : vector<1x1x256xi32> to vector<1x1x256xi32>
    %301 = vector.broadcast %300 : vector<1x1x256xi32> to vector<2x64x256xi32>
    %302 = vector.broadcast %c1073741824_i32_128 : i32 to vector<2x64x256xi32>
    %303 = arith.select %299, %301, %302 : vector<2x64x256xi1>, vector<2x64x256xi32>
    %cst_129 = arith.constant dense<2147483647> : vector<2x64xi32>
    %304 = vector.multi_reduction <minsi>, %303, %cst_129 [2] : vector<2x64x256xi32> to vector<2x64xi32>
    %305 = vector.shape_cast %304 : vector<2x64xi32> to vector<2x64x1xi32>
    %c768_i32 = arith.constant 768 : i32
    %306 = vector.broadcast %c768_i32 : i32 to vector<2x64x1xi32>
    %307 = arith.addi %305, %306 : vector<2x64x1xi32>
    %308 = tpu.concatenate %162, %207, %252, %297 in 2 : vector<2x64x1xf32>, vector<2x64x1xf32>, vector<2x64x1xf32>, vector<2x64x1xf32> -> vector<2x64x4xf32>
    %309 = tpu.concatenate %172, %217, %262, %307 in 2 : vector<2x64x1xi32>, vector<2x64x1xi32>, vector<2x64x1xi32>, vector<2x64x1xi32> -> vector<2x64x4xi32>
    %cst_130 = arith.constant dense<0xFF800000> : vector<2x64xf32>
    %310 = vector.multi_reduction <maximumf>, %308, %cst_130 [2] : vector<2x64x4xf32> to vector<2x64xf32>
    %311 = vector.shape_cast %310 : vector<2x64xf32> to vector<2x64x1xf32>
    %312 = vector.broadcast %311 : vector<2x64x1xf32> to vector<2x64x4xf32>
    %313 = arith.cmpf oeq, %308, %312 : vector<2x64x4xf32>
    %c1073741824_i32_131 = arith.constant 1073741824 : i32
    %314 = vector.broadcast %c1073741824_i32_131 : i32 to vector<2x64x4xi32>
    %315 = arith.select %313, %309, %314 : vector<2x64x4xi1>, vector<2x64x4xi32>
    %cst_132 = arith.constant dense<2147483647> : vector<2x64xi32>
    %316 = vector.multi_reduction <minsi>, %315, %cst_132 [2] : vector<2x64x4xi32> to vector<2x64xi32>
    %c0_133 = arith.constant 0 : index
    %c0_134 = arith.constant 0 : index
    %317 = vector.load %arg25[%c0_133, %c0_134] : memref<2x64xi32, #tpu.memory_space<vmem>>, vector<2x64xi32>
    tpu.vector_store %arg25[%c0_133, %c0_134], %316 {strides = array<i32>} : memref<2x64xi32, #tpu.memory_space<vmem>>, vector<2x64xi32>,
    %318 = tpu.concatenate %160, %205, %250, %295 in 1 : vector<2x256xf32>, vector<2x256xf32>, vector<2x256xf32>, vector<2x256xf32> -> vector<2x1024xf32>
    %319 = arith.truncf %318 : vector<2x1024xf32> to vector<2x1024xbf16>
    %c0_135 = arith.constant 0 : index
    %c0_136 = arith.constant 0 : index
    %320 = vector.load %arg16[%c0_135, %c0_136] : memref<1024x512xbf16, #tpu.memory_space<vmem>>, vector<1024x512xbf16>
    %cst_137 = arith.constant dense<0.000000e+00> : vector<2x512xf32>
    %321 = tpu.matmul %319, %320, %cst_137 {dimension_numbers = #tpu.dot_dimension_numbers<[1], [0], [0], [1], [0, 0, 1, 1], [], []>} : vector<2x1024xbf16>, vector<1024x512xbf16>, vector<2x512xf32> -> vector<2x512xf32>
    %c0_138 = arith.constant 0 : index
    %c0_139 = arith.constant 0 : index
    %322 = vector.load %arg17[%c0_138, %c0_139] : memref<1x512xf32, #tpu.memory_space<vmem>>, vector<1x512xf32>
    %c0_140 = arith.constant 0 : index
    %c0_141 = arith.constant 0 : index
    %323 = vector.load %arg18[%c0_140, %c0_141] : memref<1x512xf32, #tpu.memory_space<vmem>>, vector<1x512xf32>
    %cst_142 = arith.constant dense<0.000000e+00> : vector<512xf32>
    %324 = vector.multi_reduction <add>, %321, %cst_142 [0] : vector<2x512xf32> to vector<512xf32>
    %325 = vector.shape_cast %324 : vector<512xf32> to vector<1x512xf32>
    %326 = arith.mulf %321, %321 : vector<2x512xf32>
    %cst_143 = arith.constant dense<0.000000e+00> : vector<512xf32>
    %327 = vector.multi_reduction <add>, %326, %cst_143 [0] : vector<2x512xf32> to vector<512xf32>
    %328 = vector.shape_cast %327 : vector<512xf32> to vector<1x512xf32>
    %cst_144 = arith.constant 5.000000e-01 : f32
    %329 = vector.broadcast %cst_144 : f32 to vector<1x512xf32>
    %330 = arith.mulf %325, %329 : vector<1x512xf32>
    %cst_145 = arith.constant 5.000000e-01 : f32
    %331 = vector.broadcast %cst_145 : f32 to vector<1x512xf32>
    %332 = arith.mulf %328, %331 : vector<1x512xf32>
    %333 = arith.mulf %330, %330 : vector<1x512xf32>
    %334 = arith.subf %332, %333 : vector<1x512xf32>
    %cst_146 = arith.constant 0.000000e+00 : f32
    %335 = vector.broadcast %cst_146 : f32 to vector<1x512xf32>
    %336 = arith.maximumf %334, %335 : vector<1x512xf32>
    %cst_147 = arith.constant 9.99999974E-6 : f32
    %337 = vector.broadcast %cst_147 : f32 to vector<1x512xf32>
    %338 = arith.addf %336, %337 : vector<1x512xf32>
    %339 = math.rsqrt %338 : vector<1x512xf32>
    %340 = arith.mulf %322, %339 : vector<1x512xf32>
    %341 = arith.mulf %330, %340 : vector<1x512xf32>
    %342 = arith.subf %323, %341 : vector<1x512xf32>
    %343 = vector.broadcast %340 : vector<1x512xf32> to vector<2x512xf32>
    %344 = arith.mulf %321, %343 : vector<2x512xf32>
    %345 = vector.broadcast %342 : vector<1x512xf32> to vector<2x512xf32>
    %346 = arith.addf %344, %345 : vector<2x512xf32>
    %cst_148 = arith.constant 0.000000e+00 : f32
    %347 = vector.broadcast %cst_148 : f32 to vector<2x512xf32>
    %348 = arith.maximumf %346, %347 : vector<2x512xf32>
    %349 = arith.truncf %348 : vector<2x512xf32> to vector<2x512xbf16>
    %c0_149 = arith.constant 0 : index
    %c0_150 = arith.constant 0 : index
    %350 = vector.load %arg19[%c0_149, %c0_150] : memref<512x256xbf16, #tpu.memory_space<vmem>>, vector<512x256xbf16>
    %cst_151 = arith.constant dense<0.000000e+00> : vector<2x256xf32>
    %351 = tpu.matmul %349, %350, %cst_151 {dimension_numbers = #tpu.dot_dimension_numbers<[1], [0], [0], [1], [0, 0, 1, 1], [], []>} : vector<2x512xbf16>, vector<512x256xbf16>, vector<2x256xf32> -> vector<2x256xf32>
    %c0_152 = arith.constant 0 : index
    %c0_153 = arith.constant 0 : index
    %352 = vector.load %arg20[%c0_152, %c0_153] : memref<1x256xf32, #tpu.memory_space<vmem>>, vector<1x256xf32>
    %c0_154 = arith.constant 0 : index
    %c0_155 = arith.constant 0 : index
    %353 = vector.load %arg21[%c0_154, %c0_155] : memref<1x256xf32, #tpu.memory_space<vmem>>, vector<1x256xf32>
    %cst_156 = arith.constant dense<0.000000e+00> : vector<256xf32>
    %354 = vector.multi_reduction <add>, %351, %cst_156 [0] : vector<2x256xf32> to vector<256xf32>
    %355 = vector.shape_cast %354 : vector<256xf32> to vector<1x256xf32>
    %356 = arith.mulf %351, %351 : vector<2x256xf32>
    %cst_157 = arith.constant dense<0.000000e+00> : vector<256xf32>
    %357 = vector.multi_reduction <add>, %356, %cst_157 [0] : vector<2x256xf32> to vector<256xf32>
    %358 = vector.shape_cast %357 : vector<256xf32> to vector<1x256xf32>
    %cst_158 = arith.constant 5.000000e-01 : f32
    %359 = vector.broadcast %cst_158 : f32 to vector<1x256xf32>
    %360 = arith.mulf %355, %359 : vector<1x256xf32>
    %cst_159 = arith.constant 5.000000e-01 : f32
    %361 = vector.broadcast %cst_159 : f32 to vector<1x256xf32>
    %362 = arith.mulf %358, %361 : vector<1x256xf32>
    %363 = arith.mulf %360, %360 : vector<1x256xf32>
    %364 = arith.subf %362, %363 : vector<1x256xf32>
    %cst_160 = arith.constant 0.000000e+00 : f32
    %365 = vector.broadcast %cst_160 : f32 to vector<1x256xf32>
    %366 = arith.maximumf %364, %365 : vector<1x256xf32>
    %cst_161 = arith.constant 9.99999974E-6 : f32
    %367 = vector.broadcast %cst_161 : f32 to vector<1x256xf32>
    %368 = arith.addf %366, %367 : vector<1x256xf32>
    %369 = math.rsqrt %368 : vector<1x256xf32>
    %370 = arith.mulf %352, %369 : vector<1x256xf32>
    %371 = arith.mulf %360, %370 : vector<1x256xf32>
    %372 = arith.subf %353, %371 : vector<1x256xf32>
    %373 = vector.broadcast %370 : vector<1x256xf32> to vector<2x256xf32>
    %374 = arith.mulf %351, %373 : vector<2x256xf32>
    %375 = vector.broadcast %372 : vector<1x256xf32> to vector<2x256xf32>
    %376 = arith.addf %374, %375 : vector<2x256xf32>
    %cst_162 = arith.constant 0.000000e+00 : f32
    %377 = vector.broadcast %cst_162 : f32 to vector<2x256xf32>
    %378 = arith.maximumf %376, %377 : vector<2x256xf32>
    %379 = arith.truncf %378 : vector<2x256xf32> to vector<2x256xbf16>
    %c0_163 = arith.constant 0 : index
    %c0_164 = arith.constant 0 : index
    %380 = vector.load %arg22[%c0_163, %c0_164] : memref<256x3xbf16, #tpu.memory_space<vmem>>, vector<256x3xbf16>
    %cst_165 = arith.constant dense<0.000000e+00> : vector<2x3xf32>
    %381 = tpu.matmul %379, %380, %cst_165 {dimension_numbers = #tpu.dot_dimension_numbers<[1], [0], [0], [1], [0, 0, 1, 1], [], []>} : vector<2x256xbf16>, vector<256x3xbf16>, vector<2x3xf32> -> vector<2x3xf32>
    %c0_166 = arith.constant 0 : index
    %c0_167 = arith.constant 0 : index
    %382 = vector.load %arg23[%c0_166, %c0_167] : memref<1x3xf32, #tpu.memory_space<vmem>>, vector<1x3xf32>
    %383 = vector.broadcast %382 : vector<1x3xf32> to vector<2x3xf32>
    %384 = arith.addf %381, %383 : vector<2x3xf32>
    %c0_168 = arith.constant 0 : index
    %c0_169 = arith.constant 0 : index
    %385 = vector.load %arg24[%c0_168, %c0_169] : memref<2x3xf32, #tpu.memory_space<vmem>>, vector<2x3xf32>
    tpu.vector_store %arg24[%c0_168, %c0_169], %384 {strides = array<i32>} : memref<2x3xf32, #tpu.memory_space<vmem>>, vector<2x3xf32>,
    return
  }
}

</mosaic_0001>

<bundles_post_ra>
// kernel: tpu_custom_call.1
= control target key start
LH: loop header
LB: loop body
LE: loop exit
PB: predicated region body
PF: predicated region fallthrough
CT: control target
= control target key end

     0   :  { %s15253_s0 = inlined_call_operand.vmem [shape: bf16[2,8,64], index: 0, kind: input, shape index: {}]   ;;  %s15254_s1 = inlined_call_operand.vmem [shape: bf16[8,64], index: 1, kind: input, shape index: {}]   ;;  %s15255_s2 = inlined_call_operand.vmem [shape: f32[1,64], index: 2, kind: input, shape index: {}]   ;;  %s15256_s3 = inlined_call_operand.vmem [shape: f32[1,64], index: 3, kind: input, shape index: {}]   ;;  %s15257_s4 = inlined_call_operand.vmem [shape: bf16[64,64], index: 4, kind: input, shape index: {}]   ;;  %s15258_s5 = inlined_call_operand.vmem [shape: f32[1,64], index: 5, kind: input, shape index: {}]   ;;  %s15259_s6 = inlined_call_operand.vmem [shape: f32[1,64], index: 6, kind: input, shape index: {}]   ;;  %s15260_s7 = inlined_call_operand.vmem [shape: bf16[64,64], index: 7, kind: input, shape index: {}]   ;;  %s15261_s8 = inlined_call_operand.vmem [shape: f32[1,64], index: 8, kind: input, shape index: {}]   ;;  %s15262_s9 = inlined_call_operand.vmem [shape: f32[1,64], index: 9, kind: input, shape index: {}]   ;;  %s15263_s10 = inlined_call_operand.vmem [shape: bf16[64,128], index: 10, kind: input, shape index: {}]   ;;  %s15264_s11 = inlined_call_operand.vmem [shape: f32[1,128], index: 11, kind: input, shape index: {}]   ;;  %s15265_s12 = inlined_call_operand.vmem [shape: f32[1,128], index: 12, kind: input, shape index: {}]   ;;  %s15266_s13 = inlined_call_operand.hbm [shape: bf16[128,1024], index: 13, kind: input, shape index: {}]   ;;  %s15267_s14 = inlined_call_operand.vmem [shape: f32[1,1024], index: 14, kind: input, shape index: {}]   ;;  %s15268_s15 = inlined_call_operand.vmem [shape: f32[1,1024], index: 15, kind: input, shape index: {}]   ;;  %s15269_s16 = inlined_call_operand.hbm [shape: bf16[1024,512], index: 16, kind: input, shape index: {}]   ;;  %s15270_s17 = inlined_call_operand.vmem [shape: f32[1,512], index: 17, kind: input, shape index: {}]   ;;  %s15271_s18 = inlined_call_operand.vmem [shape: f32[1,512], index: 18, kind: input, shape index: {}]   ;;  %s15272_s19 = inlined_call_operand.hbm [shape: bf16[512,256], index: 19, kind: input, shape index: {}]   ;;  %s15273_s20 = inlined_call_operand.vmem [shape: f32[1,256], index: 20, kind: input, shape index: {}]   ;;  %s15274_s21 = inlined_call_operand.vmem [shape: f32[1,256], index: 21, kind: input, shape index: {}]   ;;  %s15275_s22 = inlined_call_operand.vmem [shape: bf16[256,3], index: 22, kind: input, shape index: {}]   ;;  %s15276_s23 = inlined_call_operand.vmem [shape: f32[1,3], index: 23, kind: input, shape index: {}]   ;;  %s15277_s24 = inlined_call_operand.hbm [shape: f32[2,3], index: 24, kind: output, shape index: {0}]   ;;  %s15278_s25 = inlined_call_operand.hbm [shape: s32[2,64], index: 25, kind: output, shape index: {1}]  }
   0x1   :  { %15786 = sst [smem:[#allocation147_spill]] %s15253_s0 }
   0x2   :  { %15787 = sst [smem:[#allocation148_spill]] %s15254_s1 }
   0x3   :  { %15788 = sst [smem:[#allocation149_spill]] %s15255_s2 }
   0x4   :  { %15789 = sst [smem:[#allocation150_spill]] %s15256_s3 }
   0x5   :  { %15790 = sst [smem:[#allocation151_spill]] %s15257_s4 }
   0x6   :  { %15791 = sst [smem:[#allocation152_spill]] %s15258_s5 }
   0x7   :  { %15792 = sst [smem:[#allocation153_spill]] %s15259_s6 }
   0x8   :  { %15793 = sst [smem:[#allocation154_spill]] %s15260_s7 }
   0x9   :  { %15794 = sst [smem:[#allocation155_spill]] %s15261_s8 }
   0xa   :  { %15795 = sst [smem:[#allocation156_spill]] %s15262_s9 }
   0xb   :  { %31 = vsyncpa [#allocation3], 0 }
   0xc   :  { %32 = vsyncpa [#allocation6], 0 }
   0xd   :  { %33 = vsyncpa [#allocation4], 0 }
   0xe   :  { %34 = vsyncpa [#allocation10], 0  ;;  %s9902_s29 = smov [#allocation5]   ;;  %s9784_s7 = scalar_lea.hbm %s15269_s16, 32768 }
   0xf   :  { %s82_s2 = sshll.u32 %s9902_s29, 4  ;;  %p9785_p0 = scmp.ne.s32.totalorder %s15269_s16, %s9784_s7  ;;  %s83_s2 = int_to_ptr.vmem [resolvable:$true] %s82_s2 }
  0x10   :  { %p9788_p1 = scmp.lt.u32.totalorder %s9784_s7, %s15269_s16 }
  0x12   :  { %p9790_p2 = pnand %p9788_p1, %p9785_p0 }
  0x14   :  { %9793 = shalt.err (!%p9790_p2)
}
  0x15   :  { %s9794_s27 = scalar_lea.vmem %s83_s2, 32768  ;;  %p9799_p4 = scmp.lt.s32.totalorder %s83_s2, %s83_s2 }
  0x16   :  { %p9795_p3 = scmp.ne.s32.totalorder %s83_s2, %s9794_s27  ;;  %p9800_p5 = scmp.lt.s32.totalorder %s9794_s27, %s9794_s27 }
  0x18   :  { %p9801_p6 = por %p9800_p5, %p9799_p4 }
  0x1a   :  { %p9802_p7 = pnand %p9801_p6, %p9795_p3 }
  0x1c   :  { %9805 = shalt.err (!%p9802_p7)
}
  0x1d   :  { %s9903_s4 = smov 256   ;;  %s9904_s28 = smov 16  }
  0x1e   :  { %88 = dma.hbm_to_vmem [thread:$0]  %s15269_s16, 32768, %s83_s2, [#allocation6], %s9903_s4, %s9903_s4, %s9904_s28  }
  0x1f   :  { %s9905_s0 = smov [#allocation2]   ;;  %s9806_s7 = scalar_lea.hbm %s15266_s13, 8192 }
  0x20   :  { %s66_s29 = sshll.u32 %s9905_s0, 4  ;;  %p9807_p8 = scmp.ne.s32.totalorder %s15266_s13, %s9806_s7  ;;  %s67_s29 = int_to_ptr.vmem [resolvable:$true] %s66_s29 }
  0x21   :  { %p9810_p9 = scmp.lt.u32.totalorder %s9806_s7, %s15266_s13 }
  0x23   :  { %p9812_p10 = pnand %p9810_p9, %p9807_p8 }
  0x25   :  { %9815 = shalt.err (!%p9812_p10)
}
  0x26   :  { %s9816_s27 = scalar_lea.vmem %s67_s29, 8192  ;;  %p9821_p12 = scmp.lt.s32.totalorder %s67_s29, %s67_s29 }
  0x27   :  { %p9817_p11 = scmp.ne.s32.totalorder %s67_s29, %s9816_s27  ;;  %p9822_p13 = scmp.lt.s32.totalorder %s9816_s27, %s9816_s27 }
  0x29   :  { %p9823_p0 = por %p9822_p13, %p9821_p12 }
  0x2b   :  { %p9824_p1 = pnand %p9823_p0, %p9817_p11 }
  0x2d   :  { %9827 = shalt.err (!%p9824_p1)
}
  0x2e   :  { %s9906_s16 = smov 512   ;;  %s9907_s2 = smov 32  }
  0x2f   :  { %72 = dma.hbm_to_vmem [thread:$0]  %s15266_s13, 8192, %s67_s29, [#allocation3], %s9906_s16, %s9906_s16, %s9907_s2  }
  0x30   :  { %s9908_s9 = smov [#allocation7]   ;;  %s9828_s30 = scalar_lea.hbm %s15272_s19, 8192 }
  0x31   :  { %s98_s5 = sshll.u32 %s9908_s9, 4  ;;  %p9829_p2 = scmp.ne.s32.totalorder %s15272_s19, %s9828_s30  ;;  %s99_s5 = int_to_ptr.vmem [resolvable:$true] %s98_s5 }
  0x32   :  { %p9832_p3 = scmp.lt.u32.totalorder %s9828_s30, %s15272_s19 }
  0x34   :  { %p9834_p4 = pnand %p9832_p3, %p9829_p2 }
  0x36   :  { %9837 = shalt.err (!%p9834_p4)
}
  0x37   :  { %s9838_s8 = scalar_lea.vmem %s99_s5, 8192  ;;  %p9843_p6 = scmp.lt.s32.totalorder %s99_s5, %s99_s5 }
  0x38   :  { %p9839_p5 = scmp.ne.s32.totalorder %s99_s5, %s9838_s8  ;;  %p9844_p7 = scmp.lt.s32.totalorder %s9838_s8, %s9838_s8 }
  0x3a   :  { %p9845_p8 = por %p9844_p7, %p9843_p6 }
  0x3c   :  { %p9846_p9 = pnand %p9845_p8, %p9839_p5 }
  0x3e   :  { %9849 = shalt.err (!%p9846_p9)
}
  0x3f   :  { %s9909_s13 = smov 128   ;;  %s9910_s29 = smov 8  }
  0x40   :  { %104 = dma.hbm_to_vmem [thread:$0]  %s15272_s19, 8192, %s99_s5, [#allocation6], %s9909_s13, %s9909_s13, %s9910_s29  }
  0x41   :  { %9894 = dma.done.wait [#allocation3], 8192  }
  0x42   :  { %9895 = vsyncadd [#allocation3], 4294959104 }
  0x43   :  { %9896 = dma.done.wait [#allocation6], 40960  }
  0x44   :  { %9897 = vsyncadd [#allocation6], 4294926336  ;;  %vm154_vm0 = vcmask 1043456   ;;  %s15796_s28 = sld [smem:[#allocation147_spill]]  ;;  %s15797_s6 = sld [smem:[#allocation148_spill]]  ;;  %vm141_vm1 = vcmask 64512  }
  0x45   :  { %s15798_s3 = sld [smem:[#allocation151_spill]]  ;;  %vm320_vm2 = vcmask 523264   ;;  %s15800_s4 = sld [smem:[#allocation149_spill]]  ;;  %vm5665_vm3 = vcmask 1041409  }
  0x46   :  { %s15802_s0 = sld [smem:[#allocation150_spill]]  ;;  %s15803_s5 = sld [smem:[#allocation154_spill]] }
  0x47   :  { %s15804_s27 = sld [smem:[#allocation152_spill]]  ;;  %s15806_s26 = sld [smem:[#allocation155_spill]] }
  0x48   :  { %s15807_s13 = sld [smem:[#allocation156_spill]] }
  0x4a   :  { %v123_v0 = vld [vmem:[%s15796_s28] sm:$0xf]  ;;  %v8579_v3 = vld [vmem:[%s15796_s28 + $0x4] sm:$0xf] }
  0x4b   :  { %v124_v1 = vld [vmem:[%s15797_s6] sm:$0xf]  ;;  %125 = vxpose.xlu0.c.b16.start.end [1/1] (short) (narrow) %v123_v0, 64  ;;  %v9241_v13 = vld [vmem:[%s15798_s3 + $0x8] sm:$0xff]   ;;  %v9242_v14 = vld [vmem:[%s15798_s3 + $0x10] sm:$0xff]  }
  0x4c   :  { %9225 = vmatprep.subr.msk.bf16.mxu0 %vm154_vm0, %v124_v1  ;;  %v156_v2 = vsel %vm154_vm0, %v124_v1, 0  ;;  %9226 = vmatprep.subr.msk.bf16.mxu1 %vm154_vm0, %v124_v1  ;;  %v9240_v12 = vld [vmem:[%s15798_s3] sm:$0xff]   ;;  %v9243_v15 = vld [vmem:[%s15798_s3 + $0x18] sm:$0xff]  }
  0x4d   :  { %9090 = vmatpush3.bf16.msra.mxu0 %v156_v2  ;;  %9100 = vmatpush3.bf16.msra.mxu1 %v156_v2 }
  0x4e   :  { %9109 = vmatprep.subr.bf16.mxu0 %v9240_v12 }
  0x58   :  { %225 = vxpose.xlu0.c.b16.start.end [1/1] (short) (narrow) %v8579_v3, 64 }
  0xb1   :  { %v133_v4 = vpop.trf.xlu0 }
  0xb2   :  { %9091 = vmatprep.mubr.msk.bf16.mxu0 %vm141_vm1, %v133_v4 }
  0xb5   :  { %v134_v5 = vpop.trf.xlu0 }
  0xb6   :  { %9092 = vmatmul.mubr.msk.bf16.vlgmr.msra.gmra.mrb[0].mxu0 %vm141_vm1, %v134_v5 }
  0xb7   :  { %9110 = vmatpush3.bf16.msra.mxu0 %v9240_v12 }
  0xb8   :  { %9111 = vmatprep.subr.bf16.mxu0 %v9241_v13 }
  0xb9   :  { %v135_v6 = vpop.trf.xlu0 }
  0xba   :  { %9095 = vmatprep.mubr.msk.bf16.mxu0 %vm141_vm1, %v135_v6 }
  0xbb   :  { %9112 = vmatpush3.bf16.msra.mxu0 %v9241_v13 }
  0xbc   :  { %9113 = vmatprep.subr.bf16.mxu0 %v9242_v14 }
  0xbd   :  { %v136_v7 = vpop.trf.xlu0 }
  0xbe   :  { %9096 = vmatmul.mubr.msk.bf16.gmra.mrb[4].mxu0 %vm141_vm1, %v136_v7 }
  0xbf   :  { %9114 = vmatpush3.bf16.msra.mxu0 %v9242_v14 }
  0xc0   :  { %9115 = vmatprep.subr.bf16.mxu0 %v9243_v15 }
  0xc1   :  { %v233_v8 = vpop.trf.xlu0 }
  0xc2   :  { %9101 = vmatprep.mubr.msk.bf16.mxu1 %vm141_vm1, %v233_v8 }
  0xc3   :  { %9116 = vmatpush3.bf16.msra.mxu0 %v9243_v15 }
  0xc5   :  { %v234_v9 = vpop.trf.xlu0 }
  0xc6   :  { %9102 = vmatmul.mubr.msk.bf16.vlgmr.msra.gmra.mrb[0].mxu1 %vm141_vm1, %v234_v9 }
  0xc9   :  { %v235_v10 = vpop.trf.xlu0 }
  0xca   :  { %9105 = vmatprep.mubr.msk.bf16.mxu1 %vm141_vm1, %v235_v10 }
  0xcd   :  { %v236_v11 = vpop.trf.xlu0 }
  0xce   :  { %9106 = vmatmul.mubr.msk.bf16.gmra.mrb[4].mxu1 %vm141_vm1, %v236_v11 }
 0x189   :  { %v10110_v16 = vpop.f32.mrb[0].mxu0 }
 0x18a   :  { %v10112_v17 = vpop.f32.mrb[1].mxu0  ;;  %v360_v21 = vmul.f32 %v10110_v16, %v10110_v16  ;;  %v324_v26 = vsel %vm320_vm2, %v10110_v16, 0.0 }
 0x18b   :  { %v358_v18 = vmul.f32 %v10112_v17, %v10112_v17  ;;  %v10116_v19 = vpop.f32.mrb[2].mxu0  ;;  %v321_v22 = vsel %vm320_vm2, %v10112_v17, 0.0 }
 0x18c   :  { %v10118_v20 = vpop.f32.mrb[3].mxu0  ;;  %v361_v28 = vmul.f32 %v10116_v19, %v10116_v19  ;;  %v377_v32 = vsel %vm320_vm2, %v360_v21, 0.0  ;;  %v326_v33 = vsel %vm320_vm2, %v10116_v19, 0.0 }
 0x18d   :  { %v322_v23 = vsel %vm320_vm2, %v10118_v20, 0.0  ;;  %v359_v24 = vmul.f32 %v10118_v20, %v10118_v20  ;;  %v374_v27 = vsel %vm320_vm2, %v358_v18, 0.0 }
 0x18e   :  { %v323_v25 = vadd.f32 %v322_v23, %v321_v22  ;;  %v379_v38 = vsel %vm320_vm2, %v361_v28, 0.0 }
 0x18f   :  { %v375_v29 = vsel %vm320_vm2, %v359_v24, 0.0 }
 0x190   :  { %v325_v30 = vadd.f32 %v324_v26, %v323_v25  ;;  %v376_v31 = vadd.f32 %v375_v29, %v374_v27 }
 0x191   :  { %v10137_v34 = vpop.f32.mrb[4].mxu0 }
 0x192   :  { %v378_v35 = vadd.f32 %v377_v32, %v376_v31  ;;  %v10139_v36 = vpop.f32.mrb[5].mxu0  ;;  %v327_v37 = vadd.f32 %v326_v33, %v325_v30  ;;  %v364_v45 = vmul.f32 %v10137_v34, %v10137_v34  ;;  %v332_v51 = vsel %vm320_vm2, %v10137_v34, 0.0 }
 0x193   :  { %v328_v39 = vsel %vm320_vm2, %v10139_v36, 0.0  ;;  %v362_v40 = vmul.f32 %v10139_v36, %v10139_v36  ;;  %v10146_v41 = vpop.f32.mrb[6].mxu0 }
 0x194   :  { %v329_v42 = vadd.f32 %v328_v39, %v327_v37  ;;  %v380_v43 = vadd.f32 %v379_v38, %v378_v35  ;;  %v10148_v44 = vpop.f32.mrb[7].mxu0  ;;  %v365_v52 = vmul.f32 %v10146_v41, %v10146_v41  ;;  %v385_v56 = vsel %vm320_vm2, %v364_v45, 0.0 }
 0x195   :  { %v381_v46 = vsel %vm320_vm2, %v362_v40, 0.0  ;;  %v330_v47 = vsel %vm320_vm2, %v10148_v44, 0.0  ;;  %v363_v48 = vmul.f32 %v10148_v44, %v10148_v44  ;;  %v334_v57 = vsel %vm320_vm2, %v10146_v41, 0.0 }
 0x196   :  { %v382_v49 = vadd.f32 %v381_v46, %v380_v43  ;;  %v331_v50 = vadd.f32 %v330_v47, %v329_v42  ;;  %v387_v62 = vsel %vm320_vm2, %v365_v52, 0.0 }
 0x197   :  { %v383_v53 = vsel %vm320_vm2, %v363_v48, 0.0 }
 0x198   :  { %v333_v54 = vadd.f32 %v332_v51, %v331_v50  ;;  %v384_v55 = vadd.f32 %v383_v53, %v382_v49 }
 0x199   :  { %v10165_v58 = vpop.f32.mrb[0].mxu1 }
 0x19a   :  { %v386_v59 = vadd.f32 %v385_v56, %v384_v55  ;;  %v10167_v60 = vpop.f32.mrb[1].mxu1  ;;  %v335_v61 = vadd.f32 %v334_v57, %v333_v54  ;;  %v368_v5 = vmul.f32 %v10165_v58, %v10165_v58  ;;  %v340_v11 = vsel %vm320_vm2, %v10165_v58, 0.0 }
 0x19b   :  { %v336_v63 = vsel %vm320_vm2, %v10167_v60, 0.0  ;;  %v366_v0 = vmul.f32 %v10167_v60, %v10167_v60  ;;  %v10174_v1 = vpop.f32.mrb[2].mxu1 }
 0x19c   :  { %v337_v2 = vadd.f32 %v336_v63, %v335_v61  ;;  %v388_v3 = vadd.f32 %v387_v62, %v386_v59  ;;  %v10176_v4 = vpop.f32.mrb[3].mxu1  ;;  %v369_v12 = vmul.f32 %v10174_v1, %v10174_v1  ;;  %v393_v18 = vsel %vm320_vm2, %v368_v5, 0.0 }
 0x19d   :  { %v389_v6 = vsel %vm320_vm2, %v366_v0, 0.0  ;;  %v338_v7 = vsel %vm320_vm2, %v10176_v4, 0.0  ;;  %v367_v8 = vmul.f32 %v10176_v4, %v10176_v4  ;;  %v342_v21 = vsel %vm320_vm2, %v10174_v1, 0.0 }
 0x19e   :  { %v390_v9 = vadd.f32 %v389_v6, %v388_v3  ;;  %v339_v10 = vadd.f32 %v338_v7, %v337_v2  ;;  %v395_v26 = vsel %vm320_vm2, %v369_v12, 0.0  ;;  %v15282_v12 = vlaneseq }
 0x19f   :  { %v391_v13 = vsel %vm320_vm2, %v367_v8, 0.0 }
 0x1a0   :  { %v341_v14 = vadd.f32 %v340_v11, %v339_v10  ;;  %v392_v15 = vadd.f32 %v391_v13, %v390_v9  ;;  %v10218_v13 = vshrl.u32 %v15282_v12, 7 }
 0x1a1   :  { %v10193_v22 = vpop.f32.mrb[4].mxu1 }
 0x1a2   :  { %v394_v23 = vadd.f32 %v393_v18, %v392_v15  ;;  %v10195_v24 = vpop.f32.mrb[5].mxu1  ;;  %v343_v25 = vadd.f32 %v342_v21, %v341_v14  ;;  %v372_v33 = vmul.f32 %v10193_v22, %v10193_v22  ;;  %v348_v42 = vsel %vm320_vm2, %v10193_v22, 0.0  ;;  %15799 = vst [vmem:[#allocation15_spill] sm:$0xff] %v10218_v13  ;;  %v318_v14 = vld [vmem:[%s15800_s4] sm:$0x1]  ;;  %s15805_s4 = sld [smem:[#allocation153_spill]] }
 0x1a3   :  { %v344_v27 = vsel %vm320_vm2, %v10195_v24, 0.0  ;;  %v370_v28 = vmul.f32 %v10195_v24, %v10195_v24  ;;  %v10202_v29 = vpop.f32.mrb[6].mxu1  ;;  %v10224_v15 = vsub.s32 0, %v10218_v13 }
 0x1a4   :  { %v345_v30 = vadd.f32 %v344_v27, %v343_v25  ;;  %v396_v31 = vadd.f32 %v395_v26, %v394_v23  ;;  %v306_v32 = vpop.f32.mrb[7].mxu1  ;;  %v373_v43 = vmul.f32 %v10202_v29, %v10202_v29  ;;  %v401_v48 = vsel %vm320_vm2, %v372_v33, 0.0  ;;  %v319_v23 = vld [vmem:[%s15802_s0] sm:$0x1] }
 0x1a5   :  { %v397_v35 = vsel %vm320_vm2, %v370_v28, 0.0  ;;  %v346_v37 = vsel %vm320_vm2, %v306_v32, 0.0  ;;  %v371_v38 = vmul.f32 %v306_v32, %v306_v32  ;;  %v350_v49 = vsel %vm320_vm2, %v10202_v29, 0.0  ;;  %15801 = vst [vmem:[#allocation16_spill] sm:$0xff] %v10224_v15 }
 0x1a6   :  { %v398_v39 = vadd.f32 %v397_v35, %v396_v31  ;;  %v347_v40 = vadd.f32 %v346_v37, %v345_v30  ;;  %v403_v52 = vsel %vm320_vm2, %v373_v43, 0.0 }
 0x1a7   :  { %v399_v45 = vsel %vm320_vm2, %v371_v38, 0.0 }
 0x1a8   :  { %v349_v46 = vadd.f32 %v348_v42, %v347_v40  ;;  %v400_v47 = vadd.f32 %v399_v45, %v398_v39 }
 0x1aa   :  { %v351_v50 = vadd.f32 %v350_v49, %v349_v46  ;;  %v402_v51 = vadd.f32 %v401_v48, %v400_v47 }
 0x1ac   :  { %v352_v53 = vrot.slane %v351_v50, 4  ;;  %v404_v54 = vadd.f32 %v403_v52, %v402_v51 }
 0x1ae   :  { %v353_v55 = vadd.f32 %v352_v53, %v351_v50  ;;  %v405_v56 = vrot.slane %v404_v54, 4 }
 0x1b0   :  { %v354_v57 = vrot.slane %v353_v55, 2  ;;  %v406_v59 = vadd.f32 %v405_v56, %v404_v54 }
 0x1b2   :  { %v355_v61 = vadd.f32 %v354_v57, %v353_v55  ;;  %v407_v62 = vrot.slane %v406_v59, 2 }
 0x1b4   :  { %v356_v63 = vrot.slane %v355_v61, 1  ;;  %v408_v0 = vadd.f32 %v407_v62, %v406_v59 }
 0x1b6   :  { %v357_v2 = vadd.f32 %v356_v63, %v355_v61  ;;  %v409_v3 = vrot.slane %v408_v0, 1 }
 0x1b8   :  { %v410_v5 = vadd.f32 %v409_v3, %v408_v0  ;;  %v411_v6 = vmul.f32 0.0078125, %v357_v2 }
 0x1ba   :  { %v412_v7 = vmul.f32 0.0078125, %v410_v5  ;;  %v413_v8 = vmul.f32 %v411_v6, %v411_v6 }
 0x1bc   :  { %v414_v9 = vsub.f32 %v412_v7, %v413_v8 }
 0x1be   :  { %v415_v10 = vmax.f32 %v414_v9, 0.0 }
 0x1c0   :  { %v416_v11 = vadd.f32 1e-05, %v415_v10 }
 0x1c2   :  { %9748 = vrsqrt.f32 %v416_v11 }
 0x1cc   :  { %v9749_v18 = vpop.eup %9748 }
 0x1cd   :  { %v418_v21 = vmul.f32 %v9749_v18, %v318_v14 }
 0x1cf   :  { %v419_v25 = vmul.f32 %v418_v21, %v411_v6  ;;  %v425_v26 = vrot.slane %v418_v21, %v10224_v15 }
 0x1d1   :  { %v420_v27 = vsub.f32 %v319_v23, %v419_v25  ;;  %v440_v28 = vmul.f32 %v425_v26, %v306_v32  ;;  %v427_v30 = vmul.f32 %v425_v26, %v10112_v17  ;;  %v428_v31 = vmul.f32 %v425_v26, %v10118_v20 }
 0x1d2   :  { %v429_v33 = vmul.f32 %v10110_v16, %v425_v26  ;;  %v430_v35 = vmul.f32 %v10116_v19, %v425_v26  ;;  %v431_v37 = vmul.f32 %v425_v26, %v10139_v36  ;;  %v432_v38 = vmul.f32 %v425_v26, %v10148_v44 }
 0x1d3   :  { %v447_v39 = vrot.slane %v420_v27, %v10224_v15  ;;  %v433_v40 = vmul.f32 %v10137_v34, %v425_v26  ;;  %v434_v42 = vmul.f32 %v10146_v41, %v425_v26  ;;  %v435_v32 = vmul.f32 %v425_v26, %v10167_v60  ;;  %v9247_v27 = vld [vmem:[%s15803_s5 + $0x18] sm:$0xff]  }
 0x1d4   :  { %v436_v17 = vmul.f32 %v425_v26, %v10176_v4  ;;  %v437_v20 = vmul.f32 %v10165_v58, %v425_v26  ;;  %v438_v16 = vmul.f32 %v10174_v1, %v425_v26  ;;  %v439_v19 = vmul.f32 %v425_v26, %v10195_v24 }
 0x1d5   :  { %v462_v43 = vadd.f32 %v447_v39, %v440_v28  ;;  %v449_v36 = vadd.f32 %v447_v39, %v427_v30  ;;  %v450_v45 = vadd.f32 %v447_v39, %v428_v31  ;;  %v451_v44 = vadd.f32 %v447_v39, %v429_v33 }
 0x1d6   :  { %v452_v46 = vadd.f32 %v447_v39, %v430_v35  ;;  %v453_v47 = vadd.f32 %v447_v39, %v431_v37  ;;  %v454_v48 = vadd.f32 %v447_v39, %v432_v38  ;;  %v455_v34 = vadd.f32 %v447_v39, %v433_v40 }
 0x1d7   :  { %v478_v49 = vmax.f32 %v462_v43, 0.0  ;;  %v465_v41 = vmax.f32 %v449_v36, 0.0  ;;  %v466_v50 = vmax.f32 %v450_v45, 0.0  ;;  %v467_v60 = vmax.f32 %v451_v44, 0.0 }
 0x1d8   :  { %v468_v51 = vmax.f32 %v452_v46, 0.0  ;;  %v469_v4 = vmax.f32 %v453_v47, 0.0  ;;  %v470_v52 = vmax.f32 %v454_v48, 0.0  ;;  %v456_v58 = vadd.f32 %v447_v39, %v434_v42 }
 0x1d9   :  { %v481_v53 = vpack.c.bf16 %v466_v50, %v465_v41  ;;  %v471_v1 = vmax.f32 %v455_v34, 0.0  ;;  %v457_v54 = vadd.f32 %v447_v39, %v435_v32  ;;  %v458_v24 = vadd.f32 %v447_v39, %v436_v17 }
 0x1da   :  { %v482_v55 = vpack.c.bf16 %v468_v51, %v467_v60  ;;  %v483_v56 = vpack.c.bf16 %v470_v52, %v469_v4  ;;  %v472_v57 = vmax.f32 %v456_v58, 0.0  ;;  %v459_v59 = vadd.f32 %v447_v39, %v437_v20 }
 0x1db   :  { %9117 = vmatprep.mubr.msk.bf16.mxu0 %vm320_vm2, %v481_v53  ;;  %v473_v61 = vmax.f32 %v457_v54, 0.0  ;;  %v474_v62 = vmax.f32 %v458_v24, 0.0  ;;  %v460_v63 = vadd.f32 %v447_v39, %v438_v16  ;;  %v461_v0 = vadd.f32 %v447_v39, %v439_v19 }
 0x1dc   :  { %9118 = vmatmul.mubr.msk.bf16.vlgmr.msra.gmra.mrb[8].mxu0 %vm320_vm2, %v482_v55  ;;  %v484_v2 = vpack.c.bf16 %v472_v57, %v471_v1  ;;  %v475_v3 = vmax.f32 %v459_v59, 0.0  ;;  %v441_v5 = vmul.f32 %v10193_v22, %v425_v26  ;;  %v442_v6 = vmul.f32 %v10202_v29, %v425_v26  ;;  %v9244_v22 = vld [vmem:[%s15803_s5] sm:$0xff]   ;;  %v9245_v29 = vld [vmem:[%s15803_s5 + $0x8] sm:$0xff]   ;;  %v9246_v26 = vld [vmem:[%s15803_s5 + $0x10] sm:$0xff]  }
 0x1dd   :  { %9121 = vmatprep.mubr.msk.bf16.mxu0 %vm320_vm2, %v483_v56  ;;  %v485_v7 = vpack.c.bf16 %v474_v62, %v473_v61  ;;  %v476_v8 = vmax.f32 %v460_v63, 0.0  ;;  %v477_v9 = vmax.f32 %v461_v0, 0.0  ;;  %9133 = vmatprep.subr.bf16.mxu1 %v9244_v22 }
 0x1de   :  { %v463_v10 = vadd.f32 %v447_v39, %v441_v5  ;;  %v464_v11 = vadd.f32 %v447_v39, %v442_v6  ;;  %9134 = vmatpush3.bf16.msra.mxu1 %v9244_v22 }
 0x1df   :  { %v486_v14 = vpack.c.bf16 %v476_v8, %v475_v3  ;;  %v487_v18 = vpack.c.bf16 %v478_v49, %v477_v9  ;;  %9135 = vmatprep.subr.bf16.mxu1 %v9245_v29 }
 0x1e0   :  { %v479_v21 = vmax.f32 %v463_v10, 0.0  ;;  %v480_v23 = vmax.f32 %v464_v11, 0.0 }
 0x1e2   :  { %v488_v25 = vpack.c.bf16 %v480_v23, %v479_v21  ;;  %9136 = vmatpush3.bf16.msra.mxu1 %v9245_v29 }
 0x1e3   :  { %9137 = vmatprep.subr.bf16.mxu1 %v9246_v26 }
 0x1e4   :  { %9122 = vmatmul.mubr.msk.bf16.gmra.mrb[12].mxu0 %vm320_vm2, %v484_v2 }
 0x1e5   :  { %9125 = vmatprep.mubr.msk.bf16.mxu0 %vm320_vm2, %v485_v7 }
 0x1e6   :  { %9138 = vmatpush3.bf16.msra.mxu1 %v9246_v26 }
 0x1e7   :  { %9139 = vmatprep.subr.bf16.mxu1 %v9247_v27 }
 0x1ea   :  { %9140 = vmatpush3.bf16.msra.mxu1 %v9247_v27 }
 0x1ec   :  { %9126 = vmatmul.mubr.msk.bf16.gmra.mrb[16].mxu0 %vm320_vm2, %v486_v14 }
 0x1ed   :  { %9129 = vmatprep.mubr.msk.bf16.mxu0 %vm320_vm2, %v487_v18 }
 0x1f4   :  { %9130 = vmatmul.mubr.msk.bf16.gmra.mrb[20].mxu0 %vm320_vm2, %v488_v25 }
 0x2af   :  { %v10266_v28 = vpop.f32.mrb[8].mxu0 }
 0x2b0   :  { %v10268_v30 = vpop.f32.mrb[9].mxu0  ;;  %v683_v37 = vmul.f32 %v10266_v28, %v10266_v28  ;;  %v647_v32 = vsel %vm320_vm2, %v10266_v28, 0.0 }
 0x2b1   :  { %v681_v31 = vmul.f32 %v10268_v30, %v10268_v30  ;;  %v10272_v33 = vpop.f32.mrb[10].mxu0  ;;  %v644_v38 = vsel %vm320_vm2, %v10268_v30, 0.0 }
 0x2b2   :  { %v10274_v35 = vpop.f32.mrb[11].mxu0  ;;  %v684_v20 = vmul.f32 %v10272_v33, %v10272_v33  ;;  %v700_v36 = vsel %vm320_vm2, %v683_v37, 0.0  ;;  %v649_v45 = vsel %vm320_vm2, %v10272_v33, 0.0 }
 0x2b3   :  { %v645_v39 = vsel %vm320_vm2, %v10274_v35, 0.0  ;;  %v682_v40 = vmul.f32 %v10274_v35, %v10274_v35  ;;  %v697_v17 = vsel %vm320_vm2, %v681_v31, 0.0 }
 0x2b4   :  { %v646_v42 = vadd.f32 %v645_v39, %v644_v38  ;;  %v702_v34 = vsel %vm320_vm2, %v684_v20, 0.0 }
 0x2b5   :  { %v698_v16 = vsel %vm320_vm2, %v682_v40, 0.0 }
 0x2b6   :  { %v648_v19 = vadd.f32 %v647_v32, %v646_v42  ;;  %v699_v43 = vadd.f32 %v698_v16, %v697_v17 }
 0x2b7   :  { %v10293_v44 = vpop.f32.mrb[12].mxu0 }
 0x2b8   :  { %v701_v46 = vadd.f32 %v700_v36, %v699_v43  ;;  %v10295_v47 = vpop.f32.mrb[13].mxu0  ;;  %v650_v48 = vadd.f32 %v649_v45, %v648_v19  ;;  %v687_v52 = vmul.f32 %v10293_v44, %v10293_v44  ;;  %v655_v55 = vsel %vm320_vm2, %v10293_v44, 0.0 }
 0x2b9   :  { %v651_v49 = vsel %vm320_vm2, %v10295_v47, 0.0  ;;  %v685_v41 = vmul.f32 %v10295_v47, %v10295_v47  ;;  %v10302_v50 = vpop.f32.mrb[14].mxu0 }
 0x2ba   :  { %v652_v60 = vadd.f32 %v651_v49, %v650_v48  ;;  %v703_v51 = vadd.f32 %v702_v34, %v701_v46  ;;  %v10304_v4 = vpop.f32.mrb[15].mxu0  ;;  %v688_v56 = vmul.f32 %v10302_v50, %v10302_v50  ;;  %v708_v62 = vsel %vm320_vm2, %v687_v52, 0.0 }
 0x2bb   :  { %v704_v58 = vsel %vm320_vm2, %v685_v41, 0.0  ;;  %v653_v53 = vsel %vm320_vm2, %v10304_v4, 0.0  ;;  %v686_v1 = vmul.f32 %v10304_v4, %v10304_v4  ;;  %v657_v63 = vsel %vm320_vm2, %v10302_v50, 0.0 }
 0x2bc   :  { %v705_v54 = vadd.f32 %v704_v58, %v703_v51  ;;  %v654_v24 = vadd.f32 %v653_v53, %v652_v60  ;;  %v710_v6 = vsel %vm320_vm2, %v688_v56, 0.0 }
 0x2bd   :  { %v706_v57 = vsel %vm320_vm2, %v686_v1, 0.0 }
 0x2be   :  { %v656_v59 = vadd.f32 %v655_v55, %v654_v24  ;;  %v707_v61 = vadd.f32 %v706_v57, %v705_v54 }
 0x2bf   :  { %v10321_v0 = vpop.f32.mrb[16].mxu0 }
 0x2c0   :  { %v709_v2 = vadd.f32 %v708_v62, %v707_v61  ;;  %v10323_v3 = vpop.f32.mrb[17].mxu0  ;;  %v658_v5 = vadd.f32 %v657_v63, %v656_v59  ;;  %v691_v18 = vmul.f32 %v10321_v0, %v10321_v0  ;;  %v663_v26 = vsel %vm320_vm2, %v10321_v0, 0.0 }
 0x2c1   :  { %v659_v7 = vsel %vm320_vm2, %v10323_v3, 0.0  ;;  %v689_v8 = vmul.f32 %v10323_v3, %v10323_v3  ;;  %v10330_v9 = vpop.f32.mrb[18].mxu0 }
 0x2c2   :  { %v660_v10 = vadd.f32 %v659_v7, %v658_v5  ;;  %v711_v11 = vadd.f32 %v710_v6, %v709_v2  ;;  %v10332_v14 = vpop.f32.mrb[19].mxu0  ;;  %v692_v27 = vmul.f32 %v10330_v9, %v10330_v9  ;;  %v716_v39 = vsel %vm320_vm2, %v691_v18, 0.0 }
 0x2c3   :  { %v712_v21 = vsel %vm320_vm2, %v689_v8, 0.0  ;;  %v661_v23 = vsel %vm320_vm2, %v10332_v14, 0.0  ;;  %v690_v25 = vmul.f32 %v10332_v14, %v10332_v14  ;;  %v665_v40 = vsel %vm320_vm2, %v10330_v9, 0.0 }
 0x2c4   :  { %v713_v22 = vadd.f32 %v712_v21, %v711_v11  ;;  %v662_v29 = vadd.f32 %v661_v23, %v660_v10  ;;  %v718_v16 = vsel %vm320_vm2, %v692_v27, 0.0 }
 0x2c5   :  { %v714_v31 = vsel %vm320_vm2, %v690_v25, 0.0 }
 0x2c6   :  { %v664_v37 = vadd.f32 %v663_v26, %v662_v29  ;;  %v715_v38 = vadd.f32 %v714_v31, %v713_v22 }
 0x2c7   :  { %v10349_v42 = vpop.f32.mrb[20].mxu0 }
 0x2c8   :  { %v717_v32 = vadd.f32 %v716_v39, %v715_v38  ;;  %v10351_v17 = vpop.f32.mrb[21].mxu0  ;;  %v666_v20 = vadd.f32 %v665_v40, %v664_v37  ;;  %v695_v34 = vmul.f32 %v10349_v42, %v10349_v42  ;;  %v671_v58 = vsel %vm320_vm2, %v10349_v42, 0.0  ;;  %v642_v38 = vld [vmem:[%s15804_s27] sm:$0x1] }
 0x2c9   :  { %v667_v19 = vsel %vm320_vm2, %v10351_v17, 0.0  ;;  %v693_v43 = vmul.f32 %v10351_v17, %v10351_v17  ;;  %v10358_v36 = vpop.f32.mrb[22].mxu0 }
 0x2ca   :  { %v668_v45 = vadd.f32 %v667_v19, %v666_v20  ;;  %v719_v46 = vadd.f32 %v718_v16, %v717_v32  ;;  %v630_v48 = vpop.f32.mrb[23].mxu0  ;;  %v696_v53 = vmul.f32 %v10358_v36, %v10358_v36  ;;  %v724_v55 = vsel %vm320_vm2, %v695_v34, 0.0  ;;  %v643_v32 = vld [vmem:[%s15805_s4] sm:$0x1] }
 0x2cb   :  { %v720_v49 = vsel %vm320_vm2, %v693_v43, 0.0  ;;  %v669_v41 = vsel %vm320_vm2, %v630_v48, 0.0  ;;  %v694_v60 = vmul.f32 %v630_v48, %v630_v48  ;;  %v673_v56 = vsel %vm320_vm2, %v10358_v36, 0.0 }
 0x2cc   :  { %v721_v51 = vadd.f32 %v720_v49, %v719_v46  ;;  %v670_v52 = vadd.f32 %v669_v41, %v668_v45  ;;  %v726_v61 = vsel %vm320_vm2, %v696_v53, 0.0 }
 0x2cd   :  { %v722_v1 = vsel %vm320_vm2, %v694_v60, 0.0 }
 0x2ce   :  { %v672_v54 = vadd.f32 %v671_v58, %v670_v52  ;;  %v723_v24 = vadd.f32 %v722_v1, %v721_v51 }
 0x2d0   :  { %v674_v57 = vadd.f32 %v673_v56, %v672_v54  ;;  %v725_v59 = vadd.f32 %v724_v55, %v723_v24 }
 0x2d2   :  { %v675_v62 = vrot.slane %v674_v57, 4  ;;  %v727_v63 = vadd.f32 %v726_v61, %v725_v59 }
 0x2d4   :  { %v676_v2 = vadd.f32 %v675_v62, %v674_v57  ;;  %v728_v5 = vrot.slane %v727_v63, 4 }
 0x2d6   :  { %v677_v6 = vrot.slane %v676_v2, 2  ;;  %v729_v7 = vadd.f32 %v728_v5, %v727_v63 }
 0x2d8   :  { %v678_v8 = vadd.f32 %v677_v6, %v676_v2  ;;  %v730_v10 = vrot.slane %v729_v7, 2 }
 0x2da   :  { %v679_v11 = vrot.slane %v678_v8, 1  ;;  %v731_v18 = vadd.f32 %v730_v10, %v729_v7 }
 0x2dc   :  { %v680_v21 = vadd.f32 %v679_v11, %v678_v8  ;;  %v732_v23 = vrot.slane %v731_v18, 1 }
 0x2de   :  { %v733_v25 = vadd.f32 %v732_v23, %v731_v18  ;;  %v734_v22 = vmul.f32 0.0078125, %v680_v21 }
 0x2e0   :  { %v735_v29 = vmul.f32 0.0078125, %v733_v25  ;;  %v736_v26 = vmul.f32 %v734_v22, %v734_v22 }
 0x2e2   :  { %v737_v27 = vsub.f32 %v735_v29, %v736_v26 }
 0x2e4   :  { %v738_v31 = vmax.f32 %v737_v27, 0.0 }
 0x2e6   :  { %v739_v37 = vadd.f32 1e-05, %v738_v31 }
 0x2e8   :  { %9750 = vrsqrt.f32 %v739_v37 }
 0x2f2   :  { %v9751_v39 = vpop.eup %9750 }
 0x2f3   :  { %v741_v40 = vmul.f32 %v9751_v39, %v642_v38 }
 0x2f5   :  { %v742_v20 = vmul.f32 %v741_v40, %v734_v22  ;;  %v748_v16 = vrot.slane %v741_v40, %v10224_v15 }
 0x2f7   :  { %v743_v19 = vsub.f32 %v643_v32, %v742_v20  ;;  %v763_v43 = vmul.f32 %v748_v16, %v630_v48  ;;  %v750_v45 = vmul.f32 %v748_v16, %v10268_v30  ;;  %v751_v46 = vmul.f32 %v748_v16, %v10274_v35 }
 0x2f8   :  { %v752_v34 = vmul.f32 %v10266_v28, %v748_v16  ;;  %v753_v49 = vmul.f32 %v10272_v33, %v748_v16  ;;  %v754_v41 = vmul.f32 %v748_v16, %v10295_v47  ;;  %v755_v60 = vmul.f32 %v748_v16, %v10304_v4 }
 0x2f9   :  { %v770_v51 = vrot.slane %v743_v19, %v10224_v15  ;;  %v756_v52 = vmul.f32 %v10293_v44, %v748_v16  ;;  %v757_v58 = vmul.f32 %v10302_v50, %v748_v16  ;;  %v758_v48 = vmul.f32 %v748_v16, %v10323_v3  ;;  %v9251_v19 = vld [vmem:[%s15263_s10 + $0x18] sm:$0xff]  }
 0x2fa   :  { %v759_v30 = vmul.f32 %v748_v16, %v10332_v14  ;;  %v760_v35 = vmul.f32 %v10321_v0, %v748_v16  ;;  %v761_v28 = vmul.f32 %v10330_v9, %v748_v16  ;;  %v762_v33 = vmul.f32 %v748_v16, %v10351_v17 }
 0x2fb   :  { %v785_v53 = vadd.f32 %v770_v51, %v763_v43  ;;  %v772_v47 = vadd.f32 %v770_v51, %v750_v45  ;;  %v773_v1 = vadd.f32 %v770_v51, %v751_v46  ;;  %v774_v4 = vadd.f32 %v770_v51, %v752_v34 }
 0x2fc   :  { %v775_v54 = vadd.f32 %v770_v51, %v753_v49  ;;  %v776_v24 = vadd.f32 %v770_v51, %v754_v41  ;;  %v777_v55 = vadd.f32 %v770_v51, %v755_v60  ;;  %v778_v44 = vadd.f32 %v770_v51, %v756_v52 }
 0x2fd   :  { %v801_v56 = vmax.f32 %v785_v53, 0.0  ;;  %v788_v50 = vmax.f32 %v772_v47, 0.0  ;;  %v789_v57 = vmax.f32 %v773_v1, 0.0  ;;  %v790_v3 = vmax.f32 %v774_v4, 0.0 }
 0x2fe   :  { %v791_v59 = vmax.f32 %v775_v54, 0.0  ;;  %v792_v14 = vmax.f32 %v776_v24, 0.0  ;;  %v793_v61 = vmax.f32 %v777_v55, 0.0  ;;  %v779_v0 = vadd.f32 %v770_v51, %v757_v58 }
 0x2ff   :  { %v804_v62 = vpack.c.bf16 %v789_v57, %v788_v50  ;;  %v794_v9 = vmax.f32 %v778_v44, 0.0  ;;  %v780_v63 = vadd.f32 %v770_v51, %v758_v48  ;;  %v781_v17 = vadd.f32 %v770_v51, %v759_v30 }
 0x300   :  { %v805_v2 = vpack.c.bf16 %v791_v59, %v790_v3  ;;  %v806_v5 = vpack.c.bf16 %v793_v61, %v792_v14  ;;  %v795_v6 = vmax.f32 %v779_v0, 0.0  ;;  %v782_v7 = vadd.f32 %v770_v51, %v760_v35 }
 0x301   :  { %9141 = vmatprep.mubr.msk.bf16.mxu1 %vm320_vm2, %v804_v62  ;;  %v796_v8 = vmax.f32 %v780_v63, 0.0  ;;  %v797_v10 = vmax.f32 %v781_v17, 0.0  ;;  %v783_v11 = vadd.f32 %v770_v51, %v761_v28  ;;  %v784_v18 = vadd.f32 %v770_v51, %v762_v33 }
 0x302   :  { %9142 = vmatmul.mubr.msk.bf16.vlgmr.msra.gmra.mrb[8].mxu1 %vm320_vm2, %v805_v2  ;;  %v807_v21 = vpack.c.bf16 %v795_v6, %v794_v9  ;;  %v798_v23 = vmax.f32 %v782_v7, 0.0  ;;  %v764_v25 = vmul.f32 %v10349_v42, %v748_v16  ;;  %v765_v22 = vmul.f32 %v10358_v36, %v748_v16  ;;  %v9248_v42 = vld [vmem:[%s15263_s10] sm:$0xff]   ;;  %v9249_v36 = vld [vmem:[%s15263_s10 + $0x8] sm:$0xff]   ;;  %v9250_v16 = vld [vmem:[%s15263_s10 + $0x10] sm:$0xff]  }
 0x303   :  { %9145 = vmatprep.mubr.msk.bf16.mxu1 %vm320_vm2, %v806_v5  ;;  %v808_v29 = vpack.c.bf16 %v797_v10, %v796_v8  ;;  %v799_v26 = vmax.f32 %v783_v11, 0.0  ;;  %v800_v27 = vmax.f32 %v784_v18, 0.0  ;;  %9157 = vmatprep.subr.bf16.mxu0 %v9248_v42 }
 0x304   :  { %v786_v31 = vadd.f32 %v770_v51, %v764_v25  ;;  %v787_v37 = vadd.f32 %v770_v51, %v765_v22  ;;  %9158 = vmatpush3.bf16.msra.mxu0 %v9248_v42 }
 0x305   :  { %v809_v38 = vpack.c.bf16 %v799_v26, %v798_v23  ;;  %v810_v39 = vpack.c.bf16 %v801_v56, %v800_v27  ;;  %9159 = vmatprep.subr.bf16.mxu0 %v9249_v36 }
 0x306   :  { %v802_v40 = vmax.f32 %v786_v31, 0.0  ;;  %v803_v32 = vmax.f32 %v787_v37, 0.0 }
 0x308   :  { %v811_v20 = vpack.c.bf16 %v803_v32, %v802_v40  ;;  %9160 = vmatpush3.bf16.msra.mxu0 %v9249_v36 }
 0x309   :  { %9161 = vmatprep.subr.bf16.mxu0 %v9250_v16 }
 0x30a   :  { %9146 = vmatmul.mubr.msk.bf16.gmra.mrb[12].mxu1 %vm320_vm2, %v807_v21 }
 0x30b   :  { %9149 = vmatprep.mubr.msk.bf16.mxu1 %vm320_vm2, %v808_v29 }
 0x30c   :  { %9162 = vmatpush3.bf16.msra.mxu0 %v9250_v16 }
 0x30d   :  { %9163 = vmatprep.subr.bf16.mxu0 %v9251_v19 }
 0x310   :  { %9164 = vmatpush3.bf16.msra.mxu0 %v9251_v19 }
 0x312   :  { %9150 = vmatmul.mubr.msk.bf16.gmra.mrb[16].mxu1 %vm320_vm2, %v809_v38 }
 0x313   :  { %9153 = vmatprep.mubr.msk.bf16.mxu1 %vm320_vm2, %v810_v39 }
 0x31a   :  { %9154 = vmatmul.mubr.msk.bf16.gmra.mrb[20].mxu1 %vm320_vm2, %v811_v20 }
 0x3d5   :  { %v10416_v43 = vpop.f32.mrb[8].mxu1 }
 0x3d6   :  { %v10418_v45 = vpop.f32.mrb[9].mxu1  ;;  %v1006_v41 = vmul.f32 %v10416_v43, %v10416_v43  ;;  %v970_v48 = vsel %vm320_vm2, %v10416_v43, 0.0 }
 0x3d7   :  { %v1004_v46 = vmul.f32 %v10418_v45, %v10418_v45  ;;  %v10422_v34 = vpop.f32.mrb[10].mxu1  ;;  %v967_v60 = vsel %vm320_vm2, %v10418_v45, 0.0 }
 0x3d8   :  { %v10424_v49 = vpop.f32.mrb[11].mxu1  ;;  %v1007_v35 = vmul.f32 %v10422_v34, %v10422_v34  ;;  %v1023_v47 = vsel %vm320_vm2, %v1006_v41, 0.0  ;;  %v972_v1 = vsel %vm320_vm2, %v10422_v34, 0.0 }
 0x3d9   :  { %v968_v51 = vsel %vm320_vm2, %v10424_v49, 0.0  ;;  %v1005_v52 = vmul.f32 %v10424_v49, %v10424_v49  ;;  %v1020_v30 = vsel %vm320_vm2, %v1004_v46, 0.0 }
 0x3da   :  { %v969_v58 = vadd.f32 %v968_v51, %v967_v60  ;;  %v1025_v44 = vsel %vm320_vm2, %v1007_v35, 0.0 }
 0x3db   :  { %v1021_v28 = vsel %vm320_vm2, %v1005_v52, 0.0 }
 0x3dc   :  { %v971_v33 = vadd.f32 %v970_v48, %v969_v58  ;;  %v1022_v53 = vadd.f32 %v1021_v28, %v1020_v30 }
 0x3dd   :  { %v10443_v4 = vpop.f32.mrb[12].mxu1 }
 0x3de   :  { %v1024_v54 = vadd.f32 %v1023_v47, %v1022_v53  ;;  %v10445_v24 = vpop.f32.mrb[13].mxu1  ;;  %v973_v55 = vadd.f32 %v972_v1, %v971_v33  ;;  %v1010_v61 = vmul.f32 %v10443_v4, %v10443_v4  ;;  %v978_v2 = vsel %vm320_vm2, %v10443_v4, 0.0 }
 0x3df   :  { %v974_v56 = vsel %vm320_vm2, %v10445_v24, 0.0  ;;  %v1008_v50 = vmul.f32 %v10445_v24, %v10445_v24  ;;  %v10452_v57 = vpop.f32.mrb[14].mxu1 }
 0x3e0   :  { %v975_v3 = vadd.f32 %v974_v56, %v973_v55  ;;  %v1026_v59 = vadd.f32 %v1025_v44, %v1024_v54  ;;  %v10454_v14 = vpop.f32.mrb[15].mxu1  ;;  %v1011_v5 = vmul.f32 %v10452_v57, %v10452_v57  ;;  %v1031_v10 = vsel %vm320_vm2, %v1010_v61, 0.0 }
 0x3e1   :  { %v1027_v0 = vsel %vm320_vm2, %v1008_v50, 0.0  ;;  %v976_v62 = vsel %vm320_vm2, %v10454_v14, 0.0  ;;  %v1009_v9 = vmul.f32 %v10454_v14, %v10454_v14  ;;  %v980_v11 = vsel %vm320_vm2, %v10452_v57, 0.0 }
 0x3e2   :  { %v1028_v63 = vadd.f32 %v1027_v0, %v1026_v59  ;;  %v977_v17 = vadd.f32 %v976_v62, %v975_v3  ;;  %v1033_v22 = vsel %vm320_vm2, %v1011_v5, 0.0 }
 0x3e3   :  { %v1029_v6 = vsel %vm320_vm2, %v1009_v9, 0.0 }
 0x3e4   :  { %v979_v7 = vadd.f32 %v978_v2, %v977_v17  ;;  %v1030_v8 = vadd.f32 %v1029_v6, %v1028_v63 }
 0x3e5   :  { %v10471_v18 = vpop.f32.mrb[16].mxu1 }
 0x3e6   :  { %v1032_v21 = vadd.f32 %v1031_v10, %v1030_v8  ;;  %v10473_v23 = vpop.f32.mrb[17].mxu1  ;;  %v981_v25 = vadd.f32 %v980_v11, %v979_v7  ;;  %v1014_v39 = vmul.f32 %v10471_v18, %v10471_v18  ;;  %v986_v16 = vsel %vm320_vm2, %v10471_v18, 0.0 }
 0x3e7   :  { %v982_v29 = vsel %vm320_vm2, %v10473_v23, 0.0  ;;  %v1012_v26 = vmul.f32 %v10473_v23, %v10473_v23  ;;  %v10480_v27 = vpop.f32.mrb[18].mxu1 }
 0x3e8   :  { %v983_v31 = vadd.f32 %v982_v29, %v981_v25  ;;  %v1034_v37 = vadd.f32 %v1033_v22, %v1032_v21  ;;  %v10482_v38 = vpop.f32.mrb[19].mxu1  ;;  %v1015_v19 = vmul.f32 %v10480_v27, %v10480_v27  ;;  %v1039_v51 = vsel %vm320_vm2, %v1014_v39, 0.0 }
 0x3e9   :  { %v1035_v40 = vsel %vm320_vm2, %v1012_v26, 0.0  ;;  %v984_v32 = vsel %vm320_vm2, %v10482_v38, 0.0  ;;  %v1013_v20 = vmul.f32 %v10482_v38, %v10482_v38  ;;  %v988_v52 = vsel %vm320_vm2, %v10480_v27, 0.0 }
 0x3ea   :  { %v1036_v42 = vadd.f32 %v1035_v40, %v1034_v37  ;;  %v985_v36 = vadd.f32 %v984_v32, %v983_v31  ;;  %v1041_v28 = vsel %vm320_vm2, %v1015_v19, 0.0 }
 0x3eb   :  { %v1037_v46 = vsel %vm320_vm2, %v1013_v20, 0.0 }
 0x3ec   :  { %v987_v41 = vadd.f32 %v986_v16, %v985_v36  ;;  %v1038_v60 = vadd.f32 %v1037_v46, %v1036_v42 }
 0x3ed   :  { %v10499_v58 = vpop.f32.mrb[20].mxu1 }
 0x3ee   :  { %v1040_v48 = vadd.f32 %v1039_v51, %v1038_v60  ;;  %v10501_v30 = vpop.f32.mrb[21].mxu1  ;;  %v989_v35 = vadd.f32 %v988_v52, %v987_v41  ;;  %v1018_v44 = vmul.f32 %v10499_v58, %v10499_v58  ;;  %v994_v0 = vsel %vm320_vm2, %v10499_v58, 0.0  ;;  %v965_v60 = vld [vmem:[%s15806_s26] sm:$0x1] }
 0x3ef   :  { %v990_v33 = vsel %vm320_vm2, %v10501_v30, 0.0  ;;  %v1016_v53 = vmul.f32 %v10501_v30, %v10501_v30  ;;  %v10508_v47 = vpop.f32.mrb[22].mxu1 }
 0x3f0   :  { %v991_v1 = vadd.f32 %v990_v33, %v989_v35  ;;  %v1042_v54 = vadd.f32 %v1041_v28, %v1040_v48  ;;  %v953_v55 = vpop.f32.mrb[23].mxu1  ;;  %v1019_v62 = vmul.f32 %v10508_v47, %v10508_v47  ;;  %v1047_v2 = vsel %vm320_vm2, %v1018_v44, 0.0  ;;  %v966_v48 = vld [vmem:[%s15807_s13] sm:$0x1] }
 0x3f1   :  { %v1043_v56 = vsel %vm320_vm2, %v1016_v53, 0.0  ;;  %v992_v50 = vsel %vm320_vm2, %v953_v55, 0.0  ;;  %v1017_v3 = vmul.f32 %v953_v55, %v953_v55  ;;  %v996_v5 = vsel %vm320_vm2, %v10508_v47, 0.0 }
 0x3f2   :  { %v1044_v59 = vadd.f32 %v1043_v56, %v1042_v54  ;;  %v993_v61 = vadd.f32 %v992_v50, %v991_v1  ;;  %v1049_v8 = vsel %vm320_vm2, %v1019_v62, 0.0 }
 0x3f3   :  { %v1045_v9 = vsel %vm320_vm2, %v1017_v3, 0.0 }
 0x3f4   :  { %v995_v63 = vadd.f32 %v994_v0, %v993_v61  ;;  %v1046_v17 = vadd.f32 %v1045_v9, %v1044_v59 }
 0x3f6   :  { %v997_v6 = vadd.f32 %v996_v5, %v995_v63  ;;  %v1048_v7 = vadd.f32 %v1047_v2, %v1046_v17 }
 0x3f8   :  { %v998_v10 = vrot.slane %v997_v6, 4  ;;  %v1050_v11 = vadd.f32 %v1049_v8, %v1048_v7 }
 0x3fa   :  { %v999_v21 = vadd.f32 %v998_v10, %v997_v6  ;;  %v1051_v25 = vrot.slane %v1050_v11, 4 }
 0x3fc   :  { %v1000_v22 = vrot.slane %v999_v21, 2  ;;  %v1052_v29 = vadd.f32 %v1051_v25, %v1050_v11 }
 0x3fe   :  { %v1001_v26 = vadd.f32 %v1000_v22, %v999_v21  ;;  %v1053_v31 = vrot.slane %v1052_v29, 2 }
 0x400   :  { %v1002_v37 = vrot.slane %v1001_v26, 1  ;;  %v1054_v39 = vadd.f32 %v1053_v31, %v1052_v29 }
 0x402   :  { %v1003_v40 = vadd.f32 %v1002_v37, %v1001_v26  ;;  %v1055_v32 = vrot.slane %v1054_v39, 1 }
 0x404   :  { %v1056_v20 = vadd.f32 %v1055_v32, %v1054_v39  ;;  %v1057_v42 = vmul.f32 0.0078125, %v1003_v40 }
 0x406   :  { %v1058_v36 = vmul.f32 0.0078125, %v1056_v20  ;;  %v1059_v16 = vmul.f32 %v1057_v42, %v1057_v42 }
 0x408   :  { %v1060_v19 = vsub.f32 %v1058_v36, %v1059_v16 }
 0x40a   :  { %v1061_v46 = vmax.f32 %v1060_v19, 0.0 }
 0x40c   :  { %v1062_v41 = vadd.f32 1e-05, %v1061_v46 }
 0x40e   :  { %9752 = vrsqrt.f32 %v1062_v41 }
 0x418   :  { %v9753_v51 = vpop.eup %9752 }
 0x419   :  { %v1064_v52 = vmul.f32 %v9753_v51, %v965_v60 }
 0x41b   :  { %v1065_v35 = vmul.f32 %v1064_v52, %v1057_v42  ;;  %v1071_v28 = vrot.slane %v1064_v52, %v10224_v15 }
 0x41d   :  { %v1066_v33 = vsub.f32 %v966_v48, %v1065_v35  ;;  %v1086_v53 = vmul.f32 %v1071_v28, %v953_v55  ;;  %v1073_v1 = vmul.f32 %v1071_v28, %v10418_v45  ;;  %v1074_v54 = vmul.f32 %v1071_v28, %v10424_v49 }
 0x41e   :  { %v1075_v44 = vmul.f32 %v10416_v43, %v1071_v28  ;;  %v1076_v56 = vmul.f32 %v10422_v34, %v1071_v28  ;;  %v1077_v50 = vmul.f32 %v1071_v28, %v10445_v24  ;;  %v1078_v3 = vmul.f32 %v1071_v28, %v10454_v14 }
 0x41f   :  { %v1093_v59 = vrot.slane %v1066_v33, %v10224_v15  ;;  %v1079_v61 = vmul.f32 %v10443_v4, %v1071_v28  ;;  %v1080_v0 = vmul.f32 %v10452_v57, %v1071_v28  ;;  %v1081_v55 = vmul.f32 %v1071_v28, %v10473_v23 }
 0x420   :  { %v1082_v45 = vmul.f32 %v1071_v28, %v10482_v38  ;;  %v1083_v49 = vmul.f32 %v10471_v18, %v1071_v28  ;;  %v1084_v43 = vmul.f32 %v10480_v27, %v1071_v28  ;;  %v1085_v34 = vmul.f32 %v1071_v28, %v10501_v30 }
 0x421   :  { %v1108_v62 = vadd.f32 %v1093_v59, %v1086_v53  ;;  %v1095_v24 = vadd.f32 %v1093_v59, %v1073_v1  ;;  %v1096_v9 = vadd.f32 %v1093_v59, %v1074_v54  ;;  %v1097_v14 = vadd.f32 %v1093_v59, %v1075_v44  ;;  %v1431_v53 = vld [vmem:[#allocation2 + $0x40] sm:$0xff] }
 0x422   :  { %v1098_v63 = vadd.f32 %v1093_v59, %v1076_v56  ;;  %v1099_v17 = vadd.f32 %v1093_v59, %v1077_v50  ;;  %v1100_v2 = vadd.f32 %v1093_v59, %v1078_v3  ;;  %v1101_v4 = vadd.f32 %v1093_v59, %v1079_v61  ;;  %v1432_v1 = vld [vmem:[#allocation2 + $0x60] sm:$0xff] }
 0x423   :  { %v1124_v5 = vmax.f32 %v1108_v62, 0.0  ;;  %v1111_v57 = vmax.f32 %v1095_v24, 0.0  ;;  %v1112_v6 = vmax.f32 %v1096_v9, 0.0  ;;  %v1113_v23 = vmax.f32 %v1097_v14, 0.0  ;;  %v1433_v56 = vld [vmem:[#allocation2 + $0x80] sm:$0xff] }
 0x424   :  { %v1114_v7 = vmax.f32 %v1098_v63, 0.0  ;;  %v1115_v38 = vmax.f32 %v1099_v17, 0.0  ;;  %v1116_v8 = vmax.f32 %v1100_v2, 0.0  ;;  %v1102_v18 = vadd.f32 %v1093_v59, %v1080_v0  ;;  %v1434_v50 = vld [vmem:[#allocation2 + $0xa0] sm:$0xff] }
 0x425   :  { %v1127_v10 = vpack.c.bf16 %v1112_v6, %v1111_v57  ;;  %v1117_v27 = vmax.f32 %v1101_v4, 0.0  ;;  %v1103_v11 = vadd.f32 %v1093_v59, %v1081_v55  ;;  %v1104_v30 = vadd.f32 %v1093_v59, %v1082_v45  ;;  %v1435_v61 = vld [vmem:[#allocation2 + $0xc0] sm:$0xff] }
 0x426   :  { %v1128_v21 = vpack.c.bf16 %v1114_v7, %v1113_v23  ;;  %v1129_v25 = vpack.c.bf16 %v1116_v8, %v1115_v38  ;;  %v1118_v22 = vmax.f32 %v1102_v18, 0.0  ;;  %v1105_v29 = vadd.f32 %v1093_v59, %v1083_v49  ;;  %v1436_v0 = vld [vmem:[#allocation2 + $0xe0] sm:$0xff]  ;;  %v10556_v38 = vld [vmem:[#allocation2 + $0x8] sm:$0xff]  ;;  %v10560_v18 = vld [vmem:[#allocation2 + $0x10] sm:$0xff] }
 0x427   :  { %9165 = vmatprep.mubr.msk.bf16.mxu0 %vm320_vm2, %v1127_v10  ;;  %v1119_v26 = vmax.f32 %v1103_v11, 0.0  ;;  %v1120_v31 = vmax.f32 %v1104_v30, 0.0  ;;  %v1106_v37 = vadd.f32 %v1093_v59, %v1084_v43  ;;  %v1107_v39 = vadd.f32 %v1093_v59, %v1085_v34  ;;  %v1437_v49 = vld [vmem:[#allocation2 + $0x100] sm:$0xff]  ;;  %v10558_v8 = vld [vmem:[#allocation2 + $0x28] sm:$0xff] }
 0x428   :  { %9166 = vmatmul.mubr.msk.bf16.vlgmr.msra.gmra.mrb[24].mxu0 %vm320_vm2, %v1128_v21  ;;  %v1130_v40 = vpack.c.bf16 %v1118_v22, %v1117_v27  ;;  %v1121_v32 = vmax.f32 %v1105_v29, 0.0  ;;  %v1087_v20 = vmul.f32 %v10499_v58, %v1071_v28  ;;  %v1088_v42 = vmul.f32 %v10508_v47, %v1071_v28  ;;  %v1429_v58 = vld [vmem:[#allocation2] sm:$0xff]  ;;  %v10564_v27 = vld [vmem:[#allocation2 + $0x30] sm:$0xff] }
 0x429   :  { %9169 = vmatprep.mubr.msk.bf16.mxu0 %vm320_vm2, %v1129_v25  ;;  %v1131_v36 = vpack.c.bf16 %v1120_v31, %v1119_v26  ;;  %v1122_v16 = vmax.f32 %v1106_v37, 0.0  ;;  %v1123_v19 = vmax.f32 %v1107_v39, 0.0  ;;  %v1430_v47 = vld [vmem:[#allocation2 + $0x20] sm:$0xff]  ;;  %v8623_v54 = vcombine.high %v1431_v53, %v1432_v1 }
 0x42a   :  { %v1109_v46 = vadd.f32 %v1093_v59, %v1087_v20  ;;  %v1110_v41 = vadd.f32 %v1093_v59, %v1088_v42  ;;  %v8621_v28 = vcombine.high %v1429_v58, %v1430_v47  ;;  %v8620_v33 = vcombine.low %v1429_v58, %v1430_v47  ;;  %v1438_v43 = vld [vmem:[#allocation2 + $0x120] sm:$0xff] }
 0x42b   :  { %v1132_v60 = vpack.c.bf16 %v1122_v16, %v1121_v32  ;;  %v1133_v51 = vpack.c.bf16 %v1124_v5, %v1123_v19  ;;  %v8622_v44 = vcombine.low %v1431_v53, %v1432_v1  ;;  %v8625_v3 = vcombine.high %v1433_v56, %v1434_v50  ;;  %v1439_v24 = vld [vmem:[#allocation2 + $0x140] sm:$0xff] }
 0x42c   :  { %v1125_v52 = vmax.f32 %v1109_v46, 0.0  ;;  %v1126_v48 = vmax.f32 %v1110_v41, 0.0  ;;  %1525 = vmatprep.subr.bf16.mxu0 %v8621_v28  ;;  %9181 = vmatprep.subr.bf16.mxu1 %v8621_v28  ;;  %v8624_v59 = vcombine.low %v1433_v56, %v1434_v50  ;;  %v8627_v55 = vcombine.high %v1435_v61, %v1436_v0  ;;  %v1440_v9 = vld [vmem:[#allocation2 + $0x160] sm:$0xff] }
 0x42d   :  { %1526 = vmatpush1.bf16.msra.mxu0 %v8620_v33  ;;  %9189 = vmatpush1.bf16.msra.mxu1 %v8620_v33  ;;  %v8626_v45 = vcombine.low %v1435_v61, %v1436_v0  ;;  %v8629_v34 = vcombine.high %v1437_v49, %v1438_v43  ;;  %v8628_v62 = vcombine.low %v1437_v49, %v1438_v43  ;;  %v1441_v14 = vld [vmem:[#allocation2 + $0x180] sm:$0xff]  ;;  %v9911_v4 = vmov 0  }
 0x42e   :  { %v1134_v35 = vpack.c.bf16 %v1126_v48, %v1125_v52  ;;  %1527 = vmatprep.subr.bf16.mxu0 %v8623_v54  ;;  %9182 = vmatprep.subr.bf16.mxu1 %v8623_v54  ;;  %v8630_v63 = vcombine.low %v1439_v24, %v1440_v9  ;;  %v8631_v17 = vcombine.high %v1439_v24, %v1440_v9  ;;  %v1442_v2 = vld [vmem:[#allocation2 + $0x1a0] sm:$0xff] }
 0x42f   :  { %1597 = vmatprep.mubr.bf16.mxu1 %v9911_v4  ;;  %v8633_v5 = vcombine.high %v1441_v14, %v1442_v2  ;;  %v1443_v57 = vld [vmem:[#allocation2 + $0x1c0] sm:$0xff]  ;;  %v8632_v23 = vcombine.low %v1441_v14, %v1442_v2  ;;  %v8636_v10 = vcombine.low %v10556_v38, %v10558_v8  ;;  %v8652_v11 = vcombine.low %v10560_v18, %v10564_v27 }
 0x430   :  { %9170 = vmatmul.mubr.msk.bf16.gmra.mrb[28].mxu0 %vm320_vm2, %v1130_v40  ;;  %v1444_v6 = vld [vmem:[#allocation2 + $0x1e0] sm:$0xff]  ;;  %v8637_v21 = vcombine.high %v10556_v38, %v10558_v8  ;;  %v8653_v25 = vcombine.high %v10560_v18, %v10564_v27  ;;  %v2354_v38 = vld [vmem:[#allocation2 + $0xc8] sm:$0xff]  ;;  %v3290_v18 = vld [vmem:[#allocation2 + $0xf0] sm:$0xff] }
 0x431   :  { %9173 = vmatprep.mubr.msk.bf16.mxu0 %vm320_vm2, %v1131_v36  ;;  %1528 = vmatpush1.bf16.msra.mxu0 %v8622_v44  ;;  %v8635_v7 = vcombine.high %v1443_v57, %v1444_v6  ;;  %v8634_v30 = vcombine.low %v1443_v57, %v1444_v6  ;;  %v2355_v8 = vld [vmem:[#allocation2 + $0xe8] sm:$0xff] }
 0x432   :  { %9190 = vmatpush1.bf16.msra.mxu1 %v8622_v44  ;;  %1529 = vmatprep.subr.bf16.mxu0 %v8625_v3 }
 0x433   :  { %9183 = vmatprep.subr.bf16.mxu1 %v8625_v3 }
 0x435   :  { %1530 = vmatpush1.bf16.msra.mxu0 %v8624_v59 }
 0x436   :  { %9191 = vmatpush1.bf16.msra.mxu1 %v8624_v59  ;;  %1531 = vmatprep.subr.bf16.mxu0 %v8627_v55 }
 0x437   :  { %9184 = vmatprep.subr.bf16.mxu1 %v8627_v55 }
 0x438   :  { %9174 = vmatmul.mubr.msk.bf16.gmra.mrb[32].mxu0 %vm320_vm2, %v1132_v60 }
 0x439   :  { %9177 = vmatprep.mubr.msk.bf16.mxu0 %vm320_vm2, %v1133_v51  ;;  %1532 = vmatpush1.bf16.msra.mxu0 %v8626_v45 }
 0x43a   :  { %9192 = vmatpush1.bf16.msra.mxu1 %v8626_v45  ;;  %1533 = vmatprep.subr.bf16.mxu0 %v8629_v34 }
 0x43b   :  { %9185 = vmatprep.subr.bf16.mxu1 %v8629_v34 }
 0x43d   :  { %1534 = vmatpush1.bf16.msra.mxu0 %v8628_v62 }
 0x43e   :  { %9193 = vmatpush1.bf16.msra.mxu1 %v8628_v62  ;;  %1535 = vmatprep.subr.bf16.mxu0 %v8631_v17 }
 0x43f   :  { %9186 = vmatprep.subr.bf16.mxu1 %v8631_v17 }
 0x440   :  { %9178 = vmatmul.mubr.msk.bf16.gmra.mrb[36].mxu0 %vm320_vm2, %v1134_v35 }
 0x441   :  { %1557 = vmatprep.mubr.bf16.mxu0 %v9911_v4  ;;  %1536 = vmatpush1.bf16.msra.mxu0 %v8630_v63 }
 0x442   :  { %9194 = vmatpush1.bf16.msra.mxu1 %v8630_v63  ;;  %1537 = vmatprep.subr.bf16.mxu0 %v8633_v5 }
 0x443   :  { %9187 = vmatprep.subr.bf16.mxu1 %v8633_v5 }
 0x445   :  { %1538 = vmatpush1.bf16.msra.mxu0 %v8632_v23 }
 0x446   :  { %9195 = vmatpush1.bf16.msra.mxu1 %v8632_v23  ;;  %1539 = vmatprep.subr.bf16.mxu0 %v8635_v7 }
 0x447   :  { %9188 = vmatprep.subr.bf16.mxu1 %v8635_v7 }
 0x449   :  { %1540 = vmatpush1.bf16.msra.mxu0 %v8634_v30 }
 0x44a   :  { %9196 = vmatpush1.bf16.msra.mxu1 %v8634_v30  ;;  %2444 = vmatprep.subr.bf16.mxu0 %v8637_v21 }
 0x44b   :  { %3379 = vmatprep.subr.bf16.mxu1 %v8653_v25 }
 0x4fb   :  { %v10572_v22 = vpop.f32.mrb[24].mxu0 }
 0x4fc   :  { %v10574_v29 = vpop.f32.mrb[25].mxu0  ;;  %v1313_v32 = vmul.f32 %v10572_v22, %v10572_v22 }
 0x4fd   :  { %v10576_v26 = vpop.f32.mrb[26].mxu0  ;;  %v1311_v37 = vmul.f32 %v10574_v29, %v10574_v29 }
 0x4fe   :  { %v10578_v31 = vpop.f32.mrb[27].mxu0  ;;  %v1314_v36 = vmul.f32 %v10576_v26, %v10576_v26 }
 0x4ff   :  { %v1290_v39 = vadd.f32 %v10578_v31, %v10574_v29  ;;  %v1312_v40 = vmul.f32 %v10578_v31, %v10578_v31 }
 0x501   :  { %v1291_v20 = vadd.f32 %v10572_v22, %v1290_v39  ;;  %v1327_v42 = vadd.f32 %v1312_v40, %v1311_v37 }
 0x503   :  { %v1328_v16 = vadd.f32 %v1327_v42, %v1313_v32  ;;  %v10591_v19 = vpop.f32.mrb[28].mxu0  ;;  %v1292_v46 = vadd.f32 %v10576_v26, %v1291_v20 }
 0x504   :  { %v10594_v41 = vpop.f32.mrb[29].mxu0  ;;  %v1317_v33 = vmul.f32 %v10591_v19, %v10591_v19 }
 0x505   :  { %v1293_v60 = vadd.f32 %v1292_v46, %v10594_v41  ;;  %v1315_v51 = vmul.f32 %v10594_v41, %v10594_v41  ;;  %v1329_v52 = vadd.f32 %v1328_v16, %v1314_v36  ;;  %v10599_v48 = vpop.f32.mrb[30].mxu0 }
 0x506   :  { %v10601_v35 = vpop.f32.mrb[31].mxu0  ;;  %v1318_v54 = vmul.f32 %v10599_v48, %v10599_v48 }
 0x507   :  { %v1330_v58 = vadd.f32 %v1329_v52, %v1315_v51  ;;  %v1294_v47 = vadd.f32 %v1293_v60, %v10601_v35  ;;  %v1316_v28 = vmul.f32 %v10601_v35, %v10601_v35 }
 0x509   :  { %v1295_v53 = vadd.f32 %v10591_v19, %v1294_v47  ;;  %v1331_v1 = vadd.f32 %v1330_v58, %v1316_v28 }
 0x50b   :  { %v1332_v44 = vadd.f32 %v1331_v1, %v1317_v33  ;;  %v10611_v56 = vpop.f32.mrb[32].mxu0  ;;  %v1296_v50 = vadd.f32 %v10599_v48, %v1295_v53 }
 0x50c   :  { %v10614_v3 = vpop.f32.mrb[33].mxu0  ;;  %v1321_v62 = vmul.f32 %v10611_v56, %v10611_v56 }
 0x50d   :  { %v1297_v59 = vadd.f32 %v1296_v50, %v10614_v3  ;;  %v1319_v61 = vmul.f32 %v10614_v3, %v10614_v3  ;;  %v1333_v0 = vadd.f32 %v1332_v44, %v1318_v54  ;;  %v10619_v55 = vpop.f32.mrb[34].mxu0 }
 0x50e   :  { %v10621_v45 = vpop.f32.mrb[35].mxu0  ;;  %v1322_v14 = vmul.f32 %v10619_v55, %v10619_v55 }
 0x50f   :  { %v1334_v49 = vadd.f32 %v1333_v0, %v1319_v61  ;;  %v1298_v43 = vadd.f32 %v1297_v59, %v10621_v45  ;;  %v1320_v34 = vmul.f32 %v10621_v45, %v10621_v45 }
 0x511   :  { %v1299_v24 = vadd.f32 %v10611_v56, %v1298_v43  ;;  %v1335_v9 = vadd.f32 %v1334_v49, %v1320_v34  ;;  %v1288_v34 = vld [vmem:[%s15264_s11] sm:$0x1] }
 0x513   :  { %v1336_v63 = vadd.f32 %v1335_v9, %v1321_v62  ;;  %v10631_v17 = vpop.f32.mrb[36].mxu0  ;;  %v1300_v2 = vadd.f32 %v10619_v55, %v1299_v24  ;;  %v10650_v24 = vld [vmem:[#allocation2 + $0x48] sm:$0xff] }
 0x514   :  { %v10634_v5 = vpop.f32.mrb[37].mxu0  ;;  %v1325_v39 = vmul.f32 %v10631_v17, %v10631_v17  ;;  %v10652_v9 = vld [vmem:[#allocation2 + $0x68] sm:$0xff] }
 0x515   :  { %v1301_v57 = vadd.f32 %v1300_v2, %v10634_v5  ;;  %v1323_v6 = vmul.f32 %v10634_v5, %v10634_v5  ;;  %v1337_v23 = vadd.f32 %v1336_v63, %v1322_v14  ;;  %v10639_v7 = vpop.f32.mrb[38].mxu0  ;;  %v10654_v14 = vld [vmem:[#allocation2 + $0x50] sm:$0xff] }
 0x516   :  { %v1276_v30 = vpop.f32.mrb[39].mxu0  ;;  %v1326_v20 = vmul.f32 %v10639_v7, %v10639_v7  ;;  %v10656_v2 = vld [vmem:[#allocation2 + $0x70] sm:$0xff] }
 0x517   :  { %v1338_v21 = vadd.f32 %v1337_v23, %v1323_v6  ;;  %v1302_v25 = vadd.f32 %v1301_v57, %v1276_v30  ;;  %v1324_v37 = vmul.f32 %v1276_v30, %v1276_v30  ;;  %v10658_v57 = vld [vmem:[#allocation2 + $0x88] sm:$0xff]  ;;  %v1289_v23 = vld [vmem:[%s15265_s12] sm:$0x1] }
 0x518   :  { %v10660_v6 = vld [vmem:[#allocation2 + $0xa8] sm:$0xff] }
 0x519   :  { %v1303_v40 = vadd.f32 %v10631_v17, %v1302_v25  ;;  %v1339_v32 = vadd.f32 %v1338_v21, %v1324_v37  ;;  %v8638_v37 = vcombine.low %v10650_v24, %v10652_v9 }
 0x51b   :  { %v1304_v42 = vadd.f32 %v10639_v7, %v1303_v40  ;;  %v1340_v36 = vadd.f32 %v1339_v32, %v1325_v39  ;;  %v8639_v39 = vcombine.high %v10650_v24, %v10652_v9  ;;  %v8654_v40 = vcombine.low %v10654_v14, %v10656_v2  ;;  %v2357_v24 = vld [vmem:[#allocation2 + $0x128] sm:$0xff] }
 0x51c   :  { %v8655_v32 = vcombine.high %v10654_v14, %v10656_v2  ;;  %v8642_v14 = vcombine.low %v2354_v38, %v2355_v8 }
 0x51d   :  { %v1305_v16 = vrot.slane %v1304_v42, 4  ;;  %v1341_v46 = vadd.f32 %v1340_v36, %v1326_v20  ;;  %v8641_v20 = vcombine.high %v10658_v57, %v10660_v6 }
 0x51f   :  { %v1306_v60 = vadd.f32 %v1305_v16, %v1304_v42  ;;  %v1342_v51 = vrot.slane %v1341_v46, 4 }
 0x521   :  { %v1307_v52 = vrot.slane %v1306_v60, 2  ;;  %v1343_v58 = vadd.f32 %v1342_v51, %v1341_v46 }
 0x523   :  { %v1308_v47 = vadd.f32 %v1307_v52, %v1306_v60  ;;  %v1344_v28 = vrot.slane %v1343_v58, 2 }
 0x525   :  { %v1309_v33 = vrot.slane %v1308_v47, 1  ;;  %v1345_v53 = vadd.f32 %v1344_v28, %v1343_v58 }
 0x527   :  { %v1310_v1 = vadd.f32 %v1309_v33, %v1308_v47  ;;  %v1346_v54 = vrot.slane %v1345_v53, 1 }
 0x529   :  { %v1347_v44 = vadd.f32 %v1346_v54, %v1345_v53  ;;  %v1348_v50 = vmul.f32 0.0078125, %v1310_v1 }
 0x52b   :  { %v1349_v59 = vmul.f32 0.0078125, %v1347_v44  ;;  %v1350_v61 = vmul.f32 %v1348_v50, %v1348_v50 }
 0x52d   :  { %v1351_v0 = vsub.f32 %v1349_v59, %v1350_v61 }
 0x52f   :  { %v1352_v49 = vmax.f32 %v1351_v0, 0.0 }
 0x531   :  { %v1353_v43 = vadd.f32 1e-05, %v1352_v49 }
 0x533   :  { %9754 = vrsqrt.f32 %v1353_v43 }
 0x53d   :  { %v9755_v62 = vpop.eup %9754 }
 0x53e   :  { %v1355_v63 = vmul.f32 %v9755_v62, %v1288_v34 }
 0x540   :  { %v1356_v21 = vmul.f32 %v1355_v63, %v1348_v50  ;;  %v1362_v25 = vrot.slane %v1355_v63, %v10224_v15 }
 0x542   :  { %v1357_v42 = vsub.f32 %v1289_v23, %v1356_v21  ;;  %v1377_v36 = vmul.f32 %v1362_v25, %v1276_v30  ;;  %v1364_v16 = vmul.f32 %v1362_v25, %v10574_v29  ;;  %v1365_v46 = vmul.f32 %v1362_v25, %v10578_v31  ;;  %v3287_v21 = vld [vmem:[#allocation2 + $0x90] sm:$0xff] }
 0x543   :  { %v1372_v60 = vmul.f32 %v1362_v25, %v10614_v3  ;;  %v1373_v51 = vmul.f32 %v1362_v25, %v10621_v45  ;;  %v1366_v52 = vmul.f32 %v10572_v22, %v1362_v25  ;;  %v1367_v58 = vmul.f32 %v10576_v26, %v1362_v25 }
 0x544   :  { %v1384_v47 = vrot.slane %v1357_v42, %v10224_v15  ;;  %v1374_v28 = vmul.f32 %v10611_v56, %v1362_v25  ;;  %v1375_v33 = vmul.f32 %v10619_v55, %v1362_v25  ;;  %v1368_v30 = vmul.f32 %v1362_v25, %v10594_v41  ;;  %v3288_v42 = vld [vmem:[#allocation2 + $0xb0] sm:$0xff] }
 0x545   :  { %v1369_v29 = vmul.f32 %v1362_v25, %v10601_v35  ;;  %v1376_v31 = vmul.f32 %v1362_v25, %v10634_v5  ;;  %v1370_v3 = vmul.f32 %v10591_v19, %v1362_v25  ;;  %v1371_v45 = vmul.f32 %v10599_v48, %v1362_v25 }
 0x546   :  { %v1399_v53 = vadd.f32 %v1384_v47, %v1377_v36  ;;  %v1386_v22 = vadd.f32 %v1384_v47, %v1364_v16  ;;  %v1387_v1 = vadd.f32 %v1384_v47, %v1365_v46  ;;  %v1394_v26 = vadd.f32 %v1384_v47, %v1372_v60 }
 0x547   :  { %v1395_v54 = vadd.f32 %v1384_v47, %v1373_v51  ;;  %v1388_v44 = vadd.f32 %v1384_v47, %v1366_v52  ;;  %v1389_v50 = vadd.f32 %v1384_v47, %v1367_v58  ;;  %v1396_v56 = vadd.f32 %v1384_v47, %v1374_v28 }
 0x548   :  { %v1415_v59 = vmax.f32 %v1399_v53, 0.0  ;;  %v1402_v55 = vmax.f32 %v1386_v22, 0.0  ;;  %v1403_v61 = vmax.f32 %v1387_v1, 0.0  ;;  %v1410_v41 = vmax.f32 %v1394_v26, 0.0  ;;  %v2356_v22 = vld [vmem:[#allocation2 + $0x108] sm:$0xff]  ;;  %v3292_v1 = vld [vmem:[#allocation2 + $0x130] sm:$0xff] }
 0x549   :  { %v1411_v0 = vmax.f32 %v1395_v54, 0.0  ;;  %v1404_v35 = vmax.f32 %v1388_v44, 0.0  ;;  %v1405_v49 = vmax.f32 %v1389_v50, 0.0  ;;  %v1397_v5 = vadd.f32 %v1384_v47, %v1375_v33  ;;  %v3293_v26 = vld [vmem:[#allocation2 + $0x150] sm:$0xff] }
 0x54a   :  { %v10690_v43 = vpack.c.bf16 %v1403_v61, %v1402_v55  ;;  %v1412_v19 = vmax.f32 %v1396_v56, 0.0  ;;  %v1390_v48 = vadd.f32 %v1384_v47, %v1368_v30  ;;  %v1391_v34 = vadd.f32 %v1384_v47, %v1369_v29  ;;  %v3294_v54 = vld [vmem:[#allocation2 + $0x170] sm:$0xff]  ;;  %v2360_v55 = vld [vmem:[#allocation2 + $0x188] sm:$0xff] }
 0x54b   :  { %v10692_v62 = vpack.c.bf16 %v1411_v0, %v1410_v41  ;;  %v10694_v63 = vpack.c.bf16 %v1405_v49, %v1404_v35  ;;  %v1413_v23 = vmax.f32 %v1397_v5, 0.0  ;;  %v1398_v36 = vadd.f32 %v1384_v47, %v1376_v31  ;;  %v2361_v61 = vld [vmem:[#allocation2 + $0x1a8] sm:$0xff]  ;;  %v3295_v41 = vld [vmem:[#allocation2 + $0x190] sm:$0xff] }
 0x54c   :  { %1558 = vmatmul.mubr.bf16.vlgmr.msra.gmra.mrb[40].mxu0 %v10690_v43  ;;  %v1406_v16 = vmax.f32 %v1390_v48, 0.0  ;;  %v1407_v46 = vmax.f32 %v1391_v34, 0.0  ;;  %v1392_v60 = vadd.f32 %v1384_v47, %v1370_v3  ;;  %v1393_v51 = vadd.f32 %v1384_v47, %v1371_v45  ;;  %v3296_v0 = vld [vmem:[#allocation2 + $0x1b0] sm:$0xff]  ;;  %v2362_v48 = vld [vmem:[#allocation2 + $0x1c8] sm:$0xff] }
 0x54d   :  { %1598 = vmatmul.mubr.bf16.vlgmr.msra.gmra.mrb[24].mxu1 %v10692_v62  ;;  %2445 = vmatpush1.bf16.msra.mxu0 %v8636_v10  ;;  %v10701_v52 = vpack.c.bf16 %v1413_v23, %v1412_v19  ;;  %v1414_v58 = vmax.f32 %v1398_v36, 0.0  ;;  %v1378_v28 = vmul.f32 %v10631_v17, %v1362_v25  ;;  %v1379_v33 = vmul.f32 %v10639_v7, %v1362_v25  ;;  %v3289_v7 = vld [vmem:[#allocation2 + $0xd0] sm:$0xff]  ;;  %v2363_v34 = vld [vmem:[#allocation2 + $0x1e8] sm:$0xff] }
 0x54e   :  { %3380 = vmatpush1.bf16.msra.mxu1 %v8652_v11  ;;  %2446 = vmatprep.subr.bf16.mxu0 %v8639_v39  ;;  %v8657_v30 = vcombine.high %v3287_v21, %v3288_v42  ;;  %v10708_v29 = vpack.c.bf16 %v1407_v46, %v1406_v16  ;;  %v1408_v31 = vmax.f32 %v1392_v60, 0.0  ;;  %v1409_v3 = vmax.f32 %v1393_v51, 0.0  ;;  %v3297_v23 = vld [vmem:[#allocation2 + $0x1d0] sm:$0xff]  ;;  %v4218_v60 = vld [vmem:[#allocation2 + $0x18] sm:$0xff] }
 0x54f   :  { %3381 = vmatprep.subr.bf16.mxu1 %v8655_v32  ;;  %1567 = vmatprep.mubr.bf16.mxu0 %v9911_v4  ;;  %v10711_v10 = vpack.c.bf16 %v1415_v59, %v1414_v58  ;;  %v1400_v17 = vadd.f32 %v1384_v47, %v1378_v28  ;;  %v1401_v45 = vadd.f32 %v1384_v47, %v1379_v33  ;;  %v4219_v51 = vld [vmem:[#allocation2 + $0x38] sm:$0xff] }
 0x550   :  { %1607 = vmatprep.mubr.bf16.mxu1 %v9911_v4  ;;  %v10714_v27 = vpack.c.bf16 %v1409_v3, %v1408_v31  ;;  %v8640_v11 = vcombine.low %v10658_v57, %v10660_v6  ;;  %v8656_v32 = vcombine.low %v3287_v21, %v3288_v42  ;;  %v8643_v47 = vcombine.high %v2354_v38, %v2355_v8  ;;  %v3298_v21 = vld [vmem:[#allocation2 + $0x1f0] sm:$0xff]  ;;  %v4221_v31 = vld [vmem:[#allocation2 + $0x78] sm:$0xff] }
 0x551   :  { %2447 = vmatpush1.bf16.msra.mxu0 %v8638_v37  ;;  %v1416_v25 = vmax.f32 %v1400_v17, 0.0  ;;  %v1417_v39 = vmax.f32 %v1401_v45, 0.0  ;;  %v8659_v53 = vcombine.high %v3289_v7, %v3290_v18  ;;  %v3291_v37 = vld [vmem:[#allocation2 + $0x110] sm:$0xff]  ;;  %v8658_v2 = vcombine.low %v3289_v7, %v3290_v18  ;;  %v4222_v8 = vld [vmem:[#allocation2 + $0x98] sm:$0xff] }
 0x552   :  { %3382 = vmatpush1.bf16.msra.mxu1 %v8654_v40  ;;  %2448 = vmatprep.subr.bf16.mxu0 %v8641_v20  ;;  %v8645_v57 = vcombine.high %v2356_v22, %v2357_v24  ;;  %v8661_v6 = vcombine.high %v3291_v37, %v3292_v1  ;;  %v2358_v40 = vld [vmem:[#allocation2 + $0x148] sm:$0xff]  ;;  %v8644_v44 = vcombine.low %v2356_v22, %v2357_v24  ;;  %v4223_v17 = vld [vmem:[#allocation2 + $0xb8] sm:$0xff] }
 0x553   :  { %3383 = vmatprep.subr.bf16.mxu1 %v8657_v30  ;;  %v10727_v9 = vpack.c.bf16 %v1417_v39, %v1416_v25  ;;  %v2359_v20 = vld [vmem:[#allocation2 + $0x168] sm:$0xff]  ;;  %v8660_v50 = vcombine.low %v3291_v37, %v3292_v1  ;;  %v8663_v59 = vcombine.high %v3293_v26, %v3294_v54  ;;  %v8662_v49 = vcombine.low %v3293_v26, %v3294_v54  ;;  %v4220_v30 = vld [vmem:[#allocation2 + $0x58] sm:$0xff] }
 0x554   :  { %1568 = vmatmul.mubr.bf16.gmra.mrb[44].mxu0 %v10694_v63  ;;  %v8647_v56 = vcombine.high %v2358_v40, %v2359_v20  ;;  %v8646_v35 = vcombine.low %v2358_v40, %v2359_v20  ;;  %v8649_v5 = vcombine.high %v2360_v55, %v2361_v61  ;;  %v8665_v19 = vcombine.high %v3295_v41, %v3296_v0  ;;  %v4224_v18 = vld [vmem:[#allocation2 + $0xd8] sm:$0xff] }
 0x555   :  { %1608 = vmatmul.mubr.bf16.gmra.mrb[28].mxu1 %v10701_v52  ;;  %2449 = vmatpush1.bf16.msra.mxu0 %v8640_v11  ;;  %v8648_v42 = vcombine.low %v2360_v55, %v2361_v61  ;;  %v8664_v36 = vcombine.low %v3295_v41, %v3296_v0  ;;  %v8651_v16 = vcombine.high %v2362_v48, %v2363_v34  ;;  %v4225_v11 = vld [vmem:[#allocation2 + $0xf8] sm:$0xff]  ;;  %v9264_v55 = vld [vmem:[#allocation5 + $0x40] ss:$16 sps:$4 sm:$0xff]   ;;  %v9272_v61 = vld [vmem:[#allocation5 + $0x64] ss:$16 sps:$4 sm:$0xff]  }
 0x556   :  { %3384 = vmatpush1.bf16.msra.mxu1 %v8656_v32  ;;  %2450 = vmatprep.subr.bf16.mxu0 %v8643_v47  ;;  %v8667_v46 = vcombine.high %v3297_v23, %v3298_v21  ;;  %v8650_v58 = vcombine.low %v2362_v48, %v2363_v34  ;;  %v8666_v28 = vcombine.low %v3297_v23, %v3298_v21  ;;  %v4226_v32 = vld [vmem:[#allocation2 + $0x118] sm:$0xff]  ;;  %v9270_v0 = vld [vmem:[#allocation5 + $0x60] ss:$16 sps:$4 sm:$0xff]   ;;  %v9284_v34 = vld [vmem:[#allocation5 + $0xa4] ss:$16 sps:$4 sm:$0xff]  }
 0x557   :  { %3385 = vmatprep.subr.bf16.mxu1 %v8659_v53  ;;  %1577 = vmatprep.mubr.bf16.mxu0 %v9911_v4  ;;  %v8669_v33 = vcombine.high %v4218_v60, %v4219_v51  ;;  %v8668_v3 = vcombine.low %v4218_v60, %v4219_v51  ;;  %v8671_v38 = vcombine.high %v4220_v30, %v4221_v31  ;;  %v4227_v47 = vld [vmem:[#allocation2 + $0x138] sm:$0xff]  ;;  %v9282_v21 = vld [vmem:[#allocation5 + $0xa0] ss:$16 sps:$4 sm:$0xff]   ;;  %v9296_v51 = vld [vmem:[#allocation5 + $0xe4] ss:$16 sps:$4 sm:$0xff]  }
 0x558   :  { %1617 = vmatprep.mubr.bf16.mxu1 %v9911_v4  ;;  %v8670_v45 = vcombine.low %v4220_v30, %v4221_v31  ;;  %v8673_v7 = vcombine.high %v4222_v8, %v4223_v17  ;;  %v8672_v25 = vcombine.low %v4222_v8, %v4223_v17  ;;  %v8675_v39 = vcombine.high %v4224_v18, %v4225_v11  ;;  %v4228_v24 = vld [vmem:[#allocation2 + $0x158] sm:$0xff]  ;;  %v9302_v30 = vld [vmem:[#allocation5 + $0x104] ss:$16 sps:$4 sm:$0xff]  }
 0x559   :  { %2451 = vmatpush1.bf16.msra.mxu0 %v8642_v14  ;;  %v8674_v53 = vcombine.low %v4224_v18, %v4225_v11  ;;  %v8677_v22 = vcombine.high %v4226_v32, %v4227_v47  ;;  %v4229_v37 = vld [vmem:[#allocation2 + $0x178] sm:$0xff]  ;;  %v8676_v1 = vcombine.low %v4226_v32, %v4227_v47  ;;  %v9308_v8 = vld [vmem:[#allocation5 + $0x124] ss:$16 sps:$4 sm:$0xff]  }
 0x55a   :  { %3386 = vmatpush1.bf16.msra.mxu1 %v8658_v2  ;;  %2452 = vmatprep.subr.bf16.mxu0 %v8645_v57  ;;  %v8679_v14 = vcombine.high %v4228_v24, %v4229_v37  ;;  %v4230_v2 = vld [vmem:[#allocation2 + $0x198] sm:$0xff] }
 0x55b   :  { %3387 = vmatprep.subr.bf16.mxu1 %v8661_v6  ;;  %v4231_v57 = vld [vmem:[#allocation2 + $0x1b8] sm:$0xff]  ;;  %v8678_v6 = vcombine.low %v4228_v24, %v4229_v37 }
 0x55c   :  { %1578 = vmatmul.mubr.bf16.gmra.mrb[48].mxu0 %v10708_v29  ;;  %v8681_v40 = vcombine.high %v4230_v2, %v4231_v57  ;;  %v4232_v20 = vld [vmem:[#allocation2 + $0x1d8] sm:$0xff]  ;;  %v8680_v54 = vcombine.low %v4230_v2, %v4231_v57 }
 0x55d   :  { %1618 = vmatmul.mubr.bf16.gmra.mrb[32].mxu1 %v10711_v10  ;;  %2453 = vmatpush1.bf16.msra.mxu0 %v8644_v44  ;;  %v4233_v26 = vld [vmem:[#allocation2 + $0x1f8] sm:$0xff] }
 0x55e   :  { %3388 = vmatpush1.bf16.msra.mxu1 %v8660_v50  ;;  %2454 = vmatprep.subr.bf16.mxu0 %v8647_v56  ;;  %v8683_v44 = vcombine.high %v4232_v20, %v4233_v26  ;;  %v8682_v50 = vcombine.low %v4232_v20, %v4233_v26  ;;  %v9263_v56 = vld [vmem:[#allocation5 + $0x2c] ss:$16 sps:$4 sm:$0xff]   ;;  %v9279_v48 = vld [vmem:[#allocation5 + $0x88] ss:$16 sps:$4 sm:$0xff]  }
 0x55f   :  { %3389 = vmatprep.subr.bf16.mxu1 %v8663_v59  ;;  %1587 = vmatprep.mubr.bf16.mxu0 %v9911_v4  ;;  %v9258_v59 = vld [vmem:[#allocation5 + $0x20] ss:$16 sps:$4 sm:$0xff]   ;;  %v9275_v41 = vld [vmem:[#allocation5 + $0x6c] ss:$16 sps:$4 sm:$0xff]   ;;  %v9291_v60 = vld [vmem:[#allocation5 + $0xc8] ss:$16 sps:$4 sm:$0xff]  }
 0x560   :  { %1627 = vmatprep.mubr.bf16.mxu1 %v9911_v4  ;;  %v9287_v23 = vld [vmem:[#allocation5 + $0xac] ss:$16 sps:$4 sm:$0xff]  }
 0x561   :  { %2455 = vmatpush1.bf16.msra.mxu0 %v8646_v35  ;;  %v9273_v35 = vld [vmem:[#allocation5 + $0x68] ss:$16 sps:$4 sm:$0xff]   ;;  %v9305_v31 = vld [vmem:[#allocation5 + $0x10c] ss:$16 sps:$4 sm:$0xff]  }
 0x562   :  { %3390 = vmatpush1.bf16.msra.mxu1 %v8662_v49  ;;  %2456 = vmatprep.subr.bf16.mxu0 %v8649_v5  ;;  %v9278_v49 = vld [vmem:[#allocation5 + $0x84] ss:$16 sps:$4 sm:$0xff]   ;;  %v9281_v5 = vld [vmem:[#allocation5 + $0x8c] ss:$16 sps:$4 sm:$0xff]  }
 0x563   :  { %3391 = vmatprep.subr.bf16.mxu1 %v8665_v19  ;;  %v9276_v19 = vld [vmem:[#allocation5 + $0x80] ss:$16 sps:$4 sm:$0xff]   ;;  %v9311_v17 = vld [vmem:[#allocation5 + $0x12c] ss:$16 sps:$4 sm:$0xff]  }
 0x564   :  { %1588 = vmatmul.mubr.bf16.gmra.mrb[52].mxu0 %v10714_v27 }
 0x565   :  { %1628 = vmatmul.mubr.bf16.gmra.mrb[36].mxu1 %v10727_v9  ;;  %2457 = vmatpush1.bf16.msra.mxu0 %v8648_v42  ;;  %v9285_v42 = vld [vmem:[#allocation5 + $0xa8] ss:$16 sps:$4 sm:$0xff]  }
 0x566   :  { %3392 = vmatpush1.bf16.msra.mxu1 %v8664_v36  ;;  %2458 = vmatprep.subr.bf16.mxu0 %v8651_v16  ;;  %v9290_v36 = vld [vmem:[#allocation5 + $0xc4] ss:$16 sps:$4 sm:$0xff]   ;;  %v9293_v16 = vld [vmem:[#allocation5 + $0xcc] ss:$16 sps:$4 sm:$0xff]  }
 0x567   :  { %3393 = vmatprep.subr.bf16.mxu1 %v8667_v46  ;;  %2476 = vmatprep.mubr.bf16.mxu0 %v9911_v4  ;;  %v9288_v46 = vld [vmem:[#allocation5 + $0xc0] ss:$16 sps:$4 sm:$0xff]  }
 0x568   :  { %3411 = vmatprep.mubr.bf16.mxu1 %v9911_v4 }
 0x569   :  { %2459 = vmatpush1.bf16.msra.mxu0 %v8650_v58  ;;  %v9299_v58 = vld [vmem:[#allocation5 + $0xec] ss:$16 sps:$4 sm:$0xff]  }
 0x56a   :  { %3394 = vmatpush1.bf16.msra.mxu1 %v8666_v28  ;;  %4314 = vmatprep.subr.bf16.mxu0 %v8669_v33  ;;  %v9294_v28 = vld [vmem:[#allocation5 + $0xe0] ss:$16 sps:$4 sm:$0xff]   ;;  %v9297_v33 = vld [vmem:[#allocation5 + $0xe8] ss:$16 sps:$4 sm:$0xff]  }
 0x56c   :  { %2477 = vmatmul.mubr.bf16.vlgmr.msra.gmra.mrb[56].mxu0 %v10690_v43 }
 0x56d   :  { %3412 = vmatmul.mubr.bf16.vlgmr.msra.gmra.mrb[40].mxu1 %v10690_v43  ;;  %2486 = vmatprep.mubr.bf16.mxu0 %v9911_v4 }
 0x56e   :  { %3421 = vmatprep.mubr.bf16.mxu1 %v9911_v4  ;;  %4315 = vmatpush1.bf16.msra.mxu0 %v8668_v3  ;;  %v9300_v3 = vld [vmem:[#allocation5 + $0x100] ss:$16 sps:$4 sm:$0xff]  }
 0x56f   :  { %4316 = vmatprep.subr.bf16.mxu0 %v8671_v38  ;;  %v9303_v38 = vld [vmem:[#allocation5 + $0x108] ss:$16 sps:$4 sm:$0xff]  }
 0x572   :  { %4317 = vmatpush1.bf16.msra.mxu0 %v8670_v45  ;;  %v9306_v45 = vld [vmem:[#allocation5 + $0x120] ss:$16 sps:$4 sm:$0xff]  }
 0x573   :  { %4318 = vmatprep.subr.bf16.mxu0 %v8673_v7  ;;  %v9309_v7 = vld [vmem:[#allocation5 + $0x128] ss:$16 sps:$4 sm:$0xff]  }
 0x574   :  { %2487 = vmatmul.mubr.bf16.gmra.mrb[60].mxu0 %v10694_v63 }
 0x575   :  { %3422 = vmatmul.mubr.bf16.gmra.mrb[44].mxu1 %v10694_v63  ;;  %2496 = vmatprep.mubr.bf16.mxu0 %v9911_v4 }
 0x576   :  { %3431 = vmatprep.mubr.bf16.mxu1 %v9911_v4  ;;  %4319 = vmatpush1.bf16.msra.mxu0 %v8672_v25 }
 0x577   :  { %4320 = vmatprep.subr.bf16.mxu0 %v8675_v39 }
 0x57a   :  { %4321 = vmatpush1.bf16.msra.mxu0 %v8674_v53 }
 0x57b   :  { %4322 = vmatprep.subr.bf16.mxu0 %v8677_v22 }
 0x57c   :  { %2497 = vmatmul.mubr.bf16.gmra.mrb[64].mxu0 %v10708_v29 }
 0x57d   :  { %3432 = vmatmul.mubr.bf16.gmra.mrb[48].mxu1 %v10708_v29  ;;  %2506 = vmatprep.mubr.bf16.mxu0 %v9911_v4 }
 0x57e   :  { %3441 = vmatprep.mubr.bf16.mxu1 %v9911_v4  ;;  %4323 = vmatpush1.bf16.msra.mxu0 %v8676_v1 }
 0x57f   :  { %4324 = vmatprep.subr.bf16.mxu0 %v8679_v14 }
 0x582   :  { %4325 = vmatpush1.bf16.msra.mxu0 %v8678_v6 }
 0x583   :  { %4326 = vmatprep.subr.bf16.mxu0 %v8681_v40 }
 0x584   :  { %2507 = vmatmul.mubr.bf16.gmra.mrb[68].mxu0 %v10714_v27 }
 0x585   :  { %3442 = vmatmul.mubr.bf16.gmra.mrb[52].mxu1 %v10714_v27  ;;  %2516 = vmatprep.mubr.bf16.mxu0 %v9911_v4 }
 0x586   :  { %3451 = vmatprep.mubr.bf16.mxu1 %v9911_v4  ;;  %4327 = vmatpush1.bf16.msra.mxu0 %v8680_v54 }
 0x587   :  { %4328 = vmatprep.subr.bf16.mxu0 %v8683_v44 }
 0x58a   :  { %4329 = vmatpush1.bf16.msra.mxu0 %v8682_v50 }
 0x58c   :  { %2517 = vmatmul.mubr.bf16.gmra.mrb[72].mxu0 %v10692_v62 }
 0x58d   :  { %3452 = vmatmul.mubr.bf16.gmra.mrb[56].mxu1 %v10692_v62  ;;  %2526 = vmatprep.mubr.bf16.mxu0 %v9911_v4 }
 0x58e   :  { %3461 = vmatprep.mubr.bf16.mxu1 %v9911_v4 }
 0x594   :  { %2527 = vmatmul.mubr.bf16.gmra.mrb[76].mxu0 %v10701_v52 }
 0x595   :  { %3462 = vmatmul.mubr.bf16.gmra.mrb[60].mxu1 %v10701_v52  ;;  %2536 = vmatprep.mubr.bf16.mxu0 %v9911_v4 }
 0x596   :  { %3471 = vmatprep.mubr.bf16.mxu1 %v9911_v4 }
 0x59c   :  { %2537 = vmatmul.mubr.bf16.gmra.mrb[80].mxu0 %v10711_v10 }
 0x59d   :  { %3472 = vmatmul.mubr.bf16.gmra.mrb[64].mxu1 %v10711_v10  ;;  %2546 = vmatprep.mubr.bf16.mxu0 %v9911_v4 }
 0x59e   :  { %3481 = vmatprep.mubr.bf16.mxu1 %v9911_v4 }
 0x5a4   :  { %2547 = vmatmul.mubr.bf16.gmra.mrb[84].mxu0 %v10727_v9 }
 0x5a5   :  { %3482 = vmatmul.mubr.bf16.gmra.mrb[68].mxu1 %v10727_v9  ;;  %4346 = vmatprep.mubr.bf16.mxu0 %v9911_v4 }
 0x5ac   :  { %4347 = vmatmul.mubr.bf16.vlgmr.msra.gmra.mrb[88].mxu0 %v10690_v43  ;;  %v9254_v43 = vld [vmem:[#allocation5 + $0x4] ss:$16 sps:$4 sm:$0xff]  }
 0x5ad   :  { %4356 = vmatprep.mubr.bf16.mxu0 %v9911_v4  ;;  %7245 = vmatprep.subr.bf16.mxu1 %v9254_v43 }
 0x5b4   :  { %4357 = vmatmul.mubr.bf16.gmra.mrb[92].mxu0 %v10694_v63  ;;  %v9257_v63 = vld [vmem:[#allocation5 + $0xc] ss:$16 sps:$4 sm:$0xff]  }
 0x5b5   :  { %4366 = vmatprep.mubr.bf16.mxu0 %v9911_v4  ;;  %7409 = vmatprep.subr.bf16.mxu0 %v9257_v63 }
 0x5bc   :  { %4367 = vmatmul.mubr.bf16.gmra.mrb[96].mxu0 %v10708_v29  ;;  %v9252_v29 = vld [vmem:[#allocation5] ss:$16 sps:$4 sm:$0xff]  }
 0x5bd   :  { %4376 = vmatprep.mubr.bf16.mxu0 %v9911_v4  ;;  %7246 = vmatpush1.bf16.msra.mxu1 %v9252_v29 }
 0x5c4   :  { %4377 = vmatmul.mubr.bf16.gmra.mrb[100].mxu0 %v10714_v27  ;;  %v9255_v27 = vld [vmem:[#allocation5 + $0x8] ss:$16 sps:$4 sm:$0xff]  }
 0x5c5   :  { %4386 = vmatprep.mubr.bf16.mxu0 %v9911_v4  ;;  %7410 = vmatpush1.bf16.msra.mxu0 %v9255_v27 }
 0x5c6   :  { %7411 = vmatprep.subr.bf16.mxu0 %v9263_v56 }
 0x5cc   :  { %4387 = vmatmul.mubr.bf16.gmra.mrb[104].mxu0 %v10692_v62  ;;  %v9260_v62 = vld [vmem:[#allocation5 + $0x24] ss:$16 sps:$4 sm:$0xff]  }
 0x5cd   :  { %4396 = vmatprep.mubr.bf16.mxu0 %v9911_v4  ;;  %7247 = vmatprep.subr.bf16.mxu1 %v9260_v62 }
 0x5ce   :  { %7248 = vmatpush1.bf16.msra.mxu1 %v9258_v59 }
 0x5d4   :  { %4397 = vmatmul.mubr.bf16.gmra.mrb[108].mxu0 %v10701_v52  ;;  %v9261_v52 = vld [vmem:[#allocation5 + $0x28] ss:$16 sps:$4 sm:$0xff]  }
 0x5d5   :  { %4406 = vmatprep.mubr.bf16.mxu0 %v9911_v4  ;;  %7412 = vmatpush1.bf16.msra.mxu0 %v9261_v52 }
 0x5dc   :  { %4407 = vmatmul.mubr.bf16.gmra.mrb[112].mxu0 %v10711_v10  ;;  %v9266_v10 = vld [vmem:[#allocation5 + $0x44] ss:$16 sps:$4 sm:$0xff]  }
 0x5dd   :  { %4416 = vmatprep.mubr.bf16.mxu0 %v9911_v4  ;;  %v9269_v4 = vld [vmem:[#allocation5 + $0x4c] ss:$16 sps:$4 sm:$0xff]   ;;  %7249 = vmatprep.subr.bf16.mxu1 %v9266_v10 }
 0x5de   :  { %7413 = vmatprep.subr.bf16.mxu0 %v9269_v4  ;;  %7250 = vmatpush1.bf16.msra.mxu1 %v9264_v55 }
 0x5df   :  { %7251 = vmatprep.subr.bf16.mxu1 %v9272_v61 }
 0x5e2   :  { %7252 = vmatpush1.bf16.msra.mxu1 %v9270_v0 }
 0x5e3   :  { %7253 = vmatprep.subr.bf16.mxu1 %v9278_v49  ;;  %v9317_v49 = vld [vmem:[#allocation5 + $0x14c] ss:$16 sps:$4 sm:$0xff]  }
 0x5e4   :  { %4417 = vmatmul.mubr.bf16.gmra.mrb[116].mxu0 %v10727_v9  ;;  %v9267_v9 = vld [vmem:[#allocation5 + $0x48] ss:$16 sps:$4 sm:$0xff]  }
 0x5e5   :  { %7414 = vmatpush1.bf16.msra.mxu0 %v9267_v9 }
 0x5e6   :  { %7415 = vmatprep.subr.bf16.mxu0 %v9275_v41  ;;  %7254 = vmatpush1.bf16.msra.mxu1 %v9276_v19  ;;  %v9315_v19 = vld [vmem:[#allocation5 + $0x148] ss:$16 sps:$4 sm:$0xff]  }
 0x5e7   :  { %7255 = vmatprep.subr.bf16.mxu1 %v9284_v34  ;;  %v9912_v34 = vmov 1966171168  }
 0x5e9   :  { %7416 = vmatpush1.bf16.msra.mxu0 %v9273_v35  ;;  %v9314_v35 = vld [vmem:[#allocation5 + $0x144] ss:$16 sps:$4 sm:$0xff]  }
 0x5ea   :  { %7417 = vmatprep.subr.bf16.mxu0 %v9281_v5  ;;  %7256 = vmatpush1.bf16.msra.mxu1 %v9282_v21  ;;  %v9312_v5 = vld [vmem:[#allocation5 + $0x140] ss:$16 sps:$4 sm:$0xff]  }
 0x5eb   :  { %7257 = vmatprep.subr.bf16.mxu1 %v9290_v36 }
 0x5ed   :  { %7418 = vmatpush1.bf16.msra.mxu0 %v9279_v48 }
 0x5ee   :  { %7419 = vmatprep.subr.bf16.mxu0 %v9287_v23  ;;  %7258 = vmatpush1.bf16.msra.mxu1 %v9288_v46  ;;  %v1774_v23 = vunpack.c.l.s4 %v9912_v34 }
 0x5ef   :  { %7259 = vmatprep.subr.bf16.mxu1 %v9296_v51 }
 0x5f1   :  { %7420 = vmatpush1.bf16.msra.mxu0 %v9285_v42 }
 0x5f2   :  { %7421 = vmatprep.subr.bf16.mxu0 %v9293_v16  ;;  %7260 = vmatpush1.bf16.msra.mxu1 %v9294_v28 }
 0x5f3   :  { %7261 = vmatprep.subr.bf16.mxu1 %v9302_v30 }
 0x5f5   :  { %7422 = vmatpush1.bf16.msra.mxu0 %v9291_v60 }
 0x5f6   :  { %7423 = vmatprep.subr.bf16.mxu0 %v9299_v58  ;;  %7262 = vmatpush1.bf16.msra.mxu1 %v9300_v3 }
 0x5f7   :  { %7263 = vmatprep.subr.bf16.mxu1 %v9308_v8 }
 0x5f9   :  { %7424 = vmatpush1.bf16.msra.mxu0 %v9297_v33 }
 0x5fa   :  { %7425 = vmatprep.subr.bf16.mxu0 %v9305_v31  ;;  %7264 = vmatpush1.bf16.msra.mxu1 %v9306_v45 }
 0x5fb   :  { %7265 = vmatprep.subr.bf16.mxu1 %v9314_v35 }
 0x5fd   :  { %7426 = vmatpush1.bf16.msra.mxu0 %v9303_v38 }
 0x5fe   :  { %7427 = vmatprep.subr.bf16.mxu0 %v9311_v17  ;;  %7266 = vmatpush1.bf16.msra.mxu1 %v9312_v5 }
 0x601   :  { %7428 = vmatpush1.bf16.msra.mxu0 %v9309_v7  ;;  %v1775_v7 = vunpack.c.0.s8 %v1774_v23 }
 0x602   :  { %7429 = vmatprep.subr.bf16.mxu0 %v9317_v49 }
 0x605   :  { %7430 = vmatpush1.bf16.msra.mxu0 %v9315_v19 }
 0x61f   :  { %v10787_v18 = vpop.f32.mrb[40].mxu0 }
 0x620   :  { %v10789_v11 = vpop.f32.mrb[24].mxu1  ;;  %v10791_v25 = vpop.f32.mrb[41].mxu0  ;;  %v1682_v47 = vmul.f32 %v10787_v18, %v10787_v18 }
 0x621   :  { %15808 = vst [vmem:[#allocation17_spill] sm:$0xff] %v10789_v11  ;;  %v10793_v39 = vpop.f32.mrb[25].mxu1  ;;  %v10795_v32 = vpop.f32.mrb[42].mxu0  ;;  %v1683_v1 = vmul.f32 %v10791_v25, %v10791_v25 }
 0x622   :  { %v1640_v53 = vadd.f32 %v10795_v32, %v10787_v18  ;;  %v1684_v22 = vmul.f32 %v10795_v32, %v10795_v32  ;;  %v10803_v24 = vpop.f32.mrb[26].mxu1  ;;  %v10805_v37 = vpop.f32.mrb[43].mxu0 }
 0x623   :  { %15809 = vst [vmem:[#allocation18_spill] sm:$0xff] %v10803_v24  ;;  %v1661_v14 = vadd.f32 %v10805_v37, %v10791_v25  ;;  %v1685_v2 = vmul.f32 %v10805_v37, %v10805_v37  ;;  %v10813_v57 = vpop.f32.mrb[27].mxu1 }
 0x624   :  { %v1714_v6 = vadd.f32 %v1684_v22, %v1682_v47  ;;  %v1698_v22 = vmul.f32 %v10789_v11, %v10789_v11 }
 0x625   :  { %v1735_v40 = vadd.f32 %v1685_v2, %v1683_v1  ;;  %v1699_v1 = vmul.f32 %v10793_v39, %v10793_v39  ;;  %v10878_v2 = vsub.s32 %v1775_v7, %v10218_v13  ;;  %v10922_v7 = vsub.s32 1, %v10218_v13 }
 0x627   :  { %v10815_v20 = vpop.f32.mrb[44].mxu0  ;;  %15817 = vst [vmem:[#allocation26_spill] sm:$0xff] %v10878_v2  ;;  %15821 = vst [vmem:[#allocation30_spill] sm:$0xff] %v10922_v7 }
 0x628   :  { %v1641_v26 = vadd.f32 %v1640_v53, %v10815_v20  ;;  %v1686_v54 = vmul.f32 %v10815_v20, %v10815_v20  ;;  %v10820_v44 = vpop.f32.mrb[28].mxu1  ;;  %v10822_v50 = vpop.f32.mrb[45].mxu0 }
 0x629   :  { %15810 = vst [vmem:[#allocation19_spill] sm:$0xff] %v10820_v44  ;;  %v1662_v43 = vadd.f32 %v1661_v14, %v10822_v50  ;;  %v1687_v63 = vmul.f32 %v10822_v50, %v10822_v50  ;;  %v10827_v29 = vpop.f32.mrb[29].mxu1  ;;  %v10829_v27 = vpop.f32.mrb[46].mxu0 }
 0x62a   :  { %15811 = vst [vmem:[#allocation20_spill] sm:$0xff] %v10829_v27  ;;  %v1715_v62 = vadd.f32 %v1714_v6, %v1686_v54  ;;  %v1642_v56 = vadd.f32 %v1641_v26, %v10829_v27  ;;  %v1688_v59 = vmul.f32 %v10829_v27, %v10829_v27  ;;  %v10834_v52 = vpop.f32.mrb[30].mxu1  ;;  %v10836_v10 = vpop.f32.mrb[47].mxu0  ;;  %v1700_v6 = vmul.f32 %v10803_v24, %v10803_v24 }
 0x62b   :  { %15812 = vst [vmem:[#allocation21_spill] sm:$0xff] %v10834_v52  ;;  %15813 = vst [vmem:[#allocation22_spill] sm:$0xff] %v10836_v10  ;;  %v1736_v4 = vadd.f32 %v1735_v40, %v1687_v63  ;;  %v1663_v55 = vadd.f32 %v1662_v43, %v10836_v10  ;;  %v1689_v9 = vmul.f32 %v10836_v10, %v10836_v10  ;;  %v10841_v61 = vpop.f32.mrb[31].mxu1 }
 0x62c   :  { %v1716_v41 = vadd.f32 %v1715_v62, %v1688_v59  ;;  %v1701_v40 = vmul.f32 %v10813_v57, %v10813_v57  ;;  %v1702_v62 = vmul.f32 %v10820_v44, %v10820_v44  ;;  %v1704_v35 = vmul.f32 %v10834_v52, %v10834_v52 }
 0x62d   :  { %v1737_v0 = vadd.f32 %v1736_v4, %v1689_v9 }
 0x62f   :  { %v10843_v48 = vpop.f32.mrb[48].mxu0 }
 0x630   :  { %15814 = vst [vmem:[#allocation23_spill] sm:$0xff] %v10843_v48  ;;  %v1643_v21 = vadd.f32 %v1642_v56, %v10843_v48  ;;  %v1690_v42 = vmul.f32 %v10843_v48, %v10843_v48  ;;  %v10848_v36 = vpop.f32.mrb[32].mxu1  ;;  %v10850_v16 = vpop.f32.mrb[49].mxu0  ;;  %v1703_v56 = vmul.f32 %v10827_v29, %v10827_v29  ;;  %v9332_v48 = vld [vmem:[#allocation5 + $0x1a4] ss:$16 sps:$4 sm:$0xff]  }
 0x631   :  { %15815 = vst [vmem:[#allocation24_spill] sm:$0xff] %v10850_v16  ;;  %v1664_v46 = vadd.f32 %v1663_v55, %v10850_v16  ;;  %v1691_v60 = vmul.f32 %v10850_v16, %v10850_v16  ;;  %v10855_v51 = vpop.f32.mrb[33].mxu1  ;;  %v10857_v58 = vpop.f32.mrb[50].mxu0 }
 0x632   :  { %v1717_v28 = vadd.f32 %v1716_v41, %v1690_v42  ;;  %v1644_v33 = vadd.f32 %v1643_v21, %v10857_v58  ;;  %v1692_v30 = vmul.f32 %v10857_v58, %v10857_v58  ;;  %v10862_v31 = vpop.f32.mrb[34].mxu1  ;;  %v10864_v3 = vpop.f32.mrb[51].mxu0  ;;  %v9320_v41 = vld [vmem:[#allocation5 + $0x164] ss:$16 sps:$4 sm:$0xff]   ;;  %v9318_v21 = vld [vmem:[#allocation5 + $0x160] ss:$16 sps:$4 sm:$0xff]   ;;  %v1705_v42 = vmul.f32 %v10841_v61, %v10841_v61 }
 0x633   :  { %v1738_v38 = vadd.f32 %v1737_v0, %v1691_v60  ;;  %v1665_v8 = vadd.f32 %v1664_v46, %v10864_v3  ;;  %v1693_v17 = vmul.f32 %v10864_v3, %v10864_v3  ;;  %v10869_v45 = vpop.f32.mrb[35].mxu1  ;;  %v9323_v0 = vld [vmem:[#allocation5 + $0x16c] ss:$16 sps:$4 sm:$0xff]   ;;  %7267 = vmatprep.subr.bf16.mxu1 %v9320_v41 }
 0x634   :  { %v1718_v47 = vadd.f32 %v1717_v28, %v1692_v30  ;;  %v9321_v30 = vld [vmem:[#allocation5 + $0x168] ss:$16 sps:$4 sm:$0xff]   ;;  %7431 = vmatprep.subr.bf16.mxu0 %v9323_v0  ;;  %7268 = vmatpush1.bf16.msra.mxu1 %v9318_v21 }
 0x635   :  { %v1739_v53 = vadd.f32 %v1738_v38, %v1693_v17  ;;  %v1706_v38 = vmul.f32 %v10848_v36, %v10848_v36  ;;  %7432 = vmatpush1.bf16.msra.mxu0 %v9321_v30 }
 0x637   :  { %v10875_v14 = vpop.f32.mrb[52].mxu0 }
 0x638   :  { %15816 = vst [vmem:[#allocation25_spill] sm:$0xff] %v10875_v14  ;;  %v1645_v26 = vadd.f32 %v1644_v33, %v10875_v14  ;;  %v1694_v54 = vmul.f32 %v10875_v14, %v10875_v14  ;;  %v10887_v43 = vpop.f32.mrb[36].mxu1  ;;  %v10889_v63 = vpop.f32.mrb[53].mxu0 }
 0x639   :  { %15818 = vst [vmem:[#allocation27_spill] sm:$0xff] %v10889_v63  ;;  %v1666_v59 = vadd.f32 %v1665_v8, %v10889_v63  ;;  %v1695_v4 = vmul.f32 %v10889_v63, %v10889_v63  ;;  %v10898_v55 = vpop.f32.mrb[37].mxu1  ;;  %v10900_v9 = vpop.f32.mrb[54].mxu0 }
 0x63a   :  { %15819 = vst [vmem:[#allocation28_spill] sm:$0xff] %v10900_v9  ;;  %v1719_v49 = vadd.f32 %v1718_v47, %v1694_v54  ;;  %v1646_v5 = vadd.f32 %v1645_v26, %v10900_v9  ;;  %v1696_v19 = vmul.f32 %v10900_v9, %v10900_v9  ;;  %v10907_v34 = vpop.f32.mrb[38].mxu1  ;;  %v10909_v23 = vpop.f32.mrb[55].mxu0  ;;  %v1707_v47 = vmul.f32 %v10855_v51, %v10855_v51 }
 0x63b   :  { %15820 = vst [vmem:[#allocation29_spill] sm:$0xff] %v10909_v23  ;;  %v1740_v46 = vadd.f32 %v1739_v53, %v1695_v4  ;;  %v1667_v60 = vadd.f32 %v1666_v59, %v10909_v23  ;;  %v1697_v28 = vmul.f32 %v10909_v23, %v10909_v23  ;;  %v10916_v33 = vpop.f32.mrb[39].mxu1  ;;  %v10928_v53 = vmul.f32 %v10862_v31, %v10862_v31 }
 0x63c   :  { %v1647_v8 = vadd.f32 %v1646_v5, %v10789_v11  ;;  %v1720_v17 = vadd.f32 %v1719_v49, %v1696_v19  ;;  %v10933_v59 = vmul.f32 %v10869_v45, %v10869_v45  ;;  %v10937_v4 = vmul.f32 %v10887_v43, %v10887_v43 }
 0x63d   :  { %v1668_v26 = vadd.f32 %v1667_v60, %v10793_v39  ;;  %v1741_v54 = vadd.f32 %v1740_v46, %v1697_v28  ;;  %v10942_v49 = vmul.f32 %v10898_v55, %v10898_v55  ;;  %v10946_v5 = vmul.f32 %v10907_v34, %v10907_v34 }
 0x63e   :  { %v1648_v41 = vadd.f32 %v1647_v8, %v10803_v24  ;;  %v1721_v0 = vadd.f32 %v1720_v17, %v1698_v22  ;;  %v10954_v30 = vmul.f32 %v10916_v33, %v10916_v33 }
 0x63f   :  { %v1669_v19 = vadd.f32 %v1668_v26, %v10813_v57  ;;  %v1742_v21 = vadd.f32 %v1741_v54, %v1699_v1  ;;  %v10949_v46 = vpop.f32.mrb[56].mxu0 }
 0x640   :  { %15822 = vst [vmem:[#allocation31_spill] sm:$0xff] %v10949_v46  ;;  %v1649_v60 = vadd.f32 %v1648_v41, %v10820_v44  ;;  %v1722_v28 = vadd.f32 %v1721_v0, %v1700_v6  ;;  %v2601_v22 = vmul.f32 %v10949_v46, %v10949_v46  ;;  %v10958_v8 = vpop.f32.mrb[40].mxu1  ;;  %v10960_v17 = vpop.f32.mrb[57].mxu0 }
 0x641   :  { %15823 = vst [vmem:[#allocation32_spill] sm:$0xff] %v10958_v8  ;;  %15824 = vst [vmem:[#allocation33_spill] sm:$0xff] %v10960_v17  ;;  %v1670_v12 = vadd.f32 %v1669_v19, %v10827_v29  ;;  %v1743_v26 = vadd.f32 %v1742_v21, %v1701_v40  ;;  %v3536_v1 = vmul.f32 %v10958_v8, %v10958_v8  ;;  %v10967_v54 = vpop.f32.mrb[41].mxu1  ;;  %v10969_v41 = vpop.f32.mrb[58].mxu0 }
 0x642   :  { %v2602_v6 = vmul.f32 %v10960_v17, %v10960_v17  ;;  %15825 = vst [vmem:[#allocation34_spill] sm:$0xff] %v10967_v54  ;;  %15826 = vst [vmem:[#allocation35_spill] sm:$0xff] %v10969_v41  ;;  %v1723_v0 = vadd.f32 %v1722_v28, %v1702_v62  ;;  %v1650_v13 = vadd.f32 %v1649_v60, %v10834_v52  ;;  %v10976_v40 = vpop.f32.mrb[42].mxu1  ;;  %v10978_v21 = vpop.f32.mrb[59].mxu0  ;;  %v9324_v28 = vld [vmem:[#allocation5 + $0x180] ss:$16 sps:$4 sm:$0xff]  }
 0x643   :  { %v3537_v44 = vmul.f32 %v10967_v54, %v10967_v54  ;;  %v2559_v19 = vadd.f32 %v10969_v41, %v10949_v46  ;;  %15827 = vst [vmem:[#allocation36_spill] sm:$0xff] %v10976_v40  ;;  %15828 = vst [vmem:[#allocation37_spill] sm:$0xff] %v10978_v21  ;;  %v1744_v24 = vadd.f32 %v1743_v26, %v1703_v56  ;;  %v10985_v60 = vpop.f32.mrb[43].mxu1  ;;  %v9326_v52 = vld [vmem:[#allocation5 + $0x184] ss:$16 sps:$4 sm:$0xff]  }
 0x644   :  { %v1671_v11 = vadd.f32 %v1670_v12, %v10841_v61  ;;  %v2603_v23 = vmul.f32 %v10969_v41, %v10969_v41  ;;  %v3494_v62 = vadd.f32 %v10976_v40, %v10958_v8  ;;  %15829 = vst [vmem:[#allocation38_spill] sm:$0xff] %v10985_v60  ;;  %v1651_v9 = vadd.f32 %v1650_v13, %v10848_v36  ;;  %v9327_v12 = vld [vmem:[#allocation5 + $0x188] ss:$16 sps:$4 sm:$0xff]   ;;  %v9329_v26 = vld [vmem:[#allocation5 + $0x18c] ss:$16 sps:$4 sm:$0xff]  }
 0x645   :  { %v1724_v46 = vadd.f32 %v1723_v0, %v1704_v35  ;;  %v3538_v63 = vmul.f32 %v10976_v40, %v10976_v40  ;;  %v2580_v56 = vadd.f32 %v10978_v21, %v10960_v17  ;;  %v1745_v14 = vadd.f32 %v1744_v24, %v1705_v42  ;;  %7269 = vmatprep.subr.bf16.mxu1 %v9326_v52  ;;  %v9335_v17 = vld [vmem:[#allocation5 + $0x1ac] ss:$16 sps:$4 sm:$0xff]   ;;  %v9330_v52 = vld [vmem:[#allocation5 + $0x1a0] ss:$16 sps:$4 sm:$0xff]  }
 0x646   :  { %v1672_v41 = vadd.f32 %v1671_v11, %v10855_v51  ;;  %v2633_v16 = vadd.f32 %v2603_v23, %v2601_v22  ;;  %v2604_v8 = vmul.f32 %v10978_v21, %v10978_v21  ;;  %v1652_v13 = vadd.f32 %v1651_v9, %v10862_v31  ;;  %7433 = vmatprep.subr.bf16.mxu0 %v9329_v26  ;;  %v9338_v22 = vld [vmem:[#allocation5 + $0x1c4] ss:$16 sps:$4 sm:$0xff]  }
 0x647   :  { %v1725_v35 = vadd.f32 %v1724_v46, %v1706_v38  ;;  %v3568_v0 = vadd.f32 %v3538_v63, %v3536_v1  ;;  %v3515_v40 = vadd.f32 %v10985_v60, %v10967_v54  ;;  %v1746_v27 = vadd.f32 %v1745_v14, %v1707_v47  ;;  %v11001_v23 = vpop.f32.mrb[60].mxu0  ;;  %7270 = vmatpush1.bf16.msra.mxu1 %v9324_v28  ;;  %v9333_v47 = vld [vmem:[#allocation5 + $0x1a8] ss:$16 sps:$4 sm:$0xff]   ;;  %v9341_v28 = vld [vmem:[#allocation5 + $0x1cc] ss:$16 sps:$4 sm:$0xff]  }
 0x648   :  { %v1673_v10 = vadd.f32 %v1672_v41, %v10869_v45  ;;  %v2654_v11 = vadd.f32 %v2604_v8, %v2602_v6  ;;  %v3539_v24 = vmul.f32 %v10985_v60, %v10985_v60  ;;  %15830 = vst [vmem:[#allocation39_spill] sm:$0xff] %v11001_v23  ;;  %v1653_v9 = vadd.f32 %v1652_v13, %v10887_v43  ;;  %v11008_v46 = vpop.f32.mrb[44].mxu1  ;;  %v11010_v14 = vpop.f32.mrb[61].mxu0 }
 0x649   :  { %v1726_v63 = vadd.f32 %v1725_v35, %v10928_v53  ;;  %v2560_v42 = vadd.f32 %v2559_v19, %v11001_v23  ;;  %v2605_v38 = vmul.f32 %v11001_v23, %v11001_v23  ;;  %15831 = vst [vmem:[#allocation40_spill] sm:$0xff] %v11008_v46  ;;  %15832 = vst [vmem:[#allocation41_spill] sm:$0xff] %v11010_v14  ;;  %7434 = vmatpush1.bf16.msra.mxu0 %v9327_v12  ;;  %v11015_v53 = vpop.f32.mrb[45].mxu1  ;;  %v11017_v19 = vpop.f32.mrb[62].mxu0 }
 0x64a   :  { %v1674_v8 = vadd.f32 %v1673_v10, %v10898_v55  ;;  %v1747_v1 = vadd.f32 %v1746_v27, %v10933_v59  ;;  %v3589_v6 = vadd.f32 %v3539_v24, %v3537_v44  ;;  %v3495_v41 = vadd.f32 %v3494_v62, %v11008_v46  ;;  %15833 = vst [vmem:[#allocation42_spill] sm:$0xff] %v11015_v53  ;;  %v11023_v10 = vpop.f32.mrb[46].mxu1  ;;  %v11025_v27 = vpop.f32.mrb[63].mxu0 }
 0x64b   :  { %15834 = vst [vmem:[#allocation43_spill] sm:$0xff] %v11017_v19  ;;  %7271 = vmatprep.subr.bf16.mxu1 %v9332_v48  ;;  %v1654_v26 = vadd.f32 %v1653_v9, %v10907_v34  ;;  %v1727_v13 = vadd.f32 %v1726_v63, %v10937_v4  ;;  %v2634_v12 = vadd.f32 %v2633_v16, %v2605_v38  ;;  %15835 = vst [vmem:[#allocation44_spill] sm:$0xff] %v11023_v10  ;;  %v11032_v24 = vpop.f32.mrb[47].mxu1  ;;  %v9336_v16 = vld [vmem:[#allocation5 + $0x1c0] ss:$16 sps:$4 sm:$0xff]  }
 0x64c   :  { %v3540_v35 = vmul.f32 %v11008_v46, %v11008_v46  ;;  %15836 = vst [vmem:[#allocation45_spill] sm:$0xff] %v11025_v27  ;;  %7435 = vmatprep.subr.bf16.mxu0 %v9335_v17  ;;  %v1675_v44 = vadd.f32 %v1674_v8, %v10916_v33  ;;  %v1748_v59 = vadd.f32 %v1747_v1, %v10942_v49  ;;  %15837 = vst [vmem:[#allocation46_spill] sm:$0xff] %v11032_v24  ;;  %v9339_v17 = vld [vmem:[#allocation5 + $0x1c8] ss:$16 sps:$4 sm:$0xff]   ;;  %v9344_v8 = vld [vmem:[#allocation5 + $0x1e4] ss:$16 sps:$4 sm:$0xff]  }
 0x64d   :  { %v2581_v48 = vadd.f32 %v2580_v56, %v11010_v14  ;;  %v2606_v62 = vmul.f32 %v11010_v14, %v11010_v14  ;;  %7272 = vmatpush1.bf16.msra.mxu1 %v9330_v52  ;;  %v1655_v4 = vrot.slane %v1654_v26, 4  ;;  %v1728_v9 = vadd.f32 %v1727_v13, %v10946_v5  ;;  %7436 = vmatpush1.bf16.msra.mxu0 %v9333_v47  ;;  %v9347_v52 = vld [vmem:[#allocation5 + $0x1ec] ss:$16 sps:$4 sm:$0xff]  }
 0x64e   :  { %v3569_v63 = vadd.f32 %v3568_v0, %v3540_v35  ;;  %v3516_v38 = vadd.f32 %v3515_v40, %v11015_v53  ;;  %7273 = vmatprep.subr.bf16.mxu1 %v9338_v22  ;;  %v1676_v49 = vrot.slane %v1675_v44, 4  ;;  %v1749_v56 = vadd.f32 %v1748_v59, %v10954_v30  ;;  %7437 = vmatprep.subr.bf16.mxu0 %v9341_v28  ;;  %v9342_v30 = vld [vmem:[#allocation5 + $0x1e0] ss:$16 sps:$4 sm:$0xff]  }
 0x64f   :  { %v2655_v1 = vadd.f32 %v2654_v11, %v2606_v62  ;;  %v3541_v46 = vmul.f32 %v11015_v53, %v11015_v53  ;;  %v1656_v54 = vadd.f32 %v1655_v4, %v1654_v26  ;;  %v1729_v14 = vrot.slane %v1728_v9, 4  ;;  %v11043_v35 = vpop.f32.mrb[64].mxu0 }
 0x650   :  { %v2561_v5 = vadd.f32 %v2560_v42, %v11017_v19  ;;  %v2607_v40 = vmul.f32 %v11017_v19, %v11017_v19  ;;  %v1677_v0 = vadd.f32 %v1676_v49, %v1675_v44  ;;  %v1750_v47 = vrot.slane %v1749_v56, 4  ;;  %15838 = vst [vmem:[#allocation47_spill] sm:$0xff] %v11043_v35  ;;  %v11047_v62 = vpop.f32.mrb[48].mxu1  ;;  %v11049_v42 = vpop.f32.mrb[65].mxu0  ;;  %v9345_v44 = vld [vmem:[#allocation5 + $0x1e8] ss:$16 sps:$4 sm:$0xff]  }
 0x651   :  { %v3590_v22 = vadd.f32 %v3589_v6, %v3541_v46  ;;  %v3496_v13 = vadd.f32 %v3495_v41, %v11023_v10  ;;  %7274 = vmatpush1.bf16.msra.mxu1 %v9336_v16  ;;  %v1657_v11 = vrot.slane %v1656_v54, 2  ;;  %v1730_v59 = vadd.f32 %v1729_v14, %v1728_v9  ;;  %15839 = vst [vmem:[#allocation48_spill] sm:$0xff] %v11047_v62  ;;  %v11054_v4 = vpop.f32.mrb[49].mxu1  ;;  %v11056_v14 = vpop.f32.mrb[66].mxu0 }
 0x652   :  { %v2635_v28 = vadd.f32 %v2634_v12, %v2607_v40  ;;  %v3542_v26 = vmul.f32 %v11023_v10, %v11023_v10  ;;  %15840 = vst [vmem:[#allocation49_spill] sm:$0xff] %v11049_v42  ;;  %7438 = vmatpush1.bf16.msra.mxu0 %v9339_v17  ;;  %7275 = vmatprep.subr.bf16.mxu1 %v9344_v8  ;;  %v1678_v46 = vrot.slane %v1677_v0, 2  ;;  %15841 = vst [vmem:[#allocation50_spill] sm:$0xff] %v11054_v4  ;;  %v11059_v17 = vpop.f32.mrb[50].mxu1  ;;  %v11061_v8 = vpop.f32.mrb[67].mxu0 }
 0x653   :  { %v1751_v6 = vadd.f32 %v1750_v47, %v1749_v56  ;;  %v2582_v41 = vadd.f32 %v2581_v48, %v11025_v27  ;;  %v2608_v16 = vmul.f32 %v11025_v27, %v11025_v27  ;;  %15842 = vst [vmem:[#allocation51_spill] sm:$0xff] %v11056_v14  ;;  %7439 = vmatprep.subr.bf16.mxu0 %v9347_v52  ;;  %v1731_v9 = vrot.slane %v1730_v59, 2  ;;  %v11065_v53 = vpop.f32.mrb[51].mxu1 }
 0x654   :  { %v1658_v12 = vadd.f32 %v1657_v11, %v1656_v54  ;;  %v3570_v49 = vadd.f32 %v3569_v63, %v3542_v26  ;;  %v3517_v40 = vadd.f32 %v3516_v38, %v11032_v24  ;;  %15843 = vst [vmem:[#allocation52_spill] sm:$0xff] %v11059_v17  ;;  %15844 = vst [vmem:[#allocation53_spill] sm:$0xff] %v11061_v8 }
 0x655   :  { %v1679_v56 = vadd.f32 %v1678_v46, %v1677_v0  ;;  %v1752_v47 = vrot.slane %v1751_v6, 2  ;;  %v2656_v48 = vadd.f32 %v2655_v1, %v2608_v16  ;;  %v3543_v10 = vmul.f32 %v11032_v24, %v11032_v24  ;;  %15845 = vst [vmem:[#allocation54_spill] sm:$0xff] %v11065_v53  ;;  %7276 = vmatpush1.bf16.msra.mxu1 %v9342_v30 }
 0x656   :  { %v1659_v19 = vrot.slane %v1658_v12, 1  ;;  %v1732_v52 = vadd.f32 %v1731_v9, %v1730_v59  ;;  %v2562_v54 = vadd.f32 %v2561_v5, %v11043_v35  ;;  %v2609_v63 = vmul.f32 %v11043_v35, %v11043_v35  ;;  %7440 = vmatpush1.bf16.msra.mxu0 %v9345_v44 }
 0x657   :  { %v1680_v38 = vrot.slane %v1679_v56, 1  ;;  %v1753_v11 = vadd.f32 %v1752_v47, %v1751_v6  ;;  %v3591_v26 = vadd.f32 %v3590_v22, %v3543_v10  ;;  %v3497_v0 = vadd.f32 %v3496_v13, %v11047_v62  ;;  %v11076_v9 = vpop.f32.mrb[68].mxu0 }
 0x658   :  { %v1660_v1 = vadd.f32 %v1659_v19, %v1658_v12  ;;  %v1733_v46 = vrot.slane %v1732_v52, 1  ;;  %v2636_v16 = vadd.f32 %v2635_v28, %v2609_v63  ;;  %v3544_v24 = vmul.f32 %v11047_v62, %v11047_v62  ;;  %15846 = vst [vmem:[#allocation55_spill] sm:$0xff] %v11076_v9  ;;  %v11081_v22 = vpop.f32.mrb[52].mxu1  ;;  %v11083_v13 = vpop.f32.mrb[69].mxu0 }
 0x659   :  { %v1681_v30 = vadd.f32 %v1680_v38, %v1679_v56  ;;  %v1754_v27 = vrot.slane %v1753_v11, 1  ;;  %v2583_v59 = vadd.f32 %v2582_v41, %v11049_v42  ;;  %v2610_v5 = vmul.f32 %v11049_v42, %v11049_v42  ;;  %15847 = vst [vmem:[#allocation56_spill] sm:$0xff] %v11081_v22  ;;  %15848 = vst [vmem:[#allocation57_spill] sm:$0xff] %v11083_v13  ;;  %v11089_v47 = vpop.f32.mrb[53].mxu1  ;;  %v11091_v63 = vpop.f32.mrb[70].mxu0 }
 0x65a   :  { %v1734_v44 = vadd.f32 %v1733_v46, %v1732_v52  ;;  %v11078_v6 = vmul.f32 0.0078125, %v1660_v1  ;;  %v3571_v10 = vadd.f32 %v3570_v49, %v3544_v24  ;;  %v3518_v19 = vadd.f32 %v3517_v40, %v11054_v4  ;;  %15849 = vst [vmem:[#allocation58_spill] sm:$0xff] %v11089_v47  ;;  %15850 = vst [vmem:[#allocation59_spill] sm:$0xff] %v11091_v63  ;;  %v11100_v38 = vpop.f32.mrb[71].mxu0 }
 0x65b   :  { %v1755_v28 = vadd.f32 %v1754_v27, %v1753_v11  ;;  %v11085_v12 = vmul.f32 0.0078125, %v1681_v30  ;;  %v2657_v56 = vadd.f32 %v2656_v48, %v2610_v5  ;;  %v3545_v41 = vmul.f32 %v11054_v4, %v11054_v4  ;;  %v11098_v27 = vpop.f32.mrb[54].mxu1  ;;  %15852 = vst [vmem:[#allocation61_spill] sm:$0xff] %v11100_v38  ;;  %v9350_v5 = vld [vmem:[#allocation5 + $0x204] ss:$16 sps:$4 sm:$0xff]  }
 0x65c   :  { %v1758_v52 = vmul.f32 0.0078125, %v1734_v44  ;;  %v1760_v24 = vmul.f32 %v11078_v6, %v11078_v6  ;;  %v2563_v49 = vadd.f32 %v2562_v54, %v11056_v14  ;;  %v2611_v40 = vmul.f32 %v11056_v14, %v11056_v14  ;;  %15851 = vst [vmem:[#allocation60_spill] sm:$0xff] %v11098_v27  ;;  %v11105_v30 = vpop.f32.mrb[55].mxu1  ;;  %v9353_v14 = vld [vmem:[#allocation5 + $0x20c] ss:$16 sps:$4 sm:$0xff]   ;;  %7286 = vmatprep.subr.bf16.mxu1 %v9350_v5 }
 0x65d   :  { %v1759_v48 = vmul.f32 0.0078125, %v1755_v28  ;;  %v1761_v11 = vmul.f32 %v11085_v12, %v11085_v12  ;;  %v3592_v1 = vadd.f32 %v3591_v26, %v3545_v41  ;;  %v3498_v46 = vadd.f32 %v3497_v0, %v11059_v17  ;;  %15853 = vst [vmem:[#allocation62_spill] sm:$0xff] %v11105_v30  ;;  %7450 = vmatprep.subr.bf16.mxu0 %v9353_v14 }
 0x65e   :  { %v1762_v44 = vsub.f32 %v1758_v52, %v1760_v24  ;;  %v2637_v4 = vadd.f32 %v2636_v16, %v2611_v40  ;;  %v3546_v54 = vmul.f32 %v11059_v17, %v11059_v17  ;;  %v2584_v62 = vadd.f32 %v2583_v59, %v11061_v8 }
 0x65f   :  { %v1763_v35 = vsub.f32 %v1759_v48, %v1761_v11  ;;  %v2612_v28 = vmul.f32 %v11061_v8, %v11061_v8  ;;  %v3519_v42 = vadd.f32 %v3518_v19, %v11065_v53  ;;  %v3547_v26 = vmul.f32 %v11065_v53, %v11065_v53  ;;  %v11119_v11 = vpop.f32.mrb[72].mxu0 }
 0x660   :  { %v1764_v0 = vmax.f32 %v1762_v44, 0.0  ;;  %v3572_v41 = vadd.f32 %v3571_v10, %v3546_v54  ;;  %v2564_v16 = vadd.f32 %v2563_v49, %v11076_v9  ;;  %v2613_v52 = vmul.f32 %v11076_v9, %v11076_v9  ;;  %15854 = vst [vmem:[#allocation63_spill] sm:$0xff] %v11119_v11  ;;  %v11124_v44 = vpop.f32.mrb[56].mxu1  ;;  %v11126_v49 = vpop.f32.mrb[73].mxu0 }
 0x661   :  { %v1765_v59 = vmax.f32 %v1763_v35, 0.0  ;;  %v2658_v24 = vadd.f32 %v2657_v56, %v2612_v28  ;;  %v3593_v40 = vadd.f32 %v3592_v1, %v3547_v26  ;;  %v3499_v48 = vadd.f32 %v3498_v46, %v11081_v22  ;;  %15855 = vst [vmem:[#allocation64_spill] sm:$0xff] %v11124_v44  ;;  %15856 = vst [vmem:[#allocation65_spill] sm:$0xff] %v11126_v49  ;;  %v11133_v1 = vpop.f32.mrb[57].mxu1 }
 0x662   :  { %v1766_v19 = vadd.f32 1e-05, %v1764_v0  ;;  %v2638_v17 = vadd.f32 %v2637_v4, %v2613_v52  ;;  %v3548_v5 = vmul.f32 %v11081_v22, %v11081_v22  ;;  %v2585_v10 = vadd.f32 %v2584_v62, %v11083_v13  ;;  %15857 = vst [vmem:[#allocation66_spill] sm:$0xff] %v11133_v1  ;;  %v11135_v4 = vpop.f32.mrb[74].mxu0  ;;  %v11140_v26 = vpop.f32.mrb[58].mxu1 }
 0x663   :  { %v1767_v54 = vadd.f32 1e-05, %v1765_v59  ;;  %v2614_v35 = vmul.f32 %v11083_v13, %v11083_v13  ;;  %v3520_v14 = vadd.f32 %v3519_v42, %v11089_v47  ;;  %v3549_v56 = vmul.f32 %v11089_v47, %v11089_v47  ;;  %15858 = vst [vmem:[#allocation67_spill] sm:$0xff] %v11135_v4  ;;  %15859 = vst [vmem:[#allocation68_spill] sm:$0xff] %v11140_v26  ;;  %v11142_v0 = vpop.f32.mrb[75].mxu0  ;;  %v11145_v22 = vpop.f32.mrb[59].mxu1 }
 0x664   :  { %9756 = vrsqrt.f32 %v1766_v19  ;;  %v3573_v46 = vadd.f32 %v3572_v41, %v3548_v5  ;;  %v2565_v62 = vadd.f32 %v2564_v16, %v11091_v63  ;;  %v2615_v28 = vmul.f32 %v11091_v63, %v11091_v63  ;;  %15860 = vst [vmem:[#allocation69_spill] sm:$0xff] %v11142_v0  ;;  %15861 = vst [vmem:[#allocation70_spill] sm:$0xff] %v11145_v22 }
 0x665   :  { %9758 = vrsqrt.f32 %v1767_v54  ;;  %v2659_v42 = vadd.f32 %v2658_v24, %v2614_v35  ;;  %v3594_v52 = vadd.f32 %v3593_v40, %v3549_v56  ;;  %v3500_v59 = vadd.f32 %v3499_v48, %v11098_v27 }
 0x666   :  { %v2639_v47 = vadd.f32 %v2638_v17, %v2615_v28  ;;  %v3550_v41 = vmul.f32 %v11098_v27, %v11098_v27  ;;  %v2586_v16 = vadd.f32 %v2585_v10, %v11100_v38  ;;  %v2616_v19 = vmul.f32 %v11100_v38, %v11100_v38 }
 0x667   :  { %v3521_v5 = vadd.f32 %v3520_v14, %v11105_v30  ;;  %v3551_v54 = vmul.f32 %v11105_v30, %v11105_v30  ;;  %v2566_v24 = vadd.f32 %v2565_v62, %v11119_v11  ;;  %v2617_v40 = vmul.f32 %v11119_v11, %v11119_v11  ;;  %v11164_v30 = vpop.f32.mrb[76].mxu0 }
 0x668   :  { %v3574_v48 = vadd.f32 %v3573_v46, %v3550_v41  ;;  %v2660_v17 = vadd.f32 %v2659_v42, %v2616_v19  ;;  %v3501_v35 = vadd.f32 %v3500_v59, %v11124_v44  ;;  %v3552_v10 = vmul.f32 %v11124_v44, %v11124_v44  ;;  %15862 = vst [vmem:[#allocation71_spill] sm:$0xff] %v11164_v30  ;;  %v11170_v59 = vpop.f32.mrb[60].mxu1  ;;  %v11172_v41 = vpop.f32.mrb[77].mxu0 }
 0x669   :  { %v3595_v56 = vadd.f32 %v3594_v52, %v3551_v54  ;;  %v2640_v28 = vadd.f32 %v2639_v47, %v2617_v40  ;;  %v2587_v27 = vadd.f32 %v2586_v16, %v11126_v49  ;;  %v2618_v14 = vmul.f32 %v11126_v49, %v11126_v49  ;;  %15863 = vst [vmem:[#allocation72_spill] sm:$0xff] %v11170_v59  ;;  %v11179_v54 = vpop.f32.mrb[61].mxu1 }
 0x66a   :  { %v3575_v62 = vadd.f32 %v3574_v48, %v3552_v10  ;;  %v3522_v53 = vadd.f32 %v3521_v5, %v11133_v1  ;;  %v3553_v46 = vmul.f32 %v11133_v1, %v11133_v1  ;;  %v2567_v42 = vadd.f32 %v2566_v24, %v11135_v4  ;;  %15864 = vst [vmem:[#allocation73_spill] sm:$0xff] %v11172_v41  ;;  %v11181_v5 = vpop.f32.mrb[78].mxu0  ;;  %v11187_v10 = vpop.f32.mrb[62].mxu1 }
 0x66b   :  { %v2661_v47 = vadd.f32 %v2660_v17, %v2618_v14  ;;  %v2619_v52 = vmul.f32 %v11135_v4, %v11135_v4  ;;  %v3502_v16 = vadd.f32 %v3501_v35, %v11140_v26  ;;  %v3554_v19 = vmul.f32 %v11140_v26, %v11140_v26  ;;  %15865 = vst [vmem:[#allocation74_spill] sm:$0xff] %v11179_v54  ;;  %v11189_v14 = vpop.f32.mrb[79].mxu0  ;;  %v11194_v13 = vpop.f32.mrb[63].mxu1 }
 0x66c   :  { %15866 = vst [vmem:[#allocation75_spill] sm:$0xff] %v11181_v5  ;;  %v3596_v40 = vadd.f32 %v3595_v56, %v3553_v46  ;;  %v2588_v24 = vadd.f32 %v2587_v27, %v11142_v0  ;;  %v2620_v48 = vmul.f32 %v11142_v0, %v11142_v0  ;;  %v3523_v17 = vadd.f32 %v3522_v53, %v11145_v22 }
 0x66d   :  { %15867 = vst [vmem:[#allocation76_spill] sm:$0xff] %v11187_v10  ;;  %15868 = vst [vmem:[#allocation77_spill] sm:$0xff] %v11189_v14  ;;  %v2641_v35 = vadd.f32 %v2640_v28, %v2619_v52  ;;  %v3576_v63 = vadd.f32 %v3575_v62, %v3554_v19  ;;  %v3555_v9 = vmul.f32 %v11145_v22, %v11145_v22 }
 0x66e   :  { %v2568_v38 = vadd.f32 %v2567_v42, %v11164_v30  ;;  %15869 = vst [vmem:[#allocation78_spill] sm:$0xff] %v11194_v13  ;;  %v9757_v56 = vpop.eup %9756  ;;  %v2662_v27 = vadd.f32 %v2661_v47, %v2620_v48  ;;  %v2621_v46 = vmul.f32 %v11164_v30, %v11164_v30  ;;  %v3503_v53 = vadd.f32 %v3502_v16, %v11170_v59 }
 0x66f   :  { %v3556_v8 = vmul.f32 %v11170_v59, %v11170_v59  ;;  %v9759_v1 = vpop.eup %9758  ;;  %v3597_v28 = vadd.f32 %v3596_v40, %v3555_v9  ;;  %v2589_v62 = vadd.f32 %v2588_v24, %v11172_v41  ;;  %v2622_v52 = vmul.f32 %v11172_v41, %v11172_v41  ;;  %v11211_v40 = vpop.f32.mrb[80].mxu0 }
 0x670   :  { %v3524_v42 = vadd.f32 %v3523_v17, %v11179_v54  ;;  %v1772_v19 = vcombine.low %v9757_v56, %v9759_v1  ;;  %v2642_v44 = vadd.f32 %v2641_v35, %v2621_v46  ;;  %v3557_v48 = vmul.f32 %v11179_v54, %v11179_v54  ;;  %15870 = vst [vmem:[#allocation79_spill] sm:$0xff] %v11211_v40  ;;  %v11219_v17 = vpop.f32.mrb[81].mxu0 }
 0x671   :  { %v3577_v47 = vadd.f32 %v3576_v63, %v3556_v8  ;;  %v2663_v22 = vadd.f32 %v2662_v27, %v2622_v52  ;;  %v2569_v16 = vadd.f32 %v2568_v38, %v11181_v5  ;;  %v2623_v59 = vmul.f32 %v11181_v5, %v11181_v5  ;;  %v11217_v63 = vpop.f32.mrb[64].mxu1  ;;  %15872 = vst [vmem:[#allocation81_spill] sm:$0xff] %v11219_v17  ;;  %v1638_v38 = vld [vmem:[%s15267_s14] sm:$0x3] }
 0x672   :  { %v3504_v9 = vadd.f32 %v3503_v53, %v11187_v10  ;;  %v1779_v24 = vrot.slane %v1772_v19, %v10878_v2  ;;  %v3598_v26 = vadd.f32 %v3597_v28, %v3557_v48  ;;  %v3558_v1 = vmul.f32 %v11187_v10, %v11187_v10  ;;  %15871 = vst [vmem:[#allocation80_spill] sm:$0xff] %v11217_v63  ;;  %v11229_v53 = vpop.f32.mrb[65].mxu1  ;;  %v11231_v28 = vpop.f32.mrb[82].mxu0 }
 0x673   :  { %v2590_v8 = vadd.f32 %v2589_v62, %v11189_v14  ;;  %v2643_v35 = vadd.f32 %v2642_v44, %v2623_v59  ;;  %v2624_v56 = vmul.f32 %v11189_v14, %v11189_v14  ;;  %v3525_v27 = vadd.f32 %v3524_v42, %v11194_v13  ;;  %15873 = vst [vmem:[#allocation82_spill] sm:$0xff] %v11229_v53  ;;  %v11237_v59 = vpop.f32.mrb[66].mxu1  ;;  %v11239_v48 = vpop.f32.mrb[83].mxu0 }
 0x674   :  { %v3559_v46 = vmul.f32 %v11194_v13, %v11194_v13  ;;  %15874 = vst [vmem:[#allocation83_spill] sm:$0xff] %v11231_v28  ;;  %v1786_v62 = vrot.slane %v1779_v24, %v10878_v2  ;;  %v3578_v52 = vadd.f32 %v3577_v47, %v3558_v1  ;;  %v2570_v19 = vadd.f32 %v2569_v16, %v11211_v40  ;;  %v11244_v5 = vpop.f32.mrb[67].mxu1 }
 0x675   :  { %v2625_v44 = vmul.f32 %v11211_v40, %v11211_v40  ;;  %15875 = vst [vmem:[#allocation84_spill] sm:$0xff] %v11237_v59  ;;  %15876 = vst [vmem:[#allocation85_spill] sm:$0xff] %v11239_v48  ;;  %v2664_v42 = vadd.f32 %v2663_v22, %v2624_v56  ;;  %v3505_v13 = vadd.f32 %v3504_v9, %v11217_v63 }
 0x676   :  { %v3599_v10 = vadd.f32 %v3598_v26, %v3559_v46  ;;  %v3560_v54 = vmul.f32 %v11217_v63, %v11217_v63  ;;  %15877 = vst [vmem:[#allocation86_spill] sm:$0xff] %v11244_v5  ;;  %v1788_v24 = vmul.f32 %v1786_v62, %v1638_v38  ;;  %v2591_v16 = vadd.f32 %v2590_v8, %v11219_v17 }
 0x677   :  { %v2644_v47 = vadd.f32 %v2643_v35, %v2625_v44  ;;  %v2626_v1 = vmul.f32 %v11219_v17, %v11219_v17  ;;  %v3526_v14 = vadd.f32 %v3525_v27, %v11229_v53  ;;  %v3561_v22 = vmul.f32 %v11229_v53, %v11229_v53  ;;  %v11265_v62 = vpop.f32.mrb[84].mxu0 }
 0x678   :  { %v3579_v40 = vadd.f32 %v3578_v52, %v3560_v54  ;;  %v2571_v26 = vadd.f32 %v2570_v19, %v11231_v28  ;;  %v11254_v9 = vrot.slane %v1788_v24, %v10224_v15  ;;  %v11257_v56 = vrot.slane %v1788_v24, %v10922_v7  ;;  %15878 = vst [vmem:[#allocation87_spill] sm:$0xff] %v11265_v62 }
 0x679   :  { %v2665_v38 = vadd.f32 %v2664_v42, %v2626_v1  ;;  %v2627_v8 = vmul.f32 %v11231_v28, %v11231_v28  ;;  %v3600_v35 = vadd.f32 %v3599_v10, %v3561_v22  ;;  %v3506_v54 = vadd.f32 %v3505_v13, %v11237_v59  ;;  %v11273_v10 = vpop.f32.mrb[68].mxu1  ;;  %v11275_v13 = vpop.f32.mrb[85].mxu0 }
 0x67a   :  { %v3562_v27 = vmul.f32 %v11237_v59, %v11237_v59  ;;  %v2592_v46 = vadd.f32 %v2591_v16, %v11239_v48  ;;  %v1800_v52 = vmul.f32 %v11254_v9, %v11078_v6  ;;  %v1801_v19 = vmul.f32 %v11257_v56, %v11085_v12  ;;  %15879 = vst [vmem:[#allocation88_spill] sm:$0xff] %v11273_v10  ;;  %v11282_v22 = vpop.f32.mrb[69].mxu1  ;;  %v11284_v12 = vpop.f32.mrb[86].mxu0 }
 0x67b   :  { %v1852_v44 = vmul.f32 %v11257_v56, %v10916_v33  ;;  %v2645_v42 = vadd.f32 %v2644_v47, %v2627_v8  ;;  %15880 = vst [vmem:[#allocation89_spill] sm:$0xff] %v11275_v13  ;;  %v2628_v16 = vmul.f32 %v11239_v48, %v11239_v48  ;;  %v3527_v1 = vadd.f32 %v3526_v14, %v11244_v5  ;;  %v11290_v8 = vpop.f32.mrb[70].mxu1 }
 0x67c   :  { %v3580_v24 = vadd.f32 %v3579_v40, %v3562_v27  ;;  %v3563_v6 = vmul.f32 %v11244_v5, %v11244_v5  ;;  %15881 = vst [vmem:[#allocation90_spill] sm:$0xff] %v11282_v22  ;;  %15882 = vst [vmem:[#allocation91_spill] sm:$0xff] %v11284_v12  ;;  %v1804_v59 = vcombine.low %v1800_v52, %v1801_v19  ;;  %v11292_v27 = vpop.f32.mrb[87].mxu0  ;;  %v11297_v28 = vpop.f32.mrb[71].mxu1 }
 0x67d   :  { %v2572_v33 = vadd.f32 %v2571_v26, %v11265_v62  ;;  %v2629_v47 = vmul.f32 %v11265_v62, %v11265_v62  ;;  %v3507_v40 = vadd.f32 %v3506_v54, %v11273_v10  ;;  %15883 = vst [vmem:[#allocation92_spill] sm:$0xff] %v11290_v8  ;;  %v2666_v14 = vadd.f32 %v2665_v38, %v2628_v16  ;;  %v1639_v38 = vld [vmem:[%s15268_s15] sm:$0x3] }
 0x67e   :  { %v3601_v53 = vadd.f32 %v3600_v35, %v3563_v6  ;;  %v3564_v5 = vmul.f32 %v11273_v10, %v11273_v10  ;;  %v2593_v63 = vadd.f32 %v2592_v46, %v11275_v13  ;;  %15884 = vst [vmem:[#allocation93_spill] sm:$0xff] %v11297_v28  ;;  %v1811_v26 = vrot.slane %v1804_v59, %v10878_v2 }
 0x67f   :  { %v2646_v52 = vadd.f32 %v2645_v42, %v2629_v47  ;;  %v2630_v19 = vmul.f32 %v11275_v13, %v11275_v13  ;;  %v3528_v54 = vadd.f32 %v3527_v1, %v11282_v22  ;;  %v3565_v16 = vmul.f32 %v11282_v22, %v11282_v22 }
 0x680   :  { %v3581_v35 = vadd.f32 %v3580_v24, %v3564_v5  ;;  %v2573_v46 = vadd.f32 %v2572_v33, %v11284_v12  ;;  %v2631_v6 = vmul.f32 %v11284_v12, %v11284_v12  ;;  %v1818_v59 = vrot.slane %v1811_v26, %v10878_v2  ;;  %v11316_v24 = vpop.f32.mrb[88].mxu0 }
 0x681   :  { %v2667_v42 = vadd.f32 %v2666_v14, %v2630_v19  ;;  %v3508_v47 = vadd.f32 %v3507_v40, %v11290_v8  ;;  %v3566_v1 = vmul.f32 %v11290_v8, %v11290_v8  ;;  %v3602_v10 = vadd.f32 %v3601_v53, %v3565_v16  ;;  %15885 = vst [vmem:[#allocation94_spill] sm:$0xff] %v11316_v24  ;;  %v11320_v26 = vpop.f32.mrb[89].mxu0 }
 0x682   :  { %v2574_v62 = vrot.slane %v2573_v46, 4  ;;  %v2647_v13 = vadd.f32 %v2646_v52, %v2631_v6  ;;  %v2594_v5 = vadd.f32 %v2593_v63, %v11292_v27  ;;  %v1820_v22 = vsub.f32 %v1639_v38, %v1818_v59  ;;  %15886 = vst [vmem:[#allocation95_spill] sm:$0xff] %v11320_v26  ;;  %v11323_v53 = vpop.f32.mrb[90].mxu0 }
 0x683   :  { %v3509_v33 = vrot.slane %v3508_v47, 4  ;;  %v3582_v48 = vadd.f32 %v3581_v35, %v3566_v1  ;;  %v2632_v12 = vmul.f32 %v11292_v27, %v11292_v27  ;;  %v3529_v8 = vadd.f32 %v3528_v54, %v11297_v28  ;;  %15887 = vst [vmem:[#allocation96_spill] sm:$0xff] %v11323_v53  ;;  %v11328_v38 = vpop.f32.mrb[91].mxu0 }
 0x684   :  { %v2575_v14 = vadd.f32 %v2574_v62, %v2573_v46  ;;  %v2648_v40 = vrot.slane %v2647_v13, 4  ;;  %v2595_v19 = vrot.slane %v2594_v5, 4  ;;  %v11326_v52 = vrot.slane %v1820_v22, %v10922_v7  ;;  %15888 = vst [vmem:[#allocation97_spill] sm:$0xff] %v11328_v38 }
 0x685   :  { %v3510_v63 = vadd.f32 %v3509_v33, %v3508_v47  ;;  %v3583_v16 = vrot.slane %v3582_v48, 4  ;;  %v2668_v1 = vadd.f32 %v2667_v42, %v2632_v12  ;;  %v3530_v23 = vrot.slane %v3529_v8, 4 }
 0x686   :  { %v2576_v35 = vrot.slane %v2575_v14, 2  ;;  %v2649_v6 = vadd.f32 %v2648_v40, %v2647_v13  ;;  %v2596_v59 = vadd.f32 %v2595_v19, %v2594_v5  ;;  %v11331_v17 = vadd.f32 %v11326_v52, %v1852_v44 }
 0x687   :  { %v3511_v62 = vrot.slane %v3510_v63, 2  ;;  %v3584_v46 = vadd.f32 %v3583_v16, %v3582_v48  ;;  %v2669_v11 = vrot.slane %v2668_v1, 4  ;;  %v11334_v41 = vrot.slane %v1820_v22, %v10224_v15  ;;  %v11336_v42 = vpop.f32.mrb[92].mxu0 }
 0x688   :  { %v2577_v54 = vadd.f32 %v2576_v35, %v2575_v14  ;;  %v2650_v60 = vrot.slane %v2649_v6, 2  ;;  %v2597_v49 = vrot.slane %v2596_v59, 2  ;;  %v3531_v30 = vadd.f32 %v3530_v23, %v3529_v8  ;;  %15889 = vst [vmem:[#allocation98_spill] sm:$0xff] %v11336_v42  ;;  %v11340_v19 = vpop.f32.mrb[93].mxu0 }
 0x689   :  { %v3512_v47 = vadd.f32 %v3511_v62, %v3510_v63  ;;  %v3585_v33 = vrot.slane %v3584_v46, 2  ;;  %v2670_v12 = vadd.f32 %v2669_v11, %v2668_v1  ;;  %v3567_v14 = vmul.f32 %v11297_v28, %v11297_v28  ;;  %15890 = vst [vmem:[#allocation99_spill] sm:$0xff] %v11340_v19  ;;  %v11342_v62 = vpop.f32.mrb[94].mxu0 }
 0x68a   :  { %v2578_v0 = vrot.slane %v2577_v54, 1  ;;  %v2651_v13 = vadd.f32 %v2650_v60, %v2649_v6  ;;  %v2598_v5 = vadd.f32 %v2597_v49, %v2596_v59  ;;  %v3532_v48 = vrot.slane %v3531_v30, 2  ;;  %15891 = vst [vmem:[#allocation100_spill] sm:$0xff] %v11342_v62  ;;  %v11344_v8 = vpop.f32.mrb[95].mxu0 }
 0x68b   :  { %v3513_v44 = vrot.slane %v3512_v47, 1  ;;  %v3586_v40 = vadd.f32 %v3585_v33, %v3584_v46  ;;  %v2671_v63 = vrot.slane %v2670_v12, 2  ;;  %v3603_v11 = vadd.f32 %v3602_v10, %v3567_v14  ;;  %15892 = vst [vmem:[#allocation101_spill] sm:$0xff] %v11344_v8 }
 0x68c   :  { %v2579_v16 = vadd.f32 %v2578_v0, %v2577_v54  ;;  %v2652_v22 = vrot.slane %v2651_v13, 1  ;;  %v2599_v35 = vrot.slane %v2598_v5, 1  ;;  %v3533_v49 = vadd.f32 %v3532_v48, %v3531_v30 }
 0x68d   :  { %v3514_v23 = vadd.f32 %v3513_v44, %v3512_v47  ;;  %v3587_v60 = vrot.slane %v3586_v40, 1  ;;  %v2672_v46 = vadd.f32 %v2671_v63, %v2670_v12  ;;  %v3604_v54 = vrot.slane %v3603_v11, 4 }
 0x68e   :  { %v2653_v6 = vadd.f32 %v2652_v22, %v2651_v13  ;;  %v11346_v59 = vmul.f32 0.0078125, %v2579_v16  ;;  %v2600_v1 = vadd.f32 %v2599_v35, %v2598_v5  ;;  %v3534_v0 = vrot.slane %v3533_v49, 1 }
 0x68f   :  { %v3588_v33 = vadd.f32 %v3587_v60, %v3586_v40  ;;  %v11348_v28 = vmul.f32 0.0078125, %v3514_v23  ;;  %v2673_v47 = vrot.slane %v2672_v46, 1  ;;  %v3605_v48 = vadd.f32 %v3604_v54, %v3603_v11  ;;  %v11360_v16 = vpop.f32.mrb[96].mxu0 }
 0x690   :  { %v2677_v4 = vmul.f32 0.0078125, %v2653_v6  ;;  %v2679_v21 = vmul.f32 %v11346_v59, %v11346_v59  ;;  %v11352_v44 = vmul.f32 0.0078125, %v2600_v1  ;;  %v3535_v13 = vadd.f32 %v3534_v0, %v3533_v49  ;;  %15893 = vst [vmem:[#allocation102_spill] sm:$0xff] %v11360_v16  ;;  %v11366_v60 = vpop.f32.mrb[97].mxu0 }
 0x691   :  { %v3612_v30 = vmul.f32 0.0078125, %v3588_v33  ;;  %v3614_v10 = vmul.f32 %v11348_v28, %v11348_v28  ;;  %v2674_v12 = vadd.f32 %v2673_v47, %v2672_v46  ;;  %v4471_v14 = vmul.f32 %v11316_v24, %v11316_v24  ;;  %15894 = vst [vmem:[#allocation103_spill] sm:$0xff] %v11366_v60  ;;  %v11372_v6 = vpop.f32.mrb[98].mxu0 }
 0x692   :  { %v2681_v5 = vsub.f32 %v2677_v4, %v2679_v21  ;;  %v2680_v40 = vmul.f32 %v11352_v44, %v11352_v44  ;;  %v3606_v35 = vrot.slane %v3605_v48, 2  ;;  %v11362_v63 = vmul.f32 0.0078125, %v3535_v13  ;;  %15895 = vst [vmem:[#allocation104_spill] sm:$0xff] %v11372_v6  ;;  %v11378_v54 = vpop.f32.mrb[99].mxu0 }
 0x693   :  { %v3616_v22 = vsub.f32 %v3612_v30, %v3614_v10  ;;  %v4472_v23 = vmul.f32 %v11320_v26, %v11320_v26  ;;  %v2678_v21 = vmul.f32 0.0078125, %v2674_v12  ;;  %v4429_v4 = vadd.f32 %v11323_v53, %v11316_v24  ;;  %15896 = vst [vmem:[#allocation105_spill] sm:$0xff] %v11378_v54 }
 0x694   :  { %v2683_v49 = vmax.f32 %v2681_v5, 0.0  ;;  %v4473_v11 = vmul.f32 %v11323_v53, %v11323_v53  ;;  %v3607_v46 = vadd.f32 %v3606_v35, %v3605_v48  ;;  %v3615_v33 = vmul.f32 %v11362_v63, %v11362_v63 }
 0x695   :  { %v3618_v1 = vmax.f32 %v3616_v22, 0.0  ;;  %v4450_v0 = vadd.f32 %v11328_v38, %v11320_v26  ;;  %v2682_v30 = vsub.f32 %v2678_v21, %v2680_v40  ;;  %v4474_v13 = vmul.f32 %v11328_v38, %v11328_v38 }
 0x696   :  { %v2685_v47 = vadd.f32 1e-05, %v2683_v49  ;;  %v4503_v10 = vadd.f32 %v4473_v11, %v4471_v14  ;;  %v3608_v12 = vrot.slane %v3607_v46, 1  ;;  %v4430_v24 = vadd.f32 %v4429_v4, %v11336_v42 }
 0x697   :  { %v3620_v5 = vadd.f32 1e-05, %v3618_v1  ;;  %v4475_v48 = vmul.f32 %v11336_v42, %v11336_v42  ;;  %v2684_v22 = vmax.f32 %v2682_v30, 0.0  ;;  %v4524_v35 = vadd.f32 %v4474_v13, %v4472_v23  ;;  %v11392_v1 = vpop.f32.mrb[100].mxu0 }
 0x698   :  { %9760 = vrsqrt.f32 %v2685_v47  ;;  %v4451_v26 = vadd.f32 %v4450_v0, %v11340_v19  ;;  %v3609_v53 = vadd.f32 %v3608_v12, %v3607_v46  ;;  %v4476_v40 = vmul.f32 %v11340_v19, %v11340_v19  ;;  %15897 = vst [vmem:[#allocation106_spill] sm:$0xff] %v11392_v1  ;;  %v11398_v30 = vpop.f32.mrb[101].mxu0 }
 0x699   :  { %9762 = vrsqrt.f32 %v3620_v5  ;;  %v4504_v49 = vadd.f32 %v4503_v10, %v4475_v48  ;;  %v2686_v14 = vadd.f32 1e-05, %v2684_v22  ;;  %v4431_v21 = vadd.f32 %v4430_v24, %v11342_v62  ;;  %15898 = vst [vmem:[#allocation107_spill] sm:$0xff] %v11398_v30  ;;  %v11404_v13 = vpop.f32.mrb[102].mxu0 }
 0x69a   :  { %v4477_v4 = vmul.f32 %v11342_v62, %v11342_v62  ;;  %v4452_v11 = vadd.f32 %v4451_v26, %v11344_v8  ;;  %v3613_v47 = vmul.f32 0.0078125, %v3609_v53  ;;  %v4525_v23 = vadd.f32 %v4524_v35, %v4476_v40  ;;  %15899 = vst [vmem:[#allocation108_spill] sm:$0xff] %v11404_v13  ;;  %v11411_v48 = vpop.f32.mrb[103].mxu0 }
 0x69b   :  { %v4478_v0 = vmul.f32 %v11344_v8, %v11344_v8  ;;  %v1831_v46 = vmul.f32 %v11254_v9, %v10857_v58  ;;  %9764 = vrsqrt.f32 %v2686_v14  ;;  %v1832_v24 = vmul.f32 %v11257_v56, %v10864_v3  ;;  %15900 = vst [vmem:[#allocation109_spill] sm:$0xff] %v11411_v48 }
 0x69c   :  { %v4505_v10 = vadd.f32 %v4504_v49, %v4477_v4  ;;  %v1821_v26 = vmul.f32 %v11254_v9, %v10787_v18  ;;  %v3617_v53 = vsub.f32 %v3613_v47, %v3615_v33  ;;  %v1822_v58 = vmul.f32 %v11257_v56, %v10791_v25 }
 0x69d   :  { %v11406_v5 = vadd.f32 %v4525_v23, %v4478_v0  ;;  %v1874_v12 = vadd.f32 %v11334_v41, %v1831_v46  ;;  %v1875_v22 = vadd.f32 %v11326_v52, %v1832_v24  ;;  %v1838_v3 = vmul.f32 %v11257_v56, %v10793_v39 }
 0x69e   :  { %v1864_v35 = vadd.f32 %v11334_v41, %v1821_v26  ;;  %v1840_v18 = vmul.f32 %v11257_v56, %v10813_v57  ;;  %v3619_v33 = vmax.f32 %v3617_v53, 0.0  ;;  %v1865_v40 = vadd.f32 %v11326_v52, %v1822_v58 }
 0x69f   :  { %v11419_v49 = vmax.f32 %v1874_v12, 0.0  ;;  %v1842_v25 = vmul.f32 %v11257_v56, %v10827_v29  ;;  %v11424_v14 = vmax.f32 %v1875_v22, 0.0  ;;  %v1844_v47 = vmul.f32 %v11257_v56, %v10841_v61  ;;  %v11442_v12 = vpop.f32.mrb[104].mxu0 }
 0x6a0   :  { %v11426_v4 = vmax.f32 %v1864_v35, 0.0  ;;  %v1845_v39 = vmul.f32 %v11254_v9, %v10848_v36  ;;  %v3621_v23 = vadd.f32 1e-05, %v3619_v33  ;;  %v11432_v57 = vmax.f32 %v1865_v40, 0.0  ;;  %15905 = vst [vmem:[#allocation114_spill] sm:$0xff] %v11442_v12  ;;  %v11450_v35 = vpop.f32.mrb[105].mxu0 }
 0x6a1   :  { %15901 = vst [vmem:[#allocation110_spill] sm:$0xff] %v11419_v49  ;;  %15902 = vst [vmem:[#allocation111_spill] sm:$0xff] %v11424_v14  ;;  %v1846_v0 = vmul.f32 %v11257_v56, %v10855_v51  ;;  %v1881_v46 = vadd.f32 %v11326_v52, %v1838_v3  ;;  %v1995_v29 = vmax.f32 %v11419_v49, %v11424_v14 }
 0x6a2   :  { %15903 = vst [vmem:[#allocation112_spill] sm:$0xff] %v11426_v4  ;;  %15904 = vst [vmem:[#allocation113_spill] sm:$0xff] %v11432_v57  ;;  %v9761_v24 = vpop.eup %9760  ;;  %v1883_v26 = vadd.f32 %v11326_v52, %v1840_v18  ;;  %v1885_v53 = vadd.f32 %v11326_v52, %v1842_v25  ;;  %v1887_v61 = vadd.f32 %v11326_v52, %v1844_v47  ;;  %9766 = vrsqrt.f32 %v3621_v23  ;;  %v11460_v25 = vpop.f32.mrb[106].mxu0 }
 0x6a3   :  { %v11444_v36 = vpop.eup %9762  ;;  %v1980_v51 = vmax.f32 %v11426_v4, %v11432_v57  ;;  %v1888_v58 = vadd.f32 %v11334_v41, %v1845_v39  ;;  %v1889_v22 = vadd.f32 %v11326_v52, %v1846_v0  ;;  %15906 = vst [vmem:[#allocation115_spill] sm:$0xff] %v11450_v35  ;;  %1996 = vmax.xlane.f32.xlu0 %v1995_v29  ;;  %v11452_v3 = vmax.f32 %v1881_v46, 0.0  ;;  %v11470_v46 = vpop.f32.mrb[107].mxu0 }
 0x6a4   :  { %v11454_v18 = vmax.f32 %v1883_v26, 0.0  ;;  %v11456_v33 = vmax.f32 %v1885_v53, 0.0  ;;  %v11458_v40 = vmax.f32 %v1887_v61, 0.0  ;;  %v1823_v39 = vmul.f32 %v11254_v9, %v10795_v32 }
 0x6a5   :  { %15907 = vst [vmem:[#allocation116_spill] sm:$0xff] %v11452_v3  ;;  %1981 = vmax.xlane.f32.xlu1 %v1980_v51  ;;  %v11462_v47 = vmax.f32 %v1888_v58, 0.0  ;;  %v11464_v23 = vmax.f32 %v1889_v22, 0.0  ;;  %v1824_v0 = vmul.f32 %v11257_v56, %v10805_v37  ;;  %v9765_v29 = vpop.eup %9764  ;;  %v4432_v53 = vadd.f32 %v4431_v21, %v11360_v16 }
 0x6a6   :  { %15908 = vst [vmem:[#allocation117_spill] sm:$0xff] %v11454_v18  ;;  %15909 = vst [vmem:[#allocation118_spill] sm:$0xff] %v11456_v33  ;;  %v1967_v26 = vmax.f32 %v11452_v3, %v11454_v18  ;;  %v4479_v61 = vmul.f32 %v11360_v16, %v11360_v16  ;;  %v4453_v51 = vadd.f32 %v4452_v11, %v11366_v60 }
 0x6a7   :  { %15910 = vst [vmem:[#allocation119_spill] sm:$0xff] %v11458_v40  ;;  %15911 = vst [vmem:[#allocation120_spill] sm:$0xff] %v11462_v47  ;;  %v2691_v58 = vcombine.low %v9761_v24, %v9765_v29  ;;  %v2016_v32 = vmax.f32 %v11462_v47, %v11464_v23  ;;  %v1866_v22 = vadd.f32 %v11334_v41, %v1823_v39 }
 0x6a8   :  { %15912 = vst [vmem:[#allocation121_spill] sm:$0xff] %v11464_v23  ;;  %v1867_v37 = vadd.f32 %v11326_v52, %v1824_v0  ;;  %v1968_v8 = vmax.f32 %v1967_v26, %v11456_v33  ;;  %v4506_v62 = vadd.f32 %v4505_v10, %v4479_v61  ;;  %v4480_v19 = vmul.f32 %v11366_v60, %v11366_v60  ;;  %v2557_v10 = vld [vmem:[%s15267_s14 + $0x2] sm:$0x3]  ;;  %v11505_v61 = vpop.f32.mrb[108].mxu0 }
 0x6a9   :  { %v11486_v21 = vadd.f32 %v4432_v53, %v11372_v6  ;;  %v2698_v16 = vrot.slane %v2691_v58, %v10878_v2  ;;  %2017 = vmax.xlane.f32.xlu0 %v2016_v32  ;;  %v11489_v11 = vmax.f32 %v1866_v22, 0.0  ;;  %v4481_v39 = vmul.f32 %v11372_v6, %v11372_v6  ;;  %v11510_v22 = vpop.f32.mrb[109].mxu0 }
 0x6aa   :  { %v11491_v24 = vmax.f32 %v1867_v37, 0.0  ;;  %v1969_v0 = vmax.f32 %v1968_v8, %v11458_v40  ;;  %v4527_v29 = vadd.f32 %v11406_v5, %v4480_v19  ;;  %v11501_v26 = vadd.f32 %v4453_v51, %v11378_v54  ;;  %v11519_v51 = vpop.f32.mrb[110].mxu0 }
 0x6ab   :  { %15913 = vst [vmem:[#allocation122_spill] sm:$0xff] %v11489_v11  ;;  %v4482_v53 = vmul.f32 %v11378_v54, %v11378_v54  ;;  %v2705_v58 = vrot.slane %v2698_v16, %v10878_v2  ;;  %v11513_v8 = vadd.f32 %v4506_v62, %v4481_v39  ;;  %v1848_v5 = vmul.f32 %v11257_v56, %v10869_v45  ;;  %v11527_v39 = vpop.f32.mrb[111].mxu0 }
 0x6ac   :  { %15914 = vst [vmem:[#allocation123_spill] sm:$0xff] %v11491_v24  ;;  %v1983_v32 = vmax.f32 %v11489_v11, %v11491_v24  ;;  %v1970_v37 = vmax.f32 %v1969_v0, %v11464_v23  ;;  %v9767_v54 = vpop.eup %9766  ;;  %v1849_v16 = vmul.f32 %v11254_v9, %v10887_v43  ;;  %v1850_v60 = vmul.f32 %v11257_v56, %v10898_v55 }
 0x6ad   :  { %v11515_v19 = vadd.f32 %v4527_v29, %v4482_v53  ;;  %v2707_v6 = vmul.f32 %v2705_v58, %v2557_v10  ;;  %v1825_v62 = vmul.f32 %v11254_v9, %v10815_v20  ;;  %15915 = vst [vmem:[#allocation124_spill] sm:$0xff] %v11527_v39  ;;  %v3626_v0 = vcombine.low %v11444_v36, %v9767_v54  ;;  %v15916_v10 = vld [vmem:[#allocation20_spill] sm:$0xff] }
 0x6ae   :  { %1984 = vmax.xlane.f32.xlu1 %v1983_v32  ;;  %v1891_v45 = vadd.f32 %v11326_v52, %v1848_v5  ;;  %v1826_v29 = vmul.f32 %v11257_v56, %v10822_v50  ;;  %v1827_v53 = vmul.f32 %v11254_v9, %v15916_v10  ;;  %v1892_v20 = vadd.f32 %v11334_v41, %v1849_v16 }
 0x6af   :  { %v11536_v43 = vrot.slane %v2707_v6, %v10224_v15  ;;  %v11539_v55 = vrot.slane %v2707_v6, %v10922_v7  ;;  %v1893_v58 = vadd.f32 %v11326_v52, %v1850_v60  ;;  %v3633_v54 = vrot.slane %v3626_v0, %v10878_v2  ;;  %v3492_v60 = vld [vmem:[%s15267_s14 + $0x4] sm:$0x3] }
 0x6b0   :  { %v11544_v36 = vmax.f32 %v1891_v45, 0.0  ;;  %v1868_v32 = vadd.f32 %v11334_v41, %v1825_v62  ;;  %v1869_v50 = vadd.f32 %v11326_v52, %v1826_v29  ;;  %v11557_v16 = vmax.f32 %v1892_v20, 0.0 }
 0x6b1   :  { %15917 = vst [vmem:[#allocation20_spill] sm:$0xff] %v11539_v55  ;;  %v2719_v5 = vmul.f32 %v11536_v43, %v11346_v59  ;;  %v2720_v10 = vmul.f32 %v11539_v55, %v11352_v44  ;;  %v2771_v6 = vmul.f32 %v11539_v55, %v11292_v27  ;;  %v3640_v0 = vrot.slane %v3633_v54, %v10878_v2  ;;  %v11565_v59 = vpop.f32.mrb[112].mxu0  ;;  %v15924_v27 = vld [vmem:[#allocation22_spill] sm:$0xff] }
 0x6b2   :  { %15918 = vst [vmem:[#allocation125_spill] sm:$0xff] %v11544_v36  ;;  %15919 = vst [vmem:[#allocation126_spill] sm:$0xff] %v11557_v16  ;;  %v11560_v62 = vmax.f32 %v1893_v58, 0.0  ;;  %v1971_v45 = vmax.f32 %v1970_v37, %v11544_v36  ;;  %v11563_v29 = vmax.f32 %v1868_v32, 0.0  ;;  %v11567_v23 = vmax.f32 %v1869_v50, 0.0  ;;  %v11572_v20 = vpop.f32.mrb[113].mxu0 }
 0x6b3   :  { %15922 = vst [vmem:[#allocation129_spill] sm:$0xff] %v11565_v59  ;;  %v2723_v44 = vcombine.low %v2719_v5, %v2720_v10  ;;  %v1828_v42 = vmul.f32 %v11257_v56, %v15924_v27  ;;  %v1870_v38 = vadd.f32 %v11334_v41, %v1827_v53  ;;  %15925 = vst [vmem:[#allocation22_spill] sm:$0xff] %v11572_v20  ;;  %v11578_v54 = vpop.f32.mrb[114].mxu0 }
 0x6b4   :  { %15920 = vst [vmem:[#allocation127_spill] sm:$0xff] %v11560_v62  ;;  %15921 = vst [vmem:[#allocation128_spill] sm:$0xff] %v11563_v29  ;;  %v3642_v55 = vmul.f32 %v3640_v0, %v3492_v60  ;;  %v1941_v58 = vmax.f32 %v11432_v57, %v11491_v24  ;;  %v2022_v37 = vmax.f32 %v11557_v16, %v11560_v62  ;;  %v11586_v10 = vpop.f32.mrb[115].mxu0  ;;  %v2558_v60 = vld [vmem:[%s15268_s15 + $0x2] sm:$0x3] }
 0x6b5   :  { %15923 = vst [vmem:[#allocation130_spill] sm:$0xff] %v11567_v23  ;;  %15926 = vst [vmem:[#allocation131_spill] sm:$0xff] %v11578_v54  ;;  %v2730_v32 = vrot.slane %v2723_v44, %v10878_v2  ;;  %v1928_v50 = vmax.f32 %v11426_v4, %v11489_v11  ;;  %v1986_v5 = vmax.f32 %v11563_v29, %v11567_v23  ;;  %v11598_v24 = vmax.f32 %v1870_v38, 0.0 }
 0x6b6   :  { %v1871_v53 = vadd.f32 %v11326_v52, %v1828_v42  ;;  %15927 = vst [vmem:[#allocation132_spill] sm:$0xff] %v11586_v10  ;;  %v11592_v0 = vrot.slane %v3642_v55, %v10224_v15  ;;  %v11595_v27 = vrot.slane %v3642_v55, %v10922_v7  ;;  %v1972_v44 = vmax.f32 %v1971_v45, %v11560_v62 }
 0x6b7   :  { %2023 = vmax.xlane.f32.xlu0 %v2022_v37  ;;  %15928 = vst [vmem:[#allocation133_spill] sm:$0xff] %v11598_v24  ;;  %v2737_v11 = vrot.slane %v2730_v32, %v10878_v2  ;;  %1987 = vmax.xlane.f32.xlu1 %v1986_v5  ;;  %v4434_v57 = vadd.f32 %v11486_v21, %v11392_v1  ;;  %v11613_v37 = vmax.f32 %v11331_v17, 0.0 }
 0x6b8   :  { %v11601_v42 = vmax.f32 %v1871_v53, 0.0  ;;  %v4483_v4 = vmul.f32 %v11392_v1, %v11392_v1  ;;  %v3654_v55 = vmul.f32 %v11592_v0, %v11348_v28  ;;  %v3655_v45 = vmul.f32 %v11595_v27, %v11362_v63  ;;  %v11623_v1 = vpop.f32.mrb[116].mxu0 }
 0x6b9   :  { %v1942_v38 = vmax.f32 %v1941_v58, %v11567_v23  ;;  %15930 = vst [vmem:[#allocation135_spill] sm:$0xff] %v11613_v37  ;;  %v2739_v32 = vsub.f32 %v2558_v60, %v2737_v11  ;;  %v1929_v5 = vmax.f32 %v1928_v50, %v11563_v29  ;;  %v4455_v28 = vadd.f32 %v11501_v26, %v11398_v30  ;;  %v15936_v29 = vld [vmem:[#allocation24_spill] sm:$0xff] }
 0x6ba   :  { %15929 = vst [vmem:[#allocation134_spill] sm:$0xff] %v11601_v42  ;;  %v1989_v21 = vmax.f32 %v11598_v24, %v11601_v42  ;;  %v3658_v53 = vcombine.low %v3654_v55, %v3655_v45  ;;  %v4508_v62 = vadd.f32 %v11513_v8, %v4483_v4  ;;  %v4484_v63 = vmul.f32 %v11398_v30, %v11398_v30  ;;  %v11632_v4 = vpop.f32.mrb[117].mxu0 }
 0x6bb   :  { %15931 = vst [vmem:[#allocation136_spill] sm:$0xff] %v11623_v1  ;;  %v11626_v17 = vrot.slane %v2739_v32, %v10922_v7  ;;  %v1973_v11 = vmax.f32 %v1972_v44, %v11613_v37  ;;  %v4435_v58 = vadd.f32 %v4434_v57, %v11404_v13  ;;  %v4485_v50 = vmul.f32 %v11404_v13, %v11404_v13  ;;  %v11639_v45 = vpop.f32.mrb[118].mxu0 }
 0x6bc   :  { %1990 = vmax.xlane.f32.xlu1 %v1989_v21  ;;  %15932 = vst [vmem:[#allocation137_spill] sm:$0xff] %v11632_v4  ;;  %v1943_v26 = vmax.f32 %v1942_v38, %v11601_v42  ;;  %v4529_v8 = vadd.f32 %v11515_v19, %v4484_v63  ;;  %v4456_v60 = vadd.f32 %v4455_v28, %v11411_v48  ;;  %15933 = vst [vmem:[#allocation138_spill] sm:$0xff] %v11639_v45  ;;  %v15935_v21 = vld [vmem:[#allocation23_spill] sm:$0xff]  ;;  %v11648_v38 = vpop.f32.mrb[119].mxu0  ;;  %v15937_v63 = vld [vmem:[#allocation25_spill] sm:$0xff] }
 0x6bd   :  { %v4486_v55 = vmul.f32 %v11411_v48, %v11411_v48  ;;  %v11642_v44 = vadd.f32 %v11626_v17, %v2771_v6  ;;  %v4509_v57 = vadd.f32 %v4508_v62, %v4485_v50  ;;  %v1829_v23 = vmul.f32 %v11254_v9, %v15935_v21  ;;  %v15938_v48 = vld [vmem:[#allocation27_spill] sm:$0xff] }
 0x6be   :  { %v1830_v13 = vmul.f32 %v11257_v56, %v15936_v29  ;;  %v3665_v19 = vrot.slane %v3658_v53, %v10878_v2  ;;  %v1833_v42 = vmul.f32 %v11254_v9, %v15937_v63  ;;  %v1834_v30 = vmul.f32 %v11257_v56, %v15938_v48 }
 0x6bf   :  { %15934 = vst [vmem:[#allocation139_spill] sm:$0xff] %v11642_v44  ;;  %v4530_v28 = vadd.f32 %v4529_v8, %v4486_v55  ;;  %v1930_v6 = vmax.f32 %v1929_v5, %v11598_v24  ;;  %v1872_v62 = vadd.f32 %v11334_v41, %v1829_v23  ;;  %v4436_v21 = vadd.f32 %v4435_v58, %v11442_v12 }
 0x6c0   :  { %v1873_v50 = vadd.f32 %v11326_v52, %v1830_v13  ;;  %v1876_v29 = vadd.f32 %v11334_v41, %v1833_v42  ;;  %v1877_v44 = vadd.f32 %v11326_v52, %v1834_v30  ;;  %v4487_v53 = vmul.f32 %v11442_v12, %v11442_v12  ;;  %v3493_v30 = vld [vmem:[%s15268_s15 + $0x4] sm:$0x3] }
 0x6c1   :  { %v11663_v8 = vmax.f32 %v1872_v62, 0.0  ;;  %v4457_v48 = vadd.f32 %v4456_v60, %v11450_v35  ;;  %v4488_v23 = vmul.f32 %v11450_v35, %v11450_v35  ;;  %v3672_v13 = vrot.slane %v3665_v19, %v10878_v2 }
 0x6c2   :  { %v11665_v55 = vmax.f32 %v1873_v50, 0.0  ;;  %v1974_v5 = vrot.slane %v1973_v11, 4  ;;  %v11671_v58 = vmax.f32 %v1876_v29, 0.0  ;;  %v11673_v42 = vmax.f32 %v1877_v44, 0.0 }
 0x6c3   :  { %15939 = vst [vmem:[#allocation23_spill] sm:$0xff] %v11663_v8  ;;  %v1931_v60 = vmax.f32 %v1930_v6, %v11663_v8  ;;  %v4510_v50 = vadd.f32 %v4509_v57, %v4487_v53  ;;  %v11683_v24 = vrot.slane %v2739_v32, %v10224_v15  ;;  %v4531_v19 = vadd.f32 %v4530_v28, %v4488_v23  ;;  %v15943_v32 = vld [vmem:[#allocation28_spill] sm:$0xff]  ;;  %v15944_v6 = vld [vmem:[#allocation29_spill] sm:$0xff] }
 0x6c4   :  { %15940 = vst [vmem:[#allocation24_spill] sm:$0xff] %v11665_v55  ;;  %15941 = vst [vmem:[#allocation25_spill] sm:$0xff] %v11671_v58  ;;  %v1944_v63 = vmax.f32 %v1943_v26, %v11665_v55  ;;  %v1992_v62 = vmax.f32 %v11663_v8, %v11665_v55  ;;  %v4437_v29 = vadd.f32 %v4436_v21, %v11460_v25 }
 0x6c5   :  { %15942 = vst [vmem:[#allocation27_spill] sm:$0xff] %v11673_v42  ;;  %v1932_v35 = vmax.f32 %v1931_v60, %v11419_v49  ;;  %v4489_v26 = vmul.f32 %v11460_v25, %v11460_v25  ;;  %v4458_v12 = vadd.f32 %v4457_v48, %v11470_v46  ;;  %v11691_v55 = vsub.f32 %v3493_v30, %v3672_v13  ;;  %v15994_v49 = vld [vmem:[#allocation89_spill] sm:$0xff] }
 0x6c6   :  { %1993 = vmax.xlane.f32.xlu1 %v1992_v62  ;;  %v1945_v44 = vmax.f32 %v1944_v63, %v11424_v14  ;;  %v4490_v57 = vmul.f32 %v11470_v46, %v11470_v46  ;;  %v1835_v28 = vmul.f32 %v11254_v9, %v15943_v32  ;;  %v1836_v21 = vmul.f32 %v11257_v56, %v15944_v6  ;;  %v15945_v32 = vld [vmem:[#allocation17_spill] sm:$0xff]  ;;  %v15946_v56 = vld [vmem:[#allocation18_spill] sm:$0xff]  ;;  %v15947_v6 = vld [vmem:[#allocation19_spill] sm:$0xff] }
 0x6c7   :  { %v1998_v23 = vmax.f32 %v11671_v58, %v11673_v42  ;;  %v4511_v63 = vadd.f32 %v4510_v50, %v4489_v26  ;;  %v1975_v62 = vmax.f32 %v1973_v11, %v1974_v5  ;;  %v1933_v48 = vmax.f32 %v1932_v35, %v11671_v58  ;;  %v15950_v35 = vld [vmem:[#allocation21_spill] sm:$0xff] }
 0x6c8   :  { %v1946_v53 = vmax.f32 %v1945_v44, %v11673_v42  ;;  %v4532_v13 = vadd.f32 %v4531_v19, %v4490_v57  ;;  %v1878_v30 = vadd.f32 %v11334_v41, %v1835_v28  ;;  %v1879_v60 = vadd.f32 %v11326_v52, %v1836_v21 }
 0x6c9   :  { %v1976_v14 = vrot.slane %v1975_v62, 2  ;;  %v1837_v8 = vmul.f32 %v11254_v9, %v15945_v32  ;;  %v1839_v44 = vmul.f32 %v11254_v9, %v15946_v56  ;;  %v1841_v42 = vmul.f32 %v11254_v9, %v15947_v6 }
 0x6ca   :  { %1999 = vmax.xlane.f32.xlu1 %v1998_v23  ;;  %v11711_v50 = vmax.f32 %v1878_v30, 0.0  ;;  %v11713_v11 = vmax.f32 %v1879_v60, 0.0  ;;  %v1843_v5 = vmul.f32 %v11254_v9, %v15950_v35  ;;  %v1847_v52 = vmul.f32 %v11254_v9, %v10862_v31 }
 0x6cb   :  { %v1977_v19 = vmax.f32 %v1975_v62, %v1976_v14  ;;  %v1851_v26 = vmul.f32 %v11254_v9, %v10907_v34  ;;  %v1880_v57 = vadd.f32 %v11334_v41, %v1837_v8  ;;  %v1882_v28 = vadd.f32 %v11334_v41, %v1839_v44 }
 0x6cc   :  { %15948 = vst [vmem:[#allocation28_spill] sm:$0xff] %v11711_v50  ;;  %15949 = vst [vmem:[#allocation29_spill] sm:$0xff] %v11713_v11  ;;  %v1947_v21 = vmax.f32 %v1946_v53, %v11713_v11  ;;  %v2001_v23 = vmax.f32 %v11711_v50, %v11713_v11  ;;  %v1934_v30 = vmax.f32 %v1933_v48, %v11711_v50  ;;  %v9375_v11 = vld [vmem:[#allocation5 + $0x288] ss:$16 sps:$4 sm:$0xff]  }
 0x6cd   :  { %v1884_v60 = vadd.f32 %v11334_v41, %v1841_v42  ;;  %v1978_v32 = vrot.slane %v1977_v19, 1  ;;  %v1886_v31 = vadd.f32 %v11334_v41, %v1843_v5  ;;  %v1890_v14 = vadd.f32 %v11334_v41, %v1847_v52 }
 0x6ce   :  { %v1894_v34 = vadd.f32 %v11334_v41, %v1851_v26  ;;  %v1948_v9 = vrot.slane %v1947_v21, 4  ;;  %2002 = vmax.xlane.f32.xlu1 %v2001_v23  ;;  %v1935_v8 = vrot.slane %v1934_v30, 4  ;;  %v11731_v62 = vmax.f32 %v1880_v57, 0.0 }
 0x6cf   :  { %v11733_v53 = vmax.f32 %v1882_v28, 0.0  ;;  %v1979_v56 = vmax.f32 %v1977_v19, %v1978_v32  ;;  %v11735_v44 = vmax.f32 %v1884_v60, 0.0  ;;  %v11737_v48 = vmax.f32 %v1886_v31, 0.0 }
 0x6d0   :  { %15951 = vst [vmem:[#allocation17_spill] sm:$0xff] %v11731_v62  ;;  %v11739_v42 = vmax.f32 %v1890_v14, 0.0  ;;  %v1949_v6 = vmax.f32 %v1947_v21, %v1948_v9  ;;  %v1936_v35 = vmax.f32 %v1934_v30, %v1935_v8  ;;  %v11741_v5 = vmax.f32 %v1894_v34, 0.0 }
 0x6d1   :  { %15952 = vst [vmem:[#allocation18_spill] sm:$0xff] %v11733_v53  ;;  %15953 = vst [vmem:[#allocation19_spill] sm:$0xff] %v11735_v44  ;;  %v1954_v41 = vmax.f32 %v11731_v62, %v11733_v53  ;;  %v2004_v52 = vmax.f32 %v11731_v62, %v11452_v3  ;;  %v4438_v26 = vadd.f32 %v4437_v29, %v11505_v61 }
 0x6d2   :  { %15954 = vst [vmem:[#allocation21_spill] sm:$0xff] %v11737_v48  ;;  %15955 = vst [vmem:[#allocation140_spill] sm:$0xff] %v11739_v42  ;;  %v4491_v19 = vmul.f32 %v11505_v61, %v11505_v61  ;;  %v4459_v57 = vadd.f32 %v4458_v12, %v11510_v22  ;;  %v1937_v28 = vrot.slane %v1936_v35, 2  ;;  %v1950_v23 = vrot.slane %v1949_v6, 2 }
 0x6d3   :  { %15956 = vst [vmem:[#allocation141_spill] sm:$0xff] %v11741_v5  ;;  %v1955_v21 = vmax.f32 %v1954_v41, %v11735_v44  ;;  %v4492_v30 = vmul.f32 %v11510_v22, %v11510_v22  ;;  %2005 = vmax.xlane.f32.xlu1 %v2004_v52  ;;  %v4439_v32 = vadd.f32 %v4438_v26, %v11519_v51 }
 0x6d4   :  { %v4512_v60 = vadd.f32 %v4511_v63, %v4491_v19  ;;  %v4493_v31 = vmul.f32 %v11519_v51, %v11519_v51  ;;  %v4460_v29 = vadd.f32 %v4459_v57, %v11527_v39  ;;  %v1938_v14 = vmax.f32 %v1936_v35, %v1937_v28 }
 0x6d5   :  { %v1951_v34 = vmax.f32 %v1949_v6, %v1950_v23  ;;  %v1956_v12 = vmax.f32 %v1955_v21, %v11737_v48  ;;  %v4533_v9 = vadd.f32 %v4532_v13, %v4492_v30  ;;  %v4494_v41 = vmul.f32 %v11527_v39, %v11527_v39 }
 0x6d6   :  { %v4513_v8 = vadd.f32 %v4512_v60, %v4493_v31  ;;  %v2007_v52 = vmax.f32 %v11733_v53, %v11454_v18  ;;  %v2010_v63 = vmax.f32 %v11735_v44, %v11456_v33  ;;  %v1939_v26 = vrot.slane %v1938_v14, 1  ;;  %v15976_v18 = vld [vmem:[#allocation38_spill] sm:$0xff] }
 0x6d7   :  { %v1952_v19 = vrot.slane %v1951_v34, 1  ;;  %v1957_v3 = vmax.f32 %v1956_v12, %v11462_v47  ;;  %v4440_v35 = vadd.f32 %v4439_v32, %v11565_v59  ;;  %v4534_v6 = vadd.f32 %v4533_v9, %v4494_v41 }
 0x6d8   :  { %2008 = vmax.xlane.f32.xlu1 %v2007_v52  ;;  %v4495_v13 = vmul.f32 %v11565_v59, %v11565_v59  ;;  %v4461_v57 = vadd.f32 %v4460_v29, %v11572_v20  ;;  %v4496_v28 = vmul.f32 %v11572_v20, %v11572_v20  ;;  %v11772_v23 = vmax.f32 %v1938_v14, %v1939_v26  ;;  %v9407_v20 = vld [vmem:[#allocation5 + $0x32c] ss:$16 sps:$4 sm:$0xff]   ;;  %v9405_v59 = vld [vmem:[#allocation5 + $0x328] ss:$16 sps:$4 sm:$0xff]  }
 0x6d9   :  { %v1953_v21 = vmax.f32 %v1951_v34, %v1952_v19  ;;  %v1958_v30 = vmax.f32 %v1957_v3, %v11739_v42  ;;  %v4441_v60 = vadd.f32 %v4440_v35, %v11578_v54  ;;  %v4497_v32 = vmul.f32 %v11578_v54, %v11578_v54 }
 0x6da   :  { %v4514_v31 = vadd.f32 %v4513_v8, %v4495_v13  ;;  %v4535_v12 = vadd.f32 %v4534_v6, %v4496_v28  ;;  %v4462_v9 = vadd.f32 %v4461_v57, %v11586_v10  ;;  %v4498_v14 = vmul.f32 %v11586_v10, %v11586_v10 }
 0x6db   :  { %v5674_v41 = vsel %vm5665_vm3, %v1979_v56, %v1953_v21  ;;  %v1959_v29 = vmax.f32 %v1958_v30, %v11557_v16  ;;  %v2013_v34 = vmax.f32 %v11737_v48, %v11458_v40  ;;  %v2019_v8 = vmax.f32 %v11739_v42, %v11544_v36  ;;  %v15960_v48 = vld [vmem:[#allocation67_spill] sm:$0xff] }
 0x6dc   :  { %v5702_v3 = vpack.c.bf16 %v5674_v41, %v5674_v41  ;;  %2011 = vmax.xlane.f32.xlu1 %v2010_v63  ;;  %v4515_v52 = vadd.f32 %v4514_v31, %v4497_v32  ;;  %v4442_v26 = vadd.f32 %v4441_v60, %v11623_v1  ;;  %v4536_v35 = vadd.f32 %v4535_v12, %v4498_v14  ;;  %v15957_v32 = vld [vmem:[#allocation35_spill] sm:$0xff]  ;;  %v15958_v41 = vld [vmem:[#allocation37_spill] sm:$0xff] }
 0x6dd   :  { %v1960_v19 = vmax.f32 %v1959_v29, %v11741_v5  ;;  %v4499_v56 = vmul.f32 %v11623_v1, %v11623_v1  ;;  %v4463_v6 = vadd.f32 %v4462_v9, %v11632_v4  ;;  %v4500_v13 = vmul.f32 %v11632_v4, %v11632_v4  ;;  %v15959_v29 = vld [vmem:[#allocation20_spill] sm:$0xff]  ;;  %v9381_v16 = vld [vmem:[#allocation5 + $0x2a8] ss:$16 sps:$4 sm:$0xff]   ;;  %v15999_v1 = vld [vmem:[#allocation66_spill] sm:$0xff] }
 0x6de   :  { %7277 = vmatprep.mubr.bf16.mxu1 %v5702_v3  ;;  %7441 = vmatprep.mubr.bf16.mxu0 %v5702_v3  ;;  %v4443_v63 = vadd.f32 %v4442_v26, %v11639_v45  ;;  %v4501_v57 = vmul.f32 %v11639_v45, %v11639_v45  ;;  %v4502_v60 = vmul.f32 %v11648_v38, %v11648_v38  ;;  %v15998_v4 = vld [vmem:[#allocation64_spill] sm:$0xff] }
 0x6df   :  { %v1961_v28 = vrot.slane %v1960_v19, 4  ;;  %v4516_v21 = vadd.f32 %v4515_v52, %v4499_v56  ;;  %v4464_v30 = vadd.f32 %v4463_v6, %v11648_v38  ;;  %v4537_v31 = vadd.f32 %v4536_v35, %v4500_v13 }
 0x6e0   :  { %2014 = vmax.xlane.f32.xlu1 %v2013_v34  ;;  %v4444_v12 = vrot.slane %v4443_v63, 4  ;;  %v2742_v9 = vmul.f32 %v11536_v43, %v15957_v32  ;;  %v2743_v14 = vmul.f32 %v15959_v29, %v15958_v41  ;;  %v2025_v52 = vmax.f32 %v11741_v5, %v11613_v37 }
 0x6e1   :  { %v1962_v3 = vmax.f32 %v1960_v19, %v1961_v28  ;;  %v4517_v26 = vadd.f32 %v4516_v21, %v4501_v57  ;;  %v4465_v36 = vrot.slane %v4464_v30, 4  ;;  %v4538_v6 = vadd.f32 %v4537_v31, %v4502_v60  ;;  %v15962_v31 = vld [vmem:[#allocation69_spill] sm:$0xff] }
 0x6e2   :  { %v4445_v56 = vadd.f32 %v4444_v12, %v4443_v63  ;;  %v2785_v42 = vadd.f32 %v11683_v24, %v2742_v9  ;;  %v2786_v34 = vadd.f32 %v11626_v17, %v2743_v14  ;;  %v2758_v32 = vmul.f32 %v11536_v43, %v15960_v48 }
 0x6e3   :  { %v1963_v35 = vrot.slane %v1962_v3, 2  ;;  %v4518_v13 = vrot.slane %v4517_v26, 4  ;;  %v4466_v40 = vadd.f32 %v4465_v36, %v4464_v30  ;;  %v4539_v19 = vrot.slane %v4538_v6, 4 }
 0x6e4   :  { %2020 = vmax.xlane.f32.xlu1 %v2019_v8  ;;  %v4446_v41 = vrot.slane %v4445_v56, 2  ;;  %v11810_v57 = vmax.f32 %v2785_v42, 0.0  ;;  %v11812_v28 = vmax.f32 %v2786_v34, 0.0  ;;  %v2759_v12 = vmul.f32 %v15959_v29, %v15962_v31  ;;  %v15966_v31 = vld [vmem:[#allocation33_spill] sm:$0xff] }
 0x6e5   :  { %v1964_v21 = vmax.f32 %v1962_v3, %v1963_v35  ;;  %v4519_v63 = vadd.f32 %v4518_v13, %v4517_v26  ;;  %v4467_v60 = vrot.slane %v4466_v40, 2  ;;  %v4540_v14 = vadd.f32 %v4539_v19, %v4538_v6  ;;  %v15964_v26 = vld [vmem:[#allocation31_spill] sm:$0xff] }
 0x6e6   :  { %15961 = vst [vmem:[#allocation35_spill] sm:$0xff] %v11812_v28  ;;  %v4447_v9 = vadd.f32 %v4446_v41, %v4445_v56  ;;  %v2902_v36 = vmax.f32 %v11810_v57, %v11812_v28  ;;  %v2801_v48 = vadd.f32 %v11683_v24, %v2758_v32  ;;  %v2802_v42 = vadd.f32 %v11626_v17, %v2759_v12  ;;  %v9348_v12 = vld [vmem:[#allocation5 + $0x200] ss:$16 sps:$4 sm:$0xff]  }
 0x6e7   :  { %v1965_v8 = vrot.slane %v1964_v21, 1  ;;  %v4520_v30 = vrot.slane %v4519_v63, 2  ;;  %v4468_v37 = vadd.f32 %v4467_v60, %v4466_v40  ;;  %v4541_v5 = vrot.slane %v4540_v14, 2 }
 0x6e8   :  { %v4448_v34 = vrot.slane %v4447_v9, 1  ;;  %2903 = vmax.xlane.f32.xlu0 %v2902_v36  ;;  %2026 = vmax.xlane.f32.xlu1 %v2025_v52  ;;  %v11820_v3 = vmax.f32 %v2801_v48, 0.0  ;;  %v2740_v56 = vmul.f32 %v11536_v43, %v15964_v26  ;;  %v11824_v41 = vmax.f32 %v2802_v42, 0.0  ;;  %v9351_v36 = vld [vmem:[#allocation5 + $0x208] ss:$16 sps:$4 sm:$0xff]  }
 0x6e9   :  { %v1966_v6 = vmax.f32 %v1964_v21, %v1965_v8  ;;  %v4521_v35 = vadd.f32 %v4520_v30, %v4519_v63  ;;  %v4469_v13 = vrot.slane %v4468_v37, 1  ;;  %v4542_v19 = vadd.f32 %v4541_v5, %v4540_v14  ;;  %v9356_v8 = vld [vmem:[#allocation5 + $0x224] ss:$16 sps:$4 sm:$0xff]   ;;  %v9359_v30 = vld [vmem:[#allocation5 + $0x22c] ss:$16 sps:$4 sm:$0xff]  }
 0x6ea   :  { %15963 = vst [vmem:[#allocation37_spill] sm:$0xff] %v11820_v3  ;;  %15965 = vst [vmem:[#allocation20_spill] sm:$0xff] %v11824_v41  ;;  %v4449_v32 = vadd.f32 %v4448_v34, %v4447_v9  ;;  %v2741_v40 = vmul.f32 %v15959_v29, %v15966_v31  ;;  %v2783_v60 = vadd.f32 %v11683_v24, %v2740_v56 }
 0x6eb   :  { %v5673_v52 = vsel %vm5665_vm3, %v1966_v6, %v11772_v23  ;;  %v4522_v48 = vrot.slane %v4521_v35, 1  ;;  %v4470_v33 = vadd.f32 %v4469_v13, %v4468_v37  ;;  %v2926_v21 = vmax.f32 %v11820_v3, %v11824_v41  ;;  %v15968_v23 = vld [vmem:[#allocation71_spill] sm:$0xff] }
 0x6ec   :  { %v5701_v63 = vpack.c.bf16 %v5673_v52, %v5673_v52  ;;  %v11833_v9 = vmul.f32 0.0078125, %v4449_v32  ;;  %v4543_v5 = vrot.slane %v4542_v19, 1  ;;  %v2784_v14 = vadd.f32 %v11626_v17, %v2741_v40  ;;  %v15970_v32 = vld [vmem:[#allocation73_spill] sm:$0xff] }
 0x6ed   :  { %v4523_v42 = vadd.f32 %v4522_v48, %v4521_v35  ;;  %v11836_v34 = vmul.f32 0.0078125, %v4470_v33  ;;  %2927 = vmax.xlane.f32.xlu0 %v2926_v21  ;;  %v11838_v26 = vmax.f32 %v2783_v60, 0.0  ;;  %v2760_v37 = vmul.f32 %v11536_v43, %v15968_v23  ;;  %v9354_v35 = vld [vmem:[#allocation5 + $0x220] ss:$16 sps:$4 sm:$0xff]   ;;  %v9357_v40 = vld [vmem:[#allocation5 + $0x228] ss:$16 sps:$4 sm:$0xff]  }
 0x6ee   :  { %7278 = vmatmul.mubr.bf16.vlgmr.msra.gmra.mrb[72].mxu1 %v5701_v63  ;;  %7442 = vmatmul.mubr.bf16.vlgmr.msra.gmra.mrb[120].mxu0 %v5701_v63  ;;  %v4549_v56 = vmul.f32 %v11833_v9, %v11833_v9  ;;  %v4544_v6 = vadd.f32 %v4543_v5, %v4542_v19  ;;  %v11844_v13 = vmax.f32 %v2784_v14, 0.0  ;;  %v2761_v31 = vmul.f32 %v15959_v29, %v15970_v32  ;;  %v9362_v21 = vld [vmem:[#allocation5 + $0x244] ss:$16 sps:$4 sm:$0xff]   ;;  %v9365_v63 = vld [vmem:[#allocation5 + $0x24c] ss:$16 sps:$4 sm:$0xff]  }
 0x6ef   :  { %15967 = vst [vmem:[#allocation67_spill] sm:$0xff] %v11838_v26  ;;  %v11850_v33 = vrot.slane %v11691_v55, %v10224_v15  ;;  %7287 = vmatpush1.bf16.msra.mxu1 %v9348_v12  ;;  %7451 = vmatpush1.bf16.msra.mxu0 %v9351_v36  ;;  %v4547_v60 = vmul.f32 0.0078125, %v4523_v42  ;;  %v4550_v52 = vmul.f32 %v11836_v34, %v11836_v34  ;;  %v15972_v23 = vld [vmem:[#allocation63_spill] sm:$0xff]  ;;  %v15973_v32 = vld [vmem:[#allocation65_spill] sm:$0xff] }
 0x6f0   :  { %15969 = vst [vmem:[#allocation69_spill] sm:$0xff] %v11844_v13  ;;  %v2803_v48 = vadd.f32 %v11683_v24, %v2760_v37  ;;  %v11857_v19 = vrot.slane %v11691_v55, %v10922_v7  ;;  %7288 = vmatprep.subr.bf16.mxu1 %v9356_v8  ;;  %7452 = vmatprep.subr.bf16.mxu0 %v9359_v30  ;;  %v4548_v5 = vmul.f32 0.0078125, %v4544_v6  ;;  %v15975_v30 = vld [vmem:[#allocation36_spill] sm:$0xff] }
 0x6f1   :  { %v2899_v12 = vmax.f32 %v11838_v26, %v11844_v13  ;;  %v2804_v36 = vadd.f32 %v11626_v17, %v2761_v31  ;;  %v4551_v14 = vsub.f32 %v4547_v60, %v4549_v56  ;;  %v2756_v37 = vmul.f32 %v11536_v43, %v15972_v23  ;;  %v9360_v56 = vld [vmem:[#allocation5 + $0x240] ss:$16 sps:$4 sm:$0xff]   ;;  %v9363_v31 = vld [vmem:[#allocation5 + $0x248] ss:$16 sps:$4 sm:$0xff]  }
 0x6f2   :  { %v11862_v42 = vmax.f32 %v2803_v48, 0.0  ;;  %v2757_v55 = vmul.f32 %v15959_v29, %v15973_v32  ;;  %v4552_v44 = vsub.f32 %v4548_v5, %v4550_v52  ;;  %v3677_v6 = vmul.f32 %v11592_v0, %v15975_v30  ;;  %v15977_v32 = vld [vmem:[#allocation39_spill] sm:$0xff] }
 0x6f3   :  { %2900 = vmax.xlane.f32.xlu1 %v2899_v12  ;;  %v11868_v8 = vmax.f32 %v2804_v36, 0.0  ;;  %v3678_v53 = vmul.f32 %v11595_v27, %v15976_v18  ;;  %7289 = vmatpush1.bf16.msra.mxu1 %v9354_v35  ;;  %v4553_v60 = vmax.f32 %v4551_v14, 0.0  ;;  %v2799_v48 = vadd.f32 %v11683_v24, %v2756_v37  ;;  %v9368_v5 = vld [vmem:[#allocation5 + $0x264] ss:$16 sps:$4 sm:$0xff]   ;;  %v9371_v12 = vld [vmem:[#allocation5 + $0x26c] ss:$16 sps:$4 sm:$0xff]  }
 0x6f4   :  { %15971 = vst [vmem:[#allocation31_spill] sm:$0xff] %v11862_v42  ;;  %7453 = vmatpush1.bf16.msra.mxu0 %v9357_v40  ;;  %v2800_v23 = vadd.f32 %v11626_v17, %v2757_v55  ;;  %v2744_v52 = vmul.f32 %v11536_v43, %v15977_v32  ;;  %7290 = vmatprep.subr.bf16.mxu1 %v9362_v21  ;;  %v4554_v36 = vmax.f32 %v4552_v44, 0.0  ;;  %v15980_v55 = vld [vmem:[#allocation41_spill] sm:$0xff] }
 0x6f5   :  { %15974 = vst [vmem:[#allocation33_spill] sm:$0xff] %v11868_v8  ;;  %7454 = vmatprep.subr.bf16.mxu0 %v9365_v63  ;;  %v2929_v18 = vmax.f32 %v11862_v42, %v11868_v8  ;;  %v3720_v35 = vadd.f32 %v11850_v33, %v3677_v6  ;;  %v3721_v40 = vadd.f32 %v11857_v19, %v3678_v53  ;;  %v4555_v14 = vadd.f32 1e-05, %v4553_v60  ;;  %v9366_v6 = vld [vmem:[#allocation5 + $0x260] ss:$16 sps:$4 sm:$0xff]  }
 0x6f6   :  { %v11882_v30 = vmax.f32 %v2799_v48, 0.0  ;;  %v11884_v37 = vmax.f32 %v2800_v23, 0.0  ;;  %v2745_v32 = vmul.f32 %v15959_v29, %v15980_v55  ;;  %v4556_v21 = vadd.f32 1e-05, %v4554_v36  ;;  %v9369_v53 = vld [vmem:[#allocation5 + $0x268] ss:$16 sps:$4 sm:$0xff]  }
 0x6f7   :  { %2930 = vmax.xlane.f32.xlu0 %v2929_v18  ;;  %v11888_v63 = vmax.f32 %v3720_v35, 0.0  ;;  %v11890_v44 = vmax.f32 %v3721_v40, 0.0  ;;  %v2787_v62 = vadd.f32 %v11683_v24, %v2744_v52  ;;  %7291 = vmatpush1.bf16.msra.mxu1 %v9360_v56  ;;  %9768 = vrsqrt.f32 %v4555_v14  ;;  %v9374_v48 = vld [vmem:[#allocation5 + $0x284] ss:$16 sps:$4 sm:$0xff]   ;;  %v9377_v23 = vld [vmem:[#allocation5 + $0x28c] ss:$16 sps:$4 sm:$0xff]  }
 0x6f8   :  { %15978 = vst [vmem:[#allocation71_spill] sm:$0xff] %v11882_v30  ;;  %15979 = vst [vmem:[#allocation73_spill] sm:$0xff] %v11884_v37  ;;  %7455 = vmatpush1.bf16.msra.mxu0 %v9363_v31  ;;  %v2923_v60 = vmax.f32 %v11882_v30, %v11884_v37  ;;  %7292 = vmatprep.subr.bf16.mxu1 %v9368_v5  ;;  %9770 = vrsqrt.f32 %v4556_v21  ;;  %v2788_v18 = vadd.f32 %v11626_v17, %v2745_v32  ;;  %v15983_v56 = vld [vmem:[#allocation68_spill] sm:$0xff]  ;;  %v15984_v52 = vld [vmem:[#allocation70_spill] sm:$0xff] }
 0x6f9   :  { %15981 = vst [vmem:[#allocation63_spill] sm:$0xff] %v11890_v44  ;;  %7456 = vmatprep.subr.bf16.mxu0 %v9371_v12  ;;  %v3837_v36 = vmax.f32 %v11888_v63, %v11890_v44  ;;  %v11898_v35 = vmax.f32 %v2787_v62, 0.0  ;;  %v3693_v31 = vmul.f32 %v11592_v0, %v15983_v56  ;;  %v3694_v40 = vmul.f32 %v11595_v27, %v15984_v52  ;;  %v15985_v14 = vld [vmem:[#allocation32_spill] sm:$0xff]  ;;  %v15987_v21 = vld [vmem:[#allocation34_spill] sm:$0xff]  ;;  %v15988_v32 = vld [vmem:[#allocation77_spill] sm:$0xff] }
 0x6fa   :  { %2924 = vmax.xlane.f32.xlu1 %v2923_v60  ;;  %v3675_v5 = vmul.f32 %v11592_v0, %v15985_v14  ;;  %v2886_v12 = vmax.f32 %v11884_v37, %v11824_v41  ;;  %v11908_v55 = vmax.f32 %v2788_v18, 0.0  ;;  %v3676_v62 = vmul.f32 %v11595_v27, %v15987_v21  ;;  %v9372_v56 = vld [vmem:[#allocation5 + $0x280] ss:$16 sps:$4 sm:$0xff]   ;;  %v9383_v18 = vld [vmem:[#allocation5 + $0x2ac] ss:$16 sps:$4 sm:$0xff]  }
 0x6fb   :  { %15982 = vst [vmem:[#allocation65_spill] sm:$0xff] %v11898_v35  ;;  %3838 = vmax.xlane.f32.xlu0 %v3837_v36  ;;  %v2763_v60 = vmul.f32 %v15959_v29, %v15988_v32  ;;  %7293 = vmatpush1.bf16.msra.mxu1 %v9366_v6  ;;  %v3736_v52 = vadd.f32 %v11850_v33, %v3693_v31  ;;  %v9380_v36 = vld [vmem:[#allocation5 + $0x2a4] ss:$16 sps:$4 sm:$0xff]  }
 0x6fc   :  { %15986 = vst [vmem:[#allocation36_spill] sm:$0xff] %v11908_v55  ;;  %7457 = vmatpush1.bf16.msra.mxu0 %v9369_v53  ;;  %v3737_v14 = vadd.f32 %v11857_v19, %v3694_v40  ;;  %v3718_v50 = vadd.f32 %v11850_v33, %v3675_v5  ;;  %7294 = vmatprep.subr.bf16.mxu1 %v9374_v48  ;;  %v15989_v32 = vld [vmem:[#allocation75_spill] sm:$0xff]  ;;  %v15991_v40 = vld [vmem:[#allocation81_spill] sm:$0xff] }
 0x6fd   :  { %7458 = vmatprep.subr.bf16.mxu0 %v9377_v23  ;;  %v2905_v21 = vmax.f32 %v11898_v35, %v11908_v55  ;;  %v3719_v37 = vadd.f32 %v11857_v19, %v3676_v62  ;;  %v2762_v6 = vmul.f32 %v11536_v43, %v15989_v32  ;;  %v11922_v53 = vmax.f32 %v3736_v52, 0.0  ;;  %v15993_v5 = vld [vmem:[#allocation85_spill] sm:$0xff] }
 0x6fe   :  { %v11924_v41 = vmax.f32 %v3737_v14, 0.0  ;;  %v11926_v31 = vmax.f32 %v3718_v50, 0.0  ;;  %v2765_v48 = vmul.f32 %v15959_v29, %v15991_v40  ;;  %v2767_v58 = vmul.f32 %v15959_v29, %v15993_v5  ;;  %v15995_v52 = vld [vmem:[#allocation93_spill] sm:$0xff]  ;;  %v9378_v50 = vld [vmem:[#allocation5 + $0x2a0] ss:$16 sps:$4 sm:$0xff]  }
 0x6ff   :  { %2906 = vmax.xlane.f32.xlu1 %v2905_v21  ;;  %v11930_v23 = vmax.f32 %v3719_v37, 0.0  ;;  %v2769_v62 = vmul.f32 %v15959_v29, %v15994_v49  ;;  %v2805_v32 = vadd.f32 %v11683_v24, %v2762_v6  ;;  %v3706_v14 = vmul.f32 %v11595_v27, %v15995_v52  ;;  %7295 = vmatpush1.bf16.msra.mxu1 %v9372_v56  ;;  %v9386_v40 = vld [vmem:[#allocation5 + $0x2c4] ss:$16 sps:$4 sm:$0xff]   ;;  %v9389_v5 = vld [vmem:[#allocation5 + $0x2cc] ss:$16 sps:$4 sm:$0xff]  }
 0x700   :  { %15990 = vst [vmem:[#allocation38_spill] sm:$0xff] %v11924_v41  ;;  %7459 = vmatpush1.bf16.msra.mxu0 %v9375_v11  ;;  %v3861_v21 = vmax.f32 %v11922_v53, %v11924_v41  ;;  %v2806_v37 = vadd.f32 %v11626_v17, %v2763_v60  ;;  %7296 = vmatprep.subr.bf16.mxu1 %v9380_v36 }
 0x701   :  { %15992 = vst [vmem:[#allocation39_spill] sm:$0xff] %v11930_v23  ;;  %7460 = vmatprep.subr.bf16.mxu0 %v9383_v18  ;;  %v3834_v49 = vmax.f32 %v11926_v31, %v11930_v23  ;;  %v2808_v6 = vadd.f32 %v11626_v17, %v2765_v48  ;;  %v11945_v47 = vmax.f32 %v2805_v32, 0.0  ;;  %v9769_v56 = vpop.eup %9768  ;;  %v11948_v11 = vadd.f32 %v11857_v19, %v3706_v14 }
 0x702   :  { %3862 = vmax.xlane.f32.xlu0 %v3861_v21  ;;  %v2810_v52 = vadd.f32 %v11626_v17, %v2767_v58  ;;  %v2812_v60 = vadd.f32 %v11626_v17, %v2769_v62  ;;  %v11952_v36 = vmax.f32 %v2806_v37, 0.0  ;;  %v9771_v18 = vpop.eup %9770  ;;  %v2860_v48 = vmax.f32 %v11844_v13, %v11812_v28  ;;  %v9384_v58 = vld [vmem:[#allocation5 + $0x2c0] ss:$16 sps:$4 sm:$0xff]   ;;  %v9387_v62 = vld [vmem:[#allocation5 + $0x2c8] ss:$16 sps:$4 sm:$0xff]  }
 0x703   :  { %15996 = vst [vmem:[#allocation41_spill] sm:$0xff] %v11945_v47  ;;  %3835 = vmax.xlane.f32.xlu1 %v3834_v49  ;;  %v2887_v32 = vmax.f32 %v2886_v12, %v11868_v8  ;;  %v3691_v14 = vmul.f32 %v11592_v0, %v15998_v4  ;;  %v4561_v21 = vcombine.low %v9769_v56, %v9771_v18  ;;  %v9392_v13 = vld [vmem:[#allocation5 + $0x2e4] ss:$16 sps:$4 sm:$0xff]   ;;  %v9395_v49 = vld [vmem:[#allocation5 + $0x2ec] ss:$16 sps:$4 sm:$0xff]   ;;  %v11965_v28 = vmax.f32 %v2808_v6, 0.0 }
 0x704   :  { %15997 = vst [vmem:[#allocation68_spill] sm:$0xff] %v11952_v36  ;;  %7297 = vmatpush1.bf16.msra.mxu1 %v9378_v50  ;;  %7461 = vmatpush1.bf16.msra.mxu0 %v9381_v16  ;;  %v2873_v37 = vmax.f32 %v11882_v30, %v11820_v3  ;;  %v3692_v45 = vmul.f32 %v11595_v27, %v15999_v1  ;;  %v16001_v18 = vld [vmem:[#allocation72_spill] sm:$0xff]  ;;  %v4427_v6 = vld [vmem:[%s15267_s14 + $0x6] sm:$0x3]  ;;  %v11998_v10 = vmax.f32 %v2812_v60, 0.0 }
 0x705   :  { %7298 = vmatprep.subr.bf16.mxu1 %v9386_v40  ;;  %7462 = vmatprep.subr.bf16.mxu0 %v9389_v5  ;;  %16000 = vst [vmem:[#allocation70_spill] sm:$0xff] %v11965_v28  ;;  %v2888_v12 = vmax.f32 %v2887_v32, %v11952_v36  ;;  %v2932_v4 = vmax.f32 %v11945_v47, %v11952_v36  ;;  %v16002_v40 = vld [vmem:[#allocation74_spill] sm:$0xff]  ;;  %v11980_v32 = vmax.f32 %v2810_v52, 0.0 }
 0x706   :  { %v3734_v16 = vadd.f32 %v11850_v33, %v3691_v14  ;;  %v4568_v50 = vrot.slane %v4561_v21, %v10878_v2  ;;  %v3735_v56 = vadd.f32 %v11857_v19, %v3692_v45  ;;  %v3695_v1 = vmul.f32 %v11592_v0, %v16001_v18  ;;  %v16004_v21 = vld [vmem:[#allocation45_spill] sm:$0xff]  ;;  %v9390_v18 = vld [vmem:[#allocation5 + $0x2e0] ss:$16 sps:$4 sm:$0xff]   ;;  %16007 = vst [vmem:[#allocation77_spill] sm:$0xff] %v11998_v10 }
 0x707   :  { %v3696_v5 = vmul.f32 %v11595_v27, %v16002_v40  ;;  %16003 = vst [vmem:[#allocation32_spill] sm:$0xff] %v11980_v32  ;;  %v2889_v36 = vmax.f32 %v2888_v12, %v11965_v28  ;;  %2933 = vmax.xlane.f32.xlu0 %v2932_v4  ;;  %v2747_v45 = vmul.f32 %v15959_v29, %v16004_v21  ;;  %v9393_v40 = vld [vmem:[#allocation5 + $0x2e8] ss:$16 sps:$4 sm:$0xff]   ;;  %v9398_v12 = vld [vmem:[#allocation5 + $0x304] ss:$16 sps:$4 sm:$0xff]  }
 0x708   :  { %v11983_v14 = vmax.f32 %v3734_v16, 0.0  ;;  %v4575_v8 = vrot.slane %v4568_v50, %v10878_v2  ;;  %7299 = vmatpush1.bf16.msra.mxu1 %v9384_v58  ;;  %7463 = vmatpush1.bf16.msra.mxu0 %v9387_v62  ;;  %v11988_v30 = vmax.f32 %v3735_v56, 0.0  ;;  %v3738_v3 = vadd.f32 %v11850_v33, %v3695_v1  ;;  %v9401_v4 = vld [vmem:[#allocation5 + $0x30c] ss:$16 sps:$4 sm:$0xff]   ;;  %v16006_v50 = vld [vmem:[#allocation49_spill] sm:$0xff]  ;;  %v16008_v1 = vld [vmem:[#allocation43_spill] sm:$0xff] }
 0x709   :  { %v3739_v52 = vadd.f32 %v11857_v19, %v3696_v5  ;;  %7300 = vmatprep.subr.bf16.mxu1 %v9392_v13  ;;  %7464 = vmatprep.subr.bf16.mxu0 %v9395_v49  ;;  %v11993_v16 = vmax.f32 %v2860_v48, %v11908_v55  ;;  %v2890_v21 = vmax.f32 %v2889_v36, %v11980_v32  ;;  %v16010_v48 = vld [vmem:[#allocation53_spill] sm:$0xff]  ;;  %v9396_v60 = vld [vmem:[#allocation5 + $0x300] ss:$16 sps:$4 sm:$0xff]  }
 0x70a   :  { %16005 = vst [vmem:[#allocation34_spill] sm:$0xff] %v11988_v30  ;;  %v2749_v58 = vmul.f32 %v15959_v29, %v16006_v50  ;;  %v4577_v62 = vmul.f32 %v4575_v8, %v4427_v6  ;;  %v12000_v56 = vmax.f32 %v3738_v3, 0.0  ;;  %v2746_v5 = vmul.f32 %v11536_v43, %v16008_v1  ;;  %v16011_v36 = vld [vmem:[#allocation57_spill] sm:$0xff] }
 0x70b   :  { %v3858_v13 = vmax.f32 %v11983_v14, %v11988_v30  ;;  %v12006_v49 = vmax.f32 %v3739_v52, 0.0  ;;  %v2751_v55 = vmul.f32 %v15959_v29, %v16010_v48  ;;  %v2753_v54 = vmul.f32 %v15959_v29, %v16011_v36  ;;  %v9399_v6 = vld [vmem:[#allocation5 + $0x308] ss:$16 sps:$4 sm:$0xff]   ;;  %v9404_v48 = vld [vmem:[#allocation5 + $0x324] ss:$16 sps:$4 sm:$0xff]  }
 0x70c   :  { %v12013_v8 = vrot.slane %v4577_v62, %v10224_v15  ;;  %v12016_v3 = vrot.slane %v4577_v62, %v10922_v7  ;;  %7301 = vmatpush1.bf16.msra.mxu1 %v9390_v18  ;;  %7465 = vmatpush1.bf16.msra.mxu0 %v9393_v40  ;;  %v2891_v50 = vmax.f32 %v2890_v21, %v11998_v10  ;;  %v16012_v52 = vld [vmem:[#allocation139_spill] sm:$0xff] }
 0x70d   :  { %16009 = vst [vmem:[#allocation75_spill] sm:$0xff] %v12006_v49  ;;  %v12020_v1 = vmax.f32 %v16012_v52, 0.0  ;;  %7302 = vmatprep.subr.bf16.mxu1 %v9398_v12  ;;  %7466 = vmatprep.subr.bf16.mxu0 %v9401_v4  ;;  %v12023_v36 = vmax.f32 %v2873_v37, %v11862_v42  ;;  %v3864_v62 = vmax.f32 %v12000_v56, %v12006_v49 }
 0x70e   :  { %v2789_v18 = vadd.f32 %v11683_v24, %v2746_v5  ;;  %v4589_v40 = vmul.f32 %v12013_v8, %v11833_v9  ;;  %v4590_v21 = vmul.f32 %v12016_v3, %v11836_v34  ;;  %v12034_v12 = vmul.f32 %v12016_v3, %v11648_v38  ;;  %3859 = vmax.xlane.f32.xlu1 %v3858_v13  ;;  %v9402_v34 = vld [vmem:[#allocation5 + $0x320] ss:$16 sps:$4 sm:$0xff]   ;;  %v16015_v38 = vld [vmem:[#allocation61_spill] sm:$0xff] }
 0x70f   :  { %16013 = vst [vmem:[#allocation81_spill] sm:$0xff] %v12020_v1  ;;  %v2790_v4 = vadd.f32 %v11626_v17, %v2747_v45  ;;  %3865 = vmax.xlane.f32.xlu0 %v3864_v62  ;;  %v2792_v37 = vadd.f32 %v11626_v17, %v2749_v58  ;;  %v2794_v52 = vadd.f32 %v11626_v17, %v2751_v55 }
 0x710   :  { %v2796_v5 = vadd.f32 %v11626_v17, %v2753_v54  ;;  %v12040_v42 = vmax.f32 %v2789_v18, 0.0  ;;  %v4593_v9 = vcombine.low %v4589_v40, %v4590_v21  ;;  %7303 = vmatpush1.bf16.msra.mxu1 %v9396_v60  ;;  %7467 = vmatpush1.bf16.msra.mxu0 %v9399_v6  ;;  %v2755_v13 = vmul.f32 %v15959_v29, %v16015_v38  ;;  %v9410_v54 = vld [vmem:[#allocation5 + $0x344] ss:$16 sps:$4 sm:$0xff]   ;;  %v9413_v60 = vld [vmem:[#allocation5 + $0x34c] ss:$16 sps:$4 sm:$0xff]  }
 0x711   :  { %v12042_v39 = vmax.f32 %v2790_v4, 0.0  ;;  %v2892_v45 = vmax.f32 %v2891_v50, %v12020_v1  ;;  %v16016_v55 = vmax.f32 %v11838_v26, %v11810_v57  ;;  %7304 = vmatprep.subr.bf16.mxu1 %v9404_v48  ;;  %7468 = vmatprep.subr.bf16.mxu0 %v9407_v20  ;;  %v3821_v62 = vmax.f32 %v11988_v30, %v11924_v41  ;;  %v4428_v48 = vld [vmem:[%s15268_s15 + $0x6] sm:$0x3]  ;;  %v16022_v41 = vld [vmem:[#allocation76_spill] sm:$0xff] }
 0x712   :  { %v12057_v18 = vmax.f32 %v2792_v37, 0.0  ;;  %v4600_v29 = vrot.slane %v4593_v9, %v10878_v2  ;;  %v2798_v20 = vadd.f32 %v11626_v17, %v2755_v13  ;;  %v16018_v4 = vld [vmem:[#allocation79_spill] sm:$0xff]  ;;  %v16019_v37 = vld [vmem:[#allocation40_spill] sm:$0xff]  ;;  %v16020_v9 = vld [vmem:[#allocation42_spill] sm:$0xff]  ;;  %v12075_v13 = vmax.f32 %v2794_v52, 0.0 }
 0x713   :  { %16014 = vst [vmem:[#allocation85_spill] sm:$0xff] %v12042_v39  ;;  %v12051_v58 = vmax.f32 %v16016_v55, %v11898_v35  ;;  %v2862_v50 = vmax.f32 %v11993_v16, %v12042_v39  ;;  %v2908_v40 = vmax.f32 %v12040_v42, %v12042_v39  ;;  %v2893_v21 = vrot.slane %v2892_v45, 4  ;;  %v9408_v39 = vld [vmem:[#allocation5 + $0x340] ss:$16 sps:$4 sm:$0xff]   ;;  %v9411_v17 = vld [vmem:[#allocation5 + $0x348] ss:$16 sps:$4 sm:$0xff]  }
 0x714   :  { %16017 = vst [vmem:[#allocation89_spill] sm:$0xff] %v12057_v18  ;;  %v2764_v38 = vmul.f32 %v11536_v43, %v16018_v4  ;;  %v3679_v55 = vmul.f32 %v11592_v0, %v16019_v37  ;;  %v3680_v6 = vmul.f32 %v11595_v27, %v16020_v9  ;;  %v4607_v16 = vrot.slane %v4600_v29, %v10878_v2  ;;  %v9416_v4 = vld [vmem:[#allocation5 + $0x364] ss:$16 sps:$4 sm:$0xff]   ;;  %v9419_v37 = vld [vmem:[#allocation5 + $0x36c] ss:$16 sps:$4 sm:$0xff]  }
 0x715   :  { %7305 = vmatpush1.bf16.msra.mxu1 %v9402_v34  ;;  %7469 = vmatpush1.bf16.msra.mxu0 %v9405_v59  ;;  %16021 = vst [vmem:[#allocation93_spill] sm:$0xff] %v12075_v13  ;;  %v2863_v30 = vmax.f32 %v2862_v50, %v12057_v18  ;;  %v3697_v35 = vmul.f32 %v11592_v0, %v16022_v41  ;;  %v12084_v59 = vmax.f32 %v2796_v5, 0.0  ;;  %v9414_v5 = vld [vmem:[#allocation5 + $0x360] ss:$16 sps:$4 sm:$0xff]  }
 0x716   :  { %7306 = vmatprep.subr.bf16.mxu1 %v9410_v54  ;;  %7470 = vmatprep.subr.bf16.mxu0 %v9413_v60  ;;  %v2894_v26 = vmax.f32 %v2892_v45, %v2893_v21  ;;  %v2807_v9 = vadd.f32 %v11683_v24, %v2764_v38  ;;  %v3722_v29 = vadd.f32 %v11850_v33, %v3679_v55  ;;  %v9422_v21 = vld [vmem:[#allocation5 + $0x384] ss:$16 sps:$4 sm:$0xff]   ;;  %v9425_v55 = vld [vmem:[#allocation5 + $0x38c] ss:$16 sps:$4 sm:$0xff]  }
 0x717   :  { %v12082_v34 = vsub.f32 %v4428_v48, %v4607_v16  ;;  %16023 = vst [vmem:[#allocation64_spill] sm:$0xff] %v12084_v59  ;;  %v2864_v52 = vmax.f32 %v2863_v30, %v12075_v13  ;;  %2909 = vmax.xlane.f32.xlu1 %v2908_v40  ;;  %v3723_v50 = vadd.f32 %v11857_v19, %v3680_v6  ;;  %v9417_v48 = vld [vmem:[#allocation5 + $0x368] ss:$16 sps:$4 sm:$0xff]   ;;  %v12098_v40 = vmax.f32 %v2798_v20, 0.0  ;;  %v16027_v16 = vld [vmem:[#allocation78_spill] sm:$0xff] }
 0x718   :  { %v2895_v2 = vrot.slane %v2894_v26, 2  ;;  %v12088_v41 = vmax.f32 %v2807_v9, 0.0  ;;  %v12090_v54 = vmax.f32 %v3722_v29, 0.0  ;;  %v3740_v45 = vadd.f32 %v11850_v33, %v3697_v35 }
 0x719   :  { %v12095_v60 = vrot.slane %v12082_v34, %v10922_v7  ;;  %7307 = vmatpush1.bf16.msra.mxu1 %v9408_v39  ;;  %7471 = vmatpush1.bf16.msra.mxu0 %v9411_v17  ;;  %v2865_v30 = vmax.f32 %v2864_v52, %v12084_v59  ;;  %16025 = vst [vmem:[#allocation72_spill] sm:$0xff] %v12098_v40  ;;  %v12100_v6 = vmax.f32 %v3723_v50, 0.0  ;;  %v9423_v50 = vld [vmem:[#allocation5 + $0x388] ss:$16 sps:$4 sm:$0xff]  }
 0x71a   :  { %16024 = vst [vmem:[#allocation66_spill] sm:$0xff] %v12088_v41  ;;  %7308 = vmatprep.subr.bf16.mxu1 %v9416_v4  ;;  %7472 = vmatprep.subr.bf16.mxu0 %v9419_v37  ;;  %v2896_v38 = vmax.f32 %v2894_v26, %v2895_v2  ;;  %v2935_v35 = vmax.f32 %v12088_v41, %v11965_v28  ;;  %v12121_v29 = vmax.f32 %v3740_v45, 0.0  ;;  %v16030_v2 = vld [vmem:[#allocation87_spill] sm:$0xff] }
 0x71b   :  { %16026 = vst [vmem:[#allocation74_spill] sm:$0xff] %v12100_v6  ;;  %v3698_v39 = vmul.f32 %v11595_v27, %v16027_v16  ;;  %v12108_v17 = vadd.f32 %v12095_v60, %v12034_v12  ;;  %v3795_v20 = vmax.f32 %v11930_v23, %v11890_v44  ;;  %v12113_v9 = vmax.f32 %v3821_v62, %v12006_v49  ;;  %v9420_v12 = vld [vmem:[#allocation5 + $0x380] ss:$16 sps:$4 sm:$0xff]   ;;  %v16028_v62 = vld [vmem:[#allocation47_spill] sm:$0xff] }
 0x71c   :  { %v2866_v4 = vmax.f32 %v2865_v30, %v12098_v40  ;;  %2936 = vmax.xlane.f32.xlu0 %v2935_v35  ;;  %v3840_v26 = vmax.f32 %v12090_v54, %v12100_v6  ;;  %v2748_v16 = vmul.f32 %v11536_v43, %v16028_v62  ;;  %v16029_v30 = vld [vmem:[#allocation83_spill] sm:$0xff]  ;;  %v2768_v35 = vmul.f32 %v11536_v43, %v16030_v2 }
 0x71d   :  { %v3741_v37 = vadd.f32 %v11857_v19, %v3698_v39  ;;  %7309 = vmatpush1.bf16.msra.mxu1 %v9414_v5  ;;  %7473 = vmatpush1.bf16.msra.mxu0 %v9417_v48  ;;  %v2766_v7 = vmul.f32 %v11536_v43, %v16029_v30  ;;  %v2897_v28 = vrot.slane %v2896_v38, 1  ;;  %v16031_v45 = vmax.f32 %v12023_v36, %v11945_v47  ;;  %v9428_v48 = vld [vmem:[#allocation5 + $0x3a4] ss:$16 sps:$4 sm:$0xff]   ;;  %v9431_v39 = vld [vmem:[#allocation5 + $0x3ac] ss:$16 sps:$4 sm:$0xff]  }
 0x71e   :  { %v2867_v52 = vrot.slane %v2866_v4, 4  ;;  %7310 = vmatprep.subr.bf16.mxu1 %v9422_v21  ;;  %7474 = vmatprep.subr.bf16.mxu0 %v9425_v55  ;;  %v16033_v23 = vld [vmem:[#allocation91_spill] sm:$0xff]  ;;  %v2791_v30 = vadd.f32 %v11683_v24, %v2748_v16  ;;  %v2811_v55 = vadd.f32 %v11683_v24, %v2768_v35  ;;  %v12141_v2 = vmax.f32 %v3795_v20, %v12100_v6 }
 0x71f   :  { %v2876_v5 = vmax.f32 %v16031_v45, %v12088_v41  ;;  %v12133_v49 = vmax.f32 %v3741_v37, 0.0  ;;  %v2770_v62 = vmul.f32 %v11536_v43, %v16033_v23  ;;  %3841 = vmax.xlane.f32.xlu1 %v3840_v26  ;;  %v2809_v21 = vadd.f32 %v11683_v24, %v2766_v7  ;;  %v16034_v45 = vld [vmem:[#allocation44_spill] sm:$0xff]  ;;  %v16035_v41 = vld [vmem:[#allocation46_spill] sm:$0xff]  ;;  %v9429_v16 = vld [vmem:[#allocation5 + $0x3a8] ss:$16 sps:$4 sm:$0xff]  }
 0x720   :  { %v2868_v44 = vmax.f32 %v2866_v4, %v2867_v52  ;;  %v3681_v37 = vmul.f32 %v11592_v0, %v16034_v45  ;;  %v3682_v47 = vmul.f32 %v11595_v27, %v16035_v41  ;;  %v9426_v4 = vld [vmem:[#allocation5 + $0x3a0] ss:$16 sps:$4 sm:$0xff]   ;;  %v12150_v26 = vmax.f32 %v2791_v30, 0.0  ;;  %v9434_v35 = vld [vmem:[#allocation5 + $0x3c4] ss:$16 sps:$4 sm:$0xff]  }
 0x721   :  { %16032 = vst [vmem:[#allocation45_spill] sm:$0xff] %v12133_v49  ;;  %v2813_v36 = vadd.f32 %v11683_v24, %v2770_v62  ;;  %7311 = vmatpush1.bf16.msra.mxu1 %v9420_v12  ;;  %7475 = vmatpush1.bf16.msra.mxu0 %v9423_v50  ;;  %v3867_v7 = vmax.f32 %v12121_v29, %v12133_v49  ;;  %v12152_v52 = vmax.f32 %v2809_v21, 0.0  ;;  %v9437_v50 = vld [vmem:[#allocation5 + $0x3cc] ss:$16 sps:$4 sm:$0xff]   ;;  %v12158_v6 = vmax.f32 %v2811_v55, 0.0 }
 0x722   :  { %v2869_v23 = vrot.slane %v2868_v44, 2  ;;  %v2898_v20 = vmax.f32 %v2896_v38, %v2897_v28  ;;  %7312 = vmatprep.subr.bf16.mxu1 %v9428_v48  ;;  %7476 = vmatprep.subr.bf16.mxu0 %v9431_v39  ;;  %v3724_v62 = vadd.f32 %v11850_v33, %v3681_v37  ;;  %v3725_v41 = vadd.f32 %v11857_v19, %v3682_v47  ;;  %v16039_v37 = vld [vmem:[#allocation80_spill] sm:$0xff] }
 0x723   :  { %16036 = vst [vmem:[#allocation49_spill] sm:$0xff] %v12152_v52  ;;  %3868 = vmax.xlane.f32.xlu0 %v3867_v7  ;;  %v2911_v12 = vmax.f32 %v12150_v26, %v12057_v18  ;;  %16037 = vst [vmem:[#allocation43_spill] sm:$0xff] %v12158_v6  ;;  %v2877_v30 = vmax.f32 %v2876_v5, %v12152_v52  ;;  %v3823_v28 = vmax.f32 %v12113_v9, %v12133_v49  ;;  %v9435_v9 = vld [vmem:[#allocation5 + $0x3c8] ss:$16 sps:$4 sm:$0xff]   ;;  %v16040_v7 = vld [vmem:[#allocation82_spill] sm:$0xff] }
 0x724   :  { %v2870_v45 = vmax.f32 %v2868_v44, %v2869_v23  ;;  %v12163_v38 = vmax.f32 %v2813_v36, 0.0  ;;  %v12165_v48 = vmax.f32 %v3724_v62, 0.0  ;;  %v12167_v39 = vmax.f32 %v3725_v41, 0.0  ;;  %v9432_v44 = vld [vmem:[#allocation5 + $0x3c0] ss:$16 sps:$4 sm:$0xff]   ;;  %v16044_v18 = vld [vmem:[#allocation51_spill] sm:$0xff] }
 0x725   :  { %2912 = vmax.xlane.f32.xlu1 %v2911_v12  ;;  %7313 = vmatpush1.bf16.msra.mxu1 %v9426_v4  ;;  %v2878_v21 = vmax.f32 %v2877_v30, %v12158_v6  ;;  %v2938_v55 = vmax.f32 %v12152_v52, %v11980_v32  ;;  %v3699_v5 = vmul.f32 %v11592_v0, %v16039_v37  ;;  %v9440_v23 = vld [vmem:[#allocation5 + $0x3e4] ss:$16 sps:$4 sm:$0xff]   ;;  %v16041_v4 = vld [vmem:[#allocation86_spill] sm:$0xff]  ;;  %v12181_v12 = vmax.f32 %v11948_v11, 0.0 }
 0x726   :  { %16038 = vst [vmem:[#allocation53_spill] sm:$0xff] %v12163_v38  ;;  %v2871_v47 = vrot.slane %v2870_v45, 1  ;;  %7477 = vmatpush1.bf16.msra.mxu0 %v9429_v16  ;;  %7314 = vmatprep.subr.bf16.mxu1 %v9434_v35  ;;  %v3843_v36 = vmax.f32 %v12165_v48, %v12167_v39  ;;  %v3700_v62 = vmul.f32 %v11595_v27, %v16040_v7  ;;  %v9443_v16 = vld [vmem:[#allocation5 + $0x3ec] ss:$16 sps:$4 sm:$0xff]  }
 0x727   :  { %v3702_v41 = vmul.f32 %v11595_v27, %v16041_v4  ;;  %16042 = vst [vmem:[#allocation57_spill] sm:$0xff] %v12181_v12  ;;  %7478 = vmatprep.subr.bf16.mxu0 %v9437_v50  ;;  %v2879_v37 = vmax.f32 %v2878_v21, %v12163_v38  ;;  %2939 = vmax.xlane.f32.xlu0 %v2938_v55  ;;  %v16043_v32 = vld [vmem:[#allocation90_spill] sm:$0xff]  ;;  %v16046_v21 = vld [vmem:[#allocation55_spill] sm:$0xff] }
 0x728   :  { %v2872_v30 = vmax.f32 %v2870_v45, %v2871_v47  ;;  %v3742_v35 = vadd.f32 %v11850_v33, %v3699_v5  ;;  %v3704_v52 = vmul.f32 %v11595_v27, %v16043_v32  ;;  %v3743_v49 = vadd.f32 %v11857_v19, %v3700_v62  ;;  %v9438_v50 = vld [vmem:[#allocation5 + $0x3e0] ss:$16 sps:$4 sm:$0xff]   ;;  %v9441_v62 = vld [vmem:[#allocation5 + $0x3e8] ss:$16 sps:$4 sm:$0xff]  }
 0x729   :  { %v3745_v7 = vadd.f32 %v11857_v19, %v3702_v41  ;;  %v2750_v4 = vmul.f32 %v11536_v43, %v16044_v18  ;;  %v2880_v45 = vrot.slane %v2879_v37, 4  ;;  %3844 = vmax.xlane.f32.xlu1 %v3843_v36  ;;  %7315 = vmatpush1.bf16.msra.mxu1 %v9432_v44  ;;  %v2752_v55 = vmul.f32 %v11536_v43, %v16046_v21  ;;  %v16049_v36 = vld [vmem:[#allocation59_spill] sm:$0xff] }
 0x72a   :  { %v5682_v11 = vsel %vm5665_vm3, %v2898_v20, %v2872_v30  ;;  %v12192_v47 = vmax.f32 %v3742_v35, 0.0  ;;  %v3808_v32 = vmax.f32 %v11983_v14, %v11922_v53  ;;  %7479 = vmatpush1.bf16.msra.mxu0 %v9435_v9  ;;  %7316 = vmatprep.subr.bf16.mxu1 %v9440_v23  ;;  %v3747_v18 = vadd.f32 %v11857_v19, %v3704_v52  ;;  %v9446_v9 = vld [vmem:[#allocation5 + $0x404] ss:$16 sps:$4 sm:$0xff]   ;;  %v9449_v23 = vld [vmem:[#allocation5 + $0x40c] ss:$16 sps:$4 sm:$0xff]  }
 0x72b   :  { %v5704_v5 = vpack.c.bf16 %v5682_v11, %v5682_v11  ;;  %v12199_v41 = vmax.f32 %v3743_v49, 0.0  ;;  %v16048_v20 = vmax.f32 %v12051_v58, %v12040_v42  ;;  %7480 = vmatprep.subr.bf16.mxu0 %v9443_v16  ;;  %v2754_v30 = vmul.f32 %v11536_v43, %v16049_v36 }
 0x72c   :  { %16045 = vst [vmem:[#allocation139_spill] sm:$0xff] %v12192_v47  ;;  %v2793_v35 = vadd.f32 %v11683_v24, %v2750_v4  ;;  %v2795_v11 = vadd.f32 %v11683_v24, %v2752_v55  ;;  %v12209_v52 = vmax.f32 %v3745_v7, 0.0  ;;  %v2881_v21 = vmax.f32 %v2879_v37, %v2880_v45  ;;  %v16054_v45 = vld [vmem:[#allocation50_spill] sm:$0xff] }
 0x72d   :  { %16047 = vst [vmem:[#allocation61_spill] sm:$0xff] %v12199_v41  ;;  %v2850_v44 = vmax.f32 %v16048_v20, %v12150_v26  ;;  %7318 = vmatprep.mubr.bf16.mxu1 %v5704_v5  ;;  %7482 = vmatprep.mubr.bf16.mxu0 %v5704_v5  ;;  %v3824_v49 = vmax.f32 %v3823_v28, %v12199_v41  ;;  %v12221_v5 = vmax.f32 %v3747_v18, 0.0  ;;  %v16053_v28 = vld [vmem:[#allocation48_spill] sm:$0xff]  ;;  %v16056_v18 = vld [vmem:[#allocation54_spill] sm:$0xff] }
 0x72e   :  { %16050 = vst [vmem:[#allocation79_spill] sm:$0xff] %v12209_v52  ;;  %v3870_v58 = vmax.f32 %v12192_v47, %v12199_v41  ;;  %v3797_v16 = vmax.f32 %v12141_v2, %v12167_v39  ;;  %v2797_v43 = vadd.f32 %v11683_v24, %v2754_v30  ;;  %v12217_v4 = vmax.f32 %v2793_v35, 0.0  ;;  %7317 = vmatpush1.bf16.msra.mxu1 %v9438_v50  ;;  %v16076_v41 = vld [vmem:[#allocation60_spill] sm:$0xff] }
 0x72f   :  { %v2941_v55 = vmax.f32 %v12158_v6, %v11998_v10  ;;  %16052 = vst [vmem:[#allocation42_spill] sm:$0xff] %v12221_v5  ;;  %v3825_v7 = vmax.f32 %v3824_v49, %v12209_v52  ;;  %7481 = vmatpush1.bf16.msra.mxu0 %v9441_v62  ;;  %v3683_v37 = vmul.f32 %v11592_v0, %v16053_v28  ;;  %v12228_v20 = vmax.f32 %v2795_v11, 0.0  ;;  %v16075_v6 = vld [vmem:[#allocation97_spill] sm:$0xff] }
 0x730   :  { %16051 = vst [vmem:[#allocation40_spill] sm:$0xff] %v12217_v4  ;;  %3871 = vmax.xlane.f32.xlu0 %v3870_v58  ;;  %v3684_v2 = vmul.f32 %v11595_v27, %v16054_v45  ;;  %v2851_v24 = vmax.f32 %v2850_v44, %v12217_v4  ;;  %v2914_v50 = vmax.f32 %v12217_v4, %v12075_v13  ;;  %v12236_v30 = vmax.f32 %v2797_v43, 0.0  ;;  %v16058_v58 = vld [vmem:[#allocation58_spill] sm:$0xff] }
 0x731   :  { %16055 = vst [vmem:[#allocation76_spill] sm:$0xff] %v12228_v20  ;;  %7327 = vmatprep.subr.bf16.mxu1 %v9446_v9  ;;  %7491 = vmatprep.subr.bf16.mxu0 %v9449_v23  ;;  %v3686_v36 = vmul.f32 %v11595_v27, %v16056_v18  ;;  %v3826_v62 = vmax.f32 %v3825_v7, %v12221_v5  ;;  %v2882_v35 = vrot.slane %v2881_v21, 2  ;;  %v16060_v43 = vld [vmem:[#allocation62_spill] sm:$0xff] }
 0x732   :  { %16057 = vst [vmem:[#allocation78_spill] sm:$0xff] %v12236_v30  ;;  %v3726_v49 = vadd.f32 %v11850_v33, %v3683_v37  ;;  %v2852_v11 = vmax.f32 %v2851_v24, %v12228_v20  ;;  %2915 = vmax.xlane.f32.xlu1 %v2914_v50  ;;  %v3688_v44 = vmul.f32 %v11595_v27, %v16058_v58  ;;  %v9503_v13 = vld [vmem:[#allocation5 + $0x52c] ss:$16 sps:$4 sm:$0xff]  }
 0x733   :  { %v3727_v28 = vadd.f32 %v11857_v19, %v3684_v2  ;;  %v3729_v9 = vadd.f32 %v11857_v19, %v3686_v36  ;;  %v3782_v23 = vmax.f32 %v11926_v31, %v11888_v63  ;;  %v3690_v45 = vmul.f32 %v11595_v27, %v16060_v43 }
 0x734   :  { %2942 = vmax.xlane.f32.xlu0 %v2941_v55  ;;  %v12246_v7 = vmax.f32 %v3726_v49, 0.0  ;;  %v3827_v37 = vmax.f32 %v3826_v62, %v12181_v12  ;;  %v2853_v24 = vmax.f32 %v2852_v11, %v12236_v30  ;;  %v3731_v50 = vadd.f32 %v11857_v19, %v3688_v44 }
 0x735   :  { %v12253_v18 = vmax.f32 %v3727_v28, 0.0  ;;  %v12256_v2 = vmax.f32 %v3808_v32, %v12000_v56  ;;  %v2883_v36 = vmax.f32 %v2881_v21, %v2882_v35  ;;  %v3733_v58 = vadd.f32 %v11857_v19, %v3690_v45  ;;  %v16063_v21 = vld [vmem:[#allocation84_spill] sm:$0xff] }
 0x736   :  { %16059 = vst [vmem:[#allocation47_spill] sm:$0xff] %v12246_v7  ;;  %v3828_v55 = vrot.slane %v3827_v37, 4  ;;  %v2854_v49 = vrot.slane %v2853_v24, 4  ;;  %v12259_v10 = vmax.f32 %v3729_v9, 0.0  ;;  %v12266_v11 = vrot.slane %v12082_v34, %v10224_v15 }
 0x737   :  { %16061 = vst [vmem:[#allocation83_spill] sm:$0xff] %v12253_v18  ;;  %v3798_v27 = vmax.f32 %v3797_v16, %v12253_v18  ;;  %v3846_v62 = vmax.f32 %v12246_v7, %v12253_v18  ;;  %v12269_v44 = vmax.f32 %v3782_v23, %v12090_v54  ;;  %v3701_v19 = vmul.f32 %v11592_v0, %v16063_v21  ;;  %v16065_v16 = vld [vmem:[#allocation52_spill] sm:$0xff] }
 0x738   :  { %16062 = vst [vmem:[#allocation87_spill] sm:$0xff] %v12259_v10  ;;  %v3829_v32 = vmax.f32 %v3827_v37, %v3828_v55  ;;  %v2855_v35 = vmax.f32 %v2853_v24, %v2854_v49  ;;  %v12273_v28 = vmax.f32 %v3731_v50, 0.0  ;;  %v3685_v43 = vmul.f32 %v11592_v0, %v16065_v16 }
 0x739   :  { %v3799_v9 = vmax.f32 %v3798_v27, %v12259_v10  ;;  %3847 = vmax.xlane.f32.xlu1 %v3846_v62  ;;  %v2884_v45 = vrot.slane %v2883_v36, 1  ;;  %v12278_v18 = vmax.f32 %v3733_v58, 0.0  ;;  %v3744_v23 = vadd.f32 %v11850_v33, %v3701_v19  ;;  %v16068_v62 = vld [vmem:[#allocation88_spill] sm:$0xff] }
 0x73a   :  { %16064 = vst [vmem:[#allocation91_spill] sm:$0xff] %v12273_v28  ;;  %v3830_v34 = vrot.slane %v3829_v32, 2  ;;  %v2856_v15 = vrot.slane %v2855_v35, 2  ;;  %v2917_v24 = vmax.f32 %v12228_v20, %v12084_v59  ;;  %v3728_v50 = vadd.f32 %v11850_v33, %v3685_v43 }
 0x73b   :  { %16066 = vst [vmem:[#allocation44_spill] sm:$0xff] %v12278_v18  ;;  %v3800_v37 = vmax.f32 %v3799_v9, %v12273_v28  ;;  %v3810_v55 = vmax.f32 %v12256_v2, %v12121_v29  ;;  %v12287_v27 = vmax.f32 %v3744_v23, 0.0  ;;  %v3703_v58 = vmul.f32 %v11592_v0, %v16068_v62 }
 0x73c   :  { %v3831_v49 = vmax.f32 %v3829_v32, %v3830_v34  ;;  %v3784_v21 = vmax.f32 %v12269_v44, %v12165_v48  ;;  %v2857_v19 = vmax.f32 %v2855_v35, %v2856_v15  ;;  %v12294_v16 = vmax.f32 %v3728_v50, 0.0  ;;  %v16070_v32 = vld [vmem:[#allocation92_spill] sm:$0xff] }
 0x73d   :  { %16067 = vst [vmem:[#allocation46_spill] sm:$0xff] %v12287_v27  ;;  %v3801_v9 = vmax.f32 %v3800_v37, %v12278_v18  ;;  %2918 = vmax.xlane.f32.xlu1 %v2917_v24  ;;  %v2885_v59 = vmax.f32 %v2883_v36, %v2884_v45  ;;  %v3873_v43 = vmax.f32 %v12287_v27, %v12209_v52  ;;  %v16071_v15 = vld [vmem:[#allocation56_spill] sm:$0xff]  ;;  %v12305_v37 = vpop.xlane.xlu1 %1981 }
 0x73e   :  { %16069 = vst [vmem:[#allocation80_spill] sm:$0xff] %v12294_v16  ;;  %v3746_v2 = vadd.f32 %v11850_v33, %v3703_v58  ;;  %v3705_v34 = vmul.f32 %v11592_v0, %v16070_v32  ;;  %v2858_v23 = vrot.slane %v2857_v19, 1  ;;  %v3849_v44 = vmax.f32 %v12294_v16, %v12259_v10  ;;  %16072 = vst [vmem:[#allocation82_spill] sm:$0xff] %v12305_v37  ;;  %v16073_v52 = vld [vmem:[#allocation96_spill] sm:$0xff] }
 0x73f   :  { %v3802_v62 = vrot.slane %v3801_v9, 4  ;;  %v3687_v35 = vmul.f32 %v11592_v0, %v16071_v15  ;;  %v3832_v24 = vrot.slane %v3831_v49, 1  ;;  %3874 = vmax.xlane.f32.xlu0 %v3873_v43  ;;  %v2944_v36 = vmax.f32 %v12163_v38, %v12020_v1 }
 0x740   :  { %v2920_v45 = vmax.f32 %v12236_v30, %v12098_v40  ;;  %v3748_v50 = vadd.f32 %v11850_v33, %v3705_v34  ;;  %v2859_v58 = vmax.f32 %v2857_v19, %v2858_v23  ;;  %v4612_v15 = vmul.f32 %v12013_v8, %v16073_v52  ;;  %v9447_v34 = vld [vmem:[#allocation5 + $0x408] ss:$16 sps:$4 sm:$0xff]  }
 0x741   :  { %v3803_v32 = vmax.f32 %v3801_v9, %v3802_v62  ;;  %3850 = vmax.xlane.f32.xlu1 %v3849_v44  ;;  %v3730_v10 = vadd.f32 %v11850_v33, %v3687_v35  ;;  %v12315_v20 = vmax.f32 %v3746_v2, 0.0  ;;  %v4613_v43 = vmul.f32 %v12016_v3, %v16075_v6  ;;  %v9444_v9 = vld [vmem:[#allocation5 + $0x400] ss:$16 sps:$4 sm:$0xff]   ;;  %v9452_v44 = vld [vmem:[#allocation5 + $0x424] ss:$16 sps:$4 sm:$0xff]  }
 0x742   :  { %v3689_v1 = vmul.f32 %v11592_v0, %v16076_v41  ;;  %v4628_v38 = vmul.f32 %v12013_v8, %v11460_v25  ;;  %v5681_v19 = vsel %vm5665_vm3, %v2885_v59, %v2859_v58  ;;  %v4655_v52 = vadd.f32 %v12266_v11, %v4612_v15  ;;  %v9455_v35 = vld [vmem:[#allocation5 + $0x42c] ss:$16 sps:$4 sm:$0xff]  }
 0x743   :  { %16074 = vst [vmem:[#allocation86_spill] sm:$0xff] %v12315_v20  ;;  %v3804_v23 = vrot.slane %v3803_v32, 2  ;;  %v12324_v62 = vmax.f32 %v3730_v10, 0.0  ;;  %v5703_v2 = vpack.c.bf16 %v5681_v19, %v5681_v19  ;;  %2945 = vmax.xlane.f32.xlu0 %v2944_v36  ;;  %v12327_v6 = vmax.f32 %v3748_v50, 0.0  ;;  %v12334_v10 = vpop.xlane.xlu1 %1984 }
 0x744   :  { %v4656_v0 = vadd.f32 %v12095_v60, %v4613_v43  ;;  %v3732_v41 = vadd.f32 %v11850_v33, %v3689_v1  ;;  %v12332_v25 = vmax.f32 %v3810_v55, %v12192_v47  ;;  %v3833_v58 = vmax.f32 %v3831_v49, %v3832_v24  ;;  %v9450_v55 = vld [vmem:[#allocation5 + $0x420] ss:$16 sps:$4 sm:$0xff]   ;;  %v9453_v49 = vld [vmem:[#allocation5 + $0x428] ss:$16 sps:$4 sm:$0xff]  }
 0x745   :  { %16077 = vst [vmem:[#allocation90_spill] sm:$0xff] %v12324_v62  ;;  %16078 = vst [vmem:[#allocation51_spill] sm:$0xff] %v12327_v6  ;;  %v3805_v59 = vmax.f32 %v3803_v32, %v3804_v23  ;;  %2921 = vmax.xlane.f32.xlu1 %v2920_v45  ;;  %7319 = vmatmul.mubr.bf16.vlgmr.msra.gmra.mrb[72].mxu1 %v5703_v2  ;;  %v3876_v15 = vmax.f32 %v12315_v20, %v12221_v5  ;;  %v16080_v45 = vld [vmem:[#allocation94_spill] sm:$0xff]  ;;  %v16081_v43 = vld [vmem:[#allocation95_spill] sm:$0xff] }
 0x746   :  { %7483 = vmatmul.mubr.bf16.vlgmr.msra.gmra.mrb[120].mxu0 %v5703_v2  ;;  %v3852_v36 = vmax.f32 %v12324_v62, %v12273_v28  ;;  %v12340_v50 = vmax.f32 %v3732_v41, 0.0  ;;  %v4629_v33 = vmul.f32 %v12016_v3, %v11470_v46  ;;  %7328 = vmatpush1.bf16.msra.mxu1 %v9444_v9  ;;  %v4671_v24 = vadd.f32 %v12266_v11, %v4628_v38  ;;  %v9458_v2 = vld [vmem:[#allocation5 + $0x444] ss:$16 sps:$4 sm:$0xff]   ;;  %v9461_v46 = vld [vmem:[#allocation5 + $0x44c] ss:$16 sps:$4 sm:$0xff]  }
 0x747   :  { %v3806_v1 = vrot.slane %v3805_v59, 1  ;;  %7492 = vmatpush1.bf16.msra.mxu0 %v9447_v34  ;;  %v4610_v32 = vmul.f32 %v12013_v8, %v16080_v45  ;;  %v4611_v19 = vmul.f32 %v12016_v3, %v16081_v43  ;;  %v12350_v23 = vmax.f32 %v3784_v21, %v12246_v7  ;;  %7329 = vmatprep.subr.bf16.mxu1 %v9452_v44  ;;  %v9468_v28 = vld [vmem:[#allocation5 + $0x480] ss:$16 sps:$4 sm:$0xff]   ;;  %v16128_v47 = vld [vmem:[#allocation107_spill] sm:$0xff] }
 0x748   :  { %16079 = vst [vmem:[#allocation55_spill] sm:$0xff] %v12340_v50  ;;  %7493 = vmatprep.subr.bf16.mxu0 %v9455_v35  ;;  %v3879_v9 = vmax.f32 %v12327_v6, %v12181_v12  ;;  %v12354_v34 = vmax.f32 %v4655_v52, 0.0  ;;  %v3855_v38 = vmax.f32 %v12340_v50, %v12278_v18  ;;  %3877 = vmax.xlane.f32.xlu0 %v3876_v15  ;;  %v12358_v45 = vmax.f32 %v4656_v0, 0.0  ;;  %v9456_v0 = vld [vmem:[#allocation5 + $0x440] ss:$16 sps:$4 sm:$0xff]  }
 0x749   :  { %v3807_v41 = vmax.f32 %v3805_v59, %v3806_v1  ;;  %3853 = vmax.xlane.f32.xlu1 %v3852_v36  ;;  %v4672_v21 = vadd.f32 %v12095_v60, %v4629_v33  ;;  %v4653_v44 = vadd.f32 %v12266_v11, %v4610_v32  ;;  %v12362_v35 = vmax.f32 %v4671_v24, 0.0  ;;  %v9459_v15 = vld [vmem:[#allocation5 + $0x448] ss:$16 sps:$4 sm:$0xff]   ;;  %v16087_v1 = vld [vmem:[#allocation114_spill] sm:$0xff]  ;;  %v12376_v32 = vpop.xlane.xlu1 %1987 }
 0x74a   :  { %16082 = vst [vmem:[#allocation59_spill] sm:$0xff] %v12354_v34  ;;  %16083 = vst [vmem:[#allocation48_spill] sm:$0xff] %v12358_v45  ;;  %v4654_v43 = vadd.f32 %v12095_v60, %v4611_v19  ;;  %v4630_v52 = vmul.f32 %v12013_v8, %v11505_v61  ;;  %v4631_v5 = vmul.f32 %v12016_v3, %v11510_v22  ;;  %7330 = vmatpush1.bf16.msra.mxu1 %v9450_v55  ;;  %v9464_v61 = vld [vmem:[#allocation5 + $0x464] ss:$16 sps:$4 sm:$0xff]   ;;  %v9467_v22 = vld [vmem:[#allocation5 + $0x46c] ss:$16 sps:$4 sm:$0xff]  }
 0x74b   :  { %16084 = vst [vmem:[#allocation50_spill] sm:$0xff] %v12362_v35  ;;  %v5690_v59 = vsel %vm5665_vm3, %v3833_v58, %v3807_v41  ;;  %7494 = vmatpush1.bf16.msra.mxu0 %v9453_v49  ;;  %v12370_v36 = vmax.f32 %v4672_v21, 0.0  ;;  %v12372_v33 = vmax.f32 %v4653_v44, 0.0  ;;  %v4626_v24 = vmul.f32 %v12013_v8, %v16087_v1  ;;  %7331 = vmatprep.subr.bf16.mxu1 %v9458_v2  ;;  %v16089_v44 = vld [vmem:[#allocation115_spill] sm:$0xff] }
 0x74c   :  { %v5706_v19 = vpack.c.bf16 %v5690_v59, %v5690_v59  ;;  %7495 = vmatprep.subr.bf16.mxu0 %v9461_v46  ;;  %v12378_v18 = vmax.f32 %v4654_v43, 0.0  ;;  %v4673_v58 = vadd.f32 %v12266_v11, %v4630_v52  ;;  %v3812_v55 = vmax.f32 %v12332_v25, %v12287_v27  ;;  %3880 = vmax.xlane.f32.xlu0 %v3879_v9  ;;  %v9462_v25 = vld [vmem:[#allocation5 + $0x460] ss:$16 sps:$4 sm:$0xff]   ;;  %v9465_v9 = vld [vmem:[#allocation5 + $0x468] ss:$16 sps:$4 sm:$0xff]  }
 0x74d   :  { %16085 = vst [vmem:[#allocation54_spill] sm:$0xff] %v12370_v36  ;;  %16086 = vst [vmem:[#allocation58_spill] sm:$0xff] %v12372_v33  ;;  %v4772_v49 = vmax.f32 %v12354_v34, %v12358_v45  ;;  %3856 = vmax.xlane.f32.xlu1 %v3855_v38  ;;  %v4674_v41 = vadd.f32 %v12095_v60, %v4631_v5  ;;  %v3786_v2 = vmax.f32 %v12350_v23, %v12294_v16  ;;  %v9470_v23 = vld [vmem:[#allocation5 + $0x484] ss:$16 sps:$4 sm:$0xff]   ;;  %v9473_v52 = vld [vmem:[#allocation5 + $0x48c] ss:$16 sps:$4 sm:$0xff]  }
 0x74e   :  { %16088 = vst [vmem:[#allocation62_spill] sm:$0xff] %v12378_v18  ;;  %7359 = vmatprep.mubr.bf16.mxu1 %v5706_v19  ;;  %7523 = vmatprep.mubr.bf16.mxu0 %v5706_v19  ;;  %v4796_v46 = vmax.f32 %v12362_v35, %v12370_v36  ;;  %v4769_v21 = vmax.f32 %v12372_v33, %v12378_v18  ;;  %v16090_v59 = vld [vmem:[#allocation124_spill] sm:$0xff]  ;;  %v16091_v19 = vld [vmem:[#allocation98_spill] sm:$0xff] }
 0x74f   :  { %7332 = vmatpush1.bf16.msra.mxu1 %v9456_v0  ;;  %7496 = vmatpush1.bf16.msra.mxu0 %v9459_v15  ;;  %v4627_v38 = vmul.f32 %v12016_v3, %v16089_v44  ;;  %v4669_v5 = vadd.f32 %v12266_v11, %v4626_v24  ;;  %v4632_v43 = vmul.f32 %v12013_v8, %v11519_v51  ;;  %v16092_v15 = vld [vmem:[#allocation99_spill] sm:$0xff]  ;;  %v12403_v44 = vmax.f32 %v4673_v58, 0.0 }
 0x750   :  { %7333 = vmatprep.subr.bf16.mxu1 %v9464_v61  ;;  %7497 = vmatprep.subr.bf16.mxu0 %v9467_v22  ;;  %v4633_v1 = vmul.f32 %v12016_v3, %v16090_v59  ;;  %v4614_v0 = vmul.f32 %v12013_v8, %v16091_v19  ;;  %v4615_v12 = vmul.f32 %v12016_v3, %v16092_v15  ;;  %v12405_v24 = vmax.f32 %v4674_v41, 0.0  ;;  %v12409_v22 = vpop.xlane.xlu1 %1990  ;;  %v16095_v15 = vld [vmem:[#allocation129_spill] sm:$0xff] }
 0x751   :  { %4773 = vmax.xlane.f32.xlu0 %v4772_v49  ;;  %4770 = vmax.xlane.f32.xlu1 %v4769_v21  ;;  %16093 = vst [vmem:[#allocation84_spill] sm:$0xff] %v12403_v44  ;;  %v4670_v51 = vadd.f32 %v12095_v60, %v4627_v38  ;;  %v4675_v61 = vadd.f32 %v12266_v11, %v4632_v43  ;;  %v9471_v58 = vld [vmem:[#allocation5 + $0x488] ss:$16 sps:$4 sm:$0xff]   ;;  %v12416_v41 = vmax.f32 %v4669_v5, 0.0  ;;  %v16099_v43 = vld [vmem:[#allocation22_spill] sm:$0xff] }
 0x752   :  { %16094 = vst [vmem:[#allocation52_spill] sm:$0xff] %v12405_v24  ;;  %v4676_v59 = vadd.f32 %v12095_v60, %v4633_v1  ;;  %v4657_v19 = vadd.f32 %v12266_v11, %v4614_v0  ;;  %v4658_v40 = vadd.f32 %v12095_v60, %v4615_v12  ;;  %v4634_v49 = vmul.f32 %v12013_v8, %v16095_v15  ;;  %v9476_v1 = vld [vmem:[#allocation5 + $0x4a4] ss:$16 sps:$4 sm:$0xff]   ;;  %v9479_v0 = vld [vmem:[#allocation5 + $0x4ac] ss:$16 sps:$4 sm:$0xff]  }
 0x753   :  { %7334 = vmatpush1.bf16.msra.mxu1 %v9462_v25  ;;  %7498 = vmatpush1.bf16.msra.mxu0 %v9465_v9  ;;  %16096 = vst [vmem:[#allocation88_spill] sm:$0xff] %v12416_v41  ;;  %v12418_v21 = vmax.f32 %v4670_v51, 0.0  ;;  %v12420_v38 = vmax.f32 %v4675_v61, 0.0  ;;  %v4635_v30 = vmul.f32 %v12016_v3, %v16099_v43  ;;  %v4730_v25 = vmax.f32 %v12378_v18, %v12358_v45  ;;  %v16104_v45 = vld [vmem:[#allocation101_spill] sm:$0xff] }
 0x754   :  { %7335 = vmatprep.subr.bf16.mxu1 %v9470_v23  ;;  %7499 = vmatprep.subr.bf16.mxu0 %v9473_v52  ;;  %v12424_v12 = vmax.f32 %v4676_v59, 0.0  ;;  %v4677_v15 = vadd.f32 %v12266_v11, %v4634_v49  ;;  %v3813_v51 = vmax.f32 %v3812_v55, %v12315_v20  ;;  %v12434_v23 = vmax.f32 %v3786_v2, %v12324_v62  ;;  %v9477_v59 = vld [vmem:[#allocation5 + $0x4a8] ss:$16 sps:$4 sm:$0xff]   ;;  %v12447_v2 = vpop.xlane.xlu1 %1993  ;;  %v16108_v62 = vld [vmem:[#allocation132_spill] sm:$0xff] }
 0x755   :  { %16097 = vst [vmem:[#allocation92_spill] sm:$0xff] %v12418_v21  ;;  %16098 = vst [vmem:[#allocation56_spill] sm:$0xff] %v12420_v38  ;;  %4797 = vmax.xlane.f32.xlu0 %v4796_v46  ;;  %v4756_v9 = vmax.f32 %v12418_v21, %v12370_v36  ;;  %v4678_v5 = vadd.f32 %v12095_v60, %v4635_v30  ;;  %v4799_v52 = vmax.f32 %v12403_v44, %v12405_v24  ;;  %v9474_v46 = vld [vmem:[#allocation5 + $0x4a0] ss:$16 sps:$4 sm:$0xff]   ;;  %v9485_v36 = vld [vmem:[#allocation5 + $0x4cc] ss:$16 sps:$4 sm:$0xff]  }
 0x756   :  { %16100 = vst [vmem:[#allocation96_spill] sm:$0xff] %v12424_v12  ;;  %v12438_v61 = vmax.f32 %v4657_v19, 0.0  ;;  %v4793_v49 = vmax.f32 %v12416_v41, %v12418_v21  ;;  %v4802_v30 = vmax.f32 %v12420_v38, %v12424_v12  ;;  %v12445_v55 = vmax.f32 %v4658_v40, 0.0  ;;  %v9482_v19 = vld [vmem:[#allocation5 + $0x4c4] ss:$16 sps:$4 sm:$0xff]  }
 0x757   :  { %7336 = vmatpush1.bf16.msra.mxu1 %v9468_v28  ;;  %7500 = vmatpush1.bf16.msra.mxu0 %v9471_v58  ;;  %v4757_v43 = vmax.f32 %v4756_v9, %v12405_v24  ;;  %v16103_v28 = vld [vmem:[#allocation100_spill] sm:$0xff]  ;;  %v4617_v18 = vmul.f32 %v12016_v3, %v16104_v45  ;;  %v16105_v21 = vld [vmem:[#allocation131_spill] sm:$0xff]  ;;  %v4637_v45 = vmul.f32 %v12016_v3, %v16108_v62 }
 0x758   :  { %16101 = vst [vmem:[#allocation97_spill] sm:$0xff] %v12438_v61  ;;  %16102 = vst [vmem:[#allocation60_spill] sm:$0xff] %v12445_v55  ;;  %7337 = vmatprep.subr.bf16.mxu1 %v9476_v1  ;;  %7501 = vmatprep.subr.bf16.mxu0 %v9479_v0  ;;  %v4616_v58 = vmul.f32 %v12013_v8, %v16103_v28  ;;  %v4636_v9 = vmul.f32 %v12013_v8, %v16105_v21  ;;  %v12459_v1 = vmax.f32 %v4677_v15, 0.0  ;;  %v16109_v15 = vld [vmem:[#allocation102_spill] sm:$0xff] }
 0x759   :  { %4800 = vmax.xlane.f32.xlu0 %v4799_v52  ;;  %4794 = vmax.xlane.f32.xlu1 %v4793_v49  ;;  %v4758_v40 = vmax.f32 %v4757_v43, %v12424_v12  ;;  %v12457_v24 = vmax.f32 %v4730_v25, %v12445_v55  ;;  %v12461_v0 = vmax.f32 %v4678_v5, 0.0  ;;  %v4660_v28 = vadd.f32 %v12095_v60, %v4617_v18  ;;  %v9480_v52 = vld [vmem:[#allocation5 + $0x4c0] ss:$16 sps:$4 sm:$0xff]   ;;  %v9483_v49 = vld [vmem:[#allocation5 + $0x4c8] ss:$16 sps:$4 sm:$0xff]   ;;  %v12474_v12 = vpop.xlane.xlu1 %1999 }
 0x75a   :  { %16106 = vst [vmem:[#allocation94_spill] sm:$0xff] %v12459_v1  ;;  %v4659_v20 = vadd.f32 %v12266_v11, %v4616_v58  ;;  %v4679_v21 = vadd.f32 %v12266_v11, %v4636_v9  ;;  %v4775_v25 = vmax.f32 %v12438_v61, %v12445_v55  ;;  %v4618_v5 = vmul.f32 %v12013_v8, %v16109_v15  ;;  %v16110_v43 = vld [vmem:[#allocation103_spill] sm:$0xff]  ;;  %v9491_v62 = vld [vmem:[#allocation5 + $0x4ec] ss:$16 sps:$4 sm:$0xff]  }
 0x75b   :  { %16107 = vst [vmem:[#allocation95_spill] sm:$0xff] %v12461_v0  ;;  %7338 = vmatpush1.bf16.msra.mxu1 %v9474_v46  ;;  %7502 = vmatpush1.bf16.msra.mxu0 %v9477_v59  ;;  %v4619_v58 = vmul.f32 %v12016_v3, %v16110_v43  ;;  %16111 = vst [vmem:[#allocation114_spill] sm:$0xff] %v12474_v12  ;;  %v9488_v18 = vld [vmem:[#allocation5 + $0x4e4] ss:$16 sps:$4 sm:$0xff]   ;;  %v12477_v46 = vmax.f32 %v4758_v40, %v12461_v0  ;;  %v12481_v9 = vmax.f32 %v4660_v28, 0.0 }
 0x75c   :  { %7339 = vmatprep.subr.bf16.mxu1 %v9482_v19  ;;  %7503 = vmatprep.subr.bf16.mxu0 %v9485_v36  ;;  %v12479_v59 = vmax.f32 %v4659_v20, 0.0  ;;  %v4680_v55 = vadd.f32 %v12095_v60, %v4637_v45  ;;  %v12484_v15 = vmax.f32 %v4679_v21, 0.0  ;;  %v4661_v43 = vadd.f32 %v12266_v11, %v4618_v5  ;;  %v16115_v36 = vld [vmem:[#allocation136_spill] sm:$0xff]  ;;  %v9489_v45 = vld [vmem:[#allocation5 + $0x4e8] ss:$16 sps:$4 sm:$0xff]  }
 0x75d   :  { %16113 = vst [vmem:[#allocation124_spill] sm:$0xff] %v12481_v9  ;;  %4803 = vmax.xlane.f32.xlu0 %v4802_v30  ;;  %4776 = vmax.xlane.f32.xlu1 %v4775_v25  ;;  %v4662_v19 = vadd.f32 %v12095_v60, %v4619_v58  ;;  %v4638_v16 = vmul.f32 %v12013_v8, %v16115_v36  ;;  %v9486_v28 = vld [vmem:[#allocation5 + $0x4e0] ss:$16 sps:$4 sm:$0xff]   ;;  %v16119_v5 = vld [vmem:[#allocation137_spill] sm:$0xff]  ;;  %v12508_v27 = vpop.xlane.xlu1 %2002 }
 0x75e   :  { %16112 = vst [vmem:[#allocation115_spill] sm:$0xff] %v12479_v59  ;;  %16114 = vst [vmem:[#allocation98_spill] sm:$0xff] %v12484_v15  ;;  %v4805_v40 = vmax.f32 %v12459_v1, %v12461_v0  ;;  %v12492_v20 = vmax.f32 %v4680_v55, 0.0  ;;  %v4778_v30 = vmax.f32 %v12479_v59, %v12481_v9  ;;  %v12496_v21 = vmax.f32 %v4661_v43, 0.0  ;;  %v9494_v55 = vld [vmem:[#allocation5 + $0x504] ss:$16 sps:$4 sm:$0xff]  }
 0x75f   :  { %7340 = vmatpush1.bf16.msra.mxu1 %v9480_v52  ;;  %7504 = vmatpush1.bf16.msra.mxu0 %v9483_v49  ;;  %v12498_v25 = vmax.f32 %v4662_v19, 0.0  ;;  %v4639_v58 = vmul.f32 %v12016_v3, %v16119_v5  ;;  %v12503_v36 = vmax.f32 %v3813_v51, %v12327_v6  ;;  %v9497_v52 = vld [vmem:[#allocation5 + $0x50c] ss:$16 sps:$4 sm:$0xff]   ;;  %v4732_v49 = vmax.f32 %v12457_v24, %v12481_v9  ;;  %v16124_v9 = vld [vmem:[#allocation105_spill] sm:$0xff] }
 0x760   :  { %16116 = vst [vmem:[#allocation99_spill] sm:$0xff] %v12492_v20  ;;  %16117 = vst [vmem:[#allocation129_spill] sm:$0xff] %v12496_v21  ;;  %7341 = vmatprep.subr.bf16.mxu1 %v9488_v18  ;;  %7505 = vmatprep.subr.bf16.mxu0 %v9491_v62  ;;  %v4681_v0 = vadd.f32 %v12266_v11, %v4638_v16  ;;  %v16121_v43 = vlaneseq  ;;  %v3788_v5 = vmax.f32 %v12434_v23, %v12340_v50  ;;  %v16123_v62 = vld [vmem:[#allocation104_spill] sm:$0xff]  ;;  %v16127_v50 = vld [vmem:[#allocation106_spill] sm:$0xff] }
 0x761   :  { %16118 = vst [vmem:[#allocation22_spill] sm:$0xff] %v12498_v25  ;;  %16120 = vst [vmem:[#allocation100_spill] sm:$0xff] %v12508_v27  ;;  %4806 = vmax.xlane.f32.xlu0 %v4805_v40  ;;  %4779 = vmax.xlane.f32.xlu1 %v4778_v30  ;;  %v4760_v51 = vmax.f32 %v12477_v46, %v12492_v20  ;;  %v4808_v18 = vmax.f32 %v12484_v15, %v12492_v20  ;;  %v9492_v23 = vld [vmem:[#allocation5 + $0x500] ss:$16 sps:$4 sm:$0xff]   ;;  %v9495_v40 = vld [vmem:[#allocation5 + $0x508] ss:$16 sps:$4 sm:$0xff]  }
 0x762   :  { %v12511_v19 = vand.u32 127, %v16121_v43  ;;  %v4781_v24 = vmax.f32 %v12496_v21, %v12498_v25  ;;  %v4682_v16 = vadd.f32 %v12095_v60, %v4639_v58  ;;  %v4620_v43 = vmul.f32 %v12013_v8, %v16123_v62  ;;  %v16126_v46 = vld [vmem:[#allocation138_spill] sm:$0xff]  ;;  %v9500_v62 = vld [vmem:[#allocation5 + $0x524] ss:$16 sps:$4 sm:$0xff]  }
 0x763   :  { %v4621_v6 = vmul.f32 %v12016_v3, %v16124_v9  ;;  %7342 = vmatpush1.bf16.msra.mxu1 %v9486_v28  ;;  %7506 = vmatpush1.bf16.msra.mxu0 %v9489_v45  ;;  %v12526_v30 = vmax.f32 %v4681_v0, 0.0  ;;  %v4640_v20 = vmul.f32 %v12013_v8, %v16126_v46  ;;  %v4622_v7 = vmul.f32 %v12013_v8, %v16127_v50 }
 0x764   :  { %16122 = vst [vmem:[#allocation101_spill] sm:$0xff] %v12511_v19  ;;  %v4623_v58 = vmul.f32 %v12016_v3, %v16128_v47  ;;  %7343 = vmatprep.subr.bf16.mxu1 %v9494_v55  ;;  %7507 = vmatprep.subr.bf16.mxu0 %v9497_v52  ;;  %v4733_v9 = vmax.f32 %v4732_v49, %v12498_v25  ;;  %v12535_v28 = vmax.f32 %v4682_v16, 0.0  ;;  %v3815_v46 = vrot.slane %v12503_v36, 4  ;;  %v12543_v52 = vpop.xlane.xlu0 %1996 }
 0x765   :  { %16125 = vst [vmem:[#allocation131_spill] sm:$0xff] %v12526_v30  ;;  %v4663_v0 = vadd.f32 %v12266_v11, %v4620_v43  ;;  %v4664_v45 = vadd.f32 %v12095_v60, %v4621_v6  ;;  %4809 = vmax.xlane.f32.xlu0 %v4808_v18  ;;  %4782 = vmax.xlane.f32.xlu1 %v4781_v24  ;;  %16130 = vst [vmem:[#allocation102_spill] sm:$0xff] %v12543_v52  ;;  %v3789_v4 = vrot.slane %v3788_v5, 4  ;;  %v12550_v6 = vpop.xlane.xlu1 %2005  ;;  %v9498_v18 = vld [vmem:[#allocation5 + $0x520] ss:$16 sps:$4 sm:$0xff]  }
 0x766   :  { %16129 = vst [vmem:[#allocation132_spill] sm:$0xff] %v12535_v28  ;;  %v4683_v50 = vadd.f32 %v12266_v11, %v4640_v20  ;;  %v4665_v47 = vadd.f32 %v12266_v11, %v4622_v7  ;;  %v4666_v55 = vadd.f32 %v12095_v60, %v4623_v58  ;;  %v4761_v49 = vmax.f32 %v4760_v51, %v12535_v28  ;;  %v9501_v24 = vld [vmem:[#allocation5 + $0x528] ss:$16 sps:$4 sm:$0xff]  }
 0x767   :  { %v12546_v16 = vmax.f32 %v4663_v0, 0.0  ;;  %v12548_v43 = vmax.f32 %v4664_v45, 0.0  ;;  %7344 = vmatpush1.bf16.msra.mxu1 %v9492_v23  ;;  %7508 = vmatpush1.bf16.msra.mxu0 %v9495_v40  ;;  %v4811_v7 = vmax.f32 %v12526_v30, %v12535_v28  ;;  %v12557_v58 = vmax.f32 %v12108_v17, 0.0  ;;  %v9506_v0 = vld [vmem:[#allocation5 + $0x544] ss:$16 sps:$4 sm:$0xff]  }
 0x768   :  { %v12554_v20 = vmax.f32 %v4683_v50, 0.0  ;;  %v4743_v51 = vmax.f32 %v12416_v41, %v12362_v35  ;;  %7345 = vmatprep.subr.bf16.mxu1 %v9500_v62  ;;  %7509 = vmatprep.subr.bf16.mxu0 %v9503_v13  ;;  %v9509_v45 = vld [vmem:[#allocation5 + $0x54c] ss:$16 sps:$4 sm:$0xff]   ;;  %v12563_v40 = vmax.f32 %v4665_v47, 0.0  ;;  %v12565_v25 = vmax.f32 %v4666_v55, 0.0 }
 0x769   :  { %16131 = vst [vmem:[#allocation103_spill] sm:$0xff] %v12546_v16  ;;  %16132 = vst [vmem:[#allocation136_spill] sm:$0xff] %v12548_v43  ;;  %v4784_v23 = vmax.f32 %v12546_v16, %v12548_v43  ;;  %4812 = vmax.xlane.f32.xlu0 %v4811_v7  ;;  %v4734_v50 = vmax.f32 %v4733_v9, %v12548_v43  ;;  %v12569_v17 = vmax.f32 %v12503_v36, %v3815_v46  ;;  %v9504_v47 = vld [vmem:[#allocation5 + $0x540] ss:$16 sps:$4 sm:$0xff]   ;;  %v9507_v35 = vld [vmem:[#allocation5 + $0x548] ss:$16 sps:$4 sm:$0xff]   ;;  %v12594_v43 = vpop.xlane.xlu1 %2008 }
 0x76a   :  { %16133 = vst [vmem:[#allocation137_spill] sm:$0xff] %v12554_v20  ;;  %16134 = vst [vmem:[#allocation104_spill] sm:$0xff] %v12557_v58  ;;  %v12571_v28 = vmax.f32 %v3788_v5, %v3789_v4  ;;  %v4717_v13 = vmax.f32 %v12372_v33, %v12354_v34  ;;  %v4762_v62 = vmax.f32 %v4761_v49, %v12557_v58  ;;  %v16137_v9 = vld [vmem:[#allocation112_spill] sm:$0xff]  ;;  %v12582_v5 = vpop.xlane.xlu0 %2017  ;;  %v9512_v49 = vld [vmem:[#allocation5 + $0x564] ss:$16 sps:$4 sm:$0xff]  }
 0x76b   :  { %16135 = vst [vmem:[#allocation105_spill] sm:$0xff] %v12563_v40  ;;  %16136 = vst [vmem:[#allocation138_spill] sm:$0xff] %v12565_v25  ;;  %4785 = vmax.xlane.f32.xlu1 %v4784_v23  ;;  %7346 = vmatpush1.bf16.msra.mxu1 %v9498_v18  ;;  %v4814_v55 = vmax.f32 %v12554_v20, %v12557_v58  ;;  %vm2028_vm4 = vcmp.eq.f32.partialorder %v16137_v9, %v12305_v37  ;;  %v16138_v36 = vld [vmem:[#allocation108_spill] sm:$0xff]  ;;  %v16140_v7 = vld [vmem:[#allocation109_spill] sm:$0xff]  ;;  %v12592_v58 = vadd.s32 128, %v12511_v19 }
 0x76c   :  { %7510 = vmatpush1.bf16.msra.mxu0 %v9501_v24  ;;  %v4624_v4 = vmul.f32 %v12013_v8, %v16138_v36  ;;  %16139 = vst [vmem:[#allocation106_spill] sm:$0xff] %v12582_v5  ;;  %v12585_v46 = vmax.f32 %v4743_v51, %v12403_v44  ;;  %7347 = vmatprep.subr.bf16.mxu1 %v9506_v0  ;;  %v9515_v18 = vld [vmem:[#allocation5 + $0x56c] ss:$16 sps:$4 sm:$0xff]   ;;  %v16141_v51 = vld [vmem:[#allocation113_spill] sm:$0xff] }
 0x76d   :  { %7511 = vmatprep.subr.bf16.mxu0 %v9509_v45  ;;  %v4787_v24 = vmax.f32 %v12563_v40, %v12565_v25  ;;  %v4625_v23 = vmul.f32 %v12016_v3, %v16140_v7  ;;  %4815 = vmax.xlane.f32.xlu0 %v4814_v55  ;;  %v4735_v8 = vmax.f32 %v4734_v50, %v12565_v25  ;;  %v9510_v45 = vld [vmem:[#allocation5 + $0x560] ss:$16 sps:$4 sm:$0xff]   ;;  %v16143_v3 = vld [vmem:[#allocation121_spill] sm:$0xff]  ;;  %v2060_v50 = vsel %vm2028_vm4, %v12511_v19, 1073741824  ;;  %v9521_v25 = vld [vmem:[#allocation5 + $0x58c] ss:$16 sps:$4 sm:$0xff]  }
 0x76e   :  { %vm2029_vm5 = vcmp.eq.f32.partialorder %v16141_v51, %v12305_v37  ;;  %v4667_v0 = vadd.f32 %v12266_v11, %v4624_v4  ;;  %v16142_v44 = vld [vmem:[#allocation120_spill] sm:$0xff]  ;;  %vm2053_vm7 = vcmp.eq.f32.partialorder %v16143_v3, %v12582_v5  ;;  %v3817_v55 = vrot.slane %v12569_v17, 2  ;;  %v9513_v11 = vld [vmem:[#allocation5 + $0x568] ss:$16 sps:$4 sm:$0xff]   ;;  %v9518_v9 = vld [vmem:[#allocation5 + $0x584] ss:$16 sps:$4 sm:$0xff]  }
 0x76f   :  { %4788 = vmax.xlane.f32.xlu1 %v4787_v24  ;;  %v4668_v36 = vadd.f32 %v12095_v60, %v4625_v23  ;;  %vm2052_vm6 = vcmp.eq.f32.partialorder %v16142_v44, %v12582_v5  ;;  %v3791_v7 = vrot.slane %v12571_v28, 2  ;;  %7348 = vmatpush1.bf16.msra.mxu1 %v9504_v47  ;;  %v4763_v4 = vrot.slane %v4762_v62, 4  ;;  %v16146_v47 = vld [vmem:[#allocation122_spill] sm:$0xff]  ;;  %v16148_v51 = vld [vmem:[#allocation123_spill] sm:$0xff] }
 0x770   :  { %7512 = vmatpush1.bf16.msra.mxu0 %v9507_v35  ;;  %v12611_v60 = vmax.f32 %v4667_v0, 0.0  ;;  %v4745_v24 = vmax.f32 %v12585_v46, %v12420_v38  ;;  %v12616_v23 = vmax.f32 %v4717_v13, %v12438_v61  ;;  %7349 = vmatprep.subr.bf16.mxu1 %v9512_v49  ;;  %v2061_v35 = vsel %vm2029_vm5, %v12592_v58, 1073741824  ;;  %v12626_v0 = vpop.xlane.xlu0 %2023  ;;  %v9516_v49 = vld [vmem:[#allocation5 + $0x580] ss:$16 sps:$4 sm:$0xff]   ;;  %v12641_v38 = vpop.xlane.xlu1 %2011  ;;  %v9519_v44 = vld [vmem:[#allocation5 + $0x588] ss:$16 sps:$4 sm:$0xff]  }
 0x771   :  { %7513 = vmatprep.subr.bf16.mxu0 %v9515_v18  ;;  %v12618_v34 = vmax.f32 %v4668_v36, 0.0  ;;  %vm2030_vm8 = vcmp.eq.f32.partialorder %v16146_v47, %v12334_v10  ;;  %16147 = vst [vmem:[#allocation108_spill] sm:$0xff] %v12626_v0  ;;  %vm2092_vm9 = vcmp.lt.s32.totalorder %v2060_v50, %v2061_v35  ;;  %v2084_v13 = vsel %vm2052_vm6, %v12511_v19, 1073741824  ;;  %v9524_v41 = vld [vmem:[#allocation5 + $0x5a4] ss:$16 sps:$4 sm:$0xff]  }
 0x772   :  { %16144 = vst [vmem:[#allocation107_spill] sm:$0xff] %v12611_v60  ;;  %v2085_v46 = vsel %vm2053_vm7, %v12592_v58, 1073741824  ;;  %vm2031_vm10 = vcmp.eq.f32.partialorder %v16148_v51, %v12334_v10  ;;  %v12639_v36 = vsel %vm2092_vm9, %v2060_v50, %v2061_v35  ;;  %v4764_v61 = vmax.f32 %v4762_v62, %v4763_v4  ;;  %v16151_v35 = vld [vmem:[#allocation126_spill] sm:$0xff] }
 0x773   :  { %16145 = vst [vmem:[#allocation112_spill] sm:$0xff] %v12618_v34  ;;  %v4736_v18 = vmax.f32 %v4735_v8, %v12618_v34  ;;  %16149 = vst [vmem:[#allocation109_spill] sm:$0xff] %v12639_v36  ;;  %vm2284_vm11 = vcmp.lt.s32.totalorder %v2084_v13, %v2085_v46  ;;  %7350 = vmatpush1.bf16.msra.mxu1 %v9510_v45  ;;  %v4790_v3 = vmax.f32 %v12611_v60, %v12618_v34  ;;  %v9527_v8 = vld [vmem:[#allocation5 + $0x5ac] ss:$16 sps:$4 sm:$0xff]  }
 0x774   :  { %7514 = vmatpush1.bf16.msra.mxu0 %v9513_v11  ;;  %v2095_v5 = vshra.s32 %v12639_v36, 16  ;;  %v12646_v33 = vsel %vm2284_vm11, %v2084_v13, %v2085_v46  ;;  %7351 = vmatprep.subr.bf16.mxu1 %v9518_v9  ;;  %vm2056_vm12 = vcmp.eq.f32.partialorder %v16151_v35, %v12626_v0  ;;  %v2062_v62 = vsel %vm2030_vm8, %v12511_v19, 1073741824  ;;  %v16152_v11 = vld [vmem:[#allocation127_spill] sm:$0xff]  ;;  %v9522_v13 = vld [vmem:[#allocation5 + $0x5a0] ss:$16 sps:$4 sm:$0xff]  }
 0x775   :  { %16150 = vst [vmem:[#allocation113_spill] sm:$0xff] %v12646_v33  ;;  %7515 = vmatprep.subr.bf16.mxu0 %v9521_v25  ;;  %v4737_v50 = vrot.slane %v4736_v18, 4  ;;  %v2287_v45 = vshra.s32 %v12646_v33, 16  ;;  %4791 = vmax.xlane.f32.xlu1 %v4790_v3  ;;  %vm2057_vm13 = vcmp.eq.f32.partialorder %v16152_v11, %v12626_v0  ;;  %v2063_v25 = vsel %vm2031_vm10, %v12592_v58, 1073741824  ;;  %v9525_v3 = vld [vmem:[#allocation5 + $0x5a8] ss:$16 sps:$4 sm:$0xff]  }
 0x776   :  { %v12657_v4 = vcvt.s32.f32 %v2095_v5  ;;  %v3792_v9 = vmax.f32 %v12571_v28, %v3791_v7  ;;  %vm2108_vm14 = vcmp.lt.s32.totalorder %v2062_v62, %v2063_v25  ;;  %v3818_v47 = vmax.f32 %v12569_v17, %v3817_v55  ;;  %v9530_v36 = vld [vmem:[#allocation5 + $0x5c4] ss:$16 sps:$4 sm:$0xff]   ;;  %v16155_v5 = vld [vmem:[#allocation128_spill] sm:$0xff]  ;;  %v16157_v7 = vld [vmem:[#allocation130_spill] sm:$0xff] }
 0x777   :  { %v4738_v46 = vmax.f32 %v4736_v18, %v4737_v50  ;;  %v12664_v33 = vcvt.s32.f32 %v2287_v45  ;;  %7352 = vmatpush1.bf16.msra.mxu1 %v9516_v49  ;;  %vm2032_vm15 = vcmp.eq.f32.partialorder %v16155_v5, %v12376_v32  ;;  %v12669_v34 = vsel %vm2108_vm14, %v2062_v62, %v2063_v25  ;;  %v9533_v28 = vld [vmem:[#allocation5 + $0x5cc] ss:$16 sps:$4 sm:$0xff]   ;;  %v12674_v49 = vpop.xlane.xlu1 %2014  ;;  %v9528_v45 = vld [vmem:[#allocation5 + $0x5c0] ss:$16 sps:$4 sm:$0xff]   ;;  %v16158_v62 = vld [vmem:[#allocation133_spill] sm:$0xff] }
 0x778   :  { %16153 = vst [vmem:[#allocation120_spill] sm:$0xff] %v12657_v4  ;;  %7516 = vmatpush1.bf16.msra.mxu0 %v9519_v44  ;;  %16156 = vst [vmem:[#allocation122_spill] sm:$0xff] %v12669_v34  ;;  %v3793_v51 = vrot.slane %v3792_v9, 1  ;;  %v4765_v37 = vrot.slane %v4764_v61, 2  ;;  %7353 = vmatprep.subr.bf16.mxu1 %v9524_v41  ;;  %vm2033_vm0 = vcmp.eq.f32.partialorder %v16157_v7, %v12376_v32  ;;  %v2111_v18 = vshra.s32 %v12669_v34, 16 }
 0x779   :  { %16154 = vst [vmem:[#allocation121_spill] sm:$0xff] %v12664_v33  ;;  %7517 = vmatprep.subr.bf16.mxu0 %v9527_v8  ;;  %v3819_v17 = vrot.slane %v3818_v47, 1  ;;  %v4739_v55 = vrot.slane %v4738_v46, 2  ;;  %v12677_v44 = vmax.f32 %v4745_v24, %v12459_v1  ;;  %v4719_v50 = vmax.f32 %v12616_v23, %v12479_v59  ;;  %2098 = vmin.xlane.f32.xlu0 %v12657_v4  ;;  %v9531_v23 = vld [vmem:[#allocation5 + $0x5c8] ss:$16 sps:$4 sm:$0xff]  }
 0x77a   :  { %2290 = vmin.xlane.f32.xlu1 %v12664_v33  ;;  %v4766_v41 = vmax.f32 %v4764_v61, %v4765_v37  ;;  %v2088_v8 = vsel %vm2056_vm12, %v12511_v19, 1073741824  ;;  %vm2034_vm1 = vcmp.eq.f32.partialorder %v16158_v62, %v12409_v22  ;;  %v12689_v25 = vcvt.s32.f32 %v2111_v18  ;;  %v9537_v0 = vld [vmem:[#allocation5 + $0x5e8] ss:$16 sps:$4 sm:$0xff]  }
 0x77b   :  { %v3794_v24 = vmax.f32 %v3792_v9, %v3793_v51  ;;  %v4740_v34 = vmax.f32 %v4738_v46, %v4739_v55  ;;  %7354 = vmatpush1.bf16.msra.mxu1 %v9522_v13  ;;  %v2089_v37 = vsel %vm2057_vm13, %v12592_v58, 1073741824  ;;  %v2064_v61 = vsel %vm2032_vm15, %v12511_v19, 1073741824  ;;  %v9536_v9 = vld [vmem:[#allocation5 + $0x5e4] ss:$16 sps:$4 sm:$0xff]   ;;  %v9539_v13 = vld [vmem:[#allocation5 + $0x5ec] ss:$16 sps:$4 sm:$0xff]  }
 0x77c   :  { %16159 = vst [vmem:[#allocation123_spill] sm:$0xff] %v12689_v25  ;;  %7518 = vmatpush1.bf16.msra.mxu0 %v9525_v3  ;;  %v4767_v4 = vrot.slane %v4766_v41, 1  ;;  %v2065_v35 = vsel %vm2033_vm0, %v12592_v58, 1073741824  ;;  %7355 = vmatprep.subr.bf16.mxu1 %v9530_v36  ;;  %v3820_v46 = vmax.f32 %v3818_v47, %v3819_v17  ;;  %vm2316_vm2 = vcmp.lt.s32.totalorder %v2088_v8, %v2089_v37  ;;  %v16160_v51 = vld [vmem:[#allocation134_spill] sm:$0xff]  ;;  %v12713_v17 = vpop.xlane.xlu1 %2020  ;;  %v16179_v33 = vld [vmem:[#allocation17_spill] sm:$0xff] }
 0x77d   :  { %7519 = vmatprep.subr.bf16.mxu0 %v9533_v28  ;;  %v4741_v3 = vrot.slane %v4740_v34, 1  ;;  %vm2124_vm4 = vcmp.lt.s32.totalorder %v2064_v61, %v2065_v35  ;;  %v4720_v11 = vmax.f32 %v4719_v50, %v12496_v21  ;;  %vm2035_vm5 = vcmp.eq.f32.partialorder %v16160_v51, %v12409_v22  ;;  %2114 = vmin.xlane.f32.xlu0 %v12689_v25  ;;  %v16163_v55 = vld [vmem:[#allocation110_spill] sm:$0xff] }
 0x77e   :  { %v12707_v5 = vsel %vm2316_vm2, %v2088_v8, %v2089_v37  ;;  %v12709_v18 = vsel %vm2124_vm4, %v2064_v61, %v2065_v35  ;;  %v4768_v36 = vmax.f32 %v4766_v41, %v4767_v4  ;;  %vm2038_vm6 = vcmp.eq.f32.partialorder %v16163_v55, %v12543_v52  ;;  %v9534_v50 = vld [vmem:[#allocation5 + $0x5e0] ss:$16 sps:$4 sm:$0xff]   ;;  %v16164_v8 = vld [vmem:[#allocation23_spill] sm:$0xff] }
 0x77f   :  { %16161 = vst [vmem:[#allocation126_spill] sm:$0xff] %v12707_v5  ;;  %16162 = vst [vmem:[#allocation127_spill] sm:$0xff] %v12709_v18  ;;  %v4742_v7 = vmax.f32 %v4740_v34, %v4741_v3  ;;  %v2319_v28 = vshra.s32 %v12707_v5, 16  ;;  %v2127_v47 = vshra.s32 %v12709_v18, 16  ;;  %7356 = vmatpush1.bf16.msra.mxu1 %v9528_v45  ;;  %vm2036_vm7 = vcmp.eq.f32.partialorder %v16164_v8, %v12447_v2  ;;  %v16165_v37 = vld [vmem:[#allocation24_spill] sm:$0xff]  ;;  %v16170_v8 = vld [vmem:[#allocation25_spill] sm:$0xff] }
 0x780   :  { %7520 = vmatpush1.bf16.msra.mxu0 %v9531_v23  ;;  %vm2037_vm8 = vcmp.eq.f32.partialorder %v16165_v37, %v12447_v2  ;;  %v2066_v34 = vsel %vm2034_vm1, %v12511_v19, 1073741824  ;;  %7357 = vmatprep.subr.bf16.mxu1 %v9536_v9  ;;  %v5689_v4 = vsel %vm5665_vm3, %v3820_v46, %v3794_v24  ;;  %v9542_v41 = vld [vmem:[#allocation5 + $0x604] ss:$16 sps:$4 sm:$0xff]   ;;  %v9545_v45 = vld [vmem:[#allocation5 + $0x60c] ss:$16 sps:$4 sm:$0xff]   ;;  %v2067_v35 = vsel %vm2035_vm5, %v12592_v58, 1073741824 }
 0x781   :  { %7521 = vmatprep.subr.bf16.mxu0 %v9539_v13  ;;  %v12726_v23 = vcvt.s32.f32 %v2319_v28  ;;  %v12728_v61 = vcvt.s32.f32 %v2127_v47  ;;  %v4747_v3 = vmax.f32 %v12677_v44, %v12484_v15  ;;  %v4721_v62 = vmax.f32 %v4720_v11, %v12546_v16  ;;  %v16168_v9 = vld [vmem:[#allocation111_spill] sm:$0xff]  ;;  %v12752_v11 = vpop.xlane.xlu0 %2903  ;;  %v9552_v5 = vld [vmem:[#allocation5 + $0x640] ss:$16 sps:$4 sm:$0xff]  }
 0x782   :  { %vm2039_vm9 = vcmp.eq.f32.partialorder %v16168_v9, %v12543_v52  ;;  %vm2140_vm10 = vcmp.lt.s32.totalorder %v2066_v34, %v2067_v35  ;;  %v5698_v24 = vsel %vm5665_vm3, %v4768_v36, %v4742_v7  ;;  %v2068_v46 = vsel %vm2036_vm7, %v12511_v19, 1073741824  ;;  %v9540_v7 = vld [vmem:[#allocation5 + $0x600] ss:$16 sps:$4 sm:$0xff]   ;;  %v9543_v47 = vld [vmem:[#allocation5 + $0x608] ss:$16 sps:$4 sm:$0xff]  }
 0x783   :  { %16166 = vst [vmem:[#allocation128_spill] sm:$0xff] %v12726_v23  ;;  %16167 = vst [vmem:[#allocation130_spill] sm:$0xff] %v12728_v61  ;;  %2322 = vmin.xlane.f32.xlu1 %v12726_v23  ;;  %2130 = vmin.xlane.f32.xlu0 %v12728_v61  ;;  %v12742_v13 = vsel %vm2140_vm10, %v2066_v34, %v2067_v35  ;;  %v2069_v44 = vsel %vm2037_vm8, %v12592_v58, 1073741824  ;;  %v5705_v51 = vpack.c.bf16 %v5689_v4, %v5689_v4  ;;  %v16171_v37 = vld [vmem:[#allocation27_spill] sm:$0xff]  ;;  %v12769_v34 = vpop.xlane.xlu1 %2026  ;;  %v9546_v9 = vld [vmem:[#allocation5 + $0x620] ss:$16 sps:$4 sm:$0xff]  }
 0x784   :  { %16169 = vst [vmem:[#allocation133_spill] sm:$0xff] %v12742_v13  ;;  %7358 = vmatpush1.bf16.msra.mxu1 %v9534_v50  ;;  %7522 = vmatpush1.bf16.msra.mxu0 %v9537_v0  ;;  %v2143_v36 = vshra.s32 %v12742_v13, 16  ;;  %vm2156_vm11 = vcmp.lt.s32.totalorder %v2068_v46, %v2069_v44  ;;  %v2070_v28 = vsel %vm2038_vm6, %v12511_v19, 1073741824  ;;  %vm2040_vm12 = vcmp.eq.f32.partialorder %v16170_v8, %v12474_v12  ;;  %v16186_v61 = vld [vmem:[#allocation19_spill] sm:$0xff]  ;;  %v16203_v15 = vld [vmem:[#allocation20_spill] sm:$0xff] }
 0x785   :  { %7368 = vmatprep.subr.bf16.mxu1 %v9542_v41  ;;  %7532 = vmatprep.subr.bf16.mxu0 %v9545_v45  ;;  %vm2041_vm13 = vcmp.eq.f32.partialorder %v16171_v37, %v12474_v12  ;;  %v12763_v0 = vsel %vm2156_vm11, %v2068_v46, %v2069_v44  ;;  %v2071_v50 = vsel %vm2039_vm9, %v12592_v58, 1073741824  ;;  %16173 = vst [vmem:[#allocation110_spill] sm:$0xff] %v12769_v34  ;;  %v9548_v41 = vld [vmem:[#allocation5 + $0x624] ss:$16 sps:$4 sm:$0xff]   ;;  %v9551_v45 = vld [vmem:[#allocation5 + $0x62c] ss:$16 sps:$4 sm:$0xff]  }
 0x786   :  { %16172 = vst [vmem:[#allocation134_spill] sm:$0xff] %v12763_v0  ;;  %v4748_v55 = vmax.f32 %v4747_v3, %v12526_v30  ;;  %v5708_v4 = vpack.c.bf16 %v5698_v24, %v5698_v24  ;;  %v4722_v35 = vmax.f32 %v4721_v62, %v12563_v40  ;;  %v12773_v23 = vcvt.s32.f32 %v2143_v36  ;;  %v9549_v24 = vld [vmem:[#allocation5 + $0x628] ss:$16 sps:$4 sm:$0xff]   ;;  %v9554_v44 = vld [vmem:[#allocation5 + $0x644] ss:$16 sps:$4 sm:$0xff]   ;;  %v12788_v36 = vpop.xlane.xlu0 %2927 }
 0x787   :  { %7360 = vmatmul.mubr.bf16.vlgmr.msra.gmra.mrb[72].mxu1 %v5705_v51  ;;  %7524 = vmatmul.mubr.bf16.vlgmr.msra.gmra.mrb[120].mxu0 %v5705_v51  ;;  %v2159_v46 = vshra.s32 %v12763_v0, 16  ;;  %vm2172_vm14 = vcmp.lt.s32.totalorder %v2070_v28, %v2071_v50  ;;  %v2072_v3 = vsel %vm2040_vm12, %v12511_v19, 1073741824  ;;  %v2073_v62 = vsel %vm2041_vm13, %v12592_v58, 1073741824  ;;  %v16175_v51 = vld [vmem:[#allocation28_spill] sm:$0xff]  ;;  %v12798_v12 = vpop.xlane.xlu1 %2900  ;;  %v16201_v40 = vld [vmem:[#allocation141_spill] sm:$0xff] }
 0x788   :  { %16174 = vst [vmem:[#allocation23_spill] sm:$0xff] %v12773_v23  ;;  %7369 = vmatpush1.bf16.msra.mxu1 %v9540_v7  ;;  %7400 = vmatprep.mubr.bf16.mxu1 %v5708_v4  ;;  %vm2042_vm15 = vcmp.eq.f32.partialorder %v16175_v51, %v12508_v27  ;;  %v16176_v7 = vld [vmem:[#allocation29_spill] sm:$0xff]  ;;  %v4749_v8 = vmax.f32 %v4748_v55, %v12554_v20  ;;  %v9557_v0 = vld [vmem:[#allocation5 + $0x64c] ss:$16 sps:$4 sm:$0xff]  }
 0x789   :  { %7533 = vmatpush1.bf16.msra.mxu0 %v9543_v47  ;;  %7564 = vmatprep.mubr.bf16.mxu0 %v5708_v4  ;;  %vm2043_vm0 = vcmp.eq.f32.partialorder %v16176_v7, %v12508_v27  ;;  %v12792_v37 = vsel %vm2172_vm14, %v2070_v28, %v2071_v50  ;;  %v4723_v47 = vmax.f32 %v4722_v35, %v12611_v60  ;;  %v12796_v4 = vcvt.s32.f32 %v2159_v46  ;;  %v16180_v55 = vld [vmem:[#allocation116_spill] sm:$0xff]  ;;  %v16182_v51 = vld [vmem:[#allocation117_spill] sm:$0xff] }
 0x78a   :  { %7370 = vmatprep.subr.bf16.mxu1 %v9548_v41  ;;  %7534 = vmatprep.subr.bf16.mxu0 %v9551_v45  ;;  %16177 = vst [vmem:[#allocation24_spill] sm:$0xff] %v12792_v37  ;;  %vm2188_vm1 = vcmp.lt.s32.totalorder %v2072_v3, %v2073_v62  ;;  %vm2044_vm2 = vcmp.eq.f32.partialorder %v16179_v33, %v12550_v6  ;;  %v2074_v28 = vsel %vm2042_vm15, %v12511_v19, 1073741824  ;;  %v2075_v50 = vsel %vm2043_vm0, %v12592_v58, 1073741824  ;;  %v9555_v41 = vld [vmem:[#allocation5 + $0x648] ss:$16 sps:$4 sm:$0xff]  }
 0x78b   :  { %2146 = vmin.xlane.f32.xlu0 %v12773_v23  ;;  %16178 = vst [vmem:[#allocation111_spill] sm:$0xff] %v12796_v4  ;;  %vm2045_vm4 = vcmp.eq.f32.partialorder %v16180_v55, %v12550_v6  ;;  %v9560_v45 = vld [vmem:[#allocation5 + $0x664] ss:$16 sps:$4 sm:$0xff]   ;;  %v2175_v35 = vshra.s32 %v12792_v37, 16  ;;  %v4750_v46 = vrot.slane %v4749_v8, 4  ;;  %v16181_v23 = vld [vmem:[#allocation18_spill] sm:$0xff]  ;;  %vm2047_vm6 = vcmp.eq.f32.partialorder %v16182_v51, %v12594_v43 }
 0x78c   :  { %7371 = vmatpush1.bf16.msra.mxu1 %v9546_v9  ;;  %v9563_v9 = vld [vmem:[#allocation5 + $0x66c] ss:$16 sps:$4 sm:$0xff]   ;;  %vm2046_vm5 = vcmp.eq.f32.partialorder %v16181_v23, %v12594_v43  ;;  %v12818_v13 = vsel %vm2188_vm1, %v2072_v3, %v2073_v62  ;;  %v4724_v7 = vrot.slane %v4723_v47, 4  ;;  %vm2204_vm7 = vcmp.lt.s32.totalorder %v2074_v28, %v2075_v50  ;;  %v9558_v27 = vld [vmem:[#allocation5 + $0x660] ss:$16 sps:$4 sm:$0xff]  }
 0x78d   :  { %7535 = vmatpush1.bf16.msra.mxu0 %v9549_v24  ;;  %7372 = vmatprep.subr.bf16.mxu1 %v9554_v44  ;;  %16183 = vst [vmem:[#allocation25_spill] sm:$0xff] %v12818_v13  ;;  %v2076_v24 = vsel %vm2044_vm2, %v12511_v19, 1073741824  ;;  %v12829_v44 = vpop.xlane.xlu0 %2930  ;;  %v9561_v3 = vld [vmem:[#allocation5 + $0x668] ss:$16 sps:$4 sm:$0xff]   ;;  %v12831_v62 = vcvt.s32.f32 %v2175_v35  ;;  %v9566_v37 = vld [vmem:[#allocation5 + $0x684] ss:$16 sps:$4 sm:$0xff]   ;;  %v12847_v35 = vmax.f32 %v4749_v8, %v4750_v46  ;;  %vm2048_vm9 = vcmp.eq.f32.partialorder %v16186_v61, %v12641_v38 }
 0x78e   :  { %7536 = vmatprep.subr.bf16.mxu0 %v9557_v0  ;;  %v2077_v0 = vsel %vm2045_vm4, %v12592_v58, 1073741824  ;;  %v2078_v33 = vsel %vm2046_vm5, %v12511_v19, 1073741824  ;;  %v2079_v55 = vsel %vm2047_vm6, %v12592_v58, 1073741824  ;;  %v9564_v23 = vld [vmem:[#allocation5 + $0x680] ss:$16 sps:$4 sm:$0xff]   ;;  %vm2949_vm12 = vcmp.eq.f32.partialorder %v11810_v57, %v12752_v11  ;;  %v16194_v61 = vld [vmem:[#allocation35_spill] sm:$0xff] }
 0x78f   :  { %2162 = vmin.xlane.f32.xlu0 %v12796_v4  ;;  %16184 = vst [vmem:[#allocation27_spill] sm:$0xff] %v12831_v62  ;;  %v2191_v4 = vshra.s32 %v12818_v13, 16  ;;  %vm2220_vm8 = vcmp.lt.s32.totalorder %v2076_v24, %v2077_v0  ;;  %v12849_v13 = vmax.f32 %v4723_v47, %v4724_v7  ;;  %vm2236_vm10 = vcmp.lt.s32.totalorder %v2078_v33, %v2079_v55  ;;  %v16193_v7 = vld [vmem:[#allocation119_spill] sm:$0xff]  ;;  %v9599_v52 = vld [vmem:[#allocation5 + $0x72c] ss:$16 sps:$4 sm:$0xff]  }
 0x790   :  { %7373 = vmatpush1.bf16.msra.mxu1 %v9552_v5  ;;  %v12842_v5 = vpop.xlane.xlu1 %2924  ;;  %v12859_v47 = vsel %vm2220_vm8, %v2076_v24, %v2077_v0  ;;  %v2080_v24 = vsel %vm2048_vm9, %v12511_v19, 1073741824  ;;  %vm2051_vm14 = vcmp.eq.f32.partialorder %v16193_v7, %v12674_v49  ;;  %vm2950_vm15 = vcmp.eq.f32.partialorder %v16194_v61, %v12752_v11  ;;  %v16202_v61 = vld [vmem:[#allocation135_spill] sm:$0xff] }
 0x791   :  { %7537 = vmatpush1.bf16.msra.mxu0 %v9555_v41  ;;  %7374 = vmatprep.subr.bf16.mxu1 %v9560_v45  ;;  %v9569_v41 = vld [vmem:[#allocation5 + $0x68c] ss:$16 sps:$4 sm:$0xff]   ;;  %v12845_v45 = vsel %vm2204_vm7, %v2074_v28, %v2075_v50  ;;  %v12854_v51 = vcvt.s32.f32 %v2191_v4  ;;  %v9572_v28 = vld [vmem:[#allocation5 + $0x6a4] ss:$16 sps:$4 sm:$0xff]   ;;  %16189 = vst [vmem:[#allocation17_spill] sm:$0xff] %v12859_v47  ;;  %v12861_v46 = vpop.xlane.xlu0 %3838  ;;  %v12915_v57 = vsel %vm2950_vm15, %v12592_v58, 1073741824  ;;  %vm2058_vm7 = vcmp.eq.f32.partialorder %v16201_v40, %v12769_v34 }
 0x792   :  { %7538 = vmatprep.subr.bf16.mxu0 %v9563_v9  ;;  %16185 = vst [vmem:[#allocation28_spill] sm:$0xff] %v12845_v45  ;;  %v9567_v9 = vld [vmem:[#allocation5 + $0x688] ss:$16 sps:$4 sm:$0xff]   ;;  %v16188_v50 = vld [vmem:[#allocation118_spill] sm:$0xff]  ;;  %v2207_v8 = vshra.s32 %v12845_v45, 16  ;;  %v2223_v45 = vshra.s32 %v12859_v47, 16  ;;  %vm2059_vm8 = vcmp.eq.f32.partialorder %v16202_v61, %v12769_v34  ;;  %vm2966_vm9 = vcmp.eq.f32.partialorder %v16203_v15, %v12788_v36 }
 0x793   :  { %2178 = vmin.xlane.f32.xlu0 %v12831_v62  ;;  %16187 = vst [vmem:[#allocation29_spill] sm:$0xff] %v12854_v51  ;;  %vm2049_vm11 = vcmp.eq.f32.partialorder %v16188_v50, %v12641_v38  ;;  %v9570_v62 = vld [vmem:[#allocation5 + $0x6a0] ss:$16 sps:$4 sm:$0xff]   ;;  %v12901_v47 = vsel %vm2949_vm12, %v12511_v19, 1073741824  ;;  %v2083_v20 = vsel %vm2051_vm14, %v12592_v58, 1073741824  ;;  %v2090_v15 = vsel %vm2058_vm7, %v12511_v19, 1073741824 }
 0x794   :  { %7375 = vmatpush1.bf16.msra.mxu1 %v9558_v27  ;;  %v9575_v27 = vld [vmem:[#allocation5 + $0x6ac] ss:$16 sps:$4 sm:$0xff]   ;;  %v12868_v4 = vpop.xlane.xlu1 %2906  ;;  %v2081_v0 = vsel %vm2049_vm11, %v12592_v58, 1073741824  ;;  %v12909_v25 = vcvt.s32.f32 %v2223_v45  ;;  %v9584_v45 = vld [vmem:[#allocation5 + $0x6e4] ss:$16 sps:$4 sm:$0xff]  }
 0x795   :  { %7539 = vmatpush1.bf16.msra.mxu0 %v9561_v3  ;;  %7376 = vmatprep.subr.bf16.mxu1 %v9566_v37  ;;  %v12866_v37 = vsel %vm2236_vm10, %v2078_v33, %v2079_v55  ;;  %v9573_v33 = vld [vmem:[#allocation5 + $0x6a8] ss:$16 sps:$4 sm:$0xff]   ;;  %v12881_v55 = vcvt.s32.f32 %v2207_v8  ;;  %v9581_v3 = vld [vmem:[#allocation5 + $0x6cc] ss:$16 sps:$4 sm:$0xff]   ;;  %vm2252_vm4 = vcmp.lt.s32.totalorder %v2080_v24, %v2081_v0  ;;  %v12907_v18 = vpop.xlane.xlu0 %3862 }
 0x796   :  { %7540 = vmatprep.subr.bf16.mxu0 %v9569_v41  ;;  %16190 = vst [vmem:[#allocation116_spill] sm:$0xff] %v12866_v37  ;;  %v9578_v41 = vld [vmem:[#allocation5 + $0x6c4] ss:$16 sps:$4 sm:$0xff]   ;;  %v16195_v50 = vld [vmem:[#allocation140_spill] sm:$0xff]  ;;  %16200 = vst [vmem:[#allocation117_spill] sm:$0xff] %v12909_v25  ;;  %v12940_v60 = vsel %vm2252_vm4, %v2080_v24, %v2081_v0 }
 0x797   :  { %2194 = vmin.xlane.f32.xlu0 %v12854_v51  ;;  %16191 = vst [vmem:[#allocation18_spill] sm:$0xff] %v12881_v55  ;;  %vm2054_vm0 = vcmp.eq.f32.partialorder %v16195_v50, %v12713_v17  ;;  %v16197_v8 = vld [vmem:[#allocation67_spill] sm:$0xff]  ;;  %v16199_v51 = vld [vmem:[#allocation69_spill] sm:$0xff]  ;;  %16205 = vst [vmem:[#allocation118_spill] sm:$0xff] %v12940_v60  ;;  %v2255_v16 = vshra.s32 %v12940_v60, 16  ;;  %v2091_v50 = vsel %vm2059_vm8, %v12592_v58, 1073741824 }
 0x798   :  { %7377 = vmatpush1.bf16.msra.mxu1 %v9564_v23  ;;  %v16192_v23 = vld [vmem:[#allocation21_spill] sm:$0xff]  ;;  %vm2947_vm2 = vcmp.eq.f32.partialorder %v16197_v8, %v12798_v12  ;;  %vm2948_vm6 = vcmp.eq.f32.partialorder %v16199_v51, %v12798_v12  ;;  %v12935_v7 = vpop.xlane.xlu1 %3835  ;;  %v2086_v51 = vsel %vm2054_vm0, %v12511_v19, 1073741824 }
 0x799   :  { %7541 = vmatpush1.bf16.msra.mxu0 %v9567_v9  ;;  %7378 = vmatprep.subr.bf16.mxu1 %v9572_v28  ;;  %vm2050_vm13 = vcmp.eq.f32.partialorder %v16192_v23, %v12674_v49  ;;  %v16196_v9 = vld [vmem:[#allocation125_spill] sm:$0xff]  ;;  %v2239_v28 = vshra.s32 %v12866_v37, 16  ;;  %v9576_v37 = vld [vmem:[#allocation5 + $0x6c0] ss:$16 sps:$4 sm:$0xff]   ;;  %v2979_v23 = vsel %vm2947_vm2, %v12511_v19, 1073741824  ;;  %v2980_v8 = vsel %vm2948_vm6, %v12592_v58, 1073741824  ;;  %v12983_v1 = vpop.xlane.xlu0 %2933 }
 0x79a   :  { %7542 = vmatprep.subr.bf16.mxu0 %v9575_v27  ;;  %vm2055_vm1 = vcmp.eq.f32.partialorder %v16196_v9, %v12713_v17  ;;  %v16198_v27 = vld [vmem:[#allocation37_spill] sm:$0xff]  ;;  %v13011_v60 = vcvt.s32.f32 %v2255_v16  ;;  %vm3884_vm6 = vcmp.eq.f32.partialorder %v11888_v63, %v12861_v46  ;;  %vm3882_vm8 = vcmp.eq.f32.partialorder %v11926_v31, %v12935_v7 }
 0x79b   :  { %2210 = vmin.xlane.f32.xlu0 %v12881_v55  ;;  %vm2965_vm5 = vcmp.eq.f32.partialorder %v16198_v27, %v12788_v36  ;;  %v2082_v55 = vsel %vm2050_vm13, %v12511_v19, 1073741824  ;;  %v16207_v24 = vld [vmem:[#allocation73_spill] sm:$0xff]  ;;  %vm3011_vm13 = vcmp.lt.s32.totalorder %v2979_v23, %v2980_v8  ;;  %v12961_v27 = vsel %vm2966_vm9, %v12592_v58, 1073741824 }
 0x79c   :  { %7379 = vmatpush1.bf16.msra.mxu1 %v9570_v62  ;;  %v9579_v62 = vld [vmem:[#allocation5 + $0x6c8] ss:$16 sps:$4 sm:$0xff]   ;;  %v12946_v21 = vsel %vm2965_vm5, %v12511_v19, 1073741824  ;;  %vm2268_vm10 = vcmp.lt.s32.totalorder %v2082_v55, %v2083_v20  ;;  %vm2964_vm12 = vcmp.eq.f32.partialorder %v16207_v24, %v12842_v5  ;;  %v12971_v30 = vsel %vm3011_vm13, %v2979_v23, %v2980_v8  ;;  %v9588_v8 = vld [vmem:[#allocation5 + $0x700] ss:$16 sps:$4 sm:$0xff]   ;;  %16216 = vst [vmem:[#allocation125_spill] sm:$0xff] %v13011_v60 }
 0x79d   :  { %7543 = vmatpush1.bf16.msra.mxu0 %v9573_v33  ;;  %7380 = vmatprep.subr.bf16.mxu1 %v9578_v41  ;;  %v9587_v33 = vld [vmem:[#allocation5 + $0x6ec] ss:$16 sps:$4 sm:$0xff]   ;;  %v12937_v41 = vcvt.s32.f32 %v2239_v28  ;;  %v16206_v28 = vld [vmem:[#allocation71_spill] sm:$0xff]  ;;  %16208 = vst [vmem:[#allocation21_spill] sm:$0xff] %v12971_v30  ;;  %v3014_v9 = vshra.s32 %v12971_v30, 16  ;;  %v2996_v61 = vsel %vm2964_vm12, %v12592_v58, 1073741824  ;;  %vm2332_vm5 = vcmp.lt.s32.totalorder %v2090_v15, %v2091_v50 }
 0x79e   :  { %7544 = vmatprep.subr.bf16.mxu0 %v9581_v3  ;;  %v9582_v3 = vld [vmem:[#allocation5 + $0x6e0] ss:$16 sps:$4 sm:$0xff]   ;;  %vm2963_vm11 = vcmp.eq.f32.partialorder %v16206_v28, %v12842_v5  ;;  %v9585_v0 = vld [vmem:[#allocation5 + $0x6e8] ss:$16 sps:$4 sm:$0xff]   ;;  %vm3900_vm12 = vcmp.eq.f32.partialorder %v11922_v53, %v12907_v18 }
 0x79f   :  { %16204 = vst [vmem:[#allocation19_spill] sm:$0xff] %v12937_v41  ;;  %2226 = vmin.xlane.f32.xlu0 %v12909_v25  ;;  %v2087_v25 = vsel %vm2055_vm1, %v12592_v58, 1073741824  ;;  %v16210_v23 = vld [vmem:[#allocation31_spill] sm:$0xff]  ;;  %v2995_v40 = vsel %vm2963_vm11, %v12511_v19, 1073741824  ;;  %v16213_v34 = vld [vmem:[#allocation65_spill] sm:$0xff]  ;;  %v16214_v24 = vld [vmem:[#allocation36_spill] sm:$0xff] }
 0x7a0   :  { %7381 = vmatpush1.bf16.msra.mxu1 %v9576_v37  ;;  %v9590_v37 = vld [vmem:[#allocation5 + $0x704] ss:$16 sps:$4 sm:$0xff]   ;;  %vm2967_vm14 = vcmp.eq.f32.partialorder %v16210_v23, %v12829_v44  ;;  %vm2300_vm0 = vcmp.lt.s32.totalorder %v2086_v51, %v2087_v25  ;;  %vm3139_vm1 = vcmp.lt.s32.totalorder %v2995_v40, %v2996_v61  ;;  %v9591_v28 = vld [vmem:[#allocation5 + $0x708] ss:$16 sps:$4 sm:$0xff]   ;;  %vm2951_vm2 = vcmp.eq.f32.partialorder %v16213_v34, %v12868_v4 }
 0x7a1   :  { %7545 = vmatpush1.bf16.msra.mxu0 %v9579_v62  ;;  %7382 = vmatprep.subr.bf16.mxu1 %v9584_v45  ;;  %v9593_v62 = vld [vmem:[#allocation5 + $0x70c] ss:$16 sps:$4 sm:$0xff]   ;;  %v12986_v45 = vsel %vm2268_vm10, %v2082_v55, %v2083_v20  ;;  %v13001_v20 = vcvt.s32.f32 %v3014_v9  ;;  %v13003_v55 = vpop.xlane.xlu1 %3859  ;;  %vm2952_vm4 = vcmp.eq.f32.partialorder %v16214_v24, %v12868_v4  ;;  %v13009_v30 = vsel %vm3139_vm1, %v2995_v40, %v2996_v61  ;;  %v9596_v9 = vld [vmem:[#allocation5 + $0x724] ss:$16 sps:$4 sm:$0xff]   ;;  %v13049_v40 = vpop.xlane.xlu0 %3865  ;;  %v9594_v61 = vld [vmem:[#allocation5 + $0x720] ss:$16 sps:$4 sm:$0xff]  }
 0x7a2   :  { %7546 = vmatprep.subr.bf16.mxu0 %v9587_v33  ;;  %16209 = vst [vmem:[#allocation119_spill] sm:$0xff] %v12986_v45  ;;  %v16211_v33 = vld [vmem:[#allocation33_spill] sm:$0xff]  ;;  %16215 = vst [vmem:[#allocation140_spill] sm:$0xff] %v13009_v30  ;;  %v3142_v59 = vshra.s32 %v13009_v30, 16  ;;  %v13028_v16 = vsel %vm2300_vm0, %v2086_v51, %v2087_v25  ;;  %v2983_v25 = vsel %vm2951_vm2, %v12511_v19, 1073741824  ;;  %v2984_v51 = vsel %vm2952_vm4, %v12592_v58, 1073741824 }
 0x7a3   :  { %2242 = vmin.xlane.f32.xlu0 %v12937_v41  ;;  %vm2968_vm15 = vcmp.eq.f32.partialorder %v16211_v33, %v12829_v44  ;;  %16212 = vst [vmem:[#allocation35_spill] sm:$0xff] %v13001_v20  ;;  %v2271_v41 = vshra.s32 %v12986_v45, 16  ;;  %16217 = vst [vmem:[#allocation67_spill] sm:$0xff] %v13028_v16  ;;  %3017 = vmin.xlane.f32.xlu1 %v13001_v20  ;;  %vm3027_vm10 = vcmp.lt.s32.totalorder %v12901_v47, %v12915_v57  ;;  %v9597_v34 = vld [vmem:[#allocation5 + $0x728] ss:$16 sps:$4 sm:$0xff]  }
 0x7a4   :  { %7383 = vmatpush1.bf16.msra.mxu1 %v9582_v3  ;;  %v13018_v3 = vsel %vm2967_vm14, %v12511_v19, 1073741824  ;;  %v13039_v23 = vcvt.s32.f32 %v3142_v59  ;;  %v16221_v59 = vld [vmem:[#allocation39_spill] sm:$0xff]  ;;  %vm3043_vm11 = vcmp.lt.s32.totalorder %v2983_v25, %v2984_v51  ;;  %v2303_v33 = vshra.s32 %v13028_v16, 16  ;;  %v9605_v20 = vld [vmem:[#allocation5 + $0x74c] ss:$16 sps:$4 sm:$0xff]  }
 0x7a5   :  { %7547 = vmatpush1.bf16.msra.mxu0 %v9585_v0  ;;  %7384 = vmatprep.subr.bf16.mxu1 %v9590_v37  ;;  %v13025_v0 = vsel %vm2968_vm15, %v12592_v58, 1073741824  ;;  %v16218_v37 = vld [vmem:[#allocation63_spill] sm:$0xff]  ;;  %vm3883_vm9 = vcmp.eq.f32.partialorder %v16221_v59, %v12935_v7  ;;  %v13066_v24 = vsel %vm3043_vm11, %v2983_v25, %v2984_v51  ;;  %v13068_v30 = vpop.xlane.xlu1 %2909  ;;  %v9600_v51 = vld [vmem:[#allocation5 + $0x740] ss:$16 sps:$4 sm:$0xff]   ;;  %vm3898_vm15 = vcmp.eq.f32.partialorder %v11983_v14, %v13003_v55 }
 0x7a6   :  { %7548 = vmatprep.subr.bf16.mxu0 %v9593_v62  ;;  %vm3885_vm7 = vcmp.eq.f32.partialorder %v16218_v37, %v12861_v46  ;;  %v13037_v62 = vsel %vm2332_vm5, %v2090_v15, %v2091_v50  ;;  %16220 = vst [vmem:[#allocation69_spill] sm:$0xff] %v13039_v23  ;;  %v13057_v15 = vcvt.s32.f32 %v2271_v41  ;;  %v9602_v50 = vld [vmem:[#allocation5 + $0x744] ss:$16 sps:$4 sm:$0xff]   ;;  %16223 = vst [vmem:[#allocation135_spill] sm:$0xff] %v13066_v24  ;;  %v3046_v63 = vshra.s32 %v13066_v24, 16  ;;  %v16229_v59 = vld [vmem:[#allocation68_spill] sm:$0xff] }
 0x7a7   :  { %2258 = vmin.xlane.f32.xlu0 %v13011_v60  ;;  %16219 = vst [vmem:[#allocation37_spill] sm:$0xff] %v13037_v62  ;;  %v13074_v41 = vsel %vm3885_vm7, %v12592_v58, 1073741824  ;;  %3145 = vmin.xlane.f32.xlu1 %v13039_v23  ;;  %v3914_v37 = vsel %vm3882_vm8, %v12511_v19, 1073741824  ;;  %v3915_v25 = vsel %vm3883_vm9, %v12592_v58, 1073741824  ;;  %v16226_v24 = vld [vmem:[#allocation41_spill] sm:$0xff]  ;;  %vm2970_vm1 = vcmp.eq.f32.partialorder %v16229_v59, %v12983_v1  ;;  %v16235_v59 = vld [vmem:[#allocation75_spill] sm:$0xff] }
 0x7a8   :  { %7385 = vmatpush1.bf16.msra.mxu1 %v9588_v8  ;;  %16222 = vst [vmem:[#allocation141_spill] sm:$0xff] %v13057_v15  ;;  %v13064_v8 = vsel %vm3884_vm6, %v12511_v19, 1073741824  ;;  %vm2969_vm14 = vcmp.eq.f32.partialorder %v16226_v24, %v12983_v1  ;;  %vm3946_vm0 = vcmp.lt.s32.totalorder %v3914_v37, %v3915_v25  ;;  %v9603_v31 = vld [vmem:[#allocation5 + $0x748] ss:$16 sps:$4 sm:$0xff]   ;;  %v9608_v23 = vld [vmem:[#allocation5 + $0x764] ss:$16 sps:$4 sm:$0xff]   ;;  %vm3155_vm2 = vcmp.lt.s32.totalorder %v12946_v21, %v12961_v27 }
 0x7a9   :  { %7549 = vmatpush1.bf16.msra.mxu0 %v9591_v28  ;;  %7386 = vmatprep.subr.bf16.mxu1 %v9596_v9  ;;  %v16224_v28 = vld [vmem:[#allocation38_spill] sm:$0xff]  ;;  %v13089_v9 = vsel %vm3027_vm10, %v12901_v47, %v12915_v57  ;;  %v13103_v47 = vcvt.s32.f32 %v3046_v63  ;;  %v13105_v57 = vcvt.s32.f32 %v2303_v33  ;;  %vm3171_vm5 = vcmp.lt.s32.totalorder %v13018_v3, %v13025_v0  ;;  %v9609_v24 = vld [vmem:[#allocation5 + $0x768] ss:$16 sps:$4 sm:$0xff]  }
 0x7aa   :  { %7550 = vmatprep.subr.bf16.mxu0 %v9599_v52  ;;  %vm3901_vm13 = vcmp.eq.f32.partialorder %v16224_v28, %v12907_v18  ;;  %v2335_v52 = vshra.s32 %v13037_v62, 16  ;;  %16225 = vst [vmem:[#allocation20_spill] sm:$0xff] %v13089_v9  ;;  %v13113_v62 = vpop.xlane.xlu0 %2936  ;;  %v9611_v63 = vld [vmem:[#allocation5 + $0x76c] ss:$16 sps:$4 sm:$0xff]   ;;  %v13153_v28 = vsel %vm2970_vm1, %v12592_v58, 1073741824  ;;  %v13160_v14 = vsel %vm3155_vm2, %v12946_v21, %v12961_v27 }
 0x7ab   :  { %2274 = vmin.xlane.f32.xlu0 %v13057_v15  ;;  %16227 = vst [vmem:[#allocation71_spill] sm:$0xff] %v13103_v47  ;;  %16228 = vst [vmem:[#allocation73_spill] sm:$0xff] %v13105_v57  ;;  %v16231_v33 = vld [vmem:[#allocation34_spill] sm:$0xff]  ;;  %3049 = vmin.xlane.f32.xlu1 %v13103_v47  ;;  %v13133_v53 = vsel %vm3901_vm13, %v12592_v58, 1073741824  ;;  %vm3902_vm6 = vcmp.eq.f32.partialorder %v12000_v56, %v13049_v40  ;;  %vm3903_vm7 = vcmp.eq.f32.partialorder %v16235_v59, %v13049_v40 }
 0x7ac   :  { %7387 = vmatpush1.bf16.msra.mxu1 %v9594_v61  ;;  %v13111_v61 = vsel %vm3946_vm0, %v3914_v37, %v3915_v25  ;;  %vm3899_vm4 = vcmp.eq.f32.partialorder %v16231_v33, %v13003_v55  ;;  %v13127_v25 = vcvt.s32.f32 %v2335_v52  ;;  %v9606_v47 = vld [vmem:[#allocation5 + $0x760] ss:$16 sps:$4 sm:$0xff]   ;;  %v13147_v52 = vsel %vm2969_vm14, %v12511_v19, 1073741824  ;;  %16233 = vst [vmem:[#allocation65_spill] sm:$0xff] %v13160_v14  ;;  %v9617_v27 = vld [vmem:[#allocation5 + $0x78c] ss:$16 sps:$4 sm:$0xff]  }
 0x7ad   :  { %7551 = vmatpush1.bf16.msra.mxu0 %v9597_v34  ;;  %7388 = vmatprep.subr.bf16.mxu1 %v9602_v50  ;;  %16230 = vst [vmem:[#allocation31_spill] sm:$0xff] %v13111_v61  ;;  %v13119_v34 = vsel %vm3900_vm12, %v12511_v19, 1073741824  ;;  %v3030_v50 = vshra.s32 %v13089_v9, 16  ;;  %v3949_v37 = vshra.s32 %v13111_v61, 16  ;;  %v3930_v61 = vsel %vm3898_vm15, %v12511_v19, 1073741824 }
 0x7ae   :  { %7552 = vmatprep.subr.bf16.mxu0 %v9605_v20  ;;  %16232 = vst [vmem:[#allocation33_spill] sm:$0xff] %v13127_v25  ;;  %v13137_v20 = vpop.xlane.xlu1 %3841  ;;  %vm3962_vm8 = vcmp.lt.s32.totalorder %v13064_v8, %v13074_v41  ;;  %v3931_v21 = vsel %vm3899_vm4, %v12592_v58, 1073741824  ;;  %vm2953_vm9 = vcmp.eq.f32.partialorder %v12040_v42, %v13068_v30  ;;  %v16240_v16 = vrot.slane %v12847_v35, 2 }
 0x7af   :  { %2306 = vmin.xlane.f32.xlu0 %v13105_v57  ;;  %v9614_v57 = vld [vmem:[#allocation5 + $0x784] ss:$16 sps:$4 sm:$0xff]   ;;  %vm4074_vm10 = vcmp.lt.s32.totalorder %v3930_v61, %v3931_v21  ;;  %v13218_v56 = vsel %vm3903_vm7, %v12592_v58, 1073741824  ;;  %vm3886_vm14 = vcmp.eq.f32.partialorder %v12090_v54, %v13137_v20  ;;  %vm4090_vm15 = vcmp.lt.s32.totalorder %v13119_v34, %v13133_v53 }
 0x7b0   :  { %7389 = vmatpush1.bf16.msra.mxu1 %v9600_v51  ;;  %v13162_v51 = vcvt.s32.f32 %v3949_v37  ;;  %v13188_v33 = vsel %vm4074_vm10, %v3930_v61, %v3931_v21  ;;  %v4753_v15 = vmax.f32 %v12847_v35, %v16240_v16  ;;  %v13196_v45 = vpop.xlane.xlu0 %3868  ;;  %v16241_v61 = vld [vmem:[#allocation85_spill] sm:$0xff]  ;;  %v16243_v21 = vld [vmem:[#allocation66_spill] sm:$0xff] }
 0x7b1   :  { %7553 = vmatpush1.bf16.msra.mxu0 %v9603_v31  ;;  %7390 = vmatprep.subr.bf16.mxu1 %v9608_v23  ;;  %v13174_v31 = vcvt.s32.f32 %v3030_v50  ;;  %v13183_v23 = vsel %vm3171_vm5, %v13018_v3, %v13025_v0  ;;  %16238 = vst [vmem:[#allocation38_spill] sm:$0xff] %v13188_v33  ;;  %v16239_v50 = vrot.slane %v12849_v13, 2  ;;  %v9612_v3 = vld [vmem:[#allocation5 + $0x780] ss:$16 sps:$4 sm:$0xff]   ;;  %v9615_v0 = vld [vmem:[#allocation5 + $0x788] ss:$16 sps:$4 sm:$0xff]   ;;  %vm2954_vm11 = vcmp.eq.f32.partialorder %v16241_v61, %v13068_v30 }
 0x7b2   :  { %16234 = vst [vmem:[#allocation36_spill] sm:$0xff] %v13162_v51  ;;  %7554 = vmatprep.subr.bf16.mxu0 %v9611_v63  ;;  %16237 = vst [vmem:[#allocation39_spill] sm:$0xff] %v13183_v23  ;;  %3952 = vmin.xlane.f32.xlu1 %v13162_v51  ;;  %v3158_v63 = vshra.s32 %v13160_v14, 16  ;;  %v13202_v51 = vsel %vm3902_vm6, %v12511_v19, 1073741824  ;;  %v4077_v35 = vshra.s32 %v13188_v33, 16  ;;  %vm2971_vm12 = vcmp.eq.f32.partialorder %v16243_v21, %v13113_v62 }
 0x7b3   :  { %16236 = vst [vmem:[#allocation63_spill] sm:$0xff] %v13174_v31  ;;  %2338 = vmin.xlane.f32.xlu0 %v13127_v25  ;;  %v4727_v37 = vmax.f32 %v12849_v13, %v16239_v50  ;;  %v13211_v13 = vsel %vm3962_vm8, %v13064_v8, %v13074_v41  ;;  %v9620_v16 = vld [vmem:[#allocation5 + $0x7a4] ss:$16 sps:$4 sm:$0xff]   ;;  %v13223_v50 = vpop.xlane.xlu1 %2912  ;;  %v2985_v8 = vsel %vm2953_vm9, %v12511_v19, 1073741824  ;;  %v9623_v41 = vld [vmem:[#allocation5 + $0x7ac] ss:$16 sps:$4 sm:$0xff]   ;;  %v13267_v21 = vsel %vm4090_vm15, %v13119_v34, %v13133_v53 }
 0x7b4   :  { %7391 = vmatpush1.bf16.msra.mxu1 %v9606_v47  ;;  %16242 = vst [vmem:[#allocation41_spill] sm:$0xff] %v13211_v13  ;;  %v3174_v47 = vshra.s32 %v13183_v23, 16  ;;  %v3965_v59 = vshra.s32 %v13211_v13, 16  ;;  %v4754_v42 = vrot.slane %v4753_v15, 1  ;;  %v9618_v25 = vld [vmem:[#allocation5 + $0x7a0] ss:$16 sps:$4 sm:$0xff]   ;;  %v13243_v60 = vcvt.s32.f32 %v3158_v63  ;;  %v13254_v13 = vpop.xlane.xlu0 %2939 }
 0x7b5   :  { %7555 = vmatpush1.bf16.msra.mxu0 %v9609_v24  ;;  %7392 = vmatprep.subr.bf16.mxu1 %v9614_v57  ;;  %v16244_v57 = vld [vmem:[#allocation70_spill] sm:$0xff]  ;;  %v13233_v24 = vcvt.s32.f32 %v4077_v35  ;;  %v4728_v33 = vrot.slane %v4727_v37, 1  ;;  %v13249_v35 = vsel %vm2971_vm12, %v12511_v19, 1073741824  ;;  %v9626_v61 = vld [vmem:[#allocation5 + $0x7c4] ss:$16 sps:$4 sm:$0xff]   ;;  %vm2955_vm2 = vcmp.eq.f32.partialorder %v12150_v26, %v13223_v50 }
 0x7b6   :  { %7556 = vmatprep.subr.bf16.mxu0 %v9617_v27  ;;  %vm2972_vm13 = vcmp.eq.f32.partialorder %v16244_v57, %v13113_v62  ;;  %v2986_v27 = vsel %vm2954_vm11, %v12592_v58, 1073741824  ;;  %v16246_v23 = vld [vmem:[#allocation74_spill] sm:$0xff]  ;;  %v16248_v57 = vld [vmem:[#allocation89_spill] sm:$0xff]  ;;  %v4093_v14 = vshra.s32 %v13267_v21, 16  ;;  %vm3187_vm5 = vcmp.lt.s32.totalorder %v13147_v52, %v13153_v28 }
 0x7b7   :  { %16245 = vst [vmem:[#allocation68_spill] sm:$0xff] %v13233_v24  ;;  %3033 = vmin.xlane.f32.xlu0 %v13174_v31  ;;  %vm3887_vm0 = vcmp.eq.f32.partialorder %v16246_v23, %v13137_v20  ;;  %4080 = vmin.xlane.f32.xlu1 %v13233_v24  ;;  %vm3059_vm1 = vcmp.lt.s32.totalorder %v2985_v8, %v2986_v27  ;;  %v13260_v63 = vsel %vm2972_vm13, %v12592_v58, 1073741824  ;;  %v13275_v31 = vcvt.s32.f32 %v3174_v47  ;;  %v13282_v53 = vpop.xlane.xlu1 %3844 }
 0x7b8   :  { %7393 = vmatpush1.bf16.msra.mxu1 %v9612_v3  ;;  %v9621_v3 = vld [vmem:[#allocation5 + $0x7a8] ss:$16 sps:$4 sm:$0xff]   ;;  %v13269_v24 = vsel %vm3059_vm1, %v2985_v8, %v2986_v27  ;;  %vm2956_vm4 = vcmp.eq.f32.partialorder %v16248_v57, %v13223_v50  ;;  %v13285_v8 = vcvt.s32.f32 %v3965_v59  ;;  %v4729_v54 = vmax.f32 %v4727_v37, %v4728_v33  ;;  %v9632_v33 = vld [vmem:[#allocation5 + $0x7e4] ss:$16 sps:$4 sm:$0xff]   ;;  %v9635_v37 = vld [vmem:[#allocation5 + $0x7ec] ss:$16 sps:$4 sm:$0xff]  }
 0x7b9   :  { %7557 = vmatpush1.bf16.msra.mxu0 %v9615_v0  ;;  %7394 = vmatprep.subr.bf16.mxu1 %v9620_v16  ;;  %16247 = vst [vmem:[#allocation34_spill] sm:$0xff] %v13269_v24  ;;  %v3918_v0 = vsel %vm3886_vm14, %v12511_v19, 1073741824  ;;  %v9629_v16 = vld [vmem:[#allocation5 + $0x7cc] ss:$16 sps:$4 sm:$0xff]   ;;  %v3062_v34 = vshra.s32 %v13269_v24, 16  ;;  %v4755_v27 = vmax.f32 %v4753_v15, %v4754_v42  ;;  %v3919_v47 = vsel %vm3887_vm0, %v12592_v58, 1073741824 }
 0x7ba   :  { %7558 = vmatprep.subr.bf16.mxu0 %v9623_v41  ;;  %v9624_v41 = vld [vmem:[#allocation5 + $0x7c0] ss:$16 sps:$4 sm:$0xff]   ;;  %vm3978_vm6 = vcmp.lt.s32.totalorder %v3918_v0, %v3919_v47  ;;  %v9627_v59 = vld [vmem:[#allocation5 + $0x7c8] ss:$16 sps:$4 sm:$0xff]   ;;  %vm3888_vm7 = vcmp.eq.f32.partialorder %v12165_v48, %v13282_v53  ;;  %v2988_v23 = vsel %vm2956_vm4, %v12592_v58, 1073741824  ;;  %vm3889_vm8 = vcmp.eq.f32.partialorder %v12167_v39, %v13282_v53 }
 0x7bb   :  { %3161 = vmin.xlane.f32.xlu0 %v13243_v60  ;;  %v13292_v9 = vcvt.s32.f32 %v3062_v34  ;;  %v13298_v15 = vsel %vm3978_vm6, %v3918_v0, %v3919_v47  ;;  %vm4106_vm9 = vcmp.lt.s32.totalorder %v13202_v51, %v13218_v56  ;;  %v5697_v26 = vsel %vm5665_vm3, %v4755_v27, %v4729_v54  ;;  %v16253_v57 = vld [vmem:[#allocation49_spill] sm:$0xff] }
 0x7bc   :  { %7395 = vmatpush1.bf16.msra.mxu1 %v9618_v25  ;;  %16250 = vst [vmem:[#allocation85_spill] sm:$0xff] %v13298_v15  ;;  %v2987_v25 = vsel %vm2955_vm2, %v12511_v19, 1073741824  ;;  %v3981_v42 = vshra.s32 %v13298_v15, 16  ;;  %vm3904_vm11 = vcmp.eq.f32.partialorder %v12121_v29, %v13196_v45  ;;  %vm2973_vm13 = vcmp.eq.f32.partialorder %v16253_v57, %v13254_v13  ;;  %v9633_v47 = vld [vmem:[#allocation5 + $0x7e8] ss:$16 sps:$4 sm:$0xff]  }
 0x7bd   :  { %16249 = vst [vmem:[#allocation75_spill] sm:$0xff] %v13292_v9  ;;  %7559 = vmatpush1.bf16.msra.mxu0 %v9621_v3  ;;  %7396 = vmatprep.subr.bf16.mxu1 %v9626_v61  ;;  %v13312_v3 = vpop.xlane.xlu0 %3871  ;;  %vm3075_vm10 = vcmp.lt.s32.totalorder %v2987_v25, %v2988_v23  ;;  %v16251_v61 = vld [vmem:[#allocation45_spill] sm:$0xff]  ;;  %v13331_v34 = vsel %vm3187_vm5, %v13147_v52, %v13153_v28  ;;  %v3920_v52 = vsel %vm3888_vm7, %v12511_v19, 1073741824  ;;  %v3921_v28 = vsel %vm3889_vm8, %v12592_v58, 1073741824 }
 0x7be   :  { %7560 = vmatprep.subr.bf16.mxu0 %v9629_v16  ;;  %3065 = vmin.xlane.f32.xlu1 %v13292_v9  ;;  %vm3905_vm12 = vcmp.eq.f32.partialorder %v16251_v61, %v13196_v45  ;;  %v13322_v0 = vsel %vm3075_vm10, %v2987_v25, %v2988_v23  ;;  %v9630_v16 = vld [vmem:[#allocation5 + $0x7e0] ss:$16 sps:$4 sm:$0xff]   ;;  %v13333_v54 = vcvt.s32.f32 %v3981_v42  ;;  %v13345_v23 = vsel %vm4106_vm9, %v13202_v51, %v13218_v56  ;;  %v16257_v56 = vld [vmem:[#allocation93_spill] sm:$0xff] }
 0x7bf   :  { %3177 = vmin.xlane.f32.xlu0 %v13275_v31  ;;  %16252 = vst [vmem:[#allocation66_spill] sm:$0xff] %v13322_v0  ;;  %v3078_v27 = vshra.s32 %v13322_v0, 16  ;;  %v13338_v25 = vpop.xlane.xlu1 %2915  ;;  %v16256_v51 = vld [vmem:[#allocation40_spill] sm:$0xff]  ;;  %v5707_v39 = vpack.c.bf16 %v5697_v26, %v5697_v26  ;;  %v13371_v29 = vcvt.s32.f32 %v4093_v14  ;;  %v4109_v61 = vshra.s32 %v13345_v23, 16  ;;  %v16260_v14 = vld [vmem:[#allocation139_spill] sm:$0xff] }
 0x7c0   :  { %7397 = vmatpush1.bf16.msra.mxu1 %v9624_v41  ;;  %16254 = vst [vmem:[#allocation70_spill] sm:$0xff] %v13333_v54  ;;  %v16255_v41 = vld [vmem:[#allocation32_spill] sm:$0xff]  ;;  %vm2957_vm15 = vcmp.eq.f32.partialorder %v16256_v51, %v13338_v25  ;;  %vm2958_vm0 = vcmp.eq.f32.partialorder %v16257_v56, %v13338_v25  ;;  %vm3994_vm1 = vcmp.lt.s32.totalorder %v3920_v52, %v3921_v28  ;;  %v16264_v51 = vld [vmem:[#allocation77_spill] sm:$0xff] }
 0x7c1   :  { %7561 = vmatpush1.bf16.msra.mxu0 %v9627_v59  ;;  %7398 = vmatprep.subr.bf16.mxu1 %v9632_v33  ;;  %vm2974_vm14 = vcmp.eq.f32.partialorder %v16255_v41, %v13254_v13  ;;  %v3936_v59 = vsel %vm3904_vm11, %v12511_v19, 1073741824  ;;  %v13364_v48 = vcvt.s32.f32 %v3078_v27  ;;  %v3937_v33 = vsel %vm3905_vm12, %v12592_v58, 1073741824  ;;  %v13374_v42 = vpop.xlane.xlu0 %2942  ;;  %v16262_v41 = vld [vmem:[#allocation61_spill] sm:$0xff] }
 0x7c2   :  { %7562 = vmatprep.subr.bf16.mxu0 %v9635_v37  ;;  %3984 = vmin.xlane.f32.xlu1 %v13333_v54  ;;  %v3190_v37 = vshra.s32 %v13331_v34, 16  ;;  %16259 = vst [vmem:[#allocation89_spill] sm:$0xff] %v13374_v42  ;;  %v3005_v27 = vsel %vm2973_vm13, %v12511_v19, 1073741824  ;;  %v3006_v26 = vsel %vm2974_vm14, %v12592_v58, 1073741824  ;;  %vm3906_vm2 = vcmp.eq.f32.partialorder %v16260_v14, %v13312_v3  ;;  %v16266_v54 = vld [vmem:[#allocation83_spill] sm:$0xff] }
 0x7c3   :  { %16258 = vst [vmem:[#allocation74_spill] sm:$0xff] %v13364_v48  ;;  %3968 = vmin.xlane.f32.xlu0 %v13285_v8  ;;  %v13387_v0 = vsel %vm3994_vm1, %v3920_v52, %v3921_v28  ;;  %v2990_v57 = vsel %vm2958_vm0, %v12592_v58, 1073741824  ;;  %vm3907_vm4 = vcmp.eq.f32.partialorder %v16262_v41, %v13312_v3  ;;  %vm3203_vm6 = vcmp.lt.s32.totalorder %v13249_v35, %v13260_v63 }
 0x7c4   :  { %7399 = vmatpush1.bf16.msra.mxu1 %v9630_v16  ;;  %16261 = vst [vmem:[#allocation45_spill] sm:$0xff] %v13387_v0  ;;  %v2989_v16 = vsel %vm2957_vm15, %v12511_v19, 1073741824  ;;  %v3997_v52 = vshra.s32 %v13387_v0, 16  ;;  %v13406_v28 = vcvt.s32.f32 %v3190_v37  ;;  %vm2976_vm7 = vcmp.eq.f32.partialorder %v16264_v51, %v13374_v42  ;;  %v16275_v51 = vld [vmem:[#allocation64_spill] sm:$0xff] }
 0x7c5   :  { %7563 = vmatpush1.bf16.msra.mxu0 %v9633_v47  ;;  %v16263_v47 = vld [vmem:[#allocation43_spill] sm:$0xff]  ;;  %vm4122_vm8 = vcmp.lt.s32.totalorder %v3936_v59, %v3937_v33  ;;  %vm3091_vm9 = vcmp.lt.s32.totalorder %v2989_v16, %v2990_v57  ;;  %v3938_v37 = vsel %vm3906_vm2, %v12511_v19, 1073741824  ;;  %v13440_v14 = vsel %vm3203_vm6, %v13249_v35, %v13260_v63 }
 0x7c6   :  { %3081 = vmin.xlane.f32.xlu1 %v13364_v48  ;;  %vm2975_vm5 = vcmp.eq.f32.partialorder %v16263_v47, %v13374_v42  ;;  %v13410_v56 = vpop.xlane.xlu1 %3847  ;;  %v16265_v48 = vld [vmem:[#allocation47_spill] sm:$0xff]  ;;  %v13416_v0 = vcvt.s32.f32 %v3997_v52  ;;  %v13418_v15 = vsel %vm3091_vm9, %v2989_v16, %v2990_v57  ;;  %v3008_v16 = vsel %vm2976_vm7, %v12592_v58, 1073741824 }
 0x7c7   :  { %7401 = vmatmul.mubr.bf16.vlgmr.msra.gmra.mrb[72].mxu1 %v5707_v39  ;;  %4096 = vmin.xlane.f32.xlu0 %v13371_v29  ;;  %vm3890_vm10 = vcmp.eq.f32.partialorder %v16265_v48, %v13410_v56  ;;  %vm3891_vm11 = vcmp.eq.f32.partialorder %v16266_v54, %v13410_v56  ;;  %16268 = vst [vmem:[#allocation32_spill] sm:$0xff] %v13418_v15  ;;  %v3939_v54 = vsel %vm3907_vm4, %v12592_v58, 1073741824  ;;  %v3007_v48 = vsel %vm2975_vm5, %v12511_v19, 1073741824 }
 0x7c8   :  { %7565 = vmatmul.mubr.bf16.vlgmr.msra.gmra.mrb[120].mxu0 %v5707_v39  ;;  %16267 = vst [vmem:[#allocation49_spill] sm:$0xff] %v13416_v0  ;;  %v3922_v9 = vsel %vm3890_vm10, %v12511_v19, 1073741824  ;;  %v3923_v24 = vsel %vm3891_vm11, %v12592_v58, 1073741824  ;;  %v3094_v39 = vshra.s32 %v13418_v15, 16  ;;  %v13451_v41 = vsel %vm4122_vm8, %v3936_v59, %v3937_v33  ;;  %v16274_v15 = vld [vmem:[#allocation76_spill] sm:$0xff]  ;;  %v16278_v33 = vld [vmem:[#allocation79_spill] sm:$0xff] }
 0x7c9   :  { %vm4010_vm12 = vcmp.lt.s32.totalorder %v3922_v9, %v3923_v24  ;;  %16270 = vst [vmem:[#allocation93_spill] sm:$0xff] %v13451_v41  ;;  %vm3219_vm13 = vcmp.lt.s32.totalorder %v3005_v27, %v3006_v26  ;;  %v13458_v63 = vcvt.s32.f32 %v4109_v61  ;;  %v4125_v59 = vshra.s32 %v13451_v41, 16 }
 0x7ca   :  { %4000 = vmin.xlane.f32.xlu1 %v13416_v0  ;;  %v13448_v57 = vpop.xlane.xlu1 %2918  ;;  %v13453_v47 = vcvt.s32.f32 %v3094_v39  ;;  %v13455_v52 = vsel %vm4010_vm12, %v3922_v9, %v3923_v24  ;;  %v3206_v0 = vshra.s32 %v13440_v14, 16  ;;  %vm4138_vm0 = vcmp.lt.s32.totalorder %v3938_v37, %v3939_v54  ;;  %v16277_v24 = vld [vmem:[#allocation46_spill] sm:$0xff] }
 0x7cb   :  { %3193 = vmin.xlane.f32.xlu0 %v13406_v28  ;;  %16269 = vst [vmem:[#allocation40_spill] sm:$0xff] %v13448_v57  ;;  %16272 = vst [vmem:[#allocation61_spill] sm:$0xff] %v13455_v52  ;;  %v4013_v35 = vshra.s32 %v13455_v52, 16  ;;  %vm2959_vm14 = vcmp.eq.f32.partialorder %v16274_v15, %v13448_v57  ;;  %vm2960_vm15 = vcmp.eq.f32.partialorder %v16275_v51, %v13448_v57  ;;  %v13502_v15 = vcvt.s32.f32 %v4125_v59  ;;  %v16287_v51 = vld [vmem:[#allocation80_spill] sm:$0xff]  ;;  %v16288_v57 = vld [vmem:[#allocation78_spill] sm:$0xff] }
 0x7cc   :  { %16271 = vst [vmem:[#allocation139_spill] sm:$0xff] %v13453_v47  ;;  %16273 = vst [vmem:[#allocation43_spill] sm:$0xff] %v13458_v63  ;;  %v13465_v42 = vpop.xlane.xlu0 %3874  ;;  %vm3235_vm1 = vcmp.lt.s32.totalorder %v3007_v48, %v3008_v16  ;;  %v13479_v39 = vsel %vm3219_vm13, %v3005_v27, %v3006_v26  ;;  %v2991_v41 = vsel %vm2959_vm14, %v12511_v19, 1073741824  ;;  %v16291_v59 = vld [vmem:[#allocation87_spill] sm:$0xff] }
 0x7cd   :  { %v13469_v9 = vcvt.s32.f32 %v4013_v35  ;;  %vm3908_vm2 = vcmp.eq.f32.partialorder %v16277_v24, %v13465_v42  ;;  %vm3909_vm4 = vcmp.eq.f32.partialorder %v16278_v33, %v13465_v42  ;;  %16279 = vst [vmem:[#allocation47_spill] sm:$0xff] %v13479_v39  ;;  %v13481_v52 = vsel %vm3235_vm1, %v3007_v48, %v3008_v16  ;;  %16284 = vst [vmem:[#allocation79_spill] sm:$0xff] %v13502_v15 }
 0x7ce   :  { %3097 = vmin.xlane.f32.xlu1 %v13453_v47  ;;  %v13476_v61 = vpop.xlane.xlu1 %3850  ;;  %16280 = vst [vmem:[#allocation83_spill] sm:$0xff] %v13481_v52  ;;  %v3940_v35 = vsel %vm3908_vm2, %v12511_v19, 1073741824  ;;  %v3941_v47 = vsel %vm3909_vm4, %v12592_v58, 1073741824  ;;  %v2992_v24 = vsel %vm2960_vm15, %v12592_v58, 1073741824  ;;  %v13493_v33 = vcvt.s32.f32 %v3206_v0 }
 0x7cf   :  { %16276 = vst [vmem:[#allocation77_spill] sm:$0xff] %v13469_v9  ;;  %4112 = vmin.xlane.f32.xlu0 %v13458_v63  ;;  %v3238_v27 = vshra.s32 %v13481_v52, 16  ;;  %vm4154_vm5 = vcmp.lt.s32.totalorder %v3940_v35, %v3941_v47  ;;  %v3222_v16 = vshra.s32 %v13479_v39, 16  ;;  %v13508_v0 = vsel %vm4138_vm0, %v3938_v37, %v3939_v54 }
 0x7d0   :  { %16281 = vst [vmem:[#allocation76_spill] sm:$0xff] %v13493_v33  ;;  %v13496_v26 = vpop.xlane.xlu0 %2945  ;;  %v13499_v48 = vsel %vm4154_vm5, %v3940_v35, %v3941_v47  ;;  %16286 = vst [vmem:[#allocation143_spill] sm:$0xff] %v13508_v0  ;;  %vm3107_vm6 = vcmp.lt.s32.totalorder %v2991_v41, %v2992_v24  ;;  %vm3892_vm7 = vcmp.eq.f32.partialorder %v16287_v51, %v13476_v61  ;;  %v16289_v47 = vld [vmem:[#allocation72_spill] sm:$0xff]  ;;  %v4141_v52 = vshra.s32 %v13508_v0, 16 }
 0x7d1   :  { %16282 = vst [vmem:[#allocation64_spill] sm:$0xff] %v13496_v26  ;;  %16283 = vst [vmem:[#allocation46_spill] sm:$0xff] %v13499_v48  ;;  %v13516_v35 = vcvt.s32.f32 %v3238_v27  ;;  %vm3893_vm10 = vcmp.eq.f32.partialorder %v16291_v59, %v13476_v61  ;;  %v4157_v54 = vshra.s32 %v13499_v48, 16  ;;  %v13527_v27 = vcvt.s32.f32 %v3222_v16  ;;  %v16297_v48 = vld [vmem:[#allocation90_spill] sm:$0xff]  ;;  %v16300_v16 = vld [vmem:[#allocation53_spill] sm:$0xff] }
 0x7d2   :  { %4016 = vmin.xlane.f32.xlu1 %v13469_v9  ;;  %v13505_v63 = vpop.xlane.xlu1 %2921  ;;  %v13534_v59 = vsel %vm3107_vm6, %v2991_v41, %v2992_v24  ;;  %v3925_v0 = vsel %vm3893_vm10, %v12592_v58, 1073741824  ;;  %vm2977_vm14 = vcmp.eq.f32.partialorder %v16300_v16, %v13496_v26 }
 0x7d3   :  { %3209 = vmin.xlane.f32.xlu0 %v13493_v33  ;;  %16285 = vst [vmem:[#allocation142_spill] sm:$0xff] %v13505_v63  ;;  %vm2961_vm8 = vcmp.eq.f32.partialorder %v16288_v57, %v13505_v63  ;;  %vm2962_vm9 = vcmp.eq.f32.partialorder %v16289_v47, %v13505_v63  ;;  %16290 = vst [vmem:[#allocation80_spill] sm:$0xff] %v13516_v35  ;;  %v3924_v57 = vsel %vm3892_vm7, %v12511_v19, 1073741824  ;;  %v13543_v9 = vcvt.s32.f32 %v4157_v54 }
 0x7d4   :  { %v2993_v39 = vsel %vm2961_vm8, %v12511_v19, 1073741824  ;;  %v2994_v37 = vsel %vm2962_vm9, %v12592_v58, 1073741824  ;;  %16292 = vst [vmem:[#allocation78_spill] sm:$0xff] %v13527_v27  ;;  %16295 = vst [vmem:[#allocation144_spill] sm:$0xff] %v13534_v59  ;;  %vm4026_vm1 = vcmp.lt.s32.totalorder %v3924_v57, %v3925_v0  ;;  %v3009_v16 = vsel %vm2977_vm14, %v12511_v19, 1073741824 }
 0x7d5   :  { %vm3123_vm11 = vcmp.lt.s32.totalorder %v2993_v39, %v2994_v37  ;;  %v13529_v51 = vpop.xlane.xlu0 %3877  ;;  %16299 = vst [vmem:[#allocation90_spill] sm:$0xff] %v13543_v9  ;;  %vm5187_vm14 = vcmask 23552  }
 0x7d6   :  { %3241 = vmin.xlane.f32.xlu1 %v13516_v35  ;;  %16293 = vst [vmem:[#allocation72_spill] sm:$0xff] %v13529_v51  ;;  %v13531_v47 = vpop.xlane.xlu1 %3853  ;;  %v13536_v63 = vsel %vm3123_vm11, %v2993_v39, %v2994_v37  ;;  %v16298_v35 = vld [vmem:[#allocation91_spill] sm:$0xff]  ;;  %v3110_v37 = vshra.s32 %v13534_v59, 16  ;;  %v16309_v59 = vld [vmem:[#allocation42_spill] sm:$0xff]  ;;  %vm5153_vm11 = vcmask 7168  }
 0x7d7   :  { %4128 = vmin.xlane.f32.xlu0 %v13502_v15  ;;  %16294 = vst [vmem:[#allocation87_spill] sm:$0xff] %v13531_v47  ;;  %16296 = vst [vmem:[#allocation145_spill] sm:$0xff] %v13536_v63  ;;  %vm3894_vm12 = vcmp.eq.f32.partialorder %v16297_v48, %v13531_v47  ;;  %vm3895_vm13 = vcmp.eq.f32.partialorder %v16298_v35, %v13531_v47  ;;  %v16301_v15 = vld [vmem:[#allocation81_spill] sm:$0xff]  ;;  %v3126_v24 = vshra.s32 %v13536_v63, 16  ;;  %v13554_v48 = vcvt.s32.f32 %v4141_v52  ;;  %v16308_v52 = vld [vmem:[#allocation86_spill] sm:$0xff] }
 0x7d8   :  { %vm2978_vm15 = vcmp.eq.f32.partialorder %v16301_v15, %v13496_v26  ;;  %v3926_v41 = vsel %vm3894_vm12, %v12511_v19, 1073741824  ;;  %v3927_v39 = vsel %vm3895_vm13, %v12592_v58, 1073741824  ;;  %v16306_v26 = vld [vmem:[#allocation51_spill] sm:$0xff]  ;;  %vm3910_vm5 = vcmp.eq.f32.partialorder %v16308_v52, %v13529_v51 }
 0x7d9   :  { %vm4042_vm0 = vcmp.lt.s32.totalorder %v3926_v41, %v3927_v39  ;;  %16302 = vst [vmem:[#allocation91_spill] sm:$0xff] %v13554_v48  ;;  %v13556_v35 = vpop.xlane.xlu0 %3880  ;;  %v3010_v47 = vsel %vm2978_vm15, %v12592_v58, 1073741824  ;;  %vm3911_vm6 = vcmp.eq.f32.partialorder %v16309_v59, %v13529_v51  ;;  %v13586_v52 = vcvt.s32.f32 %v3110_v37 }
 0x7da   :  { %4160 = vmin.xlane.f32.xlu1 %v13543_v9  ;;  %16303 = vst [vmem:[#allocation53_spill] sm:$0xff] %v13556_v35  ;;  %v13559_v54 = vpop.xlane.xlu1 %3856  ;;  %v13561_v15 = vsel %vm4042_vm0, %v3926_v41, %v3927_v39  ;;  %vm3912_vm2 = vcmp.eq.f32.partialorder %v16306_v26, %v13556_v35  ;;  %v13575_v39 = vsel %vm4026_vm1, %v3924_v57, %v3925_v0  ;;  %v13577_v9 = vcvt.s32.f32 %v3126_v24  ;;  %v16312_v0 = vld [vmem:[#allocation55_spill] sm:$0xff]  ;;  %v16313_v57 = vld [vmem:[#allocation44_spill] sm:$0xff] }
 0x7db   :  { %3225 = vmin.xlane.f32.xlu0 %v13527_v27  ;;  %16304 = vst [vmem:[#allocation81_spill] sm:$0xff] %v13559_v54  ;;  %16305 = vst [vmem:[#allocation146_spill] sm:$0xff] %v13561_v15  ;;  %v16307_v27 = vld [vmem:[#allocation57_spill] sm:$0xff]  ;;  %v3944_v63 = vsel %vm3912_vm2, %v12511_v19, 1073741824  ;;  %v4045_v33 = vshra.s32 %v13561_v15, 16  ;;  %vm3251_vm7 = vcmp.lt.s32.totalorder %v3009_v16, %v3010_v47  ;;  %v3943_v59 = vsel %vm3911_vm6, %v12592_v58, 1073741824 }
 0x7dc   :  { %vm3913_vm4 = vcmp.eq.f32.partialorder %v16307_v27, %v13556_v35  ;;  %16310 = vst [vmem:[#allocation51_spill] sm:$0xff] %v13575_v39  ;;  %v3942_v27 = vsel %vm3910_vm5, %v12511_v19, 1073741824  ;;  %16311 = vst [vmem:[#allocation57_spill] sm:$0xff] %v13586_v52  ;;  %vm3896_vm9 = vcmp.eq.f32.partialorder %v16312_v0, %v13559_v54  ;;  %vm3897_vm10 = vcmp.eq.f32.partialorder %v16313_v57, %v13559_v54 }
 0x7dd   :  { %v3945_v41 = vsel %vm3913_vm4, %v12592_v58, 1073741824  ;;  %v4029_v24 = vshra.s32 %v13575_v39, 16  ;;  %v13595_v51 = vsel %vm3251_vm7, %v3009_v16, %v3010_v47  ;;  %vm4170_vm12 = vcmp.lt.s32.totalorder %v3942_v27, %v3943_v59 }
 0x7de   :  { %v13581_v26 = vpop.xlane.xlu0 %4773  ;;  %vm4186_vm8 = vcmp.lt.s32.totalorder %v3944_v63, %v3945_v41  ;;  %3129 = vmin.xlane.f32.xlu1 %v13577_v9  ;;  %v13593_v35 = vpop.xlane.xlu1 %4770  ;;  %16314 = vst [vmem:[#allocation86_spill] sm:$0xff] %v13595_v51  ;;  %v3928_v57 = vsel %vm3896_vm9, %v12511_v19, 1073741824  ;;  %v3929_v54 = vsel %vm3897_vm10, %v12592_v58, 1073741824  ;;  %vm5170_vm13 = vcmask 15360  }
 0x7df   :  { %4144 = vmin.xlane.f32.xlu0 %v13554_v48  ;;  %v13597_v48 = vcvt.s32.f32 %v4045_v33  ;;  %v13599_v15 = vsel %vm4186_vm8, %v3944_v63, %v3945_v41  ;;  %v13608_v47 = vcvt.s32.f32 %v4029_v24  ;;  %v3254_v63 = vshra.s32 %v13595_v51, 16 }
 0x7e0   :  { %v4189_v0 = vshra.s32 %v13599_v15, 16  ;;  %v5155_v33 = vsel %vm5153_vm11, %v12334_v10, %v12752_v11  ;;  %v13614_v16 = vsel %vm4170_vm12, %v3942_v27, %v3943_v59  ;;  %vm4058_vm15 = vcmp.lt.s32.totalorder %v3928_v57, %v3929_v54 }
 0x7e1   :  { %v5172_v24 = vsel %vm5170_vm13, %v5155_v33, %v12861_v46  ;;  %vm5252_vm0 = vcmask 31744   ;;  %v13628_v10 = vcvt.s32.f32 %v3254_v63  ;;  %v4173_v11 = vshra.s32 %v13614_v16, 16 }
 0x7e2   :  { %v13602_v37 = vpop.xlane.xlu0 %4797  ;;  %4048 = vmin.xlane.f32.xlu1 %v13597_v48  ;;  %v13616_v41 = vcvt.s32.f32 %v4189_v0  ;;  %v13626_v51 = vsel %vm5187_vm14, %v5172_v24, %v13581_v26  ;;  %v5163_v27 = vsel %vm5153_vm11, %v12594_v43, %v12788_v36  ;;  %v13634_v59 = vsel %vm4058_vm15, %v3928_v57, %v3929_v54 }
 0x7e3   :  { %3113 = vmin.xlane.f32.xlu0 %v13586_v52  ;;  %16315 = vst [vmem:[#allocation42_spill] sm:$0xff] %v13626_v51  ;;  %v5256_v0 = vsel %vm5252_vm0, %v13626_v51, -inf  ;;  %v5180_v33 = vsel %vm5170_vm13, %v5163_v27, %v12907_v18  ;;  %v13647_v24 = vcvt.s32.f32 %v4173_v11  ;;  %v4061_v36 = vshra.s32 %v13634_v59, 16  ;;  %v16318_v27 = vld [vmem:[#allocation82_spill] sm:$0xff] }
 0x7e4   :  { %v13645_v63 = vsel %vm5187_vm14, %v5180_v33, %v13602_v37  ;;  %v5164_v54 = vsel %vm5153_vm11, %v12641_v38, %v12829_v44  ;;  %v5165_v44 = vsel %vm5153_vm11, %v12674_v49, %v12983_v1 }
 0x7e5   :  { %16316 = vst [vmem:[#allocation55_spill] sm:$0xff] %v13645_v63  ;;  %v5280_v18 = vsel %vm5252_vm0, %v13645_v63, -inf  ;;  %v5181_v57 = vsel %vm5170_vm13, %v5164_v54, %v13049_v40  ;;  %v13667_v33 = vcvt.s32.f32 %v4061_v36  ;;  %v16319_v63 = vld [vmem:[#allocation58_spill] sm:$0xff]  ;;  %v5182_v49 = vsel %vm5170_vm13, %v5165_v44, %v13196_v45  ;;  %v16324_v45 = vld [vmem:[#allocation92_spill] sm:$0xff] }
 0x7e6   :  { %v13619_v39 = vpop.xlane.xlu0 %4800  ;;  %v4795_v52 = vpop.xlane.xlu1 %4794  ;;  %4192 = vmin.xlane.f32.xlu1 %v13616_v41  ;;  %vm4817_vm1 = vcmp.eq.f32.partialorder %v16319_v63, %v13593_v35  ;;  %v16320_v40 = vld [vmem:[#allocation62_spill] sm:$0xff]  ;;  %v5162_v63 = vsel %vm5153_vm11, %v12550_v6, %v12842_v5  ;;  %v5157_v6 = vsel %vm5153_vm11, %v12409_v22, %v13068_v30  ;;  %v5158_v44 = vsel %vm5153_vm11, %v12447_v2, %v13223_v50 }
 0x7e7   :  { %4032 = vmin.xlane.f32.xlu0 %v13608_v47  ;;  %v13662_v11 = vsel %vm5187_vm14, %v5181_v57, %v13619_v39  ;;  %vm4818_vm2 = vcmp.eq.f32.partialorder %v16320_v40, %v13593_v35  ;;  %vm4834_vm5 = vcmp.eq.f32.partialorder %v16324_v45, %v4795_v52  ;;  %v16325_v5 = vld [vmem:[#allocation106_spill] sm:$0xff]  ;;  %v5167_v50 = vsel %vm5153_vm11, %v12713_v17, %v13254_v13 }
 0x7e8   :  { %16317 = vst [vmem:[#allocation44_spill] sm:$0xff] %v13662_v11  ;;  %v5283_v1 = vsel %vm5252_vm0, %v13662_v11, -inf  ;;  %v4850_v57 = vsel %vm4818_vm2, %v12592_v58, 1073741824  ;;  %v16333_v45 = vld [vmem:[#allocation102_spill] sm:$0xff] }
 0x7e9   :  { %v16362_v11 = vld [vmem:[#allocation98_spill] sm:$0xff] }
 0x7ea   :  { %v13637_v46 = vpop.xlane.xlu0 %4803  ;;  %5257 = vmax.xlane.f32.xlu1 %v5256_v0  ;;  %v13649_v43 = vpop.xlane.xlu1 %4776  ;;  %v5154_v0 = vsel %vm5153_vm11, %v16318_v27, %v12798_v12  ;;  %v16323_v27 = vld [vmem:[#allocation88_spill] sm:$0xff] }
 0x7eb   :  { %3257 = vmin.xlane.f32.xlu0 %v13628_v10  ;;  %v5171_v54 = vsel %vm5170_vm13, %v5154_v0, %v12935_v7  ;;  %v5156_v7 = vsel %vm5153_vm11, %v12376_v32, %v12868_v4  ;;  %vm4833_vm4 = vcmp.eq.f32.partialorder %v16323_v27, %v4795_v52  ;;  %v5166_v32 = vsel %vm5153_vm11, %v16325_v5, %v13113_v62  ;;  %v16331_v27 = vld [vmem:[#allocation60_spill] sm:$0xff] }
 0x7ec   :  { %v13685_v36 = vsel %vm5187_vm14, %v5171_v54, %v13593_v35  ;;  %v4849_v35 = vsel %vm4817_vm1, %v12511_v19, 1073741824  ;;  %v5179_v0 = vsel %vm5170_vm13, %v5162_v63, %v13003_v55  ;;  %v5183_v30 = vsel %vm5170_vm13, %v5166_v32, %v13312_v3  ;;  %v16330_v63 = vld [vmem:[#allocation97_spill] sm:$0xff] }
 0x7ed   :  { %16321 = vst [vmem:[#allocation82_spill] sm:$0xff] %v13685_v36  ;;  %v5253_v4 = vsel %vm5252_vm0, %v13685_v36, -inf  ;;  %v13721_v54 = vsel %vm5187_vm14, %v5179_v0, %v4795_v52  ;;  %v4865_v62 = vsel %vm4833_vm4, %v12511_v19, 1073741824  ;;  %v4866_v55 = vsel %vm4834_vm5, %v12592_v58, 1073741824  ;;  %v16328_v52 = vld [vmem:[#allocation59_spill] sm:$0xff] }
 0x7ee   :  { %5281 = vmax.xlane.f32.xlu1 %v5280_v18  ;;  %v13669_v38 = vpop.xlane.xlu0 %4806  ;;  %v13681_v12 = vpop.xlane.xlu1 %4779  ;;  %v13699_v18 = vsel %vm5187_vm14, %v5182_v49, %v13637_v46  ;;  %16326 = vst [vmem:[#allocation62_spill] sm:$0xff] %v13721_v54  ;;  %vm4881_vm6 = vcmp.lt.s32.totalorder %v4849_v35, %v4850_v57  ;;  %vm4819_vm7 = vcmp.eq.f32.partialorder %v16328_v52, %v13581_v26  ;;  %v5277_v17 = vsel %vm5252_vm0, %v13721_v54, -inf }
 0x7ef   :  { %4176 = vmin.xlane.f32.xlu0 %v13647_v24  ;;  %16322 = vst [vmem:[#allocation58_spill] sm:$0xff] %v13699_v18  ;;  %v5286_v22 = vsel %vm5252_vm0, %v13699_v18, -inf  ;;  %v13731_v2 = vsel %vm5187_vm14, %v5183_v30, %v13669_v38  ;;  %v5173_v49 = vsel %vm5170_vm13, %v5156_v7, %v13137_v20  ;;  %vm4821_vm9 = vcmp.eq.f32.partialorder %v16330_v63, %v13649_v43  ;;  %v16337_v30 = vld [vmem:[#allocation124_spill] sm:$0xff] }
 0x7f0   :  { %16327 = vst [vmem:[#allocation88_spill] sm:$0xff] %v13731_v2  ;;  %vm4822_vm10 = vcmp.eq.f32.partialorder %v16331_v27, %v13649_v43  ;;  %v13752_v13 = vsel %vm5187_vm14, %v5173_v49, %v13649_v43  ;;  %v5184_v20 = vsel %vm5170_vm13, %v5167_v50, %v13465_v42  ;;  %v13758_v7 = vsel %vm4881_vm6, %v4849_v35, %v4850_v57  ;;  %v16339_v49 = vld [vmem:[#allocation54_spill] sm:$0xff]  ;;  %v16341_v27 = vld [vmem:[#allocation84_spill] sm:$0xff] }
 0x7f1   :  { %16332 = vst [vmem:[#allocation92_spill] sm:$0xff] %v13752_v13  ;;  %vm5009_vm12 = vcmp.lt.s32.totalorder %v4865_v62, %v4866_v55  ;;  %v5159_v5 = vsel %vm5153_vm11, %v16333_v45, %v13338_v25  ;;  %v4851_v32 = vsel %vm4819_vm7, %v12511_v19, 1073741824  ;;  %v4853_v0 = vsel %vm4821_vm9, %v12511_v19, 1073741824 }
 0x7f2   :  { %5284 = vmax.xlane.f32.xlu1 %v5283_v1  ;;  %v13718_v40 = vpop.xlane.xlu0 %4809  ;;  %v16329_v1 = vld [vmem:[#allocation48_spill] sm:$0xff]  ;;  %v13740_v3 = vpop.xlane.xlu1 %4782  ;;  %v4854_v42 = vsel %vm4822_vm10, %v12592_v58, 1073741824  ;;  %v5259_v57 = vsel %vm5252_vm0, %v13752_v13, -inf  ;;  %v5174_v25 = vsel %vm5170_vm13, %v5157_v6, %v13282_v53  ;;  %vm4824_vm1 = vcmp.eq.f32.partialorder %v16337_v30, %v13681_v12 }
 0x7f3   :  { %4064 = vmin.xlane.f32.xlu0 %v13667_v33  ;;  %vm4820_vm8 = vcmp.eq.f32.partialorder %v16329_v1, %v13581_v26  ;;  %v5289_v26 = vsel %vm5252_vm0, %v13731_v2, -inf  ;;  %v13767_v43 = vsel %vm5187_vm14, %v5184_v20, %v13718_v40  ;;  %v4884_v50 = vshra.s32 %v13758_v7, 16  ;;  %v16338_v1 = vld [vmem:[#allocation50_spill] sm:$0xff] }
 0x7f4   :  { %16334 = vst [vmem:[#allocation106_spill] sm:$0xff] %v13767_v43  ;;  %v13782_v52 = vsel %vm5009_vm12, %v4865_v62, %v4866_v55  ;;  %vm4835_vm2 = vcmp.eq.f32.partialorder %v16338_v1, %v13602_v37  ;;  %vm4836_vm4 = vcmp.eq.f32.partialorder %v16339_v49, %v13602_v37  ;;  %v13790_v53 = vsel %vm5187_vm14, %v5174_v25, %v13681_v12  ;;  %v16342_v62 = vld [vmem:[#allocation94_spill] sm:$0xff] }
 0x7f5   :  { %16340 = vst [vmem:[#allocation48_spill] sm:$0xff] %v13790_v53  ;;  %v5292_v6 = vsel %vm5252_vm0, %v13767_v43, -inf  ;;  %vm4837_vm5 = vcmp.eq.f32.partialorder %v16341_v27, %v13619_v39  ;;  %vm4841_vm6 = vcmp.eq.f32.partialorder %v16342_v62, %v13669_v38  ;;  %v5175_v55 = vsel %vm5170_vm13, %v5158_v44, %v13410_v56 }
 0x7f6   :  { %5287 = vmax.xlane.f32.xlu1 %v5286_v22  ;;  %v13771_v35 = vpop.xlane.xlu0 %4812  ;;  %v16336_v22 = vld [vmem:[#allocation115_spill] sm:$0xff]  ;;  %vm4913_vm7 = vcmp.lt.s32.totalorder %v4853_v0, %v4854_v42  ;;  %v4856_v20 = vsel %vm4824_vm1, %v12592_v58, 1073741824  ;;  %v5012_v45 = vshra.s32 %v13782_v52, 16  ;;  %v13815_v56 = vsel %vm5187_vm14, %v5175_v55, %v13740_v3 }
 0x7f7   :  { %5254 = vmax.xlane.f32.xlu0 %v5253_v4  ;;  %v4852_v4 = vsel %vm4820_vm8, %v12592_v58, 1073741824  ;;  %16335 = vst [vmem:[#allocation59_spill] sm:$0xff] %v13771_v35  ;;  %vm4823_vm15 = vcmp.eq.f32.partialorder %v16336_v22, %v13681_v12  ;;  %16344 = vst [vmem:[#allocation97_spill] sm:$0xff] %v13815_v56  ;;  %v13817_v44 = vcvt.s32.f32 %v4884_v50  ;;  %v4867_v25 = vsel %vm4835_vm2, %v12511_v19, 1073741824  ;;  %v16345_v22 = vld [vmem:[#allocation52_spill] sm:$0xff]  ;;  %v16348_v55 = vld [vmem:[#allocation103_spill] sm:$0xff] }
 0x7f8   :  { %v4786_v63 = vpop.xlane.xlu1 %4785  ;;  %vm4897_vm9 = vcmp.lt.s32.totalorder %v4851_v32, %v4852_v4  ;;  %v4868_v12 = vsel %vm4836_vm4, %v12592_v58, 1073741824  ;;  %vm4838_vm10 = vcmp.eq.f32.partialorder %v16345_v22, %v13619_v39  ;;  %v4869_v50 = vsel %vm4837_vm5, %v12511_v19, 1073741824  ;;  %v16355_v22 = vld [vmem:[#allocation132_spill] sm:$0xff] }
 0x7f9   :  { %v4873_v1 = vsel %vm4841_vm6, %v12511_v19, 1073741824  ;;  %v5176_v37 = vsel %vm5170_vm13, %v5159_v5, %v13476_v61  ;;  %v5265_v49 = vsel %vm5252_vm0, %v13815_v56, -inf  ;;  %v13852_v27 = vcvt.s32.f32 %v5012_v45  ;;  %v16353_v45 = vld [vmem:[#allocation96_spill] sm:$0xff] }
 0x7fa   :  { %5290 = vmax.xlane.f32.xlu1 %v5289_v26  ;;  %v4855_v26 = vsel %vm4823_vm15, %v12511_v19, 1073741824  ;;  %v13829_v30 = vpop.xlane.xlu0 %4815  ;;  %v13855_v62 = vsel %vm4897_vm9, %v4851_v32, %v4852_v4  ;;  %vm4827_vm15 = vcmp.eq.f32.partialorder %v16348_v55, %v4786_v63  ;;  %v13860_v61 = vsel %vm5187_vm14, %v5176_v37, %v4786_v63  ;;  %v16354_v37 = vld [vmem:[#allocation131_spill] sm:$0xff] }
 0x7fb   :  { %5278 = vmax.xlane.f32.xlu0 %v5277_v17  ;;  %v16343_v17 = vld [vmem:[#allocation95_spill] sm:$0xff]  ;;  %16346 = vst [vmem:[#allocation60_spill] sm:$0xff] %v13829_v30  ;;  %vm4929_vm12 = vcmp.lt.s32.totalorder %v4855_v26, %v4856_v20  ;;  %16350 = vst [vmem:[#allocation115_spill] sm:$0xff] %v13860_v61  ;;  %v4870_v5 = vsel %vm4838_vm10, %v12592_v58, 1073741824  ;;  %vm5025_vm4 = vcmp.lt.s32.totalorder %v4867_v25, %v4868_v12  ;;  %v4900_v39 = vshra.s32 %v13855_v62, 16 }
 0x7fc   :  { %vm4842_vm8 = vcmp.eq.f32.partialorder %v16343_v17, %v13669_v38  ;;  %v16351_v17 = vld [vmem:[#allocation56_spill] sm:$0xff]  ;;  %v13871_v4 = vsel %vm4929_vm12, %v4855_v26, %v4856_v20  ;;  %vm4840_vm5 = vcmp.eq.f32.partialorder %v16353_v45, %v13637_v46  ;;  %vm4845_vm6 = vcmp.eq.f32.partialorder %v16354_v37, %v13771_v35 }
 0x7fd   :  { %vm4839_vm2 = vcmp.eq.f32.partialorder %v16351_v17, %v13637_v46  ;;  %v5268_v20 = vsel %vm5252_vm0, %v13860_v61, -inf  ;;  %v13891_v43 = vsel %vm5025_vm4, %v4867_v25, %v4868_v12  ;;  %v4932_v2 = vshra.s32 %v13871_v4, 16  ;;  %v16358_v25 = vld [vmem:[#allocation22_spill] sm:$0xff]  ;;  %v16361_v37 = vld [vmem:[#allocation112_spill] sm:$0xff] }
 0x7fe   :  { %5293 = vmax.xlane.f32.xlu1 %v5292_v6  ;;  %v13831_v6 = vsel %vm4913_vm7, %v4853_v0, %v4854_v42  ;;  %v4874_v0 = vsel %vm4842_vm8, %v12592_v58, 1073741824  ;;  %v13848_v42 = vpop.xlane.xlu1 %4788  ;;  %vm4846_vm8 = vcmp.eq.f32.partialorder %v16355_v22, %v13771_v35  ;;  %vm5041_vm9 = vcmp.lt.s32.totalorder %v4869_v50, %v4870_v5  ;;  %v16383_v35 = vld [vmem:[#allocation122_spill] sm:$0xff] }
 0x7ff   :  { %5260 = vmax.xlane.f32.xlu0 %v5259_v57  ;;  %v5262_v57 = vsel %vm5252_vm0, %v13790_v53, -inf  ;;  %16347 = vst [vmem:[#allocation102_spill] sm:$0xff] %v13848_v42  ;;  %v4916_v38 = vshra.s32 %v13831_v6, 16  ;;  %vm5073_vm7 = vcmp.lt.s32.totalorder %v4873_v1, %v4874_v0  ;;  %v4871_v55 = vsel %vm4839_vm2, %v12511_v19, 1073741824 }
 0x800   :  { %v4872_v56 = vsel %vm4840_vm5, %v12592_v58, 1073741824  ;;  %vm4826_vm12 = vcmp.eq.f32.partialorder %v16358_v25, %v13740_v3  ;;  %v4877_v12 = vsel %vm4845_vm6, %v12511_v19, 1073741824  ;;  %v13921_v17 = vsel %vm5041_vm9, %v4869_v50, %v4870_v5  ;;  %v16364_v50 = vld [vmem:[#allocation99_spill] sm:$0xff] }
 0x801   :  { %v13889_v45 = vcvt.s32.f32 %v4916_v38  ;;  %v5028_v38 = vshra.s32 %v13891_v43, 16  ;;  %v13927_v61 = vcvt.s32.f32 %v4932_v2  ;;  %vm4843_vm4 = vcmp.eq.f32.partialorder %v16362_v11, %v13718_v40 }
 0x802   :  { %4887 = vmin.xlane.f32.xlu1 %v13817_v44  ;;  %v13899_v53 = vpop.xlane.xlu1 %4791  ;;  %vm5057_vm5 = vcmp.lt.s32.totalorder %v4871_v55, %v4872_v56  ;;  %vm4844_vm6 = vcmp.eq.f32.partialorder %v16364_v50, %v13718_v40  ;;  %v4858_v2 = vsel %vm4826_vm12, %v12592_v58, 1073741824 }
 0x803   :  { %5263 = vmax.xlane.f32.xlu0 %v5262_v57  ;;  %v16349_v57 = vld [vmem:[#allocation136_spill] sm:$0xff]  ;;  %16356 = vst [vmem:[#allocation50_spill] sm:$0xff] %v13899_v53  ;;  %vm4832_vm2 = vcmp.eq.f32.partialorder %v16361_v37, %v13899_v53  ;;  %v13955_v51 = vsel %vm5057_vm5, %v4871_v55, %v4872_v56  ;;  %v16368_v56 = vld [vmem:[#allocation105_spill] sm:$0xff]  ;;  %v16369_v55 = vld [vmem:[#allocation138_spill] sm:$0xff] }
 0x804   :  { %vm4828_vm1 = vcmp.eq.f32.partialorder %v16349_v57, %v4786_v63  ;;  %v13901_v63 = vsel %vm5073_vm7, %v4873_v1, %v4874_v0  ;;  %v16357_v57 = vld [vmem:[#allocation129_spill] sm:$0xff]  ;;  %v4878_v1 = vsel %vm4846_vm8, %v12592_v58, 1073741824  ;;  %v13918_v0 = vcvt.s32.f32 %v4900_v39 }
 0x805   :  { %v4860_v26 = vsel %vm4828_vm1, %v12592_v58, 1073741824  ;;  %vm4825_vm10 = vcmp.eq.f32.partialorder %v16357_v57, %v13740_v3  ;;  %v5076_v18 = vshra.s32 %v13901_v63, 16  ;;  %vm5105_vm7 = vcmp.lt.s32.totalorder %v4877_v12, %v4878_v1 }
 0x806   :  { %v13869_v32 = vpop.xlane.xlu0 %2098  ;;  %5015 = vmin.xlane.f32.xlu1 %v13852_v27  ;;  %v4857_v5 = vsel %vm4825_vm10, %v12511_v19, 1073741824  ;;  %v13959_v25 = vsel %vm5105_vm7, %v4877_v12, %v4878_v1  ;;  %vm4829_vm10 = vcmp.eq.f32.partialorder %v16368_v56, %v13848_v42  ;;  %vm4830_vm12 = vcmp.eq.f32.partialorder %v16369_v55, %v13848_v42 }
 0x807   :  { %5266 = vmax.xlane.f32.xlu0 %v5265_v49  ;;  %16352 = vst [vmem:[#allocation124_spill] sm:$0xff] %v13869_v32  ;;  %v4859_v49 = vsel %vm4827_vm15, %v12511_v19, 1073741824  ;;  %v13953_v57 = vcvt.s32.f32 %v5076_v18  ;;  %vm4945_vm8 = vcmp.lt.s32.totalorder %v4857_v5, %v4858_v2  ;;  %16367 = vst [vmem:[#allocation52_spill] sm:$0xff] %v13959_v25  ;;  %v4876_v18 = vsel %vm4844_vm6, %v12592_v58, 1073741824 }
 0x808   :  { %vm4961_vm15 = vcmp.lt.s32.totalorder %v4859_v49, %v4860_v26  ;;  %v5060_v1 = vshra.s32 %v13955_v51, 16  ;;  %v13977_v11 = vsel %vm4945_vm8, %v4857_v5, %v4858_v2  ;;  %v5108_v40 = vshra.s32 %v13959_v25, 16  ;;  %v16373_v5 = vld [vmem:[#allocation137_spill] sm:$0xff]  ;;  %v16374_v2 = vld [vmem:[#allocation104_spill] sm:$0xff]  ;;  %v16388_v25 = vld [vmem:[#allocation127_spill] sm:$0xff] }
 0x809   :  { %v13933_v39 = vsel %vm4961_vm15, %v4859_v49, %v4860_v26  ;;  %v4864_v49 = vsel %vm4832_vm2, %v12592_v58, 1073741824  ;;  %v13948_v26 = vcvt.s32.f32 %v5028_v38  ;;  %16366 = vst [vmem:[#allocation95_spill] sm:$0xff] %v13953_v57  ;;  %v4875_v38 = vsel %vm4843_vm4, %v12511_v19, 1073741824 }
 0x80a   :  { %v13911_v46 = vpop.xlane.xlu0 %2114  ;;  %4919 = vmin.xlane.f32.xlu1 %v13889_v45  ;;  %16363 = vst [vmem:[#allocation84_spill] sm:$0xff] %v13933_v39  ;;  %v4964_v3 = vshra.s32 %v13933_v39, 16  ;;  %vm5089_vm15 = vcmp.lt.s32.totalorder %v4875_v38, %v4876_v18  ;;  %v4861_v56 = vsel %vm4829_vm10, %v12511_v19, 1073741824  ;;  %v4862_v54 = vsel %vm4830_vm12, %v12592_v58, 1073741824 }
 0x80b   :  { %5269 = vmax.xlane.f32.xlu0 %v5268_v20  ;;  %16359 = vst [vmem:[#allocation54_spill] sm:$0xff] %v13911_v46  ;;  %v16360_v20 = vld [vmem:[#allocation107_spill] sm:$0xff]  ;;  %vm4848_vm2 = vcmp.eq.f32.partialorder %v16374_v2, %v13829_v30  ;;  %vm4977_vm4 = vcmp.lt.s32.totalorder %v4861_v56, %v4862_v54 }
 0x80c   :  { %vm4831_vm1 = vcmp.eq.f32.partialorder %v16360_v20, %v13899_v53  ;;  %v5044_v20 = vshra.s32 %v13921_v17, 16  ;;  %v13979_v13 = vcvt.s32.f32 %v4964_v3  ;;  %v4948_v3 = vshra.s32 %v13977_v11, 16 }
 0x80d   :  { %v4863_v22 = vsel %vm4831_vm1, %v12511_v19, 1073741824  ;;  %vm4847_vm1 = vcmp.eq.f32.partialorder %v16373_v5, %v13829_v30  ;;  %v4880_v5 = vsel %vm4848_vm2, %v12592_v58, 1073741824  ;;  %v16382_v58 = vld [vmem:[#allocation120_spill] sm:$0xff] }
 0x80e   :  { %4935 = vmin.xlane.f32.xlu1 %v13927_v61  ;;  %vm4993_vm9 = vcmp.lt.s32.totalorder %v4863_v22, %v4864_v49  ;;  %v13974_v12 = vcvt.s32.f32 %v5044_v20  ;;  %16370 = vst [vmem:[#allocation103_spill] sm:$0xff] %v13979_v13  ;;  %v13994_v20 = vcvt.s32.f32 %v5060_v1  ;;  %v4879_v53 = vsel %vm4847_vm1, %v12511_v19, 1073741824  ;;  %v16378_v1 = vld [vmem:[#allocation109_spill] sm:$0xff] }
 0x80f   :  { %4903 = vmin.xlane.f32.xlu0 %v13918_v0  ;;  %v13983_v50 = vsel %vm4993_vm9, %v4863_v22, %v4864_v49  ;;  %v13997_v22 = vsel %vm5089_vm15, %v4875_v38, %v4876_v18  ;;  %v13999_v49 = vcvt.s32.f32 %v5108_v40  ;;  %v2094_v2 = vand.u32 65535, %v16378_v1 }
 0x810   :  { %v13951_v37 = vpop.xlane.xlu0 %2130  ;;  %16371 = vst [vmem:[#allocation136_spill] sm:$0xff] %v13983_v50  ;;  %16375 = vst [vmem:[#allocation96_spill] sm:$0xff] %v13997_v22  ;;  %v4996_v36 = vshra.s32 %v13983_v50, 16  ;;  %v14009_v30 = vcvt.s32.f32 %v4948_v3  ;;  %v5092_v38 = vshra.s32 %v13997_v22, 16  ;;  %v14012_v18 = vsel %vm4977_vm4, %v4861_v56, %v4862_v54 }
 0x811   :  { %16365 = vst [vmem:[#allocation94_spill] sm:$0xff] %v13951_v37  ;;  %16376 = vst [vmem:[#allocation131_spill] sm:$0xff] %v13999_v49  ;;  %vm5121_vm5 = vcmp.lt.s32.totalorder %v4879_v53, %v4880_v5  ;;  %vm2100_vm6 = vcmp.eq.f32.partialorder %v16382_v58, %v13869_v32  ;;  %v2110_v1 = vand.u32 65535, %v16383_v35  ;;  %v4980_v50 = vshra.s32 %v14012_v18, 16 }
 0x812   :  { %5079 = vmin.xlane.f32.xlu1 %v13953_v57  ;;  %16379 = vst [vmem:[#allocation129_spill] sm:$0xff] %v14012_v18  ;;  %v14014_v40 = vcvt.s32.f32 %v4996_v36  ;;  %v14023_v3 = vcvt.s32.f32 %v5092_v38  ;;  %v2096_v54 = vcvt.s32.f32 %v2094_v2  ;;  %v14026_v56 = vsel %vm5121_vm5, %v4879_v53, %v4880_v5  ;;  %v16391_v5 = vld [vmem:[#allocation113_spill] sm:$0xff] }
 0x813   :  { %5031 = vmin.xlane.f32.xlu0 %v13948_v26  ;;  %16385 = vst [vmem:[#allocation98_spill] sm:$0xff] %v14026_v56  ;;  %v2126_v58 = vand.u32 65535, %v16388_v25  ;;  %v14034_v32 = vcvt.s32.f32 %v4980_v50  ;;  %v5124_v35 = vshra.s32 %v14026_v56, 16  ;;  %v2112_v38 = vcvt.s32.f32 %v2110_v1  ;;  %v16396_v1 = vld [vmem:[#allocation121_spill] sm:$0xff] }
 0x814   :  { %16380 = vst [vmem:[#allocation22_spill] sm:$0xff] %v14014_v40  ;;  %16384 = vst [vmem:[#allocation112_spill] sm:$0xff] %v14023_v3  ;;  %v2101_v36 = vsel %vm2100_vm6, %v2096_v54, inf  ;;  %v2286_v2 = vand.u32 65535, %v16391_v5 }
 0x815   :  { %16389 = vst [vmem:[#allocation105_spill] sm:$0xff] %v14034_v32  ;;  %v14046_v50 = vcvt.s32.f32 %v5124_v35  ;;  %v16401_v35 = vld [vmem:[#allocation134_spill] sm:$0xff] }
 0x816   :  { %4967 = vmin.xlane.f32.xlu1 %v13979_v13  ;;  %v14037_v13 = vpop.xlane.xlu1 %2290 }
 0x817   :  { %5047 = vmin.xlane.f32.xlu0 %v13974_v12  ;;  %16390 = vst [vmem:[#allocation138_spill] sm:$0xff] %v14037_v13  ;;  %16395 = vst [vmem:[#allocation104_spill] sm:$0xff] %v14046_v50  ;;  %vm2292_vm9 = vcmp.eq.f32.partialorder %v16396_v1, %v14037_v13  ;;  %v16404_v13 = vld [vmem:[#allocation111_spill] sm:$0xff] }
 0x818   :  { %v13987_v55 = vpop.xlane.xlu0 %2146 }
 0x819   :  { %16372 = vst [vmem:[#allocation56_spill] sm:$0xff] %v13987_v55 }
 0x81a   :  { %5111 = vmin.xlane.f32.xlu1 %v13999_v49  ;;  %v14052_v5 = vpop.xlane.xlu1 %2322 }
 0x81b   :  { %5063 = vmin.xlane.f32.xlu0 %v13994_v20  ;;  %16398 = vst [vmem:[#allocation109_spill] sm:$0xff] %v14052_v5 }
 0x81c   :  { %v14005_v42 = vpop.xlane.xlu0 %2162 }
 0x81d   :  { %16377 = vst [vmem:[#allocation132_spill] sm:$0xff] %v14005_v42  ;;  %vm2164_vm15 = vcmp.eq.f32.partialorder %v16404_v13, %v14005_v42 }
 0x81e   :  { %4999 = vmin.xlane.f32.xlu1 %v14014_v40  ;;  %v16387_v40 = vld [vmem:[#allocation123_spill] sm:$0xff] }
 0x81f   :  { %4951 = vmin.xlane.f32.xlu0 %v14009_v30  ;;  %vm2116_vm7 = vcmp.eq.f32.partialorder %v16387_v40, %v13911_v46  ;;  %v16394_v40 = vld [vmem:[#allocation133_spill] sm:$0xff]  ;;  %v2128_v46 = vcvt.s32.f32 %v2126_v58 }
 0x820   :  { %v14017_v19 = vpop.xlane.xlu0 %2178  ;;  %v2117_v53 = vsel %vm2116_vm7, %v2112_v38, inf  ;;  %v2142_v25 = vand.u32 65535, %v16394_v40  ;;  %v16397_v38 = vld [vmem:[#allocation126_spill] sm:$0xff]  ;;  %v2158_v40 = vand.u32 65535, %v16401_v35 }
 0x821   :  { %16381 = vst [vmem:[#allocation107_spill] sm:$0xff] %v14017_v19 }
 0x822   :  { %2102 = vmin.xlane.f32.xlu1 %v2101_v36  ;;  %v16393_v36 = vld [vmem:[#allocation130_spill] sm:$0xff]  ;;  %v2144_v58 = vcvt.s32.f32 %v2142_v25  ;;  %v2160_v39 = vcvt.s32.f32 %v2158_v40  ;;  %v16410_v40 = vld [vmem:[#allocation29_spill] sm:$0xff] }
 0x823   :  { %5095 = vmin.xlane.f32.xlu0 %v14023_v3  ;;  %vm2132_vm8 = vcmp.eq.f32.partialorder %v16393_v36, %v13951_v37  ;;  %v16400_v36 = vld [vmem:[#allocation23_spill] sm:$0xff] }
 0x824   :  { %v14029_v49 = vpop.xlane.xlu0 %2194  ;;  %v2133_v56 = vsel %vm2132_vm8, %v2128_v46, inf  ;;  %vm2148_vm10 = vcmp.eq.f32.partialorder %v16400_v36, %v13987_v55  ;;  %v2165_v35 = vsel %vm2164_vm15, %v2160_v39, inf  ;;  %v16411_v39 = vld [vmem:[#allocation28_spill] sm:$0xff] }
 0x825   :  { %16386 = vst [vmem:[#allocation99_spill] sm:$0xff] %v14029_v49  ;;  %v2149_v46 = vsel %vm2148_vm10, %v2144_v58, inf  ;;  %vm2196_vm2 = vcmp.eq.f32.partialorder %v16410_v40, %v14029_v49  ;;  %v16416_v40 = vld [vmem:[#allocation20_spill] sm:$0xff] }
 0x826   :  { %2118 = vmin.xlane.f32.xlu1 %v2117_v53  ;;  %v2288_v53 = vcvt.s32.f32 %v2286_v2 }
 0x827   :  { %4983 = vmin.xlane.f32.xlu0 %v14034_v32  ;;  %v2318_v32 = vand.u32 65535, %v16397_v38 }
 0x828   :  { %v14041_v54 = vpop.xlane.xlu0 %2210  ;;  %v2293_v37 = vsel %vm2292_vm9, %v2288_v53, inf  ;;  %v16408_v53 = vld [vmem:[#allocation25_spill] sm:$0xff] }
 0x829   :  { %16392 = vst [vmem:[#allocation137_spill] sm:$0xff] %v14041_v54  ;;  %v2320_v38 = vcvt.s32.f32 %v2318_v32  ;;  %v2190_v32 = vand.u32 65535, %v16408_v53 }
 0x82a   :  { %2134 = vmin.xlane.f32.xlu1 %v2133_v56  ;;  %v16405_v56 = vld [vmem:[#allocation24_spill] sm:$0xff] }
 0x82b   :  { %5127 = vmin.xlane.f32.xlu0 %v14046_v50  ;;  %v16402_v50 = vld [vmem:[#allocation128_spill] sm:$0xff]  ;;  %v2174_v2 = vand.u32 65535, %v16405_v56  ;;  %v2192_v56 = vcvt.s32.f32 %v2190_v32  ;;  %v3029_v32 = vand.u32 65535, %v16416_v40  ;;  %v16423_v40 = vld [vmem:[#allocation63_spill] sm:$0xff] }
 0x82c   :  { %v14054_v18 = vpop.xlane.xlu0 %2226  ;;  %vm2324_vm12 = vcmp.eq.f32.partialorder %v16402_v50, %v14052_v5  ;;  %v16407_v50 = vld [vmem:[#allocation27_spill] sm:$0xff] }
 0x82d   :  { %16399 = vst [vmem:[#allocation120_spill] sm:$0xff] %v14054_v18  ;;  %v2325_v36 = vsel %vm2324_vm12, %v2320_v38, inf  ;;  %vm2180_vm1 = vcmp.eq.f32.partialorder %v16407_v50, %v14017_v19  ;;  %v2176_v58 = vcvt.s32.f32 %v2174_v2  ;;  %v2206_v38 = vand.u32 65535, %v16411_v39  ;;  %v16413_v2 = vld [vmem:[#allocation18_spill] sm:$0xff]  ;;  %v16414_v50 = vld [vmem:[#allocation17_spill] sm:$0xff] }
 0x82e   :  { %2150 = vmin.xlane.f32.xlu1 %v2149_v46  ;;  %vm2212_vm4 = vcmp.eq.f32.partialorder %v16413_v2, %v14041_v54  ;;  %v2222_v53 = vand.u32 65535, %v16414_v50  ;;  %v16417_v39 = vld [vmem:[#allocation117_spill] sm:$0xff]  ;;  %v3031_v2 = vcvt.s32.f32 %v3029_v32  ;;  %v16422_v54 = vld [vmem:[#allocation118_spill] sm:$0xff] }
 0x82f   :  { %2294 = vmin.xlane.f32.xlu0 %v2293_v37  ;;  %v2181_v46 = vsel %vm2180_vm1, %v2176_v58, inf  ;;  %v2208_v58 = vcvt.s32.f32 %v2206_v38  ;;  %vm2228_vm5 = vcmp.eq.f32.partialorder %v16417_v39, %v14054_v18  ;;  %v16420_v38 = vld [vmem:[#allocation65_spill] sm:$0xff] }
 0x830   :  { %v14061_v1 = vpop.xlane.xlu0 %2242  ;;  %v14066_v25 = vpop.xlane.xlu1 %3017  ;;  %v3157_v50 = vand.u32 65535, %v16420_v38  ;;  %v16426_v18 = vld [vmem:[#allocation125_spill] sm:$0xff] }
 0x831   :  { %16403 = vst [vmem:[#allocation122_spill] sm:$0xff] %v14061_v1  ;;  %v2213_v19 = vsel %vm2212_vm4, %v2208_v58, inf  ;;  %v16421_v58 = vld [vmem:[#allocation19_spill] sm:$0xff] }
 0x832   :  { %2166 = vmin.xlane.f32.xlu1 %v2165_v35  ;;  %vm2244_vm6 = vcmp.eq.f32.partialorder %v16421_v58, %v14061_v1  ;;  %v3159_v32 = vcvt.s32.f32 %v3157_v50  ;;  %v16427_v58 = vld [vmem:[#allocation119_spill] sm:$0xff]  ;;  %v16475_v1 = vld [vmem:[#allocation74_spill] sm:$0xff] }
 0x833   :  { %2326 = vmin.xlane.f32.xlu0 %v2325_v36  ;;  %v2197_v36 = vsel %vm2196_vm2, %v2192_v56, inf  ;;  %v16418_v56 = vld [vmem:[#allocation116_spill] sm:$0xff] }
 0x834   :  { %v14068_v37 = vpop.xlane.xlu0 %2258  ;;  %v14073_v55 = vpop.xlane.xlu1 %3145  ;;  %v2238_v49 = vand.u32 65535, %v16418_v56 }
 0x835   :  { %16406 = vst [vmem:[#allocation123_spill] sm:$0xff] %v14068_v37  ;;  %vm2260_vm8 = vcmp.eq.f32.partialorder %v16426_v18, %v14068_v37  ;;  %v16431_v18 = vld [vmem:[#allocation67_spill] sm:$0xff] }
 0x836   :  { %2182 = vmin.xlane.f32.xlu1 %v2181_v46  ;;  %v2240_v22 = vcvt.s32.f32 %v2238_v49 }
 0x838   :  { %v14075_v13 = vpop.xlane.xlu0 %2274  ;;  %v14080_v35 = vpop.xlane.xlu1 %3049 }
 0x839   :  { %16409 = vst [vmem:[#allocation127_spill] sm:$0xff] %v14075_v13 }
 0x83a   :  { %2198 = vmin.xlane.f32.xlu1 %v2197_v36  ;;  %v2224_v36 = vcvt.s32.f32 %v2222_v53  ;;  %v2245_v53 = vsel %vm2244_vm6, %v2240_v22, inf }
 0x83c   :  { %v14082_v42 = vpop.xlane.xlu0 %2306  ;;  %v2229_v3 = vsel %vm2228_vm5, %v2224_v36, inf }
 0x83d   :  { %16412 = vst [vmem:[#allocation113_spill] sm:$0xff] %v14082_v42 }
 0x83e   :  { %2214 = vmin.xlane.f32.xlu1 %v2213_v19  ;;  %v2254_v19 = vand.u32 65535, %v16422_v54  ;;  %v2270_v54 = vand.u32 65535, %v16427_v58  ;;  %v2302_v58 = vand.u32 65535, %v16431_v18 }
 0x83f   :  { %v14087_v46 = vpop.xlane.xlu1 %3952 }
 0x840   :  { %v14089_v5 = vpop.xlane.xlu0 %2338  ;;  %v2256_v49 = vcvt.s32.f32 %v2254_v19 }
 0x841   :  { %16415 = vst [vmem:[#allocation130_spill] sm:$0xff] %v14089_v5 }
 0x842   :  { %2230 = vmin.xlane.f32.xlu1 %v2229_v3  ;;  %v16425_v3 = vld [vmem:[#allocation39_spill] sm:$0xff] }
 0x843   :  { %v3173_v38 = vand.u32 65535, %v16425_v3 }
 0x844   :  { %v14095_v57 = vpop.xlane.xlu0 %3033  ;;  %v14103_v39 = vpop.xlane.xlu1 %4080 }
 0x845   :  { %16419 = vst [vmem:[#allocation133_spill] sm:$0xff] %v14095_v57  ;;  %vm3035_vm7 = vcmp.eq.f32.partialorder %v16423_v40, %v14095_v57  ;;  %v3175_v50 = vcvt.s32.f32 %v3173_v38  ;;  %v16430_v57 = vld [vmem:[#allocation141_spill] sm:$0xff] }
 0x846   :  { %v3036_v56 = vsel %vm3035_vm7, %v3031_v2, inf  ;;  %2246 = vmin.xlane.f32.xlu1 %v2245_v53  ;;  %v2261_v2 = vsel %vm2260_vm8, %v2256_v49, inf  ;;  %v16429_v53 = vld [vmem:[#allocation41_spill] sm:$0xff]  ;;  %vm2276_vm10 = vcmp.eq.f32.partialorder %v16430_v57, %v14075_v13  ;;  %v16469_v13 = vld [vmem:[#allocation70_spill] sm:$0xff] }
 0x847   :  { %3037 = vmin.xlane.f32.xlu0 %v3036_v56  ;;  %v3964_v3 = vand.u32 65535, %v16429_v53  ;;  %v16433_v53 = vld [vmem:[#allocation73_spill] sm:$0xff] }
 0x848   :  { %v14105_v36 = vpop.xlane.xlu0 %3161  ;;  %vm2308_vm15 = vcmp.eq.f32.partialorder %v16433_v53, %v14082_v42  ;;  %v16434_v57 = vld [vmem:[#allocation37_spill] sm:$0xff]  ;;  %v9636_v53 = vld [vmem:[#allocation7] ss:$8 sps:$4 sm:$0xff]  }
 0x849   :  { %16424 = vst [vmem:[#allocation121_spill] sm:$0xff] %v14105_v36  ;;  %vm3163_vm9 = vcmp.eq.f32.partialorder %v13243_v60, %v14105_v36  ;;  %v2272_v60 = vcvt.s32.f32 %v2270_v54  ;;  %v3966_v38 = vcvt.s32.f32 %v3964_v3  ;;  %v2334_v18 = vand.u32 65535, %v16434_v57  ;;  %v9638_v57 = vld [vmem:[#allocation7 + $0x4] ss:$8 sps:$4 sm:$0xff]  }
 0x84a   :  { %v3164_v40 = vsel %vm3163_vm9, %v3159_v32, inf  ;;  %2262 = vmin.xlane.f32.xlu1 %v2261_v2  ;;  %v4092_v2 = vand.u32 65535, %v13267_v21  ;;  %v3189_v21 = vand.u32 65535, %v13331_v34  ;;  %8170 = vmatprep.subr.bf16.mxu1 %v9638_v57  ;;  %v9639_v34 = vld [vmem:[#allocation7 + $0x10] ss:$8 sps:$4 sm:$0xff]  }
 0x84b   :  { %3165 = vmin.xlane.f32.xlu0 %v3164_v40  ;;  %v14113_v56 = vpop.xlane.xlu1 %3065  ;;  %v2277_v32 = vsel %vm2276_vm10, %v2272_v60, inf  ;;  %8171 = vmatpush1.bf16.msra.mxu1 %v9636_v53 }
 0x84c   :  { %v14115_v22 = vpop.xlane.xlu0 %3177  ;;  %v4094_v3 = vcvt.s32.f32 %v4092_v2 }
 0x84d   :  { %16428 = vst [vmem:[#allocation126_spill] sm:$0xff] %v14115_v22  ;;  %vm3179_vm12 = vcmp.eq.f32.partialorder %v13275_v31, %v14115_v22  ;;  %v2304_v31 = vcvt.s32.f32 %v2302_v58  ;;  %v16437_v22 = vld [vmem:[#allocation21_spill] sm:$0xff] }
 0x84e   :  { %v3180_v19 = vsel %vm3179_vm12, %v3175_v50, inf  ;;  %2278 = vmin.xlane.f32.xlu1 %v2277_v32  ;;  %v16436_v32 = vld [vmem:[#allocation33_spill] sm:$0xff]  ;;  %v3013_v36 = vand.u32 65535, %v16437_v22  ;;  %v16439_v22 = vld [vmem:[#allocation35_spill] sm:$0xff] }
 0x84f   :  { %3181 = vmin.xlane.f32.xlu0 %v3180_v19  ;;  %v14123_v49 = vpop.xlane.xlu1 %3984  ;;  %v2309_v50 = vsel %vm2308_vm15, %v2304_v31, inf  ;;  %vm2340_vm2 = vcmp.eq.f32.partialorder %v16436_v32, %v14089_v5  ;;  %v9641_v58 = vld [vmem:[#allocation7 + $0x14] ss:$8 sps:$4 sm:$0xff]   ;;  %v4108_v32 = vand.u32 65535, %v13345_v23  ;;  %vm3019_vm5 = vcmp.eq.f32.partialorder %v16439_v22, %v14066_v25  ;;  %v16459_v5 = vld [vmem:[#allocation68_spill] sm:$0xff] }
 0x850   :  { %v14125_v40 = vpop.xlane.xlu0 %3968  ;;  %8172 = vmatprep.subr.bf16.mxu1 %v9641_v58  ;;  %v3015_v57 = vcvt.s32.f32 %v3013_v36  ;;  %v3205_v22 = vand.u32 65535, %v13440_v14  ;;  %v16443_v58 = vld [vmem:[#allocation69_spill] sm:$0xff] }
 0x851   :  { %16432 = vst [vmem:[#allocation23_spill] sm:$0xff] %v14125_v40  ;;  %vm3970_vm1 = vcmp.eq.f32.partialorder %v13285_v8, %v14125_v40  ;;  %v2336_v8 = vcvt.s32.f32 %v2334_v18  ;;  %v16440_v18 = vld [vmem:[#allocation140_spill] sm:$0xff]  ;;  %8173 = vmatpush1.bf16.msra.mxu1 %v9639_v34  ;;  %v4110_v23 = vcvt.s32.f32 %v4108_v32  ;;  %vm3147_vm7 = vcmp.eq.f32.partialorder %v16443_v58, %v14073_v55 }
 0x852   :  { %v3971_v54 = vsel %vm3970_vm1, %v3966_v38, inf  ;;  %2310 = vmin.xlane.f32.xlu1 %v2309_v50  ;;  %v3191_v50 = vcvt.s32.f32 %v3189_v21  ;;  %v3020_v53 = vsel %vm3019_vm5, %v3015_v57, inf  ;;  %v9642_v21 = vld [vmem:[#allocation7 + $0x20] ss:$8 sps:$4 sm:$0xff]   ;;  %v9645_v32 = vld [vmem:[#allocation7 + $0x30] ss:$8 sps:$4 sm:$0xff]  }
 0x853   :  { %3972 = vmin.xlane.f32.xlu0 %v3971_v54  ;;  %v14133_v60 = vpop.xlane.xlu1 %3081  ;;  %v2341_v31 = vsel %vm2340_vm2, %v2336_v8, inf  ;;  %vm4082_vm2 = vcmp.eq.f32.partialorder %v16459_v5, %v14103_v39  ;;  %v16464_v5 = vld [vmem:[#allocation75_spill] sm:$0xff] }
 0x854   :  { %v14135_v19 = vpop.xlane.xlu0 %4096  ;;  %vm3067_vm5 = vcmp.eq.f32.partialorder %v16464_v5, %v14113_v56  ;;  %v16468_v5 = vld [vmem:[#allocation46_spill] sm:$0xff] }
 0x855   :  { %16435 = vst [vmem:[#allocation134_spill] sm:$0xff] %v14135_v19  ;;  %vm4098_vm4 = vcmp.eq.f32.partialorder %v13371_v29, %v14135_v19  ;;  %v9644_v29 = vld [vmem:[#allocation7 + $0x24] ss:$8 sps:$4 sm:$0xff]   ;;  %v16447_v19 = vld [vmem:[#allocation93_spill] sm:$0xff] }
 0x856   :  { %v4099_v38 = vsel %vm4098_vm4, %v4094_v3, inf  ;;  %2342 = vmin.xlane.f32.xlu1 %v2341_v31  ;;  %v3141_v3 = vand.u32 65535, %v16440_v18  ;;  %8174 = vmatprep.subr.bf16.mxu1 %v9644_v29  ;;  %v9647_v18 = vld [vmem:[#allocation7 + $0x34] ss:$8 sps:$4 sm:$0xff]   ;;  %v4124_v58 = vand.u32 65535, %v16447_v19  ;;  %v16448_v29 = vld [vmem:[#allocation71_spill] sm:$0xff] }
 0x857   :  { %4100 = vmin.xlane.f32.xlu0 %v4099_v38  ;;  %v14143_v2 = vpop.xlane.xlu1 %4000  ;;  %8175 = vmatpush1.bf16.msra.mxu1 %v9642_v21  ;;  %vm3051_vm9 = vcmp.eq.f32.partialorder %v16448_v29, %v14080_v35  ;;  %v16451_v19 = vld [vmem:[#allocation32_spill] sm:$0xff] }
 0x858   :  { %v14145_v54 = vpop.xlane.xlu0 %3193  ;;  %v3143_v57 = vcvt.s32.f32 %v3141_v3  ;;  %8176 = vmatprep.subr.bf16.mxu1 %v9647_v18  ;;  %v4126_v29 = vcvt.s32.f32 %v4124_v58  ;;  %v16453_v18 = vld [vmem:[#allocation36_spill] sm:$0xff] }
 0x859   :  { %16438 = vst [vmem:[#allocation128_spill] sm:$0xff] %v14145_v54  ;;  %vm3195_vm6 = vcmp.eq.f32.partialorder %v13406_v28, %v14145_v54  ;;  %v16444_v28 = vld [vmem:[#allocation135_spill] sm:$0xff]  ;;  %vm3954_vm12 = vcmp.eq.f32.partialorder %v16453_v18, %v14087_v46  ;;  %v9651_v58 = vld [vmem:[#allocation7 + $0x50] ss:$8 sps:$4 sm:$0xff]  }
 0x85a   :  { %v3196_v8 = vsel %vm3195_vm6, %v3191_v50, inf  ;;  %3021 = vmin.xlane.f32.xlu1 %v3020_v53  ;;  %v3045_v36 = vand.u32 65535, %v16444_v28  ;;  %v16445_v50 = vld [vmem:[#allocation43_spill] sm:$0xff]  ;;  %v3148_v34 = vsel %vm3147_vm7, %v3143_v57, inf  ;;  %v3207_v53 = vcvt.s32.f32 %v3205_v22  ;;  %v16458_v18 = vld [vmem:[#allocation61_spill] sm:$0xff] }
 0x85b   :  { %3197 = vmin.xlane.f32.xlu0 %v3196_v8  ;;  %v14153_v38 = vpop.xlane.xlu1 %3097  ;;  %v9650_v28 = vld [vmem:[#allocation7 + $0x44] ss:$8 sps:$4 sm:$0xff]   ;;  %8177 = vmatpush1.bf16.msra.mxu1 %v9645_v32  ;;  %v9648_v22 = vld [vmem:[#allocation7 + $0x40] ss:$8 sps:$4 sm:$0xff]   ;;  %vm3986_vm7 = vcmp.eq.f32.partialorder %v16469_v13, %v14123_v49  ;;  %v16474_v13 = vld [vmem:[#allocation145_spill] sm:$0xff] }
 0x85c   :  { %16441 = vst [vmem:[#allocation111_spill] sm:$0xff] %v14153_v38  ;;  %v14155_v31 = vpop.xlane.xlu0 %4112  ;;  %v3047_v57 = vcvt.s32.f32 %v3045_v36  ;;  %8178 = vmatprep.subr.bf16.mxu1 %v9650_v28  ;;  %v16456_v32 = vld [vmem:[#allocation139_spill] sm:$0xff] }
 0x85d   :  { %16442 = vst [vmem:[#allocation24_spill] sm:$0xff] %v14155_v31  ;;  %vm4114_vm8 = vcmp.eq.f32.partialorder %v16445_v50, %v14155_v31  ;;  %v16449_v50 = vld [vmem:[#allocation31_spill] sm:$0xff]  ;;  %vm3099_vm1 = vcmp.eq.f32.partialorder %v16456_v32, %v14153_v38 }
 0x85e   :  { %v4115_v8 = vsel %vm4114_vm8, %v4110_v23, inf  ;;  %3149 = vmin.xlane.f32.xlu1 %v3148_v34  ;;  %v3948_v3 = vand.u32 65535, %v16449_v50  ;;  %v16450_v23 = vld [vmem:[#allocation76_spill] sm:$0xff]  ;;  %v3052_v21 = vsel %vm3051_vm9, %v3047_v57, inf  ;;  %v3093_v34 = vand.u32 65535, %v16451_v19 }
 0x85f   :  { %4116 = vmin.xlane.f32.xlu0 %v4115_v8  ;;  %v14163_v54 = vpop.xlane.xlu1 %4016  ;;  %v9653_v50 = vld [vmem:[#allocation7 + $0x54] ss:$8 sps:$4 sm:$0xff]   ;;  %8179 = vmatpush1.bf16.msra.mxu1 %v9648_v22  ;;  %vm3083_vm9 = vcmp.eq.f32.partialorder %v16475_v1, %v14133_v60 }
 0x860   :  { %v14165_v14 = vpop.xlane.xlu0 %3209  ;;  %v3950_v57 = vcvt.s32.f32 %v3948_v3  ;;  %v3095_v28 = vcvt.s32.f32 %v3093_v34  ;;  %8180 = vmatprep.subr.bf16.mxu1 %v9653_v50  ;;  %v9656_v3 = vld [vmem:[#allocation7 + $0x64] ss:$8 sps:$4 sm:$0xff]   ;;  %v9659_v50 = vld [vmem:[#allocation7 + $0x74] ss:$8 sps:$4 sm:$0xff]  }
 0x861   :  { %16446 = vst [vmem:[#allocation27_spill] sm:$0xff] %v14165_v14  ;;  %vm3211_vm10 = vcmp.eq.f32.partialorder %v16450_v23, %v14165_v14  ;;  %v16454_v23 = vld [vmem:[#allocation38_spill] sm:$0xff] }
 0x862   :  { %v3212_v8 = vsel %vm3211_vm10, %v3207_v53, inf  ;;  %3053 = vmin.xlane.f32.xlu1 %v3052_v21  ;;  %v4076_v36 = vand.u32 65535, %v16454_v23  ;;  %v16455_v53 = vld [vmem:[#allocation79_spill] sm:$0xff]  ;;  %v3955_v19 = vsel %vm3954_vm12, %v3950_v57, inf  ;;  %v4012_v23 = vand.u32 65535, %v16458_v18  ;;  %v16461_v57 = vld [vmem:[#allocation77_spill] sm:$0xff] }
 0x863   :  { %3213 = vmin.xlane.f32.xlu0 %v3212_v8  ;;  %v14173_v31 = vpop.xlane.xlu1 %3241  ;;  %v3100_v32 = vsel %vm3099_vm1, %v3095_v28, inf  ;;  %vm4018_vm4 = vcmp.eq.f32.partialorder %v16461_v57, %v14163_v54  ;;  %8181 = vmatpush1.bf16.msra.mxu1 %v9651_v58  ;;  %v16463_v18 = vld [vmem:[#allocation83_spill] sm:$0xff]  ;;  %v16466_v58 = vld [vmem:[#allocation80_spill] sm:$0xff]  ;;  %v16479_v1 = vld [vmem:[#allocation146_spill] sm:$0xff] }
 0x864   :  { %v14176_v40 = vpop.xlane.xlu0 %4128  ;;  %v3237_v38 = vand.u32 65535, %v16463_v18  ;;  %8182 = vmatprep.subr.bf16.mxu1 %v9656_v3  ;;  %vm3243_vm6 = vcmp.eq.f32.partialorder %v16466_v58, %v14173_v31  ;;  %v4156_v3 = vand.u32 65535, %v16468_v5 }
 0x865   :  { %16452 = vst [vmem:[#allocation25_spill] sm:$0xff] %v14176_v40  ;;  %vm4130_vm15 = vcmp.eq.f32.partialorder %v16455_v53, %v14176_v40  ;;  %v9654_v40 = vld [vmem:[#allocation7 + $0x60] ss:$8 sps:$4 sm:$0xff]  }
 0x866   :  { %v4131_v8 = vsel %vm4130_vm15, %v4126_v29, inf  ;;  %3956 = vmin.xlane.f32.xlu1 %v3955_v19  ;;  %v16460_v29 = vld [vmem:[#allocation34_spill] sm:$0xff]  ;;  %v4014_v19 = vcvt.s32.f32 %v4012_v23  ;;  %v9657_v23 = vld [vmem:[#allocation7 + $0x70] ss:$8 sps:$4 sm:$0xff]   ;;  %v3239_v18 = vcvt.s32.f32 %v3237_v38  ;;  %v4158_v5 = vcvt.s32.f32 %v4156_v3 }
 0x867   :  { %4132 = vmin.xlane.f32.xlu0 %v4131_v8  ;;  %v14185_v14 = vpop.xlane.xlu1 %4160  ;;  %v3061_v53 = vand.u32 65535, %v16460_v29  ;;  %v4078_v8 = vcvt.s32.f32 %v4076_v36  ;;  %v16465_v36 = vld [vmem:[#allocation85_spill] sm:$0xff]  ;;  %8183 = vmatpush1.bf16.msra.mxu1 %v9654_v40  ;;  %v16472_v40 = vld [vmem:[#allocation90_spill] sm:$0xff] }
 0x868   :  { %16457 = vst [vmem:[#allocation29_spill] sm:$0xff] %v14185_v14  ;;  %v14187_v21 = vpop.xlane.xlu0 %3225  ;;  %v3980_v28 = vand.u32 65535, %v16465_v36  ;;  %v4019_v57 = vsel %vm4018_vm4, %v4014_v19, inf  ;;  %8184 = vmatprep.subr.bf16.mxu1 %v9659_v50  ;;  %v9662_v36 = vld [vmem:[#allocation7 + $0x84] ss:$8 sps:$4 sm:$0xff]   ;;  %v3244_v58 = vsel %vm3243_vm6, %v3239_v18, inf  ;;  %vm4162_vm8 = vcmp.eq.f32.partialorder %v16472_v40, %v14185_v14 }
 0x869   :  { %v4083_v22 = vsel %vm4082_vm2, %v4078_v8, inf  ;;  %v9660_v38 = vld [vmem:[#allocation7 + $0x80] ss:$8 sps:$4 sm:$0xff]   ;;  %v3125_v50 = vand.u32 65535, %v16474_v13  ;;  %v4163_v40 = vsel %vm4162_vm8, %v4158_v5, inf  ;;  %v16480_v13 = vld [vmem:[#allocation49_spill] sm:$0xff] }
 0x86a   :  { %4084 = vmin.xlane.f32.xlu1 %v4083_v22  ;;  %v3982_v37 = vcvt.s32.f32 %v3980_v28  ;;  %v16476_v28 = vld [vmem:[#allocation45_spill] sm:$0xff]  ;;  %vm4002_vm12 = vcmp.eq.f32.partialorder %v16480_v13, %v14143_v2 }
 0x86b   :  { %3101 = vmin.xlane.f32.xlu0 %v3100_v32  ;;  %v14201_v29 = vpop.xlane.xlu1 %3129  ;;  %v3063_v32 = vcvt.s32.f32 %v3061_v53  ;;  %v16470_v53 = vld [vmem:[#allocation66_spill] sm:$0xff]  ;;  %8185 = vmatpush1.bf16.msra.mxu1 %v9657_v23  ;;  %v3996_v18 = vand.u32 65535, %v16476_v28  ;;  %v9663_v23 = vld [vmem:[#allocation7 + $0x90] ss:$8 sps:$4 sm:$0xff]   ;;  %v9668_v28 = vld [vmem:[#allocation7 + $0xa4] ss:$8 sps:$4 sm:$0xff]  }
 0x86c   :  { %v14195_v34 = vpop.xlane.xlu0 %4144  ;;  %v3077_v19 = vand.u32 65535, %v16470_v53  ;;  %8186 = vmatprep.subr.bf16.mxu1 %v9662_v36  ;;  %v9665_v53 = vld [vmem:[#allocation7 + $0x94] ss:$8 sps:$4 sm:$0xff]   ;;  %vm3131_vm10 = vcmp.eq.f32.partialorder %v13577_v9, %v14201_v29  ;;  %v4044_v36 = vand.u32 65535, %v16479_v1 }
 0x86d   :  { %16462 = vst [vmem:[#allocation28_spill] sm:$0xff] %v14195_v34  ;;  %v3068_v8 = vsel %vm3067_vm5, %v3063_v32, inf  ;;  %v3987_v32 = vsel %vm3986_vm7, %v3982_v37, inf  ;;  %v3998_v5 = vcvt.s32.f32 %v3996_v18  ;;  %v16484_v1 = vld [vmem:[#allocation78_spill] sm:$0xff] }
 0x86e   :  { %3069 = vmin.xlane.f32.xlu1 %v3068_v8  ;;  %v3079_v42 = vcvt.s32.f32 %v3077_v19  ;;  %vm3227_vm1 = vcmp.eq.f32.partialorder %v16484_v1, %v14187_v21  ;;  %v9671_v18 = vld [vmem:[#allocation7 + $0xb4] ss:$8 sps:$4 sm:$0xff]  }
 0x86f   :  { %4020 = vmin.xlane.f32.xlu0 %v4019_v57  ;;  %v14211_v57 = vpop.xlane.xlu1 %4048  ;;  %8187 = vmatpush1.bf16.msra.mxu1 %v9660_v38  ;;  %v9666_v38 = vld [vmem:[#allocation7 + $0xa0] ss:$8 sps:$4 sm:$0xff]  }
 0x870   :  { %v14205_v22 = vpop.xlane.xlu0 %3113  ;;  %16471 = vst [vmem:[#allocation17_spill] sm:$0xff] %v14211_v57  ;;  %v3084_v37 = vsel %vm3083_vm9, %v3079_v42, inf  ;;  %8188 = vmatprep.subr.bf16.mxu1 %v9665_v53  ;;  %vm4050_vm15 = vcmp.eq.f32.partialorder %v13597_v48, %v14211_v57  ;;  %v4003_v42 = vsel %vm4002_vm12, %v3998_v5, inf  ;;  %v4188_v53 = vand.u32 65535, %v13599_v15 }
 0x871   :  { %16467 = vst [vmem:[#allocation18_spill] sm:$0xff] %v14205_v22  ;;  %vm7575_vm12 = vcmask 1041408  }
 0x872   :  { %3988 = vmin.xlane.f32.xlu1 %v3987_v32  ;;  %v3127_v32 = vcvt.s32.f32 %v3125_v50  ;;  %v4190_v15 = vcvt.s32.f32 %v4188_v53  ;;  %v16492_v53 = vld [vmem:[#allocation57_spill] sm:$0xff] }
 0x873   :  { %3245 = vmin.xlane.f32.xlu0 %v3244_v58  ;;  %v14221_v58 = vpop.xlane.xlu1 %4192  ;;  %8189 = vmatpush1.bf16.msra.mxu1 %v9663_v23  ;;  %vm3115_vm5 = vcmp.eq.f32.partialorder %v16492_v53, %v14205_v22 }
 0x874   :  { %v14215_v8 = vpop.xlane.xlu0 %4032  ;;  %16477 = vst [vmem:[#allocation117_spill] sm:$0xff] %v14221_v58  ;;  %v3132_v9 = vsel %vm3131_vm10, %v3127_v32, inf  ;;  %8190 = vmatprep.subr.bf16.mxu1 %v9668_v28  ;;  %vm4194_vm2 = vcmp.eq.f32.partialorder %v13616_v41, %v14221_v58  ;;  %v16488_v28 = vld [vmem:[#allocation91_spill] sm:$0xff] }
 0x875   :  { %16473 = vst [vmem:[#allocation20_spill] sm:$0xff] %v14215_v8  ;;  %vm4146_vm4 = vcmp.eq.f32.partialorder %v16488_v28, %v14195_v34  ;;  %vm4034_vm6 = vcmp.eq.f32.partialorder %v13608_v47, %v14215_v8 }
 0x876   :  { %3085 = vmin.xlane.f32.xlu1 %v3084_v37  ;;  %v4046_v37 = vcvt.s32.f32 %v4044_v36  ;;  %v9669_v36 = vld [vmem:[#allocation7 + $0xb0] ss:$8 sps:$4 sm:$0xff]  }
 0x877   :  { %4164 = vmin.xlane.f32.xlu0 %v4163_v40  ;;  %v14230_v19 = vpop.xlane.xlu1 %5257  ;;  %v16482_v40 = vld [vmem:[#allocation47_spill] sm:$0xff]  ;;  %8191 = vmatpush1.bf16.msra.mxu1 %v9666_v38 }
 0x878   :  { %v14225_v3 = vpop.xlane.xlu0 %3257  ;;  %16481 = vst [vmem:[#allocation65_spill] sm:$0xff] %v14230_v19  ;;  %v3221_v14 = vand.u32 65535, %v16482_v40  ;;  %v16486_v40 = vld [vmem:[#allocation143_spill] sm:$0xff]  ;;  %v4051_v48 = vsel %vm4050_vm15, %v4046_v37, inf  ;;  %8192 = vmatprep.subr.bf16.mxu1 %v9671_v18  ;;  %v16490_v37 = vld [vmem:[#allocation144_spill] sm:$0xff] }
 0x879   :  { %16478 = vst [vmem:[#allocation116_spill] sm:$0xff] %v14225_v3  ;;  %v9672_v38 = vld [vmem:[#allocation7 + $0xc0] ss:$8 sps:$4 sm:$0xff]   ;;  %vm3259_vm7 = vcmp.eq.f32.partialorder %v13628_v10, %v14225_v3 }
 0x87a   :  { %4004 = vmin.xlane.f32.xlu1 %v4003_v42  ;;  %v3223_v32 = vcvt.s32.f32 %v3221_v14  ;;  %v9674_v42 = vld [vmem:[#allocation7 + $0xc4] ss:$8 sps:$4 sm:$0xff]  }
 0x87b   :  { %3133 = vmin.xlane.f32.xlu0 %v3132_v9  ;;  %v14240_v13 = vpop.xlane.xlu1 %5281  ;;  %v4140_v9 = vand.u32 65535, %v16486_v40  ;;  %v3109_v40 = vand.u32 65535, %v16490_v37  ;;  %8193 = vmatpush1.bf16.msra.mxu1 %v9669_v36  ;;  %v9680_v36 = vld [vmem:[#allocation7 + $0xe4] ss:$8 sps:$4 sm:$0xff]  }
 0x87c   :  { %v14235_v50 = vpop.xlane.xlu0 %4176  ;;  %16485 = vst [vmem:[#allocation118_spill] sm:$0xff] %v14240_v13  ;;  %v3228_v23 = vsel %vm3227_vm1, %v3223_v32, inf  ;;  %8194 = vmatprep.subr.bf16.mxu1 %v9674_v42 }
 0x87d   :  { %16483 = vst [vmem:[#allocation19_spill] sm:$0xff] %v14235_v50  ;;  %v4142_v1 = vcvt.s32.f32 %v4140_v9  ;;  %v3111_v28 = vcvt.s32.f32 %v3109_v40  ;;  %v9678_v40 = vld [vmem:[#allocation7 + $0xe0] ss:$8 sps:$4 sm:$0xff]   ;;  %vm4178_vm8 = vcmp.eq.f32.partialorder %v13647_v24, %v14235_v50 }
 0x87e   :  { %3229 = vmin.xlane.f32.xlu1 %v3228_v23  ;;  %v9677_v23 = vld [vmem:[#allocation7 + $0xd4] ss:$8 sps:$4 sm:$0xff]  }
 0x87f   :  { %4052 = vmin.xlane.f32.xlu0 %v4051_v48  ;;  %v14249_v14 = vpop.xlane.xlu1 %5284  ;;  %v4195_v48 = vsel %vm4194_vm2, %v4190_v15, inf  ;;  %v4147_v41 = vsel %vm4146_vm4, %v4142_v1, inf  ;;  %v3116_v13 = vsel %vm3115_vm5, %v3111_v28, inf  ;;  %8195 = vmatpush1.bf16.msra.mxu1 %v9672_v38  ;;  %v9675_v15 = vld [vmem:[#allocation7 + $0xd0] ss:$8 sps:$4 sm:$0xff]  }
 0x880   :  { %v14245_v5 = vpop.xlane.xlu0 %4064  ;;  %16489 = vst [vmem:[#allocation39_spill] sm:$0xff] %v14249_v14  ;;  %v16494_v14 = vld [vmem:[#allocation51_spill] sm:$0xff]  ;;  %8196 = vmatprep.subr.bf16.mxu1 %v9677_v23  ;;  %v4172_v23 = vand.u32 65535, %v13614_v16  ;;  %v4883_v16 = vand.u32 65535, %v13758_v7 }
 0x881   :  { %16487 = vst [vmem:[#allocation63_spill] sm:$0xff] %v14245_v5  ;;  %v4028_v9 = vand.u32 65535, %v16494_v14  ;;  %vm4066_vm9 = vcmp.eq.f32.partialorder %v13667_v33, %v14245_v5 }
 0x882   :  { %4148 = vmin.xlane.f32.xlu1 %v4147_v41  ;;  %v4174_v10 = vcvt.s32.f32 %v4172_v23 }
 0x883   :  { %4196 = vmin.xlane.f32.xlu0 %v4195_v48  ;;  %v14256_v18 = vpop.xlane.xlu1 %5287  ;;  %v4030_v42 = vcvt.s32.f32 %v4028_v9  ;;  %v16497_v48 = vld [vmem:[#allocation86_spill] sm:$0xff]  ;;  %8197 = vmatpush1.bf16.msra.mxu1 %v9675_v15  ;;  %v9681_v9 = vld [vmem:[#allocation7 + $0xf0] ss:$8 sps:$4 sm:$0xff]   ;;  %v9686_v15 = vld [vmem:[#allocation7 + $0x104] ss:$8 sps:$4 sm:$0xff]  }
 0x884   :  { %v14252_v32 = vpop.xlane.xlu0 %5254  ;;  %16493 = vst [vmem:[#allocation119_spill] sm:$0xff] %v14256_v18  ;;  %v3253_v41 = vand.u32 65535, %v16497_v48  ;;  %8198 = vmatprep.subr.bf16.mxu1 %v9680_v36  ;;  %v4060_v36 = vand.u32 65535, %v13634_v59 }
 0x885   :  { %16491 = vst [vmem:[#allocation125_spill] sm:$0xff] %v14252_v32  ;;  %v4035_v53 = vsel %vm4034_vm6, %v4030_v42, inf }
 0x886   :  { %3117 = vmin.xlane.f32.xlu1 %v3116_v13  ;;  %v9683_v13 = vld [vmem:[#allocation7 + $0xf4] ss:$8 sps:$4 sm:$0xff]   ;;  %v3255_v47 = vcvt.s32.f32 %v3253_v41  ;;  %v4062_v24 = vcvt.s32.f32 %v4060_v36 }
 0x887   :  { %v14263_v1 = vpop.xlane.xlu1 %5290  ;;  %8199 = vmatpush1.bf16.msra.mxu1 %v9678_v40 }
 0x888   :  { %v14259_v37 = vpop.xlane.xlu0 %5278  ;;  %16496 = vst [vmem:[#allocation141_spill] sm:$0xff] %v14263_v1  ;;  %v3260_v28 = vsel %vm3259_vm7, %v3255_v47, inf  ;;  %8200 = vmatprep.subr.bf16.mxu1 %v9683_v13  ;;  %v5011_v13 = vand.u32 65535, %v13782_v52  ;;  %v4915_v47 = vand.u32 65535, %v13831_v6  ;;  %v4067_v23 = vsel %vm4066_vm9, %v4062_v24, inf }
 0x889   :  { %16495 = vst [vmem:[#allocation41_spill] sm:$0xff] %v14259_v37 }
 0x88a   :  { %4036 = vmin.xlane.f32.xlu1 %v4035_v53  ;;  %v4179_v53 = vsel %vm4178_vm8, %v4174_v10, inf  ;;  %v5013_v7 = vcvt.s32.f32 %v5011_v13 }
 0x88b   :  { %v14270_v38 = vpop.xlane.xlu1 %5293  ;;  %8201 = vmatpush1.bf16.msra.mxu1 %v9681_v9  ;;  %v4917_v9 = vcvt.s32.f32 %v4915_v47 }
 0x88c   :  { %v14266_v14 = vpop.xlane.xlu0 %5260  ;;  %16499 = vst [vmem:[#allocation73_spill] sm:$0xff] %v14270_v38  ;;  %8211 = vmatprep.subr.bf16.mxu1 %v9686_v15 }
 0x88d   :  { %16498 = vst [vmem:[#allocation67_spill] sm:$0xff] %v14266_v14 }
 0x88e   :  { %3261 = vmin.xlane.f32.xlu1 %v3260_v28  ;;  %v4885_v28 = vcvt.s32.f32 %v4883_v16 }
 0x88f   :  { %v14277_v42 = vpop.xlane.xlu1 %4887 }
 0x890   :  { %v14273_v48 = vpop.xlane.xlu0 %5263  ;;  %16501 = vst [vmem:[#allocation33_spill] sm:$0xff] %v14277_v42  ;;  %vm4889_vm10 = vcmp.eq.f32.partialorder %v13817_v44, %v14277_v42 }
 0x891   :  { %16500 = vst [vmem:[#allocation37_spill] sm:$0xff] %v14273_v48  ;;  %v4890_v10 = vsel %vm4889_vm10, %v4885_v28, inf }
 0x892   :  { %4180 = vmin.xlane.f32.xlu1 %v4179_v53 }
 0x893   :  { %v14285_v40 = vpop.xlane.xlu1 %5015 }
 0x894   :  { %v14280_v41 = vpop.xlane.xlu0 %5266  ;;  %16503 = vst [vmem:[#allocation35_spill] sm:$0xff] %v14285_v40  ;;  %vm5017_vm15 = vcmp.eq.f32.partialorder %v13852_v27, %v14285_v40 }
 0x895   :  { %16502 = vst [vmem:[#allocation21_spill] sm:$0xff] %v14280_v41  ;;  %v5018_v16 = vsel %vm5017_vm15, %v5013_v7, inf }
 0x896   :  { %4068 = vmin.xlane.f32.xlu1 %v4067_v23 }
 0x897   :  { %v14295_v33 = vpop.xlane.xlu1 %4919 }
 0x898   :  { %v14291_v59 = vpop.xlane.xlu0 %5269  ;;  %16505 = vst [vmem:[#allocation69_spill] sm:$0xff] %v14295_v33  ;;  %vm4921_vm1 = vcmp.eq.f32.partialorder %v13889_v45, %v14295_v33 }
 0x899   :  { %16504 = vst [vmem:[#allocation140_spill] sm:$0xff] %v14291_v59  ;;  %v4922_v24 = vsel %vm4921_vm1, %v4917_v9, inf }
 0x89a   :  { %v14297_v15 = vpop.f32.mrb[72].mxu1  ;;  %4891 = vmin.xlane.f32.xlu1 %v4890_v10 }
 0x89b   :  { %v7576_v44 = vsel %vm7575_vm12, %v14297_v15, 0.0  ;;  %v7604_v27 = vmul.f32 %v14297_v15, %v14297_v15  ;;  %v14307_v36 = vpop.f32.mrb[120].mxu0  ;;  %v14309_v53 = vpop.f32.mrb[73].mxu1 }
 0x89c   :  { %v7577_v13 = vrot.slane %v7576_v44, 4  ;;  %v7590_v47 = vsel %vm7575_vm12, %v14307_v36, 0.0  ;;  %v7606_v23 = vmul.f32 %v14307_v36, %v14307_v36  ;;  %v7583_v45 = vsel %vm7575_vm12, %v14309_v53, 0.0  ;;  %v14317_v28 = vpop.f32.mrb[121].mxu0  ;;  %v7406_v6 = vpop.f32.mrb[74].mxu1 }
 0x89d   :  { %v7608_v52 = vsel %vm7575_vm12, %v7604_v27, 0.0  ;;  %v7591_v59 = vrot.slane %v7590_v47, 4  ;;  %v7584_v38 = vrot.slane %v7583_v45, 4  ;;  %v7605_v7 = vmul.f32 %v14309_v53, %v14309_v53  ;;  %v7570_v9 = vpop.f32.mrb[122].mxu0  ;;  %v7407_v1 = vpop.f32.mrb[75].mxu1 }
 0x89e   :  { %v7578_v41 = vadd.f32 %v7577_v13, %v7576_v44  ;;  %v7609_v48 = vrot.slane %v7608_v52, 4  ;;  %v7622_v18 = vsel %vm7575_vm12, %v7606_v23, 0.0  ;;  %v7597_v19 = vsel %vm7575_vm12, %v14317_v28, 0.0  ;;  %v7571_v14 = vpop.f32.mrb[123].mxu0  ;;  %v14325_v37 = vpop.xlane.xlu0 %4903  ;;  %5019 = vmin.xlane.f32.xlu1 %v5018_v16 }
 0x89f   :  { %v7592_v6 = vadd.f32 %v7591_v59, %v7590_v47  ;;  %v7623_v10 = vrot.slane %v7622_v18, 4  ;;  %v7585_v27 = vadd.f32 %v7584_v38, %v7583_v45  ;;  %v7615_v32 = vsel %vm7575_vm12, %v7605_v7, 0.0  ;;  %v14328_v33 = vpop.xlane.xlu1 %4935 }
 0x8a0   :  { %v7579_v40 = vrot.slane %v7578_v41, 2  ;;  %v7610_v9 = vadd.f32 %v7609_v48, %v7608_v52  ;;  %v7616_v1 = vrot.slane %v7615_v32, 4  ;;  %v7598_v44 = vrot.slane %v7597_v19, 4 }
 0x8a1   :  { %v7593_v13 = vrot.slane %v7592_v6, 2  ;;  %v7624_v23 = vadd.f32 %v7623_v10, %v7622_v18  ;;  %v7586_v42 = vrot.slane %v7585_v27, 2  ;;  %v7607_v14 = vmul.f32 %v14317_v28, %v14317_v28 }
 0x8a2   :  { %v7580_v5 = vadd.f32 %v7579_v40, %v7578_v41  ;;  %v7611_v50 = vrot.slane %v7610_v9, 2  ;;  %v7617_v59 = vadd.f32 %v7616_v1, %v7615_v32  ;;  %v7599_v47 = vadd.f32 %v7598_v44, %v7597_v19  ;;  %v14332_v38 = vpop.xlane.xlu0 %5031  ;;  %4923 = vmin.xlane.f32.xlu1 %v4922_v24 }
 0x8a3   :  { %v7594_v45 = vadd.f32 %v7593_v13, %v7592_v6  ;;  %v7625_v7 = vrot.slane %v7624_v23, 2  ;;  %v7587_v3 = vadd.f32 %v7586_v42, %v7585_v27  ;;  %v7629_v48 = vsel %vm7575_vm12, %v7607_v14, 0.0  ;;  %v14335_v52 = vpop.xlane.xlu1 %5079 }
 0x8a4   :  { %v7581_v16 = vrot.slane %v7580_v5, 1  ;;  %v7612_v58 = vadd.f32 %v7611_v50, %v7610_v9  ;;  %v7618_v18 = vrot.slane %v7617_v59, 2  ;;  %v7600_v10 = vrot.slane %v7599_v47, 2 }
 0x8a5   :  { %v7595_v8 = vrot.slane %v7594_v45, 1  ;;  %v7626_v57 = vadd.f32 %v7625_v7, %v7624_v23  ;;  %v7588_v41 = vrot.slane %v7587_v3, 1  ;;  %v7630_v40 = vrot.slane %v7629_v48, 4 }
 0x8a6   :  { %v7582_v32 = vadd.f32 %v7581_v16, %v7580_v5  ;;  %v7613_v19 = vrot.slane %v7612_v58, 1  ;;  %v7619_v1 = vadd.f32 %v7618_v18, %v7617_v59  ;;  %v7601_v44 = vadd.f32 %v7600_v10, %v7599_v47  ;;  %v14337_v6 = vpop.xlane.xlu0 %5047 }
 0x8a7   :  { %v7596_v42 = vadd.f32 %v7595_v8, %v7594_v45  ;;  %v7627_v27 = vrot.slane %v7626_v57, 1  ;;  %v7589_v13 = vadd.f32 %v7588_v41, %v7587_v3  ;;  %v7631_v14 = vadd.f32 %v7630_v40, %v7629_v48  ;;  %v14339_v22 = vpop.xlane.xlu1 %4967 }
 0x8a8   :  { %v7614_v50 = vadd.f32 %v7613_v19, %v7612_v58  ;;  %v14341_v9 = vmul.f32 0.5, %v7582_v32  ;;  %v7620_v24 = vrot.slane %v7619_v1, 1  ;;  %v7602_v34 = vrot.slane %v7601_v44, 1 }
 0x8a9   :  { %v7628_v23 = vadd.f32 %v7627_v27, %v7626_v57  ;;  %v14343_v7 = vmul.f32 0.5, %v7596_v42  ;;  %v14345_v5 = vmul.f32 0.5, %v7589_v13  ;;  %v7632_v59 = vrot.slane %v7631_v14, 2 }
 0x8aa   :  { %v7640_v47 = vmul.f32 0.5, %v7614_v50  ;;  %v7644_v8 = vmul.f32 %v14341_v9, %v14341_v9  ;;  %v7621_v45 = vadd.f32 %v7620_v24, %v7619_v1  ;;  %v7603_v3 = vadd.f32 %v7602_v34, %v7601_v44  ;;  %v14349_v48 = vpop.xlane.xlu0 %5063 }
 0x8ab   :  { %v7642_v16 = vmul.f32 0.5, %v7628_v23  ;;  %v7646_v58 = vmul.f32 %v14343_v7, %v14343_v7  ;;  %v7645_v57 = vmul.f32 %v14345_v5, %v14345_v5  ;;  %v7633_v18 = vadd.f32 %v7632_v59, %v7631_v14  ;;  %v14355_v10 = vpop.xlane.xlu1 %5111 }
 0x8ac   :  { %v7648_v41 = vsub.f32 %v7640_v47, %v7644_v8  ;;  %v7641_v40 = vmul.f32 0.5, %v7621_v45  ;;  %v14357_v32 = vmul.f32 0.5, %v7603_v3  ;;  %v16506_v34 = vand.u32 65535, %v13855_v62 }
 0x8ad   :  { %v7650_v19 = vsub.f32 %v7642_v16, %v7646_v58  ;;  %v7634_v42 = vrot.slane %v7633_v18, 1  ;;  %vm4905_vm2 = vcmp.eq.f32.partialorder %v13918_v0, %v14325_v37  ;;  %v16507_v13 = vand.u32 65535, %v13891_v43 }
 0x8ae   :  { %v4901_v1 = vcvt.s32.f32 %v16506_v34  ;;  %v7652_v44 = vmax.f32 %v7648_v41, 0.0  ;;  %v7649_v27 = vsub.f32 %v7641_v40, %v7645_v57  ;;  %v5043_v14 = vand.u32 65535, %v13921_v17  ;;  %v14368_v8 = vpop.xlane.xlu0 %4951 }
 0x8af   :  { %v5029_v50 = vcvt.s32.f32 %v16507_v13  ;;  %v7654_v24 = vmax.f32 %v7650_v19, 0.0  ;;  %v7635_v23 = vadd.f32 %v7634_v42, %v7633_v18  ;;  %v7647_v59 = vmul.f32 %v14357_v32, %v14357_v32  ;;  %v14370_v62 = vpop.xlane.xlu1 %4999  ;;  %v16508_v13 = vld [vmem:[#allocation96_spill] sm:$0xff] }
 0x8b0   :  { %v4906_v47 = vsel %vm4905_vm2, %v4901_v1, inf  ;;  %v7656_v45 = vadd.f32 1e-05, %v7652_v44  ;;  %v7653_v3 = vmax.f32 %v7649_v27, 0.0  ;;  %vm5033_vm4 = vcmp.eq.f32.partialorder %v13948_v26, %v14332_v38 }
 0x8b1   :  { %4907 = vmin.xlane.f32.xlu0 %v4906_v47  ;;  %v7643_v43 = vmul.f32 0.5, %v7635_v23  ;;  %v5034_v0 = vsel %vm5033_vm4, %v5029_v50, inf  ;;  %v5059_v17 = vand.u32 65535, %v13955_v51  ;;  %vm5049_vm5 = vcmp.eq.f32.partialorder %v13974_v12, %v14337_v6  ;;  %v16511_v47 = vld [vmem:[#allocation84_spill] sm:$0xff] }
 0x8b2   :  { %9772 = vrsqrt.f32 %v7656_v45  ;;  %v7657_v16 = vadd.f32 1e-05, %v7653_v3  ;;  %v7658_v58 = vadd.f32 1e-05, %v7654_v24  ;;  %v5045_v18 = vcvt.s32.f32 %v5043_v14  ;;  %v14382_v42 = vpop.xlane.xlu0 %5095 }
 0x8b3   :  { %v7651_v57 = vsub.f32 %v7643_v43, %v7647_v59  ;;  %v14377_v41 = vpop.xlane.xlu1 %2102  ;;  %vm5065_vm6 = vcmp.eq.f32.partialorder %v13994_v20, %v14349_v48  ;;  %v4931_v26 = vand.u32 65535, %v13871_v4  ;;  %v5061_v51 = vcvt.s32.f32 %v5059_v17  ;;  %v16512_v43 = vld [vmem:[#allocation129_spill] sm:$0xff] }
 0x8b4   :  { %9774 = vrsqrt.f32 %v7657_v16  ;;  %v5050_v19 = vsel %vm5049_vm5, %v5045_v18, inf  ;;  %v4947_v34 = vand.u32 65535, %v13977_v11  ;;  %vm4937_vm7 = vcmp.eq.f32.partialorder %v13927_v61, %v14328_v33  ;;  %v16509_v61 = vld [vmem:[#allocation95_spill] sm:$0xff] }
 0x8b5   :  { %5035 = vmin.xlane.f32.xlu0 %v5034_v0  ;;  %v7655_v40 = vmax.f32 %v7651_v57, 0.0  ;;  %9776 = vrsqrt.f32 %v7658_v58  ;;  %v5066_v1 = vsel %vm5065_vm6, %v5061_v51, inf  ;;  %vm4953_vm8 = vcmp.eq.f32.partialorder %v14009_v30, %v14368_v8  ;;  %v16510_v30 = vld [vmem:[#allocation112_spill] sm:$0xff] }
 0x8b6   :  { %5067 = vmin.xlane.f32.xlu1 %v5066_v1  ;;  %v5075_v4 = vand.u32 65535, %v13901_v63  ;;  %v4933_v20 = vcvt.s32.f32 %v4931_v26  ;;  %v4949_v27 = vcvt.s32.f32 %v4947_v34  ;;  %v5091_v11 = vand.u32 65535, %v16508_v13  ;;  %v14393_v24 = vpop.xlane.xlu0 %4983  ;;  %v16513_v26 = vld [vmem:[#allocation103_spill] sm:$0xff]  ;;  %v16515_v34 = vld [vmem:[#allocation52_spill] sm:$0xff] }
 0x8b7   :  { %v7659_v12 = vadd.f32 1e-05, %v7655_v40  ;;  %v14385_v44 = vpop.xlane.xlu1 %2118  ;;  %vm5081_vm9 = vcmp.eq.f32.partialorder %v16509_v61, %v14335_v52  ;;  %vm5097_vm10 = vcmp.eq.f32.partialorder %v16510_v30, %v14382_v42  ;;  %v4963_v45 = vand.u32 65535, %v16511_v47  ;;  %v16514_v40 = vld [vmem:[#allocation105_spill] sm:$0xff]  ;;  %v16518_v30 = vld [vmem:[#allocation26_spill] sm:$0xff]  ;;  %v16519_v47 = vld [vmem:[#allocation104_spill] sm:$0xff] }
 0x8b8   :  { %v4938_v50 = vsel %vm4937_vm7, %v4933_v20, inf  ;;  %v4954_v14 = vsel %vm4953_vm8, %v4949_v27, inf  ;;  %v5077_v63 = vcvt.s32.f32 %v5075_v4  ;;  %v5093_v3 = vcvt.s32.f32 %v5091_v11  ;;  %v16516_v20 = vld [vmem:[#allocation98_spill] sm:$0xff] }
 0x8b9   :  { %5051 = vmin.xlane.f32.xlu0 %v5050_v19  ;;  %9778 = vrsqrt.f32 %v7659_v12  ;;  %v4979_v0 = vand.u32 65535, %v16512_v43  ;;  %vm4969_vm15 = vcmp.eq.f32.partialorder %v16513_v26, %v14339_v22  ;;  %vm4985_vm1 = vcmp.eq.f32.partialorder %v16514_v40, %v14393_v24 }
 0x8ba   :  { %4955 = vmin.xlane.f32.xlu1 %v4954_v14  ;;  %v5082_v58 = vsel %vm5081_vm9, %v5077_v63, inf  ;;  %v5098_v57 = vsel %vm5097_vm10, %v5093_v3, inf  ;;  %v4965_v51 = vcvt.s32.f32 %v4963_v45  ;;  %v5107_v12 = vand.u32 65535, %v16515_v34  ;;  %v14410_v1 = vpop.xlane.xlu0 %5127  ;;  %v16520_v3 = vld [vmem:[#allocation136_spill] sm:$0xff] }
 0x8bb   :  { %v14395_v23 = vpop.xlane.xlu1 %2134  ;;  %v4981_v4 = vcvt.s32.f32 %v4979_v0  ;;  %v5123_v27 = vand.u32 65535, %v16516_v20  ;;  %vm5129_vm4 = vcmp.eq.f32.partialorder %v16519_v47, %v14410_v1  ;;  %v4995_v43 = vand.u32 65535, %v16520_v3  ;;  %v16525_v20 = vld [vmem:[#allocation59_spill] sm:$0xff]  ;;  %v16529_v47 = vld [vmem:[#allocation64_spill] sm:$0xff] }
 0x8bc   :  { %v9773_v59 = vpop.eup %9772  ;;  %v4970_v11 = vsel %vm4969_vm15, %v4965_v51, inf  ;;  %v5109_v45 = vcvt.s32.f32 %v5107_v12  ;;  %v16524_v12 = vld [vmem:[#allocation22_spill] sm:$0xff] }
 0x8bd   :  { %4939 = vmin.xlane.f32.xlu0 %v4938_v50  ;;  %v16517_v50 = vld [vmem:[#allocation131_spill] sm:$0xff]  ;;  %v4986_v14 = vsel %vm4985_vm1, %v4981_v4, inf  ;;  %v5125_v0 = vcvt.s32.f32 %v5123_v27  ;;  %vm5001_vm5 = vcmp.eq.f32.partialorder %v16524_v12, %v14370_v62 }
 0x8be   :  { %v9775_v17 = vpop.eup %9774  ;;  %5099 = vmin.xlane.f32.xlu1 %v5098_v57  ;;  %vm5113_vm2 = vcmp.eq.f32.partialorder %v16517_v50, %v14355_v10 }
 0x8bf   :  { %v7668_v16 = vcombine.low %v9773_v59, %v9775_v17  ;;  %v14403_v18 = vpop.xlane.xlu1 %2150  ;;  %v9777_v19 = vpop.eup %9776  ;;  %v16521_v17 = vld [vmem:[#allocation89_spill] sm:$0xff]  ;;  %v5114_v40 = vsel %vm5113_vm2, %v5109_v45, inf  ;;  %v5130_v51 = vsel %vm5129_vm4, %v5125_v0, inf  ;;  %v16531_v0 = vld [vmem:[#allocation15_spill] sm:$0xff] }
 0x8c1   :  { %5083 = vmin.xlane.f32.xlu0 %v5082_v58  ;;  %v7676_v63 = vrot.slane %v7668_v16, %v16518_v30  ;;  %v16522_v58 = vld [vmem:[#allocation108_spill] sm:$0xff] }
 0x8c2   :  { %4987 = vmin.xlane.f32.xlu1 %v4986_v14  ;;  %v5168_v57 = vsel %vm5153_vm11, %v16522_v58, %v16521_v17  ;;  %v7573_v14 = vld [vmem:[%s15270_s17] sm:$0xf]  ;;  %v7705_v17 = vsub.s32 2, %v16531_v0  ;;  %v7709_v58 = vsub.s32 3, %v16531_v0 }
 0x8c3   :  { %v9779_v13 = vpop.eup %9778  ;;  %v14415_v59 = vpop.xlane.xlu1 %2166 }
 0x8c4   :  { %v7669_v61 = vcombine.low %v9777_v19, %v9779_v13  ;;  %v16523_v19 = vld [vmem:[#allocation72_spill] sm:$0xff] }
 0x8c5   :  { %4971 = vmin.xlane.f32.xlu0 %v4970_v11  ;;  %v5185_v16 = vsel %vm5170_vm13, %v5168_v57, %v16523_v19  ;;  %v16527_v13 = vld [vmem:[#allocation40_spill] sm:$0xff]  ;;  %v16528_v11 = vld [vmem:[#allocation114_spill] sm:$0xff]  ;;  %v14447_v57 = vpop.xlane.xlu0 %2294 }
 0x8c6   :  { %v7683_v26 = vrot.slane %v7669_v61, %v16518_v30  ;;  %5131 = vmin.xlane.f32.xlu1 %v5130_v51  ;;  %v14433_v27 = vsel %vm5187_vm14, %v5185_v16, %v16525_v20  ;;  %v5160_v50 = vsel %vm5153_vm11, %v16528_v11, %v16527_v13  ;;  %v4997_v61 = vcvt.s32.f32 %v4995_v43  ;;  %v16533_v43 = vld [vmem:[#allocation53_spill] sm:$0xff]  ;;  %v16537_v11 = vld [vmem:[#allocation60_spill] sm:$0xff] }
 0x8c7   :  { %v14427_v34 = vpop.xlane.xlu1 %2182  ;;  %16526 = vst [vmem:[#allocation135_spill] sm:$0xff] %v14433_v27  ;;  %v5295_v19 = vsel %vm5252_vm0, %v14433_v27, -inf }
 0x8c8   :  { %v7684_v4 = vcombine.low %v7676_v63, %v7683_v26  ;;  %v16530_v63 = vld [vmem:[#allocation110_spill] sm:$0xff]  ;;  %v5002_v26 = vsel %vm5001_vm5, %v4997_v61, inf }
 0x8c9   :  { %5115 = vmin.xlane.f32.xlu0 %v5114_v40  ;;  %v5169_v45 = vsel %vm5153_vm11, %v16530_v63, %v16529_v47  ;;  %v16532_v40 = vld [vmem:[#allocation87_spill] sm:$0xff]  ;;  %v16540_v47 = vld [vmem:[#allocation100_spill] sm:$0xff]  ;;  %v14485_v27 = vpop.xlane.xlu0 %2326 }
 0x8ca   :  { %v7691_v3 = vrot.slane %v7684_v4, %v16518_v30  ;;  %v5177_v51 = vsel %vm5170_vm13, %v5160_v50, %v16532_v40  ;;  %v5186_v16 = vsel %vm5170_vm13, %v5169_v45, %v16533_v43  ;;  %v16535_v4 = vld [vmem:[#allocation102_spill] sm:$0xff]  ;;  %5296 = vmax.xlane.f32.xlu1 %v5295_v19  ;;  %v16541_v45 = vld [vmem:[#allocation81_spill] sm:$0xff] }
 0x8cb   :  { %v14455_v12 = vpop.xlane.xlu1 %2198  ;;  %v14459_v13 = vsel %vm5187_vm14, %v5177_v51, %v16535_v4  ;;  %v14463_v61 = vsel %vm5187_vm14, %v5186_v16, %v16537_v11  ;;  %v16539_v50 = vld [vmem:[#allocation142_spill] sm:$0xff] }
 0x8cc   :  { %16534 = vst [vmem:[#allocation43_spill] sm:$0xff] %v14455_v12  ;;  %v7693_v20 = vmul.f32 %v7691_v3, %v7573_v14  ;;  %16536 = vst [vmem:[#allocation93_spill] sm:$0xff] %v14459_v13  ;;  %v5161_v63 = vsel %vm5153_vm11, %v16540_v47, %v16539_v50  ;;  %v16542_v14 = vld [vmem:[#allocation16_spill] sm:$0xff]  ;;  %v16543_v51 = vld [vmem:[#allocation50_spill] sm:$0xff]  ;;  %v5298_v16 = vsel %vm5252_vm0, %v14463_v61, -inf }
 0x8cd   :  { %5003 = vmin.xlane.f32.xlu0 %v5002_v26  ;;  %16538 = vst [vmem:[#allocation71_spill] sm:$0xff] %v14463_v61  ;;  %v5178_v43 = vsel %vm5170_vm13, %v5161_v63, %v16541_v45  ;;  %v5271_v26 = vsel %vm5252_vm0, %v14459_v13, -inf  ;;  %v16545_v11 = vld [vmem:[#allocation30_spill] sm:$0xff] }
 0x8ce   :  { %v7706_v40 = vrot.slane %v7693_v20, %v7705_v17  ;;  %v7710_v0 = vrot.slane %v7693_v20, %v7709_v58  ;;  %v7698_v3 = vrot.slane %v7693_v20, %v16542_v14  ;;  %v14475_v19 = vsel %vm5187_vm14, %v5178_v43, %v16543_v51  ;;  %5299 = vmax.xlane.f32.xlu1 %v5298_v16 }
 0x8cf   :  { %16544 = vst [vmem:[#allocation31_spill] sm:$0xff] %v14475_v19  ;;  %v14479_v4 = vpop.xlane.xlu1 %2214  ;;  %v7702_v50 = vrot.slane %v7693_v20, %v16545_v11 }
 0x8d0   :  { %v7717_v47 = vmul.f32 %v7706_v40, %v14343_v7  ;;  %v7718_v63 = vmul.f32 %v7710_v0, %v14357_v32  ;;  %v7752_v45 = vmul.f32 %v7710_v0, %v14317_v28  ;;  %v7715_v43 = vmul.f32 %v7698_v3, %v14341_v9 }
 0x8d1   :  { %5272 = vmax.xlane.f32.xlu0 %v5271_v26  ;;  %v7716_v51 = vmul.f32 %v7702_v50, %v14345_v5  ;;  %v7750_v61 = vmul.f32 %v7702_v50, %v14309_v53  ;;  %v7749_v13 = vmul.f32 %v7698_v3, %v14297_v15  ;;  %v7751_v20 = vmul.f32 %v7706_v40, %v14307_v36  ;;  %v7574_v36 = vld [vmem:[%s15271_s18] sm:$0xf] }
 0x8d2   :  { %v7724_v12 = vcombine.low %v7717_v47, %v7718_v63  ;;  %v5274_v7 = vsel %vm5252_vm0, %v14475_v19, -inf }
 0x8d3   :  { %v14494_v32 = vpop.xlane.xlu1 %2230  ;;  %v7723_v28 = vcombine.low %v7715_v43, %v7716_v51 }
 0x8d4   :  { %v7738_v0 = vrot.slane %v7724_v12, %v16518_v30  ;;  %v14497_v26 = vpop.xlane.xlu0 %3037 }
 0x8d5   :  { %5275 = vmax.xlane.f32.xlu0 %v5274_v7  ;;  %v7731_v9 = vrot.slane %v7723_v28, %v16518_v30 }
 0x8d7   :  { %v7739_v5 = vcombine.low %v7731_v9, %v7738_v0  ;;  %v14500_v53 = vpop.xlane.xlu1 %2246 }
 0x8d8   :  { %v14502_v15 = vpop.xlane.xlu0 %3165 }
 0x8d9   :  { %v7746_v40 = vrot.slane %v7739_v5, %v16518_v30 }
 0x8db   :  { %v7748_v3 = vsub.f32 %v7574_v36, %v7746_v40  ;;  %v14508_v16 = vpop.xlane.xlu1 %2262 }
 0x8dc   :  { %16546 = vst [vmem:[#allocation76_spill] sm:$0xff] %v14508_v16  ;;  %v14510_v12 = vpop.xlane.xlu0 %3181  ;;  %v9684_v16 = vld [vmem:[#allocation7 + $0x100] ss:$8 sps:$4 sm:$0xff]  }
 0x8dd   :  { %16547 = vst [vmem:[#allocation32_spill] sm:$0xff] %v14510_v12  ;;  %v7761_v50 = vrot.slane %v7748_v3, %v16545_v11  ;;  %v7757_v47 = vrot.slane %v7748_v3, %v16542_v14  ;;  %v7769_v63 = vrot.slane %v7748_v3, %v7709_v58  ;;  %v7765_v43 = vrot.slane %v7748_v3, %v7705_v17  ;;  %v9689_v14 = vld [vmem:[#allocation7 + $0x114] ss:$8 sps:$4 sm:$0xff]   ;;  %v9690_v3 = vld [vmem:[#allocation7 + $0x120] ss:$8 sps:$4 sm:$0xff]  }
 0x8df   :  { %v7775_v51 = vadd.f32 %v7761_v50, %v7750_v61  ;;  %v7774_v7 = vadd.f32 %v7757_v47, %v7749_v13  ;;  %v14514_v28 = vpop.xlane.xlu1 %2278  ;;  %v7777_v0 = vadd.f32 %v7769_v63, %v7752_v45  ;;  %v14518_v19 = vadd.f32 %v7765_v43, %v7751_v20  ;;  %v9687_v13 = vld [vmem:[#allocation7 + $0x110] ss:$8 sps:$4 sm:$0xff]   ;;  %v9692_v45 = vld [vmem:[#allocation7 + $0x124] ss:$8 sps:$4 sm:$0xff]   ;;  %v9695_v63 = vld [vmem:[#allocation7 + $0x134] ss:$8 sps:$4 sm:$0xff]  }
 0x8e0   :  { %16548 = vst [vmem:[#allocation36_spill] sm:$0xff] %v14514_v28  ;;  %v14516_v9 = vpop.xlane.xlu0 %3972  ;;  %v3152_v47 = vcvt.f32.s32 %v14073_v55 }
 0x8e1   :  { %v7779_v5 = vmax.f32 %v7775_v51, 0.0  ;;  %v7778_v36 = vmax.f32 %v7774_v7, 0.0  ;;  %v7781_v40 = vmax.f32 %v7777_v0, 0.0  ;;  %v9693_v51 = vld [vmem:[#allocation7 + $0x130] ss:$8 sps:$4 sm:$0xff]   ;;  %v2232_v0 = vcvt.f32.s32 %v14494_v32 }
 0x8e3   :  { %v7783_v30 = vpack.c.bf16 %v7779_v5, %v7779_v5  ;;  %v7782_v12 = vpack.c.bf16 %v7778_v36, %v7778_v36  ;;  %v14520_v11 = vpop.xlane.xlu1 %2310  ;;  %v7785_v17 = vpack.c.bf16 %v7781_v40, %v7781_v40  ;;  %v9698_v5 = vld [vmem:[#allocation7 + $0x144] ss:$8 sps:$4 sm:$0xff]  }
 0x8e4   :  { %v14522_v58 = vpop.xlane.xlu0 %4100 }
 0x8e5   :  { %8202 = vmatprep.mubr.bf16.mxu1 %v7783_v30  ;;  %v16552_v30 = vld [vmem:[#allocation120_spill] sm:$0xff] }
 0x8e6   :  { %8203 = vmatmul.mubr.bf16.vlgmr.msra.gmra.mrb[76].mxu1 %v7782_v12  ;;  %v2233_v12 = vcvt.f32.s32 %v16552_v30 }
 0x8e7   :  { %8212 = vmatpush1.bf16.msra.mxu1 %v9684_v16  ;;  %8243 = vmatprep.mubr.bf16.mxu1 %v7785_v17  ;;  %v14524_v61 = vpop.xlane.xlu1 %2342  ;;  %v3024_v16 = vcvt.f32.s32 %v14066_v25  ;;  %v3959_v25 = vcvt.f32.s32 %v14087_v46  ;;  %v9704_v46 = vld [vmem:[#allocation7 + $0x164] ss:$8 sps:$4 sm:$0xff]  }
 0x8e8   :  { %16549 = vst [vmem:[#allocation38_spill] sm:$0xff] %v14524_v61  ;;  %8213 = vmatprep.subr.bf16.mxu1 %v9689_v14  ;;  %v14526_v20 = vpop.xlane.xlu0 %3197  ;;  %v3153_v14 = vshll.u32 %v3152_v47, 16  ;;  %v2234_v17 = vshll.u32 %v2233_v12, 16  ;;  %v9696_v61 = vld [vmem:[#allocation7 + $0x140] ss:$8 sps:$4 sm:$0xff]  }
 0x8e9   :  { %16550 = vst [vmem:[#allocation79_spill] sm:$0xff] %v14526_v20  ;;  %v9699_v12 = vld [vmem:[#allocation7 + $0x150] ss:$8 sps:$4 sm:$0xff]  }
 0x8eb   :  { %8214 = vmatpush1.bf16.msra.mxu1 %v9687_v13  ;;  %v3022_v50 = vpop.xlane.xlu1 %3021 }
 0x8ec   :  { %8215 = vmatprep.subr.bf16.mxu1 %v9692_v45  ;;  %v14529_v43 = vpop.xlane.xlu0 %4116  ;;  %v3023_v55 = vcvt.f32.s32 %v3022_v50  ;;  %v3025_v45 = vshll.u32 %v3024_v16, 16  ;;  %v2104_v50 = vcvt.f32.s32 %v14377_v41  ;;  %v9702_v41 = vld [vmem:[#allocation7 + $0x160] ss:$8 sps:$4 sm:$0xff]  }
 0x8ed   :  { %16551 = vst [vmem:[#allocation139_spill] sm:$0xff] %v14529_v43  ;;  %v9701_v43 = vld [vmem:[#allocation7 + $0x154] ss:$8 sps:$4 sm:$0xff]  }
 0x8ee   :  { %v3026_v28 = vadd.s32 %v3025_v45, %v3023_v55  ;;  %v3056_v45 = vcvt.f32.s32 %v14080_v35 }
 0x8ef   :  { %8216 = vmatpush1.bf16.msra.mxu1 %v9690_v3  ;;  %v3150_v7 = vpop.xlane.xlu1 %3149  ;;  %v2235_v3 = vadd.s32 %v2234_v17, %v2232_v0 }
 0x8f0   :  { %8217 = vmatprep.subr.bf16.mxu1 %v9695_v63  ;;  %v14534_v36 = vpop.xlane.xlu0 %3213  ;;  %v3151_v40 = vcvt.f32.s32 %v3150_v7  ;;  %v16555_v63 = vld [vmem:[#allocation124_spill] sm:$0xff]  ;;  %v3267_v17 = vadd.s32 256, %v3026_v28  ;;  %v3248_v28 = vcvt.f32.s32 %v14173_v31 }
 0x8f1   :  { %16553 = vst [vmem:[#allocation61_spill] sm:$0xff] %v14534_v36  ;;  %v2105_v20 = vcvt.f32.s32 %v16555_v63  ;;  %v16557_v63 = vld [vmem:[#allocation94_spill] sm:$0xff]  ;;  %v9710_v31 = vld [vmem:[#allocation7 + $0x184] ss:$8 sps:$4 sm:$0xff]  }
 0x8f2   :  { %v3154_v13 = vadd.s32 %v3153_v14, %v3151_v40  ;;  %v4087_v14 = vcvt.f32.s32 %v14103_v39  ;;  %v2137_v55 = vcvt.f32.s32 %v16557_v63  ;;  %v9707_v39 = vld [vmem:[#allocation7 + $0x174] ss:$8 sps:$4 sm:$0xff]   ;;  %v9705_v63 = vld [vmem:[#allocation7 + $0x170] ss:$8 sps:$4 sm:$0xff]  }
 0x8f3   :  { %8218 = vmatpush1.bf16.msra.mxu1 %v9693_v51  ;;  %v3054_v30 = vpop.xlane.xlu1 %3053  ;;  %v3960_v51 = vshll.u32 %v3959_v25, 16  ;;  %v2106_v40 = vshll.u32 %v2105_v20, 16  ;;  %v3072_v25 = vcvt.f32.s32 %v14113_v56 }
 0x8f4   :  { %8219 = vmatprep.subr.bf16.mxu1 %v9698_v5  ;;  %v14537_v47 = vpop.xlane.xlu0 %4132  ;;  %v3275_v32 = vadd.s32 256, %v3154_v13 }
 0x8f5   :  { %16554 = vst [vmem:[#allocation68_spill] sm:$0xff] %v14537_v47 }
 0x8f6   :  { %v5212_v7 = vsel %vm5153_vm11, %v2235_v3, %v3275_v32  ;;  %v2107_v3 = vadd.s32 %v2106_v40, %v2104_v50  ;;  %v4088_v32 = vshll.u32 %v4087_v14, 16  ;;  %v2138_v14 = vshll.u32 %v2137_v55, 16  ;;  %v16559_v40 = vld [vmem:[#allocation56_spill] sm:$0xff] }
 0x8f7   :  { %8220 = vmatpush1.bf16.msra.mxu1 %v9696_v61  ;;  %v3957_v16 = vpop.xlane.xlu1 %3956  ;;  %v2153_v56 = vcvt.f32.s32 %v16559_v40 }
 0x8f8   :  { %8221 = vmatprep.subr.bf16.mxu1 %v9701_v43  ;;  %v14543_v0 = vpop.xlane.xlu0 %3101  ;;  %v3958_v5 = vcvt.f32.s32 %v3957_v16  ;;  %v5204_v20 = vsel %vm5153_vm11, %v2107_v3, %v3267_v17 }
 0x8f9   :  { %16556 = vst [vmem:[#allocation34_spill] sm:$0xff] %v14543_v0 }
 0x8fa   :  { %v3961_v13 = vadd.s32 %v3960_v51, %v3958_v5  ;;  %v3055_v51 = vcvt.f32.s32 %v3054_v30  ;;  %v16558_v5 = vld [vmem:[#allocation109_spill] sm:$0xff] }
 0x8fb   :  { %8222 = vmatpush1.bf16.msra.mxu1 %v9699_v12  ;;  %v4085_v61 = vpop.xlane.xlu1 %4084  ;;  %v2329_v35 = vcvt.f32.s32 %v16558_v5  ;;  %v3249_v5 = vshll.u32 %v3248_v28, 16 }
 0x8fc   :  { %8223 = vmatprep.subr.bf16.mxu1 %v9704_v46  ;;  %v14548_v43 = vpop.xlane.xlu0 %4020  ;;  %v4202_v0 = vadd.s32 512, %v3961_v13  ;;  %v4086_v16 = vcvt.f32.s32 %v4085_v61  ;;  %v3057_v46 = vshll.u32 %v3056_v45, 16  ;;  %v3073_v13 = vshll.u32 %v3072_v25, 16 }
 0x8fd   :  { %v3991_v61 = vcvt.f32.s32 %v14123_v49  ;;  %v2330_v55 = vshll.u32 %v2329_v35, 16  ;;  %v3088_v25 = vcvt.f32.s32 %v14133_v60  ;;  %v4023_v49 = vcvt.f32.s32 %v14163_v54 }
 0x8fe   :  { %v14554_v50 = vsel %vm5170_vm13, %v5204_v20, %v4202_v0  ;;  %v4089_v12 = vadd.s32 %v4088_v32, %v4086_v16  ;;  %v2328_v0 = vcvt.f32.s32 %v14485_v27  ;;  %v3058_v20 = vadd.s32 %v3057_v46, %v3055_v51  ;;  %v16560_v16 = vld [vmem:[#allocation132_spill] sm:$0xff]  ;;  %v9713_v46 = vld [vmem:[#allocation7 + $0x194] ss:$8 sps:$4 sm:$0xff]  }
 0x8ff   :  { %8224 = vmatpush1.bf16.msra.mxu1 %v9702_v41  ;;  %v3070_v47 = vpop.xlane.xlu1 %3069  ;;  %v2169_v40 = vcvt.f32.s32 %v16560_v16  ;;  %v2154_v27 = vshll.u32 %v2153_v56, 16  ;;  %v3992_v51 = vshll.u32 %v3991_v61, 16  ;;  %v3136_v35 = vcvt.f32.s32 %v14201_v29  ;;  %v9711_v29 = vld [vmem:[#allocation7 + $0x190] ss:$8 sps:$4 sm:$0xff]  }
 0x900   :  { %8225 = vmatprep.subr.bf16.mxu1 %v9707_v39  ;;  %v3246_v17 = vpop.xlane.xlu0 %3245  ;;  %v4210_v30 = vadd.s32 512, %v4089_v12  ;;  %v3071_v3 = vcvt.f32.s32 %v3070_v47  ;;  %v2136_v39 = vcvt.f32.s32 %v14395_v23  ;;  %v9708_v47 = vld [vmem:[#allocation7 + $0x180] ss:$8 sps:$4 sm:$0xff]   ;;  %v4022_v60 = vcvt.f32.s32 %v14548_v43  ;;  %v16561_v23 = vld [vmem:[#allocation137_spill] sm:$0xff] }
 0x901   :  { %v3247_v32 = vcvt.f32.s32 %v3246_v17  ;;  %v3089_v56 = vshll.u32 %v3088_v25, 16  ;;  %v4024_v61 = vshll.u32 %v4023_v49, 16  ;;  %v2216_v43 = vcvt.f32.s32 %v14479_v4 }
 0x902   :  { %v14561_v45 = vsel %vm5170_vm13, %v5212_v7, %v4210_v30  ;;  %v3074_v41 = vadd.s32 %v3073_v13, %v3071_v3  ;;  %v2331_v13 = vadd.s32 %v2330_v55, %v2328_v0  ;;  %v3269_v30 = vadd.s32 256, %v3058_v20  ;;  %v9716_v20 = vld [vmem:[#allocation7 + $0x1a4] ss:$8 sps:$4 sm:$0xff]  }
 0x903   :  { %8226 = vmatpush1.bf16.msra.mxu1 %v9705_v63  ;;  %v3250_v28 = vadd.s32 %v3249_v5, %v3247_v32  ;;  %v3989_v12 = vpop.xlane.xlu1 %3988  ;;  %v2170_v3 = vshll.u32 %v2169_v40, 16  ;;  %v2217_v63 = vcvt.f32.s32 %v16561_v23  ;;  %v4007_v5 = vcvt.f32.s32 %v14143_v2 }
 0x904   :  { %8227 = vmatprep.subr.bf16.mxu1 %v9710_v31  ;;  %v14567_v17 = vpop.xlane.xlu0 %4164  ;;  %v3990_v7 = vcvt.f32.s32 %v3989_v12  ;;  %v2139_v16 = vadd.s32 %v2138_v14, %v2136_v39  ;;  %v2168_v0 = vcvt.f32.s32 %v14415_v59  ;;  %v3137_v2 = vshll.u32 %v3136_v35, 16 }
 0x905   :  { %v3281_v54 = vadd.s32 256, %v3250_v28  ;;  %v4025_v49 = vadd.s32 %v4024_v61, %v4022_v60  ;;  %v2218_v39 = vshll.u32 %v2217_v63, 16  ;;  %v3232_v59 = vcvt.f32.s32 %v14187_v21  ;;  %v9719_v60 = vld [vmem:[#allocation7 + $0x1b4] ss:$8 sps:$4 sm:$0xff]  }
 0x906   :  { %v3993_v32 = vadd.s32 %v3992_v51, %v3990_v7  ;;  %v5206_v25 = vsel %vm5153_vm11, %v2139_v16, %v3269_v30  ;;  %v16563_v7 = vld [vmem:[#allocation29_spill] sm:$0xff]  ;;  %v2171_v23 = vadd.s32 %v2170_v3, %v2168_v0  ;;  %v4166_v61 = vcvt.f32.s32 %v14567_v17  ;;  %v9722_v17 = vld [vmem:[#allocation7 + $0x1c4] ss:$8 sps:$4 sm:$0xff]  }
 0x907   :  { %8228 = vmatpush1.bf16.msra.mxu1 %v9708_v47  ;;  %v3086_v31 = vpop.xlane.xlu1 %3085  ;;  %v14573_v36 = vsel %vm5153_vm11, %v2331_v13, %v3281_v54  ;;  %v4008_v47 = vshll.u32 %v4007_v5, 16  ;;  %v4167_v4 = vcvt.f32.s32 %v16563_v7  ;;  %v9714_v13 = vld [vmem:[#allocation7 + $0x1a0] ss:$8 sps:$4 sm:$0xff]   ;;  %v2219_v30 = vadd.s32 %v2218_v39, %v2216_v43  ;;  %v16564_v21 = vld [vmem:[#allocation113_spill] sm:$0xff] }
 0x908   :  { %16562 = vst [vmem:[#allocation77_spill] sm:$0xff] %v14573_v36  ;;  %8229 = vmatprep.subr.bf16.mxu1 %v9713_v46  ;;  %v3134_v55 = vpop.xlane.xlu0 %3133  ;;  %v4204_v40 = vadd.s32 512, %v3993_v32  ;;  %v3087_v28 = vcvt.f32.s32 %v3086_v31  ;;  %v2152_v46 = vcvt.f32.s32 %v14403_v18  ;;  %v4206_v32 = vadd.s32 512, %v4025_v49  ;;  %v16592_v36 = vld [vmem:[#allocation17_spill] sm:$0xff] }
 0x909   :  { %v3135_v14 = vcvt.f32.s32 %v3134_v55  ;;  %v2313_v31 = vcvt.f32.s32 %v16564_v21 }
 0x90a   :  { %v14579_v12 = vsel %vm5170_vm13, %v5206_v25, %v4204_v40  ;;  %v3090_v51 = vadd.s32 %v3089_v56, %v3087_v28  ;;  %v3270_v56 = vadd.s32 256, %v3074_v41  ;;  %v2155_v40 = vadd.s32 %v2154_v27, %v2152_v46  ;;  %v9717_v28 = vld [vmem:[#allocation7 + $0x1b0] ss:$8 sps:$4 sm:$0xff]   ;;  %v16569_v46 = vld [vmem:[#allocation54_spill] sm:$0xff] }
 0x90b   :  { %8230 = vmatpush1.bf16.msra.mxu1 %v9711_v29  ;;  %v3138_v54 = vadd.s32 %v3137_v2, %v3135_v14  ;;  %v4005_v35 = vpop.xlane.xlu1 %4004  ;;  %v4168_v29 = vshll.u32 %v4167_v4, 16  ;;  %v2312_v41 = vcvt.f32.s32 %v14520_v11  ;;  %v2314_v27 = vshll.u32 %v2313_v31, 16  ;;  %v16575_v31 = vld [vmem:[#allocation127_spill] sm:$0xff] }
 0x90c   :  { %8231 = vmatprep.subr.bf16.mxu1 %v9716_v20  ;;  %v3271_v63 = vadd.s32 256, %v3090_v51  ;;  %v4006_v5 = vcvt.f32.s32 %v4005_v35  ;;  %v3233_v20 = vshll.u32 %v3232_v59, 16  ;;  %v5207_v14 = vsel %vm5153_vm11, %v2155_v40, %v3270_v56  ;;  %v9720_v51 = vld [vmem:[#allocation7 + $0x1c0] ss:$8 sps:$4 sm:$0xff]   ;;  %v9725_v59 = vld [vmem:[#allocation7 + $0x1d4] ss:$8 sps:$4 sm:$0xff]  }
 0x90d   :  { %v3274_v16 = vadd.s32 256, %v3138_v54  ;;  %v4169_v49 = vadd.s32 %v4168_v29, %v4166_v61  ;;  %v2315_v4 = vadd.s32 %v2314_v27, %v2312_v41  ;;  %v16570_v54 = vld [vmem:[#allocation138_spill] sm:$0xff] }
 0x90e   :  { %v5208_v55 = vsel %vm5153_vm11, %v2171_v23, %v3271_v63  ;;  %v4009_v18 = vadd.s32 %v4008_v47, %v4006_v5  ;;  %v2297_v35 = vcvt.f32.s32 %v16570_v54  ;;  %v16571_v23 = vld [vmem:[#allocation107_spill] sm:$0xff] }
 0x90f   :  { %8232 = vmatpush1.bf16.msra.mxu1 %v9714_v13  ;;  %v3230_v3 = vpop.xlane.xlu1 %3229  ;;  %v14588_v0 = vsel %vm5170_vm13, %v5208_v55, %v4206_v32  ;;  %v14591_v43 = vsel %vm5153_vm11, %v2219_v30, %v3274_v16  ;;  %v2121_v13 = vcvt.f32.s32 %v16569_v46  ;;  %v2185_v30 = vcvt.f32.s32 %v16571_v23  ;;  %v16572_v63 = vld [vmem:[#allocation99_spill] sm:$0xff]  ;;  %v16573_v32 = vld [vmem:[#allocation122_spill] sm:$0xff] }
 0x910   :  { %16565 = vst [vmem:[#allocation83_spill] sm:$0xff] %v14588_v0  ;;  %16566 = vst [vmem:[#allocation75_spill] sm:$0xff] %v14591_v43  ;;  %8233 = vmatprep.subr.bf16.mxu1 %v9719_v60  ;;  %v4205_v2 = vadd.s32 512, %v4009_v18  ;;  %v3231_v25 = vcvt.f32.s32 %v3230_v3  ;;  %v4215_v60 = vadd.s32 512, %v4169_v49  ;;  %v2201_v5 = vcvt.f32.s32 %v16572_v63  ;;  %v16574_v16 = vld [vmem:[#allocation123_spill] sm:$0xff]  ;;  %v16591_v43 = vld [vmem:[#allocation18_spill] sm:$0xff] }
 0x911   :  { %v2249_v61 = vcvt.f32.s32 %v16573_v32  ;;  %v2265_v21 = vcvt.f32.s32 %v16574_v16  ;;  %v2281_v55 = vcvt.f32.s32 %v16575_v31  ;;  %v9723_v18 = vld [vmem:[#allocation7 + $0x1d0] ss:$8 sps:$4 sm:$0xff]   ;;  %v14614_v41 = vshll.u32 %v2121_v13, 16  ;;  %v16581_v13 = vld [vmem:[#allocation23_spill] sm:$0xff] }
 0x912   :  { %v14596_v39 = vsel %vm5170_vm13, %v5207_v14, %v4205_v2  ;;  %v3234_v47 = vadd.s32 %v3233_v20, %v3231_v25  ;;  %v9728_v20 = vld [vmem:[#allocation7 + $0x1e4] ss:$8 sps:$4 sm:$0xff]   ;;  %v14618_v2 = vshll.u32 %v2185_v30, 16  ;;  %v16578_v25 = vld [vmem:[#allocation133_spill] sm:$0xff]  ;;  %v14621_v14 = vshll.u32 %v2201_v5, 16 }
 0x913   :  { %16567 = vst [vmem:[#allocation85_spill] sm:$0xff] %v14596_v39  ;;  %8234 = vmatpush1.bf16.msra.mxu1 %v9717_v28  ;;  %v14598_v7 = vpop.xlane.xlu1 %4148  ;;  %v16577_v28 = vld [vmem:[#allocation130_spill] sm:$0xff]  ;;  %v3040_v49 = vcvt.f32.s32 %v16578_v25  ;;  %v14623_v27 = vshll.u32 %v2249_v61, 16  ;;  %v14627_v46 = vshll.u32 %v2265_v21, 16  ;;  %v3975_v54 = vcvt.f32.s32 %v16581_v13  ;;  %v16585_v5 = vld [vmem:[#allocation128_spill] sm:$0xff]  ;;  %v16587_v16 = vld [vmem:[#allocation111_spill] sm:$0xff] }
 0x914   :  { %16568 = vst [vmem:[#allocation80_spill] sm:$0xff] %v14598_v7  ;;  %8235 = vmatprep.subr.bf16.mxu1 %v9722_v17  ;;  %v3280_v11 = vadd.s32 256, %v3234_v47  ;;  %v2345_v3 = vcvt.f32.s32 %v16577_v28  ;;  %v14616_v17 = vshll.u32 %v2297_v35, 16  ;;  %v16579_v47 = vld [vmem:[#allocation121_spill] sm:$0xff]  ;;  %v16582_v35 = vld [vmem:[#allocation134_spill] sm:$0xff]  ;;  %v3200_v32 = vcvt.f32.s32 %v16585_v5  ;;  %v16586_v61 = vld [vmem:[#allocation24_spill] sm:$0xff] }
 0x915   :  { %v4103_v23 = vcvt.f32.s32 %v16582_v35  ;;  %v9726_v30 = vld [vmem:[#allocation7 + $0x1e0] ss:$8 sps:$4 sm:$0xff]   ;;  %v3104_v31 = vcvt.f32.s32 %v16587_v16  ;;  %v9731_v21 = vld [vmem:[#allocation7 + $0x1f4] ss:$8 sps:$4 sm:$0xff]   ;;  %v3120_v5 = vcvt.f32.s32 %v16591_v43 }
 0x916   :  { %v5217_v56 = vsel %vm5153_vm11, %v2315_v4, %v3280_v11  ;;  %v16580_v4 = vld [vmem:[#allocation126_spill] sm:$0xff]  ;;  %v14635_v63 = vshll.u32 %v2345_v3, 16  ;;  %v16588_v28 = vld [vmem:[#allocation27_spill] sm:$0xff]  ;;  %v16594_v0 = vld [vmem:[#allocation117_spill] sm:$0xff] }
 0x917   :  { %8236 = vmatpush1.bf16.msra.mxu1 %v9720_v51  ;;  %v14608_v29 = vpop.xlane.xlu1 %3117  ;;  %v14611_v40 = vsel %vm5170_vm13, %v5217_v56, %v4215_v60  ;;  %v3168_v51 = vcvt.f32.s32 %v16579_v47  ;;  %v3184_v11 = vcvt.f32.s32 %v16580_v4  ;;  %v4119_v56 = vcvt.f32.s32 %v16586_v61  ;;  %v16589_v47 = vld [vmem:[#allocation25_spill] sm:$0xff] }
 0x918   :  { %16576 = vst [vmem:[#allocation46_spill] sm:$0xff] %v14611_v40  ;;  %8237 = vmatprep.subr.bf16.mxu1 %v9725_v59  ;;  %v14629_v59 = vshll.u32 %v2281_v55, 16  ;;  %16584 = vst [vmem:[#allocation66_spill] sm:$0xff] %v14635_v63  ;;  %v14640_v55 = vshll.u32 %v3040_v49, 16  ;;  %v3216_v25 = vcvt.f32.s32 %v16588_v28  ;;  %v4135_v4 = vcvt.f32.s32 %v16589_v47  ;;  %v16593_v49 = vld [vmem:[#allocation20_spill] sm:$0xff]  ;;  %v16600_v63 = vld [vmem:[#allocation63_spill] sm:$0xff] }
 0x919   :  { %v14645_v35 = vshll.u32 %v3168_v51, 16  ;;  %v14647_v3 = vshll.u32 %v3184_v11, 16  ;;  %v4055_v61 = vcvt.f32.s32 %v16592_v36  ;;  %v14651_v40 = vshll.u32 %v3975_v54, 16  ;;  %v9729_v47 = vld [vmem:[#allocation7 + $0x1f0] ss:$8 sps:$4 sm:$0xff]  }
 0x91a   :  { %v4039_v16 = vcvt.f32.s32 %v16593_v49  ;;  %v4199_v28 = vcvt.f32.s32 %v16594_v0  ;;  %v14659_v51 = vshll.u32 %v3200_v32, 16  ;;  %v14661_v11 = vshll.u32 %v4119_v56, 16  ;;  %v16597_v0 = vld [vmem:[#allocation116_spill] sm:$0xff]  ;;  %v16599_v32 = vld [vmem:[#allocation19_spill] sm:$0xff] }
 0x91b   :  { %8238 = vmatpush1.bf16.msra.mxu1 %v9723_v18  ;;  %v14633_v60 = vpop.xlane.xlu1 %4036  ;;  %v16590_v18 = vld [vmem:[#allocation28_spill] sm:$0xff]  ;;  %v7780_v36 = vmax.f32 %v14518_v19, 0.0  ;;  %v14666_v43 = vshll.u32 %v3216_v25, 16  ;;  %v14668_v54 = vshll.u32 %v4135_v4, 16  ;;  %v14673_v49 = vshll.u32 %v3120_v5, 16  ;;  %v16601_v19 = vld [vmem:[#allocation33_spill] sm:$0xff] }
 0x91c   :  { %16583 = vst [vmem:[#allocation70_spill] sm:$0xff] %v14633_v60  ;;  %8239 = vmatprep.subr.bf16.mxu1 %v9728_v20  ;;  %v4151_v13 = vcvt.f32.s32 %v16590_v18  ;;  %v14653_v20 = vshll.u32 %v4103_v23, 16  ;;  %v14663_v18 = vshll.u32 %v3104_v31, 16  ;;  %v4183_v56 = vcvt.f32.s32 %v16599_v32  ;;  %v16602_v4 = vld [vmem:[#allocation35_spill] sm:$0xff] }
 0x91d   :  { %v4071_v31 = vcvt.f32.s32 %v16600_v63  ;;  %v14679_v60 = vshll.u32 %v4039_v16, 16  ;;  %v4894_v25 = vcvt.f32.s32 %v16601_v19  ;;  %v5022_v7 = vcvt.f32.s32 %v16602_v4 }
 0x91e   :  { %v14670_v23 = vshll.u32 %v4151_v13, 16  ;;  %v4910_v5 = vcvt.f32.s32 %v14325_v37  ;;  %v7784_v32 = vpack.c.bf16 %v7780_v36, %v7780_v36  ;;  %v5054_v63 = vcvt.f32.s32 %v14337_v6 }
 0x91f   :  { %8240 = vmatpush1.bf16.msra.mxu1 %v9726_v30  ;;  %v14657_v39 = vpop.xlane.xlu1 %3261  ;;  %v3264_v30 = vcvt.f32.s32 %v16597_v0  ;;  %v16603_v0 = vld [vmem:[#allocation69_spill] sm:$0xff]  ;;  %v4942_v16 = vcvt.f32.s32 %v14328_v33  ;;  %v14695_v19 = vshll.u32 %v4183_v56, 16  ;;  %v5086_v4 = vcvt.f32.s32 %v14335_v52 }
 0x920   :  { %16595 = vst [vmem:[#allocation90_spill] sm:$0xff] %v14657_v39  ;;  %8241 = vmatprep.subr.bf16.mxu1 %v9731_v21  ;;  %16596 = vst [vmem:[#allocation145_spill] sm:$0xff] %v14670_v23  ;;  %v14675_v39 = vshll.u32 %v4055_v61, 16  ;;  %v14681_v21 = vshll.u32 %v4199_v28, 16  ;;  %v5038_v61 = vcvt.f32.s32 %v14332_v38  ;;  %v4926_v23 = vcvt.f32.s32 %v16603_v0 }
 0x921   :  { %v5070_v28 = vcvt.f32.s32 %v14349_v48  ;;  %v4958_v37 = vcvt.f32.s32 %v14368_v8  ;;  %v4895_v38 = vshll.u32 %v4894_v25, 16  ;;  %v5023_v0 = vshll.u32 %v5022_v7, 16  ;;  %v16607_v7 = vld [vmem:[#allocation125_spill] sm:$0xff] }
 0x922   :  { %16598 = vst [vmem:[#allocation74_spill] sm:$0xff] %v14675_v39  ;;  %v14690_v39 = vshll.u32 %v3264_v30, 16  ;;  %v4974_v36 = vcvt.f32.s32 %v14339_v22  ;;  %v3039_v30 = vcvt.f32.s32 %v14497_v26  ;;  %v14705_v33 = vshll.u32 %v4910_v5, 16  ;;  %v16608_v26 = vld [vmem:[#allocation82_spill] sm:$0xff] }
 0x923   :  { %8242 = vmatpush1.bf16.msra.mxu1 %v9729_v47  ;;  %v14685_v13 = vpop.xlane.xlu1 %4180  ;;  %v14697_v47 = vshll.u32 %v4071_v31, 16  ;;  %v14707_v48 = vshll.u32 %v5038_v61, 16  ;;  %v14709_v56 = vshll.u32 %v4926_v23, 16  ;;  %v5102_v31 = vcvt.f32.s32 %v14382_v42 }
 0x924   :  { %v14712_v52 = vshll.u32 %v5054_v63, 16  ;;  %v14714_v8 = vshll.u32 %v4942_v16, 16  ;;  %v14716_v25 = vshll.u32 %v5070_v28, 16  ;;  %v5118_v22 = vcvt.f32.s32 %v14355_v10 }
 0x925   :  { %16604 = vst [vmem:[#allocation45_spill] sm:$0xff] %v14697_v47  ;;  %vm5301_vm6 = vcmp.eq.f32.partialorder %v16608_v26, %v16607_v7  ;;  %v14723_v5 = vshll.u32 %v4958_v37, 16  ;;  %v4990_v23 = vcvt.f32.s32 %v14393_v24  ;;  %v3167_v61 = vcvt.f32.s32 %v14502_v15 }
 0x926   :  { %8244 = vmatmul.mubr.bf16.vlgmr.msra.gmra.mrb[76].mxu1 %v7784_v32  ;;  %16606 = vst [vmem:[#allocation49_spill] sm:$0xff] %v14714_v8  ;;  %v14721_v32 = vshll.u32 %v5086_v4, 16  ;;  %v14727_v42 = vshll.u32 %v4974_v36, 16  ;;  %v5006_v63 = vcvt.f32.s32 %v14370_v62  ;;  %v5134_v16 = vcvt.f32.s32 %v14410_v1  ;;  %v16614_v36 = vld [vmem:[#allocation32_spill] sm:$0xff]  ;;  %v16616_v1 = vld [vmem:[#allocation62_spill] sm:$0xff] }
 0x927   :  { %v14703_v6 = vpop.xlane.xlu1 %4068  ;;  %16610 = vst [vmem:[#allocation78_spill] sm:$0xff] %v14723_v5  ;;  %v3042_v28 = vadd.s32 %v14640_v55, %v3039_v30  ;;  %v14732_v47 = vshll.u32 %v5102_v31, 16  ;;  %v2120_v4 = vcvt.f32.s32 %v14385_v44  ;;  %v2248_v37 = vcvt.f32.s32 %v14500_v53  ;;  %v16618_v30 = vld [vmem:[#allocation43_spill] sm:$0xff] }
 0x928   :  { %16605 = vst [vmem:[#allocation146_spill] sm:$0xff] %v14703_v6  ;;  %16609 = vst [vmem:[#allocation47_spill] sm:$0xff] %v14721_v32  ;;  %v14736_v32 = vshll.u32 %v5118_v22, 16  ;;  %v2296_v24 = vcvt.f32.s32 %v14447_v57  ;;  %v2184_v15 = vcvt.f32.s32 %v14427_v34  ;;  %v3183_v62 = vcvt.f32.s32 %v16614_v36  ;;  %v16619_v57 = vld [vmem:[#allocation76_spill] sm:$0xff] }
 0x929   :  { %16611 = vst [vmem:[#allocation143_spill] sm:$0xff] %v14727_v42  ;;  %16612 = vst [vmem:[#allocation91_spill] sm:$0xff] %v14732_v47  ;;  %v16615_v42 = vld [vmem:[#allocation41_spill] sm:$0xff]  ;;  %v14743_v55 = vshll.u32 %v4990_v23, 16  ;;  %v2200_v31 = vcvt.f32.s32 %v16618_v30  ;;  %v3170_v44 = vadd.s32 %v14645_v35, %v3167_v61  ;;  %v14747_v53 = vshll.u32 %v5006_v63, 16  ;;  %v16620_v61 = vld [vmem:[#allocation67_spill] sm:$0xff] }
 0x92a   :  { %16613 = vst [vmem:[#allocation144_spill] sm:$0xff] %v14736_v32  ;;  %vm5309_vm7 = vcmp.eq.f32.partialorder %v16616_v1, %v16615_v42  ;;  %v14749_v22 = vshll.u32 %v5134_v16, 16  ;;  %v2264_v32 = vcvt.f32.s32 %v16619_v57  ;;  %v2123_v36 = vadd.s32 %v14614_v41, %v2120_v4  ;;  %v16621_v63 = vld [vmem:[#allocation92_spill] sm:$0xff]  ;;  %v16624_v30 = vld [vmem:[#allocation139_spill] sm:$0xff] }
 0x92b   :  { %v4892_v10 = vpop.xlane.xlu1 %4891  ;;  %16617 = vst [vmem:[#allocation57_spill] sm:$0xff] %v14743_v55  ;;  %v2251_v5 = vadd.s32 %v14623_v27, %v2248_v37  ;;  %v14755_v55 = vadd.s32 %v14616_v17, %v2296_v24  ;;  %v14758_v35 = vadd.s32 %v14618_v2, %v2184_v15  ;;  %vm5303_vm8 = vcmp.eq.f32.partialorder %v16621_v63, %v16620_v61  ;;  %v16623_v15 = vld [vmem:[#allocation79_spill] sm:$0xff] }
 0x92c   :  { %v4893_v6 = vcvt.f32.s32 %v4892_v10  ;;  %v3268_v10 = vadd.s32 256, %v3042_v28  ;;  %v14765_v16 = vadd.s32 %v14621_v14, %v2200_v31  ;;  %v3276_v41 = vadd.s32 256, %v3170_v44  ;;  %v16625_v44 = vld [vmem:[#allocation61_spill] sm:$0xff] }
 0x92d   :  { %v2267_v2 = vadd.s32 %v14627_v46, %v2264_v32  ;;  %v4102_v28 = vcvt.f32.s32 %v14522_v58  ;;  %v16622_v46 = vld [vmem:[#allocation36_spill] sm:$0xff]  ;;  %v4118_v31 = vcvt.f32.s32 %v16624_v30 }
 0x92e   :  { %v4896_v47 = vadd.s32 %v4895_v38, %v4893_v6  ;;  %v3186_v38 = vadd.s32 %v14647_v3, %v3183_v62  ;;  %v3974_v6 = vcvt.f32.s32 %v14516_v9  ;;  %v5205_v17 = vsel %vm5153_vm11, %v2123_v36, %v3268_v10  ;;  %v14772_v3 = vpop.xlane.xlu0 %4052 }
 0x92f   :  { %v5020_v34 = vpop.xlane.xlu1 %5019  ;;  %v5213_v14 = vsel %vm5153_vm11, %v2251_v5, %v3276_v41  ;;  %v2280_v32 = vcvt.f32.s32 %v16622_v46  ;;  %v3199_v62 = vcvt.f32.s32 %v16623_v15  ;;  %v4105_v5 = vadd.s32 %v14653_v20, %v4102_v28 }
 0x930   :  { %v5137_v8 = vadd.s32 768, %v4896_v47  ;;  %v5021_v23 = vcvt.f32.s32 %v5020_v34  ;;  %v3215_v10 = vcvt.f32.s32 %v16625_v44  ;;  %v16626_v34 = vld [vmem:[#allocation68_spill] sm:$0xff]  ;;  %v4121_v28 = vadd.s32 %v14661_v11, %v4118_v31  ;;  %v16634_v44 = vld [vmem:[#allocation55_spill] sm:$0xff] }
 0x931   :  { %v4134_v36 = vcvt.f32.s32 %v16626_v34  ;;  %v2283_v20 = vadd.s32 %v14629_v59, %v2280_v32  ;;  %v4054_v46 = vcvt.f32.s32 %v14772_v3  ;;  %v16633_v3 = vld [vmem:[#allocation118_spill] sm:$0xff] }
 0x932   :  { %v5024_v27 = vadd.s32 %v5023_v0, %v5021_v23  ;;  %v5236_v47 = vsel %vm5187_vm14, %v14554_v50, %v5137_v8  ;;  %v3277_v50 = vadd.s32 256, %v3186_v38  ;;  %v3977_v8 = vadd.s32 %v14651_v40, %v3974_v6  ;;  %v16627_v23 = vld [vmem:[#allocation34_spill] sm:$0xff]  ;;  %v4197_v41 = vpop.xlane.xlu0 %4196 }
 0x933   :  { %v4924_v9 = vpop.xlane.xlu1 %4923  ;;  %v5317_v4 = vsel %vm5301_vm6, %v5236_v47, 1073741824  ;;  %v3103_v38 = vcvt.f32.s32 %v16627_v23  ;;  %v3202_v47 = vadd.s32 %v14659_v51, %v3199_v62  ;;  %v4137_v51 = vadd.s32 %v14668_v54, %v4134_v36  ;;  %v16636_v23 = vld [vmem:[#allocation74_spill] sm:$0xff] }
 0x934   :  { %v5145_v37 = vadd.s32 768, %v5024_v27  ;;  %v4925_v0 = vcvt.f32.s32 %v4924_v9  ;;  %v14779_v24 = vsel %vm5252_vm0, %v5317_v4, 2147483647  ;;  %v3119_v27 = vcvt.f32.s32 %v14608_v29  ;;  %v16628_v4 = vld [vmem:[#allocation38_spill] sm:$0xff] }
 0x935   :  { %v5335_v58 = vshra.s32 %v14779_v24, 16  ;;  %v4203_v1 = vadd.s32 512, %v3977_v8  ;;  %v4211_v8 = vadd.s32 512, %v4105_v5  ;;  %v3106_v11 = vadd.s32 %v14663_v18, %v3103_v38 }
 0x936   :  { %v4928_v7 = vadd.s32 %v14709_v56, %v4925_v0  ;;  %v5244_v26 = vsel %vm5187_vm14, %v14561_v45, %v5145_v37  ;;  %v5214_v45 = vsel %vm5153_vm11, %v2267_v2, %v3277_v50  ;;  %v2344_v37 = vcvt.f32.s32 %v16628_v4  ;;  %v16629_v0 = vld [vmem:[#allocation65_spill] sm:$0xff]  ;;  %v16630_v50 = vld [vmem:[#allocation42_spill] sm:$0xff] }
 0x937   :  { %v14791_v57 = vcvt.s32.f32 %v5335_v58  ;;  %v5325_v40 = vsel %vm5309_vm7, %v5244_v26, 1073741824  ;;  %v3218_v2 = vadd.s32 %v14666_v43, %v3215_v10  ;;  %vm5302_vm9 = vcmp.eq.f32.partialorder %v16630_v50, %v16629_v0  ;;  %v16631_v43 = vld [vmem:[#allocation80_spill] sm:$0xff] }
 0x938   :  { %v5139_v6 = vadd.s32 768, %v4928_v7  ;;  %v14799_v56 = vsel %vm5252_vm0, %v5325_v40, 2147483647  ;;  %v4150_v32 = vcvt.f32.s32 %v16631_v43  ;;  %v3122_v58 = vadd.s32 %v14673_v49, %v3119_v27  ;;  %v16632_v7 = vld [vmem:[#allocation70_spill] sm:$0xff]  ;;  %v16644_v0 = vld [vmem:[#allocation48_spill] sm:$0xff] }
 0x939   :  { %5338 = vmin.xlane.f32.xlu0 %v14791_v57  ;;  %v5455_v42 = vshra.s32 %v14799_v56, 16  ;;  %v5221_v63 = vsel %vm5170_vm13, %v5205_v17, %v4203_v1  ;;  %v3278_v62 = vadd.s32 256, %v3202_v47  ;;  %v4212_v54 = vadd.s32 512, %v4121_v28  ;;  %v16635_v49 = vld [vmem:[#allocation66_spill] sm:$0xff] }
 0x93a   :  { %v5238_v9 = vsel %vm5187_vm14, %v14579_v12, %v5139_v6  ;;  %v3279_v18 = vadd.s32 256, %v3218_v2  ;;  %v4198_v31 = vcvt.f32.s32 %v4197_v41  ;;  %v4038_v26 = vcvt.f32.s32 %v16632_v7  ;;  %v16637_v6 = vld [vmem:[#allocation145_spill] sm:$0xff] }
 0x93b   :  { %v14812_v59 = vcvt.s32.f32 %v5455_v42  ;;  %v5319_v29 = vsel %vm5303_vm8, %v5238_v9, 1073741824  ;;  %vm5310_vm10 = vcmp.eq.f32.partialorder %v16634_v44, %v16633_v3  ;;  %v14836_v10 = vadd.s32 %v16635_v49, %v2344_v37  ;;  %v16638_v37 = vld [vmem:[#allocation90_spill] sm:$0xff] }
 0x93c   :  { %v14822_v12 = vsel %vm5252_vm0, %v5319_v29, 2147483647  ;;  %v4213_v40 = vadd.s32 512, %v4137_v51  ;;  %v3272_v34 = vadd.s32 256, %v3106_v11  ;;  %v5229_v17 = vsel %vm5170_vm13, %v5213_v14, %v4211_v8  ;;  %v16639_v29 = vld [vmem:[#allocation39_spill] sm:$0xff]  ;;  %v16640_v8 = vld [vmem:[#allocation44_spill] sm:$0xff] }
 0x93d   :  { %5458 = vmin.xlane.f32.xlu0 %v14812_v59  ;;  %v5365_v61 = vshra.s32 %v14822_v12, 16  ;;  %v4057_v38 = vadd.s32 %v16636_v23, %v4054_v46  ;;  %v4153_v41 = vadd.s32 %v16637_v6, %v4150_v32  ;;  %v3273_v27 = vadd.s32 256, %v3122_v58  ;;  %v16641_v51 = vld [vmem:[#allocation119_spill] sm:$0xff]  ;;  %v16642_v11 = vld [vmem:[#allocation58_spill] sm:$0xff] }
 0x93e   :  { %v4908_v15 = vpop.xlane.xlu0 %4907  ;;  %v5215_v1 = vsel %vm5153_vm11, %v2283_v20, %v3278_v62  ;;  %v5230_v47 = vsel %vm5170_vm13, %v5214_v45, %v4212_v54  ;;  %v5216_v4 = vsel %vm5153_vm11, %v14755_v55, %v3279_v18  ;;  %v4041_v14 = vadd.s32 %v14679_v60, %v4038_v26 }
 0x93f   :  { %v4909_v30 = vcvt.f32.s32 %v4908_v15  ;;  %v14831_v5 = vcvt.s32.f32 %v5365_v61  ;;  %v3263_v2 = vcvt.f32.s32 %v16638_v37  ;;  %vm5311_vm15 = vcmp.eq.f32.partialorder %v16640_v8, %v16639_v29 }
 0x940   :  { %vm5312_vm1 = vcmp.eq.f32.partialorder %v16642_v11, %v16641_v51  ;;  %v5231_v20 = vsel %vm5170_vm13, %v5215_v1, %v4213_v40  ;;  %v5209_v45 = vsel %vm5153_vm11, %v14758_v35, %v3272_v34  ;;  %v4214_v43 = vadd.s32 512, %v4153_v41  ;;  %v16648_v1 = vld [vmem:[#allocation88_spill] sm:$0xff] }
 0x941   :  { %v4912_v36 = vadd.s32 %v14705_v33, %v4909_v30  ;;  %5368 = vmin.xlane.f32.xlu0 %v14831_v5  ;;  %v4201_v33 = vadd.s32 %v14681_v21, %v4198_v31  ;;  %v4208_v21 = vadd.s32 512, %v4057_v38  ;;  %v5210_v15 = vsel %vm5153_vm11, %v14765_v16, %v3273_v27  ;;  %v16643_v31 = vld [vmem:[#allocation37_spill] sm:$0xff]  ;;  %v16653_v11 = vld [vmem:[#allocation140_spill] sm:$0xff] }
 0x942   :  { %v5036_v42 = vpop.xlane.xlu0 %5035  ;;  %v3266_v30 = vadd.s32 %v14690_v39, %v3263_v2  ;;  %vm5304_vm2 = vcmp.eq.f32.partialorder %v16644_v0, %v16643_v31  ;;  %v4182_v50 = vcvt.f32.s32 %v14685_v13  ;;  %v5232_v49 = vsel %vm5170_vm13, %v5216_v4, %v4214_v43  ;;  %v16645_v13 = vld [vmem:[#allocation21_spill] sm:$0xff]  ;;  %v16660_v0 = vld [vmem:[#allocation143_spill] sm:$0xff] }
 0x943   :  { %v5138_v28 = vadd.s32 768, %v4912_v36  ;;  %v5037_v9 = vcvt.f32.s32 %v5036_v42  ;;  %v5068_v58 = vpop.xlane.xlu1 %5067  ;;  %v14884_v23 = vsel %vm5170_vm13, %v5210_v15, %v4208_v21  ;;  %v16646_v38 = vld [vmem:[#allocation97_spill] sm:$0xff] }
 0x944   :  { %v5069_v35 = vcvt.f32.s32 %v5068_v58  ;;  %vm5305_vm4 = vcmp.eq.f32.partialorder %v16646_v38, %v16645_v13  ;;  %v3282_v27 = vadd.s32 256, %v3266_v30  ;;  %v16647_v42 = vld [vmem:[#allocation141_spill] sm:$0xff]  ;;  %v16662_v38 = vld [vmem:[#allocation46_spill] sm:$0xff] }
 0x945   :  { %v5040_v46 = vadd.s32 %v14707_v48, %v5037_v9  ;;  %v5237_v55 = vsel %vm5187_vm14, %v5221_v63, %v5138_v28  ;;  %v14867_v48 = vadd.s32 512, %v4201_v33  ;;  %v4207_v63 = vadd.s32 512, %v4041_v14  ;;  %v16649_v9 = vld [vmem:[#allocation49_spill] sm:$0xff] }
 0x946   :  { %v5052_v60 = vpop.xlane.xlu0 %5051  ;;  %v5318_v32 = vsel %vm5302_vm9, %v5237_v55, 1073741824  ;;  %v5072_v7 = vadd.s32 %v14716_v25, %v5069_v35  ;;  %vm5313_vm5 = vcmp.eq.f32.partialorder %v16648_v1, %v16647_v42  ;;  %v4185_v28 = vadd.s32 %v14695_v19, %v4182_v50  ;;  %v16651_v43 = vld [vmem:[#allocation73_spill] sm:$0xff] }
 0x947   :  { %v5146_v61 = vadd.s32 768, %v5040_v46  ;;  %v5053_v62 = vcvt.f32.s32 %v5052_v60  ;;  %v14865_v54 = vsel %vm5252_vm0, %v5318_v32, 2147483647  ;;  %v4956_v36 = vpop.xlane.xlu1 %4955  ;;  %v14892_v41 = vsel %vm5170_vm13, %v5209_v45, %v4207_v63  ;;  %v16650_v45 = vld [vmem:[#allocation78_spill] sm:$0xff]  ;;  %v16656_v63 = vld [vmem:[#allocation91_spill] sm:$0xff] }
 0x948   :  { %v5350_v18 = vshra.s32 %v14865_v54, 16  ;;  %v5148_v6 = vadd.s32 768, %v5072_v7  ;;  %v4957_v44 = vcvt.f32.s32 %v4956_v36  ;;  %v16652_v60 = vld [vmem:[#allocation106_spill] sm:$0xff]  ;;  %v5219_v51 = vsel %vm5153_vm11, %v14836_v10, %v3282_v27 }
 0x949   :  { %v5056_v16 = vadd.s32 %v14712_v52, %v5053_v62  ;;  %v5245_v26 = vsel %vm5187_vm14, %v5229_v17, %v5146_v61  ;;  %vm5314_vm6 = vcmp.eq.f32.partialorder %v16652_v60, %v16651_v43  ;;  %v16654_v61 = vld [vmem:[#allocation115_spill] sm:$0xff]  ;;  %v16658_v7 = vld [vmem:[#allocation146_spill] sm:$0xff]  ;;  %v5235_v31 = vsel %vm5170_vm13, %v5219_v51, %v14867_v48 }
 0x94a   :  { %v4940_v40 = vpop.xlane.xlu0 %4939  ;;  %v14878_v34 = vcvt.s32.f32 %v5350_v18  ;;  %v5326_v39 = vsel %vm5310_vm10, %v5245_v26, 1073741824  ;;  %v5247_v14 = vsel %vm5187_vm14, %v5231_v20, %v5148_v6  ;;  %v4960_v46 = vadd.s32 %v16650_v45, %v4957_v44  ;;  %v16655_v62 = vld [vmem:[#allocation47_spill] sm:$0xff]  ;;  %v16657_v18 = vld [vmem:[#allocation85_spill] sm:$0xff] }
 0x94b   :  { %v5147_v52 = vadd.s32 768, %v5056_v16  ;;  %v4941_v25 = vcvt.f32.s32 %v4940_v40  ;;  %v14889_v17 = vsel %vm5252_vm0, %v5326_v39, 2147483647  ;;  %v5100_v21 = vpop.xlane.xlu1 %5099  ;;  %v5328_v19 = vsel %vm5312_vm1, %v5247_v14, 1073741824 }
 0x94c   :  { %5353 = vmin.xlane.f32.xlu1 %v14878_v34  ;;  %v5470_v3 = vshra.s32 %v14889_v17, 16  ;;  %v5101_v58 = vcvt.f32.s32 %v5100_v21  ;;  %v5141_v15 = vadd.s32 768, %v4960_v46  ;;  %v14919_v8 = vsel %vm5252_vm0, %v5328_v19, 2147483647 }
 0x94d   :  { %v4944_v4 = vadd.s32 %v16649_v9, %v4941_v25  ;;  %v5246_v33 = vsel %vm5187_vm14, %v5230_v47, %v5147_v52  ;;  %vm5306_vm7 = vcmp.eq.f32.partialorder %v16654_v61, %v16653_v11  ;;  %v5500_v16 = vshra.s32 %v14919_v8, 16  ;;  %v16659_v52 = vld [vmem:[#allocation83_spill] sm:$0xff] }
 0x94e   :  { %v5084_v37 = vpop.xlane.xlu0 %5083  ;;  %v14902_v2 = vcvt.s32.f32 %v5470_v3  ;;  %v5327_v55 = vsel %vm5311_vm15, %v5246_v33, 1073741824  ;;  %v5104_v30 = vadd.s32 %v16656_v63, %v5101_v58  ;;  %v4070_v26 = vcvt.f32.s32 %v16658_v7  ;;  %v16663_v58 = vld [vmem:[#allocation45_spill] sm:$0xff] }
 0x94f   :  { %v5140_v47 = vadd.s32 768, %v4944_v4  ;;  %v5085_v32 = vcvt.f32.s32 %v5084_v37  ;;  %v14914_v20 = vsel %vm5252_vm0, %v5327_v55, 2147483647  ;;  %v4988_v36 = vpop.xlane.xlu1 %4987  ;;  %v5240_v25 = vsel %vm5187_vm14, %v16659_v52, %v5141_v15  ;;  %v16661_v37 = vld [vmem:[#allocation57_spill] sm:$0xff] }
 0x950   :  { %5473 = vmin.xlane.f32.xlu1 %v14902_v2  ;;  %v5485_v29 = vshra.s32 %v14914_v20, 16  ;;  %v5150_v3 = vadd.s32 768, %v5104_v30  ;;  %v4989_v44 = vcvt.f32.s32 %v4988_v36  ;;  %v14942_v4 = vcvt.s32.f32 %v5500_v16 }
 0x951   :  { %v5088_v35 = vadd.s32 %v16655_v62, %v5085_v32  ;;  %v5239_v50 = vsel %vm5187_vm14, %v16657_v18, %v5140_v47  ;;  %v5321_v33 = vsel %vm5305_vm4, %v5240_v25, 1073741824  ;;  %v4216_v21 = vadd.s32 512, %v4185_v28  ;;  %v16665_v25 = vld [vmem:[#allocation135_spill] sm:$0xff] }
 0x952   :  { %v4972_v40 = vpop.xlane.xlu0 %4971  ;;  %v14931_v39 = vcvt.s32.f32 %v5485_v29  ;;  %v5320_v10 = vsel %vm5304_vm2, %v5239_v50, 1073741824  ;;  %v4992_v45 = vadd.s32 %v16661_v37, %v4989_v44  ;;  %v14957_v13 = vsel %vm5252_vm0, %v5321_v33, 2147483647 }
 0x953   :  { %v5149_v6 = vadd.s32 768, %v5088_v35  ;;  %v4973_v27 = vcvt.f32.s32 %v4972_v40  ;;  %v14940_v9 = vsel %vm5252_vm0, %v5320_v10, 2147483647  ;;  %v5132_v47 = vpop.xlane.xlu1 %5131  ;;  %v5249_v48 = vsel %vm5187_vm14, %v16662_v38, %v5150_v3  ;;  %v16664_v35 = vld [vmem:[#allocation144_spill] sm:$0xff]  ;;  %v16668_v38 = vld [vmem:[#allocation71_spill] sm:$0xff] }
 0x954   :  { %5488 = vmin.xlane.f32.xlu1 %v14931_v39  ;;  %v5380_v46 = vshra.s32 %v14940_v9, 16  ;;  %v4073_v15 = vadd.s32 %v16663_v58, %v4070_v26  ;;  %v5395_v42 = vshra.s32 %v14957_v13, 16  ;;  %v5330_v1 = vsel %vm5314_vm6, %v5249_v48, 1073741824 }
 0x955   :  { %v4976_v14 = vadd.s32 %v16660_v0, %v4973_v27  ;;  %v5248_v55 = vsel %vm5187_vm14, %v5232_v49, %v5149_v6  ;;  %v5133_v49 = vcvt.f32.s32 %v5132_v47  ;;  %v5143_v30 = vadd.s32 768, %v4992_v45  ;;  %v16666_v6 = vld [vmem:[#allocation77_spill] sm:$0xff] }
 0x956   :  { %v5116_v19 = vpop.xlane.xlu0 %5115  ;;  %v5329_v32 = vsel %vm5313_vm5, %v5248_v55, 1073741824  ;;  %v14962_v62 = vcvt.s32.f32 %v5380_v46  ;;  %v14978_v26 = vcvt.s32.f32 %v5395_v42  ;;  %v14984_v60 = vsel %vm5252_vm0, %v5330_v1, 2147483647 }
 0x957   :  { %v5142_v29 = vadd.s32 768, %v4976_v14  ;;  %v5117_v51 = vcvt.f32.s32 %v5116_v19  ;;  %v14966_v28 = vsel %vm5252_vm0, %v5329_v32, 2147483647  ;;  %v5136_v7 = vadd.s32 %v14749_v22, %v5133_v49  ;;  %v5297_v40 = vpop.xlane.xlu1 %5296 }
 0x958   :  { %5503 = vmin.xlane.f32.xlu1 %v14942_v4  ;;  %5383 = vmin.xlane.f32.xlu0 %v14962_v62  ;;  %v5515_v18 = vshra.s32 %v14966_v28, 16  ;;  %vm5315_vm11 = vcmp.eq.f32.partialorder %v16665_v25, %v5297_v40  ;;  %v5234_v22 = vsel %vm5170_vm13, %v16666_v6, %v4216_v21  ;;  %v5530_v3 = vshra.s32 %v14984_v60, 16  ;;  %v16667_v21 = vld [vmem:[#allocation93_spill] sm:$0xff]  ;;  %v9735_v25 = vld [vmem:[%s15275_s22 + $0x8] sm:$0xff]  }
 0x959   :  { %v5120_v63 = vadd.s32 %v16664_v35, %v5117_v51  ;;  %v5241_v50 = vsel %vm5187_vm14, %v14892_v41, %v5142_v29  ;;  %v5152_v41 = vadd.s32 768, %v5136_v7  ;;  %v5242_v61 = vsel %vm5187_vm14, %v14884_v23, %v5143_v30  ;;  %v16669_v29 = vld [vmem:[#allocation75_spill] sm:$0xff]  ;;  %v9737_v6 = vld [vmem:[%s15275_s22 + $0x10] sm:$0xff]  }
 0x95a   :  { %v5004_v16 = vpop.xlane.xlu0 %5003  ;;  %v5322_v43 = vsel %vm5306_vm7, %v5241_v50, 1073741824  ;;  %v14986_v52 = vcvt.s32.f32 %v5515_v18  ;;  %v4209_v0 = vadd.s32 512, %v4073_v15  ;;  %v15002_v45 = vcvt.s32.f32 %v5530_v3  ;;  %v16670_v35 = vld [vmem:[#allocation31_spill] sm:$0xff]  ;;  %v9739_v3 = vld [vmem:[%s15275_s22 + $0x18] sm:$0xff]  }
 0x95b   :  { %v5151_v36 = vadd.s32 768, %v5120_v63  ;;  %v5005_v10 = vcvt.f32.s32 %v5004_v16  ;;  %v14992_v27 = vsel %vm5252_vm0, %v5322_v43, 2147483647  ;;  %v5251_v46 = vsel %vm5187_vm14, %v5235_v31, %v5152_v41  ;;  %v5300_v55 = vpop.xlane.xlu1 %5299  ;;  %v9732_v43 = vld [vmem:[%s15275_s22 + $0x40] sm:$0xff]   ;;  %v9736_v41 = vld [vmem:[%s15275_s22 + $0x50] sm:$0xff]  }
 0x95c   :  { %5518 = vmin.xlane.f32.xlu1 %v14986_v52  ;;  %5398 = vmin.xlane.f32.xlu0 %v14978_v26  ;;  %v5410_v33 = vshra.s32 %v14992_v27, 16  ;;  %vm5316_vm9 = vcmp.eq.f32.partialorder %v16668_v38, %v5300_v55  ;;  %v5227_v51 = vsel %vm5170_vm13, %v16669_v29, %v4209_v0  ;;  %v9744_v0 = vld [vmem:[%s15275_s22 + $0x70] sm:$0xff]   ;;  %v5349_v29 = vand.u32 65535, %v14865_v54 }
 0x95d   :  { %v5008_v11 = vadd.s32 %v14747_v53, %v5005_v10  ;;  %v5250_v44 = vsel %vm5187_vm14, %v5234_v22, %v5151_v36  ;;  %v5332_v31 = vsel %vm5316_vm9, %v5251_v46, 1073741824  ;;  %v9733_v36 = vld [vmem:[%s15275_s22] sm:$0xff]   ;;  %v9734_v10 = vld [vmem:[%s15275_s22 + $0x48] sm:$0xff]   ;;  %9067 = vmatprep.subr.bf16.mxu0 %v9732_v43  ;;  %v9738_v22 = vld [vmem:[%s15275_s22 + $0x58] sm:$0xff]  }
 0x95e   :  { %v5273_v14 = vpop.xlane.xlu0 %5272  ;;  %v5331_v37 = vsel %vm5315_vm11, %v5250_v44, 1073741824  ;;  %v15009_v19 = vcvt.s32.f32 %v5410_v33  ;;  %v15022_v49 = vsel %vm5252_vm0, %v5332_v31, 2147483647  ;;  %9068 = vmatpush3.bf16.msra.mxu0 %v9733_v36  ;;  %v9742_v44 = vld [vmem:[%s15275_s22 + $0x68] sm:$0xff]   ;;  %v9746_v46 = vld [vmem:[%s15275_s22 + $0x78] sm:$0xff]   ;;  %v5364_v31 = vand.u32 65535, %v14822_v12 }
 0x95f   :  { %v5144_v53 = vadd.s32 768, %v5008_v11  ;;  %vm5307_vm8 = vcmp.eq.f32.partialorder %v16667_v21, %v5273_v14  ;;  %v15007_v23 = vsel %vm5252_vm0, %v5331_v37, 2147483647  ;;  %v5560_v63 = vshra.s32 %v15022_v49, 16  ;;  %9069 = vmatprep.subr.bf16.mxu0 %v9734_v10  ;;  %v9740_v11 = vld [vmem:[%s15275_s22 + $0x60] sm:$0xff]   ;;  %v9743_v33 = vld [vmem:[%s15275_s22 + $0x28] sm:$0xff]  }
 0x960   :  { %v5323_v47 = vsel %vm5307_vm8, %v5242_v61, 1073741824  ;;  %v5545_v32 = vshra.s32 %v15007_v23, 16  ;;  %5413 = vmin.xlane.f32.xlu0 %v15009_v19  ;;  %5533 = vmin.xlane.f32.xlu1 %v15002_v45  ;;  %v9741_v61 = vld [vmem:[%s15275_s22 + $0x20] sm:$0xff]   ;;  %v5334_v14 = vand.u32 65535, %v14779_v24  ;;  %v9745_v37 = vld [vmem:[%s15275_s22 + $0x30] sm:$0xff]   ;;  %v5454_v21 = vand.u32 65535, %v14799_v56 }
 0x961   :  { %v15014_v48 = vsel %vm5252_vm0, %v5323_v47, 2147483647  ;;  %v5243_v1 = vsel %vm5187_vm14, %v5227_v51, %v5144_v53  ;;  %v15035_v16 = vcvt.s32.f32 %v5560_v63  ;;  %v9747_v24 = vld [vmem:[%s15275_s22 + $0x38] sm:$0xff]   ;;  %v5469_v12 = vand.u32 65535, %v14889_v17 }
 0x962   :  { %v5425_v58 = vshra.s32 %v15014_v48, 16  ;;  %v5276_v15 = vpop.xlane.xlu0 %5275  ;;  %v15024_v42 = vcvt.s32.f32 %v5545_v32  ;;  %9070 = vmatpush3.bf16.msra.mxu0 %v9735_v25  ;;  %v5336_v53 = vcvt.s32.f32 %v5334_v14  ;;  %v5456_v38 = vcvt.s32.f32 %v5454_v21 }
 0x963   :  { %vm5308_vm10 = vcmp.eq.f32.partialorder %v16670_v35, %v5276_v15  ;;  %9071 = vmatprep.subr.bf16.mxu0 %v9736_v41  ;;  %v5366_v15 = vcvt.s32.f32 %v5364_v31  ;;  %v5471_v63 = vcvt.s32.f32 %v5469_v12  ;;  %v5499_v17 = vand.u32 65535, %v14919_v8 }
 0x964   :  { %v5324_v30 = vsel %vm5308_vm10, %v5243_v1, 1073741824  ;;  %v15029_v18 = vcvt.s32.f32 %v5425_v58  ;;  %5548 = vmin.xlane.f32.xlu1 %v15024_v42  ;;  %v5351_v1 = vcvt.s32.f32 %v5349_v29  ;;  %v5394_v25 = vand.u32 65535, %v14957_v13 }
 0x965   :  { %v15032_v50 = vsel %vm5252_vm0, %v5324_v30, 2147483647  ;;  %v5484_v30 = vand.u32 65535, %v14914_v20  ;;  %v5501_v20 = vcvt.s32.f32 %v5499_v17  ;;  %v5514_v8 = vand.u32 65535, %v14966_v28 }
 0x966   :  { %v5440_v7 = vshra.s32 %v15032_v50, 16  ;;  %5428 = vmin.xlane.f32.xlu0 %v15029_v18  ;;  %9072 = vmatpush3.bf16.msra.mxu0 %v9737_v6  ;;  %v5544_v28 = vand.u32 65535, %v15007_v23  ;;  %v5559_v23 = vand.u32 65535, %v15022_v49 }
 0x967   :  { %9073 = vmatprep.subr.bf16.mxu0 %v9738_v22  ;;  %v5396_v22 = vcvt.s32.f32 %v5394_v25 }
 0x968   :  { %v15039_v40 = vcvt.s32.f32 %v5440_v7  ;;  %5563 = vmin.xlane.f32.xlu1 %v15035_v16  ;;  %v5486_v7 = vcvt.s32.f32 %v5484_v30  ;;  %v5546_v14 = vcvt.s32.f32 %v5544_v28  ;;  %v5561_v49 = vcvt.s32.f32 %v5559_v23 }
 0x96a   :  { %5443 = vmin.xlane.f32.xlu0 %v15039_v40  ;;  %9074 = vmatpush3.bf16.msra.mxu0 %v9739_v3  ;;  %v5516_v3 = vcvt.s32.f32 %v5514_v8 }
 0x96b   :  { %9075 = vmatprep.subr.bf16.mxu0 %v9740_v11  ;;  %v5529_v11 = vand.u32 65535, %v14984_v60  ;;  %v5424_v60 = vand.u32 65535, %v15014_v48 }
 0x96e   :  { %9076 = vmatpush3.bf16.msra.mxu0 %v9741_v61 }
 0x96f   :  { %9077 = vmatprep.subr.bf16.mxu0 %v9742_v44 }
 0x972   :  { %9078 = vmatpush3.bf16.msra.mxu0 %v9743_v33 }
 0x973   :  { %9079 = vmatprep.subr.bf16.mxu0 %v9744_v0 }
 0x976   :  { %9080 = vmatpush3.bf16.msra.mxu0 %v9745_v37  ;;  %v5439_v37 = vand.u32 65535, %v15032_v50 }
 0x977   :  { %9081 = vmatprep.subr.bf16.mxu0 %v9746_v46 }
 0x978   :  { %v5441_v50 = vcvt.s32.f32 %v5439_v37 }
 0x97a   :  { %9082 = vmatpush3.bf16.msra.mxu0 %v9747_v24 }
 0x9c6   :  { %v15089_v55 = vpop.xlane.xlu0 %5338 }
 0x9c7   :  { %vm5340_vm13 = vcmp.eq.f32.partialorder %v14791_v57, %v15089_v55 }
 0x9c8   :  { %v5341_v47 = vsel %vm5340_vm13, %v5336_v53, inf }
 0x9c9   :  { %5342 = vmin.xlane.f32.xlu0 %v5341_v47 }
 0x9ca   :  { %v15097_v32 = vpop.xlane.xlu0 %5458 }
 0x9cb   :  { %vm5460_vm14 = vcmp.eq.f32.partialorder %v14812_v59, %v15097_v32 }
 0x9cc   :  { %v5461_v56 = vsel %vm5460_vm14, %v5456_v38, inf }
 0x9cd   :  { %5462 = vmin.xlane.f32.xlu0 %v5461_v56 }
 0x9ce   :  { %v15102_v58 = vpop.xlane.xlu0 %5368 }
 0x9cf   :  { %vm5370_vm0 = vcmp.eq.f32.partialorder %v14831_v5, %v15102_v58 }
 0x9d0   :  { %v5371_v57 = vsel %vm5370_vm0, %v5366_v15, inf  ;;  %vm5589_vm0 = vcmask 195712  }
 0x9d1   :  { %5372 = vmin.xlane.f32.xlu0 %v5371_v57 }
 0x9d9   :  { %v15107_v51 = vpop.xlane.xlu1 %5353 }
 0x9da   :  { %vm5355_vm15 = vcmp.eq.f32.partialorder %v14878_v34, %v15107_v51  ;;  %v5379_v34 = vand.u32 65535, %v14940_v9 }
 0x9db   :  { %v5356_v59 = vsel %vm5355_vm15, %v5351_v1, inf  ;;  %vm5596_vm15 = vcmask 261312  }
 0x9dc   :  { %5357 = vmin.xlane.f32.xlu1 %v5356_v59 }
 0x9dd   :  { %v15112_v35 = vpop.xlane.xlu1 %5473 }
 0x9de   :  { %vm5475_vm1 = vcmp.eq.f32.partialorder %v14902_v2, %v15112_v35  ;;  %v5381_v2 = vcvt.s32.f32 %v5379_v34 }
 0x9df   :  { %v5476_v5 = vsel %vm5475_vm1, %v5471_v63, inf  ;;  %vm5603_vm1 = vcmask 326912  }
 0x9e0   :  { %5477 = vmin.xlane.f32.xlu1 %v5476_v5 }
 0x9e1   :  { %v15117_v54 = vpop.xlane.xlu1 %5488 }
 0x9e2   :  { %vm5490_vm2 = vcmp.eq.f32.partialorder %v14931_v39, %v15117_v54 }
 0x9e3   :  { %v5491_v43 = vsel %vm5490_vm2, %v5486_v7, inf  ;;  %vm5610_vm2 = vcmask 392512  }
 0x9e4   :  { %5492 = vmin.xlane.f32.xlu1 %v5491_v43 }
 0x9e5   :  { %v15123_v36 = vpop.xlane.xlu1 %5503  ;;  %v15125_v10 = vpop.xlane.xlu0 %5383 }
 0x9e6   :  { %vm5505_vm4 = vcmp.eq.f32.partialorder %v14942_v4, %v15123_v36  ;;  %vm5385_vm5 = vcmp.eq.f32.partialorder %v14962_v62, %v15125_v10  ;;  %v5409_v4 = vand.u32 65535, %v14992_v27  ;;  %v5531_v27 = vcvt.s32.f32 %v5529_v11 }
 0x9e7   :  { %v5506_v39 = vsel %vm5505_vm4, %v5501_v20, inf  ;;  %v5386_v9 = vsel %vm5385_vm5, %v5381_v2, inf  ;;  %vm5617_vm4 = vcmask 458112   ;;  %vm5624_vm5 = vcmask 523712  }
 0x9e8   :  { %5507 = vmin.xlane.f32.xlu1 %v5506_v39  ;;  %5387 = vmin.xlane.f32.xlu0 %v5386_v9  ;;  %v5411_v33 = vcvt.s32.f32 %v5409_v4 }
 0x9e9   :  { %v15133_v41 = vpop.xlane.xlu0 %5398  ;;  %v15135_v6 = vpop.xlane.xlu1 %5518 }
 0x9ea   :  { %vm5400_vm6 = vcmp.eq.f32.partialorder %v14978_v26, %v15133_v41  ;;  %vm5520_vm7 = vcmp.eq.f32.partialorder %v14986_v52, %v15135_v6 }
 0x9eb   :  { %v5401_v13 = vsel %vm5400_vm6, %v5396_v22, inf  ;;  %v5521_v62 = vsel %vm5520_vm7, %v5516_v3, inf  ;;  %vm5667_vm6 = vcmask 517120  }
 0x9ec   :  { %5402 = vmin.xlane.f32.xlu0 %v5401_v13  ;;  %5522 = vmin.xlane.f32.xlu1 %v5521_v62 }
 0x9ed   :  { %v15144_v61 = vpop.xlane.xlu0 %5413  ;;  %v15146_v44 = vpop.xlane.xlu1 %5533 }
 0x9ee   :  { %vm5415_vm11 = vcmp.eq.f32.partialorder %v15009_v19, %v15144_v61  ;;  %vm5535_vm8 = vcmp.eq.f32.partialorder %v15002_v45, %v15146_v44  ;;  %v5426_v19 = vcvt.s32.f32 %v5424_v60 }
 0x9ef   :  { %v5416_v26 = vsel %vm5415_vm11, %v5411_v33, inf  ;;  %v5536_v52 = vsel %vm5535_vm8, %v5531_v27, inf }
 0x9f0   :  { %5417 = vmin.xlane.f32.xlu0 %v5416_v26  ;;  %5537 = vmin.xlane.f32.xlu1 %v5536_v52 }
 0x9f1   :  { %v15154_v0 = vpop.xlane.xlu1 %5548 }
 0x9f2   :  { %vm5550_vm9 = vcmp.eq.f32.partialorder %v15024_v42, %v15154_v0 }
 0x9f3   :  { %v15157_v46 = vpop.xlane.xlu0 %5428  ;;  %v5551_v45 = vsel %vm5550_vm9, %v5546_v14, inf }
 0x9f4   :  { %vm5430_vm10 = vcmp.eq.f32.partialorder %v15029_v18, %v15157_v46  ;;  %5552 = vmin.xlane.f32.xlu1 %v5551_v45 }
 0x9f5   :  { %v5431_v48 = vsel %vm5430_vm10, %v5426_v19, inf  ;;  %v15163_v53 = vpop.xlane.xlu1 %5563 }
 0x9f6   :  { %5432 = vmin.xlane.f32.xlu0 %v5431_v48  ;;  %vm5565_vm13 = vcmp.eq.f32.partialorder %v15035_v16, %v15163_v53 }
 0x9f7   :  { %v15165_v21 = vpop.xlane.xlu0 %5443  ;;  %v5566_v42 = vsel %vm5565_vm13, %v5561_v49, inf }
 0x9f8   :  { %vm5445_vm14 = vcmp.eq.f32.partialorder %v15039_v40, %v15165_v21  ;;  %5567 = vmin.xlane.f32.xlu1 %v5566_v42 }
 0x9f9   :  { %v5446_v24 = vsel %vm5445_vm14, %v5441_v50, inf  ;;  %v8245_v18 = vpop.f32.mrb[76].mxu1 }
 0x9fa   :  { %5447 = vmin.xlane.f32.xlu0 %v5446_v24  ;;  %v8254_v47 = vsel %vm7575_vm12, %v8245_v18, 0.0  ;;  %v8268_v38 = vmul.f32 %v8245_v18, %v8245_v18  ;;  %v8247_v31 = vpop.f32.mrb[77].mxu1 }
 0x9fb   :  { %v8255_v56 = vrot.slane %v8254_v47, 4  ;;  %v8261_v15 = vsel %vm7575_vm12, %v8247_v31, 0.0  ;;  %v8269_v57 = vmul.f32 %v8247_v31, %v8247_v31  ;;  %v8249_v29 = vpop.f32.mrb[78].mxu1 }
 0x9fc   :  { %v8270_v16 = vsel %vm7575_vm12, %v8268_v38, 0.0  ;;  %v8262_v1 = vrot.slane %v8261_v15, 4  ;;  %v8250_v12 = vpop.f32.mrb[79].mxu1  ;;  %v16671_v38 = vld [vmem:[#allocation26_spill] sm:$0xff] }
 0x9fd   :  { %v8256_v59 = vadd.f32 %v8255_v56, %v8254_v47  ;;  %v8271_v40 = vrot.slane %v8270_v16, 4  ;;  %v8277_v63 = vsel %vm7575_vm12, %v8269_v57, 0.0  ;;  %v16673_v12 = vld [vmem:[#allocation30_spill] sm:$0xff]  ;;  %vm5582_vm12 = vcmask 130112  }
 0x9fe   :  { %v8263_v30 = vadd.f32 %v8262_v1, %v8261_v15  ;;  %v8278_v5 = vrot.slane %v8277_v63, 4  ;;  %v8252_v15 = vld [vmem:[%s15273_s20] sm:$0x3]  ;;  %s9913_s20 = smov [#allocation9]  }
 0x9ff   :  { %v8257_v7 = vrot.slane %v8256_v59, 2  ;;  %v8272_v17 = vadd.f32 %v8271_v40, %v8270_v16  ;;  %v16672_v16 = vld [vmem:[#allocation16_spill] sm:$0xff] }
 0xa00   :  { %v8264_v34 = vrot.slane %v8263_v30, 2  ;;  %v8279_v43 = vadd.f32 %v8278_v5, %v8277_v63 }
 0xa01   :  { %v8258_v20 = vadd.f32 %v8257_v7, %v8256_v59  ;;  %v8273_v2 = vrot.slane %v8272_v17, 2 }
 0xa02   :  { %v8265_v25 = vadd.f32 %v8264_v34, %v8263_v30  ;;  %v8280_v8 = vrot.slane %v8279_v43, 2  ;;  %v8253_v34 = vld [vmem:[%s15274_s21] sm:$0x3]  ;;  %s8561_s21 = sshll.u32 %s9913_s20, 4  ;;  %s8562_s21 = int_to_ptr.vmem [resolvable:$true] %s8561_s21 }
 0xa03   :  { %v8259_v39 = vrot.slane %v8258_v20, 1  ;;  %v8274_v9 = vadd.f32 %v8273_v2, %v8272_v17  ;;  %s9850_s0 = scalar_lea.vmem %s8562_s21, 32  ;;  %p9855_p11 = scmp.lt.s32.totalorder %s8562_s21, %s8562_s21 }
 0xa04   :  { %v8266_v22 = vrot.slane %v8265_v25, 1  ;;  %v8281_v3 = vadd.f32 %v8280_v8, %v8279_v43  ;;  %p9851_p10 = scmp.ne.s32.totalorder %s8562_s21, %s9850_s0  ;;  %p9856_p12 = scmp.lt.s32.totalorder %s9850_s0, %s9850_s0 }
 0xa05   :  { %v8260_v4 = vadd.f32 %v8259_v39, %v8258_v20  ;;  %v8275_v11 = vrot.slane %v8274_v9, 1 }
 0xa06   :  { %v8267_v13 = vadd.f32 %v8266_v22, %v8265_v25  ;;  %v8282_v62 = vrot.slane %v8281_v3, 1  ;;  %p9857_p13 = por %p9856_p12, %p9855_p11 }
 0xa07   :  { %v8276_v28 = vadd.f32 %v8275_v11, %v8274_v9  ;;  %v8284_v33 = vmul.f32 0.5, %v8260_v4  ;;  %v5345_v11 = vcvt.f32.s32 %v15089_v55 }
 0xa08   :  { %v8283_v27 = vadd.f32 %v8282_v62, %v8281_v3  ;;  %v8285_v60 = vmul.f32 0.5, %v8267_v13  ;;  %v5375_v62 = vcvt.f32.s32 %v15102_v58  ;;  %p9858_p0 = pnand %p9857_p13, %p9851_p10 }
 0xa09   :  { %v8286_v26 = vmul.f32 0.5, %v8276_v28  ;;  %v8288_v52 = vmul.f32 %v8284_v33, %v8284_v33 }
 0xa0a   :  { %v8287_v23 = vmul.f32 0.5, %v8283_v27  ;;  %v8289_v14 = vmul.f32 %v8285_v60, %v8285_v60 }
 0xa0b   :  { %v8290_v37 = vsub.f32 %v8286_v26, %v8288_v52  ;;  %v5360_v26 = vcvt.f32.s32 %v15107_v51  ;;  %v5346_v52 = vshll.u32 %v5345_v11, 16 }
 0xa0c   :  { %v8291_v19 = vsub.f32 %v8287_v23, %v8289_v14  ;;  %v5465_v23 = vcvt.f32.s32 %v15097_v32  ;;  %v5376_v14 = vshll.u32 %v5375_v62, 16 }
 0xa0d   :  { %v8292_v45 = vmax.f32 %v8290_v37, 0.0 }
 0xa0e   :  { %v8293_v48 = vmax.f32 %v8291_v19, 0.0  ;;  %v16675_v19 = vld [vmem:[#allocation15_spill] sm:$0xff] }
 0xa0f   :  { %v8294_v49 = vadd.f32 1e-05, %v8292_v45 }
 0xa10   :  { %v8295_v50 = vadd.f32 1e-05, %v8293_v48 }
 0xa11   :  { %9780 = vrsqrt.f32 %v8294_v49 }
 0xa12   :  { %9782 = vrsqrt.f32 %v8295_v50 }
 0xa1b   :  { %v9781_v42 = vpop.eup %9780 }
 0xa1c   :  { %v9783_v24 = vpop.eup %9782 }
 0xa1d   :  { %v8300_v47 = vcombine.low %v9781_v42, %v9783_v24  ;;  %v5361_v42 = vshll.u32 %v5360_v26, 16  ;;  %v5480_v24 = vcvt.f32.s32 %v15112_v35 }
 0xa1f   :  { %v8307_v56 = vrot.slane %v8300_v47, %v16671_v38  ;;  %v5466_v47 = vshll.u32 %v5465_v23, 16 }
 0xa21   :  { %v8314_v57 = vrot.slane %v8307_v56, %v16671_v38 }
 0xa23   :  { %v8316_v29 = vmul.f32 %v8314_v57, %v8252_v15  ;;  %v5495_v57 = vcvt.f32.s32 %v15117_v54 }
 0xa25   :  { %v8321_v1 = vrot.slane %v8316_v29, %v16672_v16  ;;  %v8325_v59 = vrot.slane %v8316_v29, %v16673_v12  ;;  %v5496_v35 = vshll.u32 %v5495_v57, 16  ;;  %v5435_v57 = vcvt.f32.s32 %v15157_v46 }
 0xa26   :  { %v5450_v46 = vcvt.f32.s32 %v15165_v21 }
 0xa27   :  { %v8328_v40 = vmul.f32 %v8321_v1, %v8284_v33  ;;  %v8329_v63 = vmul.f32 %v8325_v59, %v8285_v60  ;;  %v8350_v30 = vmul.f32 %v8325_v59, %v8247_v31  ;;  %v8349_v5 = vmul.f32 %v8321_v1, %v8245_v18  ;;  %v16674_v33 = vld [vmem:[#allocation101_spill] sm:$0xff] }
 0xa28   :  { %v5577_v27 = vadd.s32 4294967288, %v16674_v33  ;;  %v5584_v37 = vadd.s32 4294967280, %v16674_v33  ;;  %v5575_v45 = vsub.s32 %v16674_v33, %v16675_v19  ;;  %v5481_v1 = vshll.u32 %v5480_v24, 16 }
 0xa29   :  { %v8332_v7 = vcombine.low %v8328_v40, %v8329_v63  ;;  %v5591_v54 = vadd.s32 4294967272, %v16674_v33 }
 0xa2a   :  { %v5580_v49 = vsub.s32 %v5577_v27, %v16675_v19 }
 0xa2b   :  { %v8339_v17 = vrot.slane %v8332_v7, %v16671_v38 }
 0xa2d   :  { %v8346_v43 = vrot.slane %v8339_v17, %v16671_v38  ;;  %v5587_v38 = vsub.s32 %v5584_v37, %v16675_v19  ;;  %v5510_v17 = vcvt.f32.s32 %v15123_v36 }
 0xa2f   :  { %v8348_v20 = vsub.f32 %v8253_v34, %v8346_v43 }
 0xa31   :  { %v8359_v2 = vrot.slane %v8348_v20, %v16673_v12  ;;  %v8355_v25 = vrot.slane %v8348_v20, %v16672_v16  ;;  %v5390_v20 = vcvt.f32.s32 %v15125_v10 }
 0xa33   :  { %v8363_v8 = vadd.f32 %v8359_v2, %v8350_v30  ;;  %v8362_v39 = vadd.f32 %v8355_v25, %v8349_v5 }
 0xa35   :  { %v8365_v9 = vmax.f32 %v8363_v8, 0.0  ;;  %v8364_v22 = vmax.f32 %v8362_v39, 0.0  ;;  %v5405_v8 = vcvt.f32.s32 %v15133_v41  ;;  %v5525_v39 = vcvt.f32.s32 %v15135_v6 }
 0xa36   :  { %v5420_v6 = vcvt.f32.s32 %v15144_v61 }
 0xa37   :  { %v8367_v31 = vpack.c.bf16 %v8365_v9, %v8365_v9  ;;  %v8366_v18 = vpack.c.bf16 %v8364_v22, %v8364_v22  ;;  %v5511_v22 = vshll.u32 %v5510_v17, 16  ;;  %v5526_v27 = vshll.u32 %v5525_v39, 16 }
 0xa38   :  { %v5421_v24 = vshll.u32 %v5420_v6, 16  ;;  %v5436_v17 = vshll.u32 %v5435_v57, 16 }
 0xa39   :  { %8535 = vmatprep.mubr.bf16.mxu0 %v8367_v31 }
 0xa3a   :  { %8536 = vmatmul.mubr.bf16.vlgmr.msra.gmra.mrb[124].mxu0 %v8366_v18  ;;  %v5594_v18 = vsub.s32 %v5591_v54, %v16675_v19 }
 0xa56   :  { %v5343_v3 = vpop.xlane.xlu0 %5342 }
 0xa57   :  { %v5344_v28 = vcvt.f32.s32 %v5343_v3 }
 0xa59   :  { %v5347_v48 = vadd.s32 %v5346_v52, %v5344_v28  ;;  %v5406_v28 = vshll.u32 %v5405_v8, 16 }
 0xa5a   :  { %v5463_v4 = vpop.xlane.xlu0 %5462 }
 0xa5b   :  { %v5464_v55 = vcvt.f32.s32 %v5463_v4  ;;  %v5576_v56 = vrot.slane %v5347_v48, %v5575_v45  ;;  %v5391_v4 = vshll.u32 %v5390_v20, 16 }
 0xa5d   :  { %v5467_v15 = vadd.s32 %v5466_v47, %v5464_v55 }
 0xa5e   :  { %v5373_v13 = vpop.xlane.xlu0 %5372 }
 0xa5f   :  { %v5374_v60 = vcvt.f32.s32 %v5373_v13  ;;  %v5629_v30 = vrot.slane %v5467_v15, %v5575_v45  ;;  %v5598_v13 = vadd.s32 4294967264, %v16674_v33 }
 0xa61   :  { %v5377_v50 = vadd.s32 %v5376_v14, %v5374_v60  ;;  %v5540_v60 = vcvt.f32.s32 %v15146_v44  ;;  %v5605_v14 = vadd.s32 4294967256, %v16674_v33  ;;  %v5601_v45 = vsub.s32 %v5598_v13, %v16675_v19 }
 0xa63   :  { %v5588_v16 = vrot.slane %v5377_v50, %v5587_v38  ;;  %v5541_v47 = vshll.u32 %v5540_v60, 16  ;;  %v5608_v61 = vsub.s32 %v5605_v14, %v16675_v19 }
 0xa69   :  { %v5358_v58 = vpop.xlane.xlu1 %5357 }
 0xa6a   :  { %v5359_v51 = vcvt.f32.s32 %v5358_v58 }
 0xa6c   :  { %v5362_v32 = vadd.s32 %v5361_v42, %v5359_v51 }
 0xa6d   :  { %v5478_v29 = vpop.xlane.xlu1 %5477 }
 0xa6e   :  { %v5581_v12 = vrot.slane %v5362_v32, %v5580_v49  ;;  %v5479_v59 = vcvt.f32.s32 %v5478_v29  ;;  %v5555_v29 = vcvt.f32.s32 %v15154_v0 }
 0xa70   :  { %v5583_v40 = vsel %vm5582_vm12, %v5581_v12, %v5576_v56  ;;  %v5482_v63 = vadd.s32 %v5481_v1, %v5479_v59 }
 0xa71   :  { %v5493_v5 = vpop.xlane.xlu1 %5492  ;;  %v5590_v7 = vsel %vm5589_vm0, %v5588_v16, %v5583_v40  ;;  %v5612_v16 = vadd.s32 4294967248, %v16674_v33 }
 0xa72   :  { %v5633_v34 = vrot.slane %v5482_v63, %v5580_v49  ;;  %v5494_v43 = vcvt.f32.s32 %v5493_v5 }
 0xa74   :  { %v5634_v2 = vsel %vm5582_vm12, %v5633_v34, %v5629_v30  ;;  %v5497_v25 = vadd.s32 %v5496_v35, %v5494_v43  ;;  %v5556_v34 = vshll.u32 %v5555_v29, 16  ;;  %v5570_v43 = vcvt.f32.s32 %v15163_v53 }
 0xa75   :  { %v5508_v9 = vpop.xlane.xlu1 %5507  ;;  %v5388_v3 = vpop.xlane.xlu0 %5387 }
 0xa76   :  { %v5638_v31 = vrot.slane %v5497_v25, %v5587_v38  ;;  %v5509_v36 = vcvt.f32.s32 %v5508_v9  ;;  %v5389_v11 = vcvt.f32.s32 %v5388_v3  ;;  %v5619_v9 = vadd.s32 4294967240, %v16674_v33 }
 0xa77   :  { %v5451_v3 = vshll.u32 %v5450_v46, 16 }
 0xa78   :  { %v5639_v10 = vsel %vm5589_vm0, %v5638_v31, %v5634_v2  ;;  %v5512_v62 = vadd.s32 %v5511_v22, %v5509_v36  ;;  %v5392_v41 = vadd.s32 %v5391_v4, %v5389_v11  ;;  %v5615_v2 = vsub.s32 %v5612_v16, %v16675_v19 }
 0xa79   :  { %v5403_v52 = vpop.xlane.xlu0 %5402  ;;  %v5523_v23 = vpop.xlane.xlu1 %5522  ;;  %v5571_v36 = vshll.u32 %v5570_v43, 16  ;;  %v5622_v53 = vsub.s32 %v5619_v9, %v16675_v19 }
 0xa7a   :  { %v5643_v26 = vrot.slane %v5512_v62, %v5594_v18  ;;  %v5595_v37 = vrot.slane %v5392_v41, %v5594_v18  ;;  %v5404_v48 = vcvt.f32.s32 %v5403_v52  ;;  %v5524_v55 = vcvt.f32.s32 %v5523_v23 }
 0xa7c   :  { %v5644_v49 = vsel %vm5596_vm15, %v5643_v26, %v5639_v10  ;;  %v5597_v58 = vsel %vm5596_vm15, %v5595_v37, %v5590_v7  ;;  %v5407_v50 = vadd.s32 %v5406_v28, %v5404_v48  ;;  %v5527_v42 = vadd.s32 %v5526_v27, %v5524_v55 }
 0xa7d   :  { %v5418_v44 = vpop.xlane.xlu0 %5417  ;;  %v5538_v51 = vpop.xlane.xlu1 %5537 }
 0xa7e   :  { %v5602_v38 = vrot.slane %v5407_v50, %v5601_v45  ;;  %v5648_v32 = vrot.slane %v5527_v42, %v5601_v45  ;;  %v5419_v56 = vcvt.f32.s32 %v5418_v44  ;;  %v5539_v15 = vcvt.f32.s32 %v5538_v51 }
 0xa80   :  { %v5604_v1 = vsel %vm5603_vm1, %v5602_v38, %v5597_v58  ;;  %v5649_v12 = vsel %vm5603_vm1, %v5648_v32, %v5644_v49  ;;  %v5422_v59 = vadd.s32 %v5421_v24, %v5419_v56  ;;  %v5542_v40 = vadd.s32 %v5541_v47, %v5539_v15 }
 0xa81   :  { %v5553_v63 = vpop.xlane.xlu1 %5552 }
 0xa82   :  { %v5609_v30 = vrot.slane %v5422_v59, %v5608_v61  ;;  %v5653_v35 = vrot.slane %v5542_v40, %v5608_v61  ;;  %v5554_v7 = vcvt.f32.s32 %v5553_v63 }
 0xa83   :  { %v5433_v5 = vpop.xlane.xlu0 %5432 }
 0xa84   :  { %v5434_v54 = vcvt.f32.s32 %v5433_v5  ;;  %v5611_v0 = vsel %vm5610_vm2, %v5609_v30, %v5604_v1  ;;  %v5654_v20 = vsel %vm5610_vm2, %v5653_v35, %v5649_v12  ;;  %v5557_v39 = vadd.s32 %v5556_v34, %v5554_v7 }
 0xa85   :  { %v5568_v8 = vpop.xlane.xlu1 %5567 }
 0xa86   :  { %v5437_v25 = vadd.s32 %v5436_v17, %v5434_v54  ;;  %v5569_v31 = vcvt.f32.s32 %v5568_v8  ;;  %v5658_v11 = vrot.slane %v5557_v39, %v5615_v2 }
 0xa87   :  { %v5448_v22 = vpop.xlane.xlu0 %5447 }
 0xa88   :  { %v5449_v18 = vcvt.f32.s32 %v5448_v22  ;;  %v5616_v4 = vrot.slane %v5437_v25, %v5615_v2  ;;  %v5572_v21 = vadd.s32 %v5571_v36, %v5569_v31  ;;  %v5659_v27 = vsel %vm5617_vm4, %v5658_v11, %v5654_v20 }
 0xa8a   :  { %v5452_v13 = vadd.s32 %v5451_v3, %v5449_v18  ;;  %v5618_v10 = vsel %vm5617_vm4, %v5616_v4, %v5611_v0  ;;  %v5663_v28 = vrot.slane %v5572_v21, %v5622_v53 }
 0xa8c   :  { %v5623_v62 = vrot.slane %v5452_v13, %v5622_v53  ;;  %v5664_v6 = vsel %vm5624_vm5, %v5663_v28, %v5659_v27 }
 0xa8e   :  { %v5625_v41 = vsel %vm5624_vm5, %v5623_v62, %v5618_v10 }
 0xa8f   :  { %v5666_v33 = vsel %vm5665_vm3, %v5664_v6, %v5625_v41 }
 0xa90   :  { %5668 = vst.msk [vmem:[#allocation9] sm:$0x3] %vm5667_vm6, %v5666_v33 }
 0xa91   :  { %9861 = shalt.err (!%p9858_p0)
}
 0xa92   :  { %s9862_s5 = scalar_lea.hbm %s15278_s25, 32 }
 0xa93   :  { %p9863_p1 = scmp.ne.s32.totalorder %s15278_s25, %s9862_s5  ;;  %p9866_p2 = scmp.lt.u32.totalorder %s9862_s5, %s15278_s25 }
 0xa95   :  { %p9868_p3 = pnand %p9866_p2, %p9863_p1 }
 0xa97   :  { %9871 = shalt.err (!%p9868_p3)
}
 0xa98   :  { %8564 = dma.vmem_to_hbm [thread:$0]  %s8562_s21, 32, %s15278_s25, [#allocation10]   ;;  %v9004_v60 = vld [vmem:[%s15276_s23] ss:$0 sm:$0xff]  ;;  %vm8543_vm3 = vcmask 17408  }
 0xa99   :  { %s9914_s8 = smov [#allocation8]  }
 0xa9a   :  { %s8551_s17 = sshll.u32 %s9914_s8, 4  ;;  %s8552_s17 = int_to_ptr.vmem [resolvable:$true] %s8551_s17 }
 0xa9b   :  { %s9872_s13 = scalar_lea.vmem %s8552_s17, 32  ;;  %p9877_p5 = scmp.lt.s32.totalorder %s8552_s17, %s8552_s17 }
 0xa9c   :  { %p9873_p4 = scmp.ne.s32.totalorder %s8552_s17, %s9872_s13  ;;  %p9878_p6 = scmp.lt.s32.totalorder %s9872_s13, %s9872_s13 }
 0xa9e   :  { %p9879_p7 = por %p9878_p6, %p9877_p5 }
 0xaa0   :  { %p9880_p8 = pnand %p9879_p7, %p9873_p4 }
 0xb0d   :  { %v9083_v19 = vpop.f32.mrb[124].mxu0 }
 0xb0e   :  { %v9084_v26 = vpop.f32.mrb[125].mxu0 }
 0xb0f   :  { %v9085_v52 = vadd.f32 %v9084_v26, %v9083_v19  ;;  %v9086_v23 = vpop.f32.mrb[126].mxu0 }
 0xb10   :  { %v9087_v14 = vpop.f32.mrb[127].mxu0 }
 0xb11   :  { %v8538_v37 = vadd.f32 %v9085_v52, %v9004_v60 }
 0xb13   :  { %8544 = vst.msk [vmem:[#allocation8] sm:$0x3] %vm8543_vm3, %v8538_v37 }
 0xb14   :  { %9883 = shalt.err (!%p9880_p8)
}
 0xb15   :  { %s9884_s23 = scalar_lea.hbm %s15277_s24, 32 }
 0xb16   :  { %p9885_p9 = scmp.ne.s32.totalorder %s15277_s24, %s9884_s23  ;;  %p9888_p10 = scmp.lt.u32.totalorder %s9884_s23, %s15277_s24 }
 0xb18   :  { %p9890_p11 = pnand %p9888_p10, %p9885_p9 }
 0xb1a   :  { %9893 = shalt.err (!%p9890_p11)
}
 0xb1b   :  { %8554 = dma.vmem_to_hbm [thread:$0]  %s8552_s17, 32, %s15277_s24, [#allocation4]  }
 0xb1c   :  { %9898 = dma.done.wait [#allocation4], 32  }
 0xb1d   :  { %9899 = vsyncadd [#allocation4], 4294967264 }
 0xb1e   :  { %9900 = dma.done.wait [#allocation10], 32  }
 0xb1f   :  { %9901 = vsyncadd [#allocation10], 4294967264 }
 0xb20   :  { %8571 = vsyncpa [#allocation3], 1 }
 0xb21   :  { %8572 = vsyncpa [#allocation6], 1 }
 0xb22   :  { %8573 = vsyncpa [#allocation4], 1 }
 0xb23   :  { %8574 = vsyncpa [#allocation10], 1 }

</bundles_post_ra>
